<compile_context>
chip_gen: v7x
topology: tpu7x:2x2x1
jax: 0.10.0
libtpu: 0.0.40
codegen_flags: <defaults>
</compile_context>

<pallas_src>
import functools

import jax
import jax.numpy as jnp
from jax.experimental import pallas as pl
from jax.experimental.pallas import tpu as pltpu


def _fused_unet_kernel(xcols_ref, w1_ref, b1_ref, w2_ref, b2_ref, w3_ref,
                       b3_ref, w4_ref, b4_ref, o_ref, pad_a, pad_b, *, H, W):
    # xcols_ref: (1, H*W, K1)   f32  wrapper-packed layer-1 im2col (K1 = 32)
    # w1_ref   : (K1, 64)       f32
    # wk_ref   : (9, Cin, Cout) f32  per-tap weights for layers 2..4
    # bk_ref   : (1, Cout)      f32
    # o_ref    : (1, 1, H*W)    f32  lane-dense sigmoid output
    # pad_a    : (H+2, W+2, 64)  f32 scratch (holds e1, then d1)
    # pad_b    : (H+2, W+2, 128) f32 scratch (holds e2)
    HW = H * W
    f32 = jnp.float32

    # Zero only the 1-pixel halo (needed for "same" padding).  Interiors are
    # fully rewritten every image, so no other per-step init is required.
    # NOTE: halo-only init relies on every layer rewriting its whole interior;
    # revisit if kernel sizes / strides ever change.
    def zero_halo(pad):
        Hp, Wp, C = pad.shape
        pad[0:1, :, :] = jnp.zeros((1, Wp, C), f32)
        pad[Hp - 1:Hp, :, :] = jnp.zeros((1, Wp, C), f32)
        pad[:, 0:1, :] = jnp.zeros((Hp, 1, C), f32)
        pad[:, Wp - 1:Wp, :] = jnp.zeros((Hp, 1, C), f32)

    zero_halo(pad_a)
    zero_halo(pad_b)

    def conv3x3(pad_ref, w_ref, b_ref):
        """3x3 same conv as 9 accumulating MXU matmuls with f32 accumulation."""
        cin = pad_ref.shape[-1]
        cout = w_ref.shape[-1]
        acc = jnp.zeros((HW, cout), f32)
        for dy in range(3):
            for dx in range(3):
                patch = pad_ref[dy:dy + H, dx:dx + W, :].reshape(HW, cin)
                acc = acc + jnp.dot(patch, w_ref[dy * 3 + dx],
                                    preferred_element_type=f32)
        return acc + b_ref[...]

    # ---- layer 1: 3 -> 64, ReLU (single matmul on pre-packed input) --------
    e1 = jnp.maximum(
        jnp.dot(xcols_ref[0], w1_ref[...], preferred_element_type=f32)
        + b1_ref[...], 0.0)
    pad_a[1:H + 1, 1:W + 1, :] = e1.reshape(H, W, -1)

    # ---- layer 2: 64 -> 128, ReLU -------------------------------------------
    e2 = jnp.maximum(conv3x3(pad_a, w2_ref, b2_ref), 0.0)
    pad_b[1:H + 1, 1:W + 1, :] = e2.reshape(H, W, -1)

    # ---- layer 3: 128 -> 64, ReLU (reuse pad_a; interior fully rewritten) ---
    d1 = jnp.maximum(conv3x3(pad_b, w3_ref, b3_ref), 0.0)
    pad_a[1:H + 1, 1:W + 1, :] = d1.reshape(H, W, -1)

    # ---- layer 4: 64 -> 1, sigmoid, lane-dense store -------------------------
    logits = conv3x3(pad_a, w4_ref, b4_ref)                    # (HW, 1) f32
    sig = pl.reciprocal(1.0 + jnp.exp(-logits), approx=True)   # EUP-only path
    o_ref[...] = sig.reshape(1, 1, HW).astype(o_ref.dtype)


def _prep_params(params, k1_pad):
    """Repack conv params for the kernel (all f32).

    Layer 1: (3,3,3,64) -> (k1_pad, 64) im2col rows (zero-padded from 27).
    Layers 2..4: (3,3,Cin,Cout) -> (9, Cin, Cout) per-tap slabs.
    Biases -> (1, Cout)."""
    w1, b1 = params[0]
    kh, kw, cin, cout = w1.shape
    w1f = w1.reshape(kh * kw * cin, cout).astype(jnp.float32)
    w1f = jnp.pad(w1f, ((0, k1_pad - kh * kw * cin), (0, 0)))
    out = [w1f, b1.reshape(1, cout).astype(jnp.float32)]
    for w, b in params[1:]:
        kh, kw, cin, cout = w.shape
        out.append(w.reshape(kh * kw, cin, cout).astype(jnp.float32))
        out.append(b.reshape(1, cout).astype(jnp.float32))
    return out


def _im2col_input(x_nhwc, k1_pad):
    """(N,H,W,C) -> (N, H*W, k1_pad) layer-1 im2col slab (zero-padded cols)."""
    N, H, W, C = x_nhwc.shape
    xp = jnp.pad(x_nhwc, ((0, 0), (1, 1), (1, 1), (0, 0)))
    taps = [xp[:, dy:dy + H, dx:dx + W, :]
            for dy in range(3) for dx in range(3)]
    cols = jnp.concatenate(taps, axis=-1).reshape(N, H * W, 9 * C)
    return jnp.pad(cols, ((0, 0), (0, 0), (0, k1_pad - 9 * C)))


def unet_shadow_detection(x_nchw, params):
    """Forward pass: relu(conv) x3 -> sigmoid(conv). Input/output are NCHW."""
    N, C, H, W = x_nchw.shape
    HW = H * W
    k1_pad = ((9 * C + 7) // 8) * 8                  # 27 -> 32, sublane aligned

    x_nhwc = jnp.transpose(x_nchw, (0, 2, 3, 1))     # NCHW -> NHWC
    x_cols = _im2col_input(x_nhwc, k1_pad)           # (N, HW, k1_pad) f32
    w1, b1, w2, b2, w3, b3, w4, b4 = _prep_params(params, k1_pad)

    kernel = functools.partial(_fused_unet_kernel, H=H, W=W)

    def const_spec(arr):                             # grid-invariant resident slab
        return pl.BlockSpec(arr.shape, lambda n, nd=arr.ndim: (0,) * nd)

    out = pl.pallas_call(
        kernel,
        out_shape=jax.ShapeDtypeStruct((N, 1, HW), jnp.float32),
        grid=(N,),
        in_specs=[
            pl.BlockSpec((1, HW, k1_pad), lambda n: (n, 0, 0)),
            const_spec(w1), const_spec(b1),
            const_spec(w2), const_spec(b2),
            const_spec(w3), const_spec(b3),
            const_spec(w4), const_spec(b4),
        ],
        out_specs=pl.BlockSpec((1, 1, HW), lambda n: (n, 0, 0)),
        scratch_shapes=[
            pltpu.VMEM((H + 2, W + 2, 64), jnp.float32),    # e1 / d1 (+ halo)
            pltpu.VMEM((H + 2, W + 2, 128), jnp.float32),   # e2 (+ halo)
        ],
        compiler_params=pltpu.CompilerParams(
            dimension_semantics=("parallel",)),
    )(x_cols, w1, b1, w2, b2, w3, b3, w4, b4)

    return out.reshape(N, 1, H, W)                   # NCHW, C=1


def init_params(key):
    """Deterministic synthetic params matching the PyTorch module's shapes.

    Stored as (kh, kw, Cin, Cout); equivalent to nn.Conv2d (Cout,Cin,3,3)
    weights permuted with (2,3,1,0)."""
    dims = [(3, 64), (64, 128), (128, 64), (64, 1)]
    params = []
    for i, (cin, cout) in enumerate(dims):
        kw_key, kb_key = jax.random.split(jax.random.fold_in(key, i))
        fan_in = cin * 9
        scale = 1.0 / jnp.sqrt(jnp.float32(fan_in))
        w = jax.random.uniform(kw_key, (3, 3, cin, cout), jnp.float32,
                               minval=-scale, maxval=scale)
        b = jax.random.uniform(kb_key, (cout,), jnp.float32,
                               minval=-scale, maxval=scale)
        params.append((w, b))
    return params


def _reference_forward(x_nchw, params):
    """Pure-JAX f32 reference (nn.Conv2d semantics) for correctness check."""
    x = jnp.transpose(x_nchw, (0, 2, 3, 1))
    acts = ["relu", "relu", "relu", "sigmoid"]
    for (w, b), act in zip(params, acts):
        x = jax.lax.conv_general_dilated(
            x, w, window_strides=(1, 1), padding="SAME",
            dimension_numbers=("NHWC", "HWIO", "NHWC"),
            precision=jax.lax.Precision.HIGHEST) + b
        x = jax.nn.relu(x) if act == "relu" else jax.nn.sigmoid(x)
    return jnp.transpose(x, (0, 3, 1, 2))


if __name__ == "__main__":
    key = jax.random.PRNGKey(0)
    x_key, p_key = jax.random.split(key)
    # Input consistent with the module: NCHW, 3 channels.
    x = jax.random.normal(x_key, (2, 3, 16, 16), jnp.float32)
    params = init_params(p_key)

    fwd = jax.jit(unet_shadow_detection)
    out = jax.block_until_ready(fwd(x, params))

    assert out.shape == (2, 1, 16, 16), out.shape
    assert out.dtype == jnp.float32
    # Sigmoid range (small slack for the approx EUP reciprocal).
    assert bool(jnp.all((out >= -1e-3) & (out <= 1.0 + 1e-3)))

    ref = _reference_forward(x, params)
    max_err = float(jnp.max(jnp.abs(out - ref)))
    assert max_err < 5e-2, max_err

    print("KERNEL_OK")
</pallas_src>

<mosaic_0001>
module attributes {stable_mosaic.version = 11 : i64} {
  func.func @_fused_unet_kernel(%arg0: i32, %arg1: memref<1x256x32xf32, #tpu.memory_space<vmem>>, %arg2: memref<32x64xf32, #tpu.memory_space<vmem>>, %arg3: memref<1x64xf32, #tpu.memory_space<vmem>>, %arg4: memref<9x64x128xf32, #tpu.memory_space<vmem>>, %arg5: memref<1x128xf32, #tpu.memory_space<vmem>>, %arg6: memref<9x128x64xf32, #tpu.memory_space<vmem>>, %arg7: memref<1x64xf32, #tpu.memory_space<vmem>>, %arg8: memref<9x64x1xf32, #tpu.memory_space<vmem>>, %arg9: memref<1x1xf32, #tpu.memory_space<vmem>>, %arg10: memref<1x1x256xf32, #tpu.memory_space<vmem>>, %arg11: memref<18x18x64xf32, #tpu.memory_space<vmem>>, %arg12: memref<18x18x128xf32, #tpu.memory_space<vmem>>) attributes {dimension_semantics = [#tpu.dimension_semantics<parallel>], iteration_bounds = array<i64: 2>, scalar_prefetch = 0 : i64, scratch_operands = 2 : i64, tpu.core_type = #tpu.core_type<tc>, window_params = [{transform_indices = @transform_0, window_bounds = array<i64: 1, 256, 32>}, {pipeline_mode = #tpu.pipeline_mode<synchronous>, transform_indices = @transform_1, window_bounds = array<i64: 32, 64>}, {pipeline_mode = #tpu.pipeline_mode<synchronous>, transform_indices = @transform_2, window_bounds = array<i64: 1, 64>}, {pipeline_mode = #tpu.pipeline_mode<synchronous>, transform_indices = @transform_3, window_bounds = array<i64: 9, 64, 128>}, {pipeline_mode = #tpu.pipeline_mode<synchronous>, transform_indices = @transform_4, window_bounds = array<i64: 1, 128>}, {pipeline_mode = #tpu.pipeline_mode<synchronous>, transform_indices = @transform_5, window_bounds = array<i64: 9, 128, 64>}, {pipeline_mode = #tpu.pipeline_mode<synchronous>, transform_indices = @transform_6, window_bounds = array<i64: 1, 64>}, {pipeline_mode = #tpu.pipeline_mode<synchronous>, transform_indices = @transform_7, window_bounds = array<i64: 9, 64, 1>}, {pipeline_mode = #tpu.pipeline_mode<synchronous>, transform_indices = @transform_8, window_bounds = array<i64: 1, 1>}, {transform_indices = @transform_9, window_bounds = array<i64: 1, 1, 256>}]} {
    %cst = arith.constant 0.000000e+00 : f32
    %0 = vector.broadcast %cst : f32 to vector<1x18x64xf32>
    %c0 = arith.constant 0 : index
    %c0_0 = arith.constant 0 : index
    %c0_1 = arith.constant 0 : index
    %1 = vector.load %arg11[%c0, %c0_0, %c0_1] : memref<18x18x64xf32, #tpu.memory_space<vmem>>, vector<1x18x64xf32>
    tpu.vector_store %arg11[%c0, %c0_0, %c0_1], %0 {strides = array<i32>} : memref<18x18x64xf32, #tpu.memory_space<vmem>>, vector<1x18x64xf32>,
    %cst_2 = arith.constant 0.000000e+00 : f32
    %2 = vector.broadcast %cst_2 : f32 to vector<1x18x64xf32>
    %c17 = arith.constant 17 : index
    %c0_3 = arith.constant 0 : index
    %c0_4 = arith.constant 0 : index
    %3 = vector.load %arg11[%c17, %c0_3, %c0_4] : memref<18x18x64xf32, #tpu.memory_space<vmem>>, vector<1x18x64xf32>
    tpu.vector_store %arg11[%c17, %c0_3, %c0_4], %2 {strides = array<i32>} : memref<18x18x64xf32, #tpu.memory_space<vmem>>, vector<1x18x64xf32>,
    %cst_5 = arith.constant 0.000000e+00 : f32
    %4 = vector.broadcast %cst_5 : f32 to vector<18x1x64xf32>
    %c0_6 = arith.constant 0 : index
    %c0_7 = arith.constant 0 : index
    %c0_8 = arith.constant 0 : index
    %5 = vector.load %arg11[%c0_6, %c0_7, %c0_8] : memref<18x18x64xf32, #tpu.memory_space<vmem>>, vector<18x1x64xf32>
    tpu.vector_store %arg11[%c0_6, %c0_7, %c0_8], %4 {strides = array<i32>} : memref<18x18x64xf32, #tpu.memory_space<vmem>>, vector<18x1x64xf32>,
    %cst_9 = arith.constant 0.000000e+00 : f32
    %6 = vector.broadcast %cst_9 : f32 to vector<18x1x64xf32>
    %c0_10 = arith.constant 0 : index
    %c17_11 = arith.constant 17 : index
    %c0_12 = arith.constant 0 : index
    %7 = vector.load %arg11[%c0_10, %c17_11, %c0_12] : memref<18x18x64xf32, #tpu.memory_space<vmem>>, vector<18x1x64xf32>
    tpu.vector_store %arg11[%c0_10, %c17_11, %c0_12], %6 {strides = array<i32>} : memref<18x18x64xf32, #tpu.memory_space<vmem>>, vector<18x1x64xf32>,
    %cst_13 = arith.constant 0.000000e+00 : f32
    %8 = vector.broadcast %cst_13 : f32 to vector<1x18x128xf32>
    %c0_14 = arith.constant 0 : index
    %c0_15 = arith.constant 0 : index
    %c0_16 = arith.constant 0 : index
    %9 = vector.load %arg12[%c0_14, %c0_15, %c0_16] : memref<18x18x128xf32, #tpu.memory_space<vmem>>, vector<1x18x128xf32>
    tpu.vector_store %arg12[%c0_14, %c0_15, %c0_16], %8 {strides = array<i32>} : memref<18x18x128xf32, #tpu.memory_space<vmem>>, vector<1x18x128xf32>,
    %cst_17 = arith.constant 0.000000e+00 : f32
    %10 = vector.broadcast %cst_17 : f32 to vector<1x18x128xf32>
    %c17_18 = arith.constant 17 : index
    %c0_19 = arith.constant 0 : index
    %c0_20 = arith.constant 0 : index
    %11 = vector.load %arg12[%c17_18, %c0_19, %c0_20] : memref<18x18x128xf32, #tpu.memory_space<vmem>>, vector<1x18x128xf32>
    tpu.vector_store %arg12[%c17_18, %c0_19, %c0_20], %10 {strides = array<i32>} : memref<18x18x128xf32, #tpu.memory_space<vmem>>, vector<1x18x128xf32>,
    %cst_21 = arith.constant 0.000000e+00 : f32
    %12 = vector.broadcast %cst_21 : f32 to vector<18x1x128xf32>
    %c0_22 = arith.constant 0 : index
    %c0_23 = arith.constant 0 : index
    %c0_24 = arith.constant 0 : index
    %13 = vector.load %arg12[%c0_22, %c0_23, %c0_24] : memref<18x18x128xf32, #tpu.memory_space<vmem>>, vector<18x1x128xf32>
    tpu.vector_store %arg12[%c0_22, %c0_23, %c0_24], %12 {strides = array<i32>} : memref<18x18x128xf32, #tpu.memory_space<vmem>>, vector<18x1x128xf32>,
    %cst_25 = arith.constant 0.000000e+00 : f32
    %14 = vector.broadcast %cst_25 : f32 to vector<18x1x128xf32>
    %c0_26 = arith.constant 0 : index
    %c17_27 = arith.constant 17 : index
    %c0_28 = arith.constant 0 : index
    %15 = vector.load %arg12[%c0_26, %c17_27, %c0_28] : memref<18x18x128xf32, #tpu.memory_space<vmem>>, vector<18x1x128xf32>
    tpu.vector_store %arg12[%c0_26, %c17_27, %c0_28], %14 {strides = array<i32>} : memref<18x18x128xf32, #tpu.memory_space<vmem>>, vector<18x1x128xf32>,
    %c0_29 = arith.constant 0 : index
    %c0_30 = arith.constant 0 : index
    %c0_31 = arith.constant 0 : index
    %16 = vector.load %arg1[%c0_29, %c0_30, %c0_31] : memref<1x256x32xf32, #tpu.memory_space<vmem>>, vector<1x256x32xf32>
    %17 = vector.shape_cast %16 : vector<1x256x32xf32> to vector<256x32xf32>
    %c0_32 = arith.constant 0 : index
    %c0_33 = arith.constant 0 : index
    %18 = vector.load %arg2[%c0_32, %c0_33] : memref<32x64xf32, #tpu.memory_space<vmem>>, vector<32x64xf32>
    %cst_34 = arith.constant dense<0.000000e+00> : vector<256x64xf32>
    %19 = tpu.matmul %17, %18, %cst_34 {dimension_numbers = #tpu.dot_dimension_numbers<[1], [0], [0], [1], [0, 0, 1, 1], [], []>} : vector<256x32xf32>, vector<32x64xf32>, vector<256x64xf32> -> vector<256x64xf32>
    %c0_35 = arith.constant 0 : index
    %c0_36 = arith.constant 0 : index
    %20 = vector.load %arg3[%c0_35, %c0_36] : memref<1x64xf32, #tpu.memory_space<vmem>>, vector<1x64xf32>
    %21 = vector.broadcast %20 : vector<1x64xf32> to vector<256x64xf32>
    %22 = arith.addf %19, %21 : vector<256x64xf32>
    %cst_37 = arith.constant 0.000000e+00 : f32
    %23 = vector.broadcast %cst_37 : f32 to vector<256x64xf32>
    %24 = arith.maximumf %22, %23 : vector<256x64xf32>
    %25 = vector.shape_cast %24 : vector<256x64xf32> to vector<16x16x64xf32>
    %c1 = arith.constant 1 : index
    %c1_38 = arith.constant 1 : index
    %c0_39 = arith.constant 0 : index
    %26 = vector.load %arg11[%c1, %c1_38, %c0_39] : memref<18x18x64xf32, #tpu.memory_space<vmem>>, vector<16x16x64xf32>
    tpu.vector_store %arg11[%c1, %c1_38, %c0_39], %25 {strides = array<i32>} : memref<18x18x64xf32, #tpu.memory_space<vmem>>, vector<16x16x64xf32>,
    %cst_40 = arith.constant 0.000000e+00 : f32
    %27 = vector.broadcast %cst_40 : f32 to vector<256x128xf32>
    %c0_41 = arith.constant 0 : index
    %c0_42 = arith.constant 0 : index
    %c0_43 = arith.constant 0 : index
    %28 = vector.load %arg11[%c0_41, %c0_42, %c0_43] : memref<18x18x64xf32, #tpu.memory_space<vmem>>, vector<16x16x64xf32>
    %29 = vector.shape_cast %28 : vector<16x16x64xf32> to vector<256x64xf32>
    %c0_44 = arith.constant 0 : index
    %c0_45 = arith.constant 0 : index
    %c0_46 = arith.constant 0 : index
    %30 = vector.load %arg4[%c0_44, %c0_45, %c0_46] : memref<9x64x128xf32, #tpu.memory_space<vmem>>, vector<1x64x128xf32>
    %31 = vector.shape_cast %30 : vector<1x64x128xf32> to vector<64x128xf32>
    %cst_47 = arith.constant dense<0.000000e+00> : vector<256x128xf32>
    %32 = tpu.matmul %29, %31, %cst_47 {dimension_numbers = #tpu.dot_dimension_numbers<[1], [0], [0], [1], [0, 0, 1, 1], [], []>} : vector<256x64xf32>, vector<64x128xf32>, vector<256x128xf32> -> vector<256x128xf32>
    %33 = arith.addf %27, %32 : vector<256x128xf32>
    %c0_48 = arith.constant 0 : index
    %c1_49 = arith.constant 1 : index
    %c0_50 = arith.constant 0 : index
    %34 = vector.load %arg11[%c0_48, %c1_49, %c0_50] : memref<18x18x64xf32, #tpu.memory_space<vmem>>, vector<16x16x64xf32>
    %35 = vector.shape_cast %34 : vector<16x16x64xf32> to vector<256x64xf32>
    %c1_51 = arith.constant 1 : index
    %c0_52 = arith.constant 0 : index
    %c0_53 = arith.constant 0 : index
    %36 = vector.load %arg4[%c1_51, %c0_52, %c0_53] : memref<9x64x128xf32, #tpu.memory_space<vmem>>, vector<1x64x128xf32>
    %37 = vector.shape_cast %36 : vector<1x64x128xf32> to vector<64x128xf32>
    %cst_54 = arith.constant dense<0.000000e+00> : vector<256x128xf32>
    %38 = tpu.matmul %35, %37, %cst_54 {dimension_numbers = #tpu.dot_dimension_numbers<[1], [0], [0], [1], [0, 0, 1, 1], [], []>} : vector<256x64xf32>, vector<64x128xf32>, vector<256x128xf32> -> vector<256x128xf32>
    %39 = arith.addf %33, %38 : vector<256x128xf32>
    %c0_55 = arith.constant 0 : index
    %c2 = arith.constant 2 : index
    %c0_56 = arith.constant 0 : index
    %40 = vector.load %arg11[%c0_55, %c2, %c0_56] : memref<18x18x64xf32, #tpu.memory_space<vmem>>, vector<16x16x64xf32>
    %41 = vector.shape_cast %40 : vector<16x16x64xf32> to vector<256x64xf32>
    %c2_57 = arith.constant 2 : index
    %c0_58 = arith.constant 0 : index
    %c0_59 = arith.constant 0 : index
    %42 = vector.load %arg4[%c2_57, %c0_58, %c0_59] : memref<9x64x128xf32, #tpu.memory_space<vmem>>, vector<1x64x128xf32>
    %43 = vector.shape_cast %42 : vector<1x64x128xf32> to vector<64x128xf32>
    %cst_60 = arith.constant dense<0.000000e+00> : vector<256x128xf32>
    %44 = tpu.matmul %41, %43, %cst_60 {dimension_numbers = #tpu.dot_dimension_numbers<[1], [0], [0], [1], [0, 0, 1, 1], [], []>} : vector<256x64xf32>, vector<64x128xf32>, vector<256x128xf32> -> vector<256x128xf32>
    %45 = arith.addf %39, %44 : vector<256x128xf32>
    %c1_61 = arith.constant 1 : index
    %c0_62 = arith.constant 0 : index
    %c0_63 = arith.constant 0 : index
    %46 = vector.load %arg11[%c1_61, %c0_62, %c0_63] : memref<18x18x64xf32, #tpu.memory_space<vmem>>, vector<16x16x64xf32>
    %47 = vector.shape_cast %46 : vector<16x16x64xf32> to vector<256x64xf32>
    %c3 = arith.constant 3 : index
    %c0_64 = arith.constant 0 : index
    %c0_65 = arith.constant 0 : index
    %48 = vector.load %arg4[%c3, %c0_64, %c0_65] : memref<9x64x128xf32, #tpu.memory_space<vmem>>, vector<1x64x128xf32>
    %49 = vector.shape_cast %48 : vector<1x64x128xf32> to vector<64x128xf32>
    %cst_66 = arith.constant dense<0.000000e+00> : vector<256x128xf32>
    %50 = tpu.matmul %47, %49, %cst_66 {dimension_numbers = #tpu.dot_dimension_numbers<[1], [0], [0], [1], [0, 0, 1, 1], [], []>} : vector<256x64xf32>, vector<64x128xf32>, vector<256x128xf32> -> vector<256x128xf32>
    %51 = arith.addf %45, %50 : vector<256x128xf32>
    %c1_67 = arith.constant 1 : index
    %c1_68 = arith.constant 1 : index
    %c0_69 = arith.constant 0 : index
    %52 = vector.load %arg11[%c1_67, %c1_68, %c0_69] : memref<18x18x64xf32, #tpu.memory_space<vmem>>, vector<16x16x64xf32>
    %53 = vector.shape_cast %52 : vector<16x16x64xf32> to vector<256x64xf32>
    %c4 = arith.constant 4 : index
    %c0_70 = arith.constant 0 : index
    %c0_71 = arith.constant 0 : index
    %54 = vector.load %arg4[%c4, %c0_70, %c0_71] : memref<9x64x128xf32, #tpu.memory_space<vmem>>, vector<1x64x128xf32>
    %55 = vector.shape_cast %54 : vector<1x64x128xf32> to vector<64x128xf32>
    %cst_72 = arith.constant dense<0.000000e+00> : vector<256x128xf32>
    %56 = tpu.matmul %53, %55, %cst_72 {dimension_numbers = #tpu.dot_dimension_numbers<[1], [0], [0], [1], [0, 0, 1, 1], [], []>} : vector<256x64xf32>, vector<64x128xf32>, vector<256x128xf32> -> vector<256x128xf32>
    %57 = arith.addf %51, %56 : vector<256x128xf32>
    %c1_73 = arith.constant 1 : index
    %c2_74 = arith.constant 2 : index
    %c0_75 = arith.constant 0 : index
    %58 = vector.load %arg11[%c1_73, %c2_74, %c0_75] : memref<18x18x64xf32, #tpu.memory_space<vmem>>, vector<16x16x64xf32>
    %59 = vector.shape_cast %58 : vector<16x16x64xf32> to vector<256x64xf32>
    %c5 = arith.constant 5 : index
    %c0_76 = arith.constant 0 : index
    %c0_77 = arith.constant 0 : index
    %60 = vector.load %arg4[%c5, %c0_76, %c0_77] : memref<9x64x128xf32, #tpu.memory_space<vmem>>, vector<1x64x128xf32>
    %61 = vector.shape_cast %60 : vector<1x64x128xf32> to vector<64x128xf32>
    %cst_78 = arith.constant dense<0.000000e+00> : vector<256x128xf32>
    %62 = tpu.matmul %59, %61, %cst_78 {dimension_numbers = #tpu.dot_dimension_numbers<[1], [0], [0], [1], [0, 0, 1, 1], [], []>} : vector<256x64xf32>, vector<64x128xf32>, vector<256x128xf32> -> vector<256x128xf32>
    %63 = arith.addf %57, %62 : vector<256x128xf32>
    %c2_79 = arith.constant 2 : index
    %c0_80 = arith.constant 0 : index
    %c0_81 = arith.constant 0 : index
    %64 = vector.load %arg11[%c2_79, %c0_80, %c0_81] : memref<18x18x64xf32, #tpu.memory_space<vmem>>, vector<16x16x64xf32>
    %65 = vector.shape_cast %64 : vector<16x16x64xf32> to vector<256x64xf32>
    %c6 = arith.constant 6 : index
    %c0_82 = arith.constant 0 : index
    %c0_83 = arith.constant 0 : index
    %66 = vector.load %arg4[%c6, %c0_82, %c0_83] : memref<9x64x128xf32, #tpu.memory_space<vmem>>, vector<1x64x128xf32>
    %67 = vector.shape_cast %66 : vector<1x64x128xf32> to vector<64x128xf32>
    %cst_84 = arith.constant dense<0.000000e+00> : vector<256x128xf32>
    %68 = tpu.matmul %65, %67, %cst_84 {dimension_numbers = #tpu.dot_dimension_numbers<[1], [0], [0], [1], [0, 0, 1, 1], [], []>} : vector<256x64xf32>, vector<64x128xf32>, vector<256x128xf32> -> vector<256x128xf32>
    %69 = arith.addf %63, %68 : vector<256x128xf32>
    %c2_85 = arith.constant 2 : index
    %c1_86 = arith.constant 1 : index
    %c0_87 = arith.constant 0 : index
    %70 = vector.load %arg11[%c2_85, %c1_86, %c0_87] : memref<18x18x64xf32, #tpu.memory_space<vmem>>, vector<16x16x64xf32>
    %71 = vector.shape_cast %70 : vector<16x16x64xf32> to vector<256x64xf32>
    %c7 = arith.constant 7 : index
    %c0_88 = arith.constant 0 : index
    %c0_89 = arith.constant 0 : index
    %72 = vector.load %arg4[%c7, %c0_88, %c0_89] : memref<9x64x128xf32, #tpu.memory_space<vmem>>, vector<1x64x128xf32>
    %73 = vector.shape_cast %72 : vector<1x64x128xf32> to vector<64x128xf32>
    %cst_90 = arith.constant dense<0.000000e+00> : vector<256x128xf32>
    %74 = tpu.matmul %71, %73, %cst_90 {dimension_numbers = #tpu.dot_dimension_numbers<[1], [0], [0], [1], [0, 0, 1, 1], [], []>} : vector<256x64xf32>, vector<64x128xf32>, vector<256x128xf32> -> vector<256x128xf32>
    %75 = arith.addf %69, %74 : vector<256x128xf32>
    %c2_91 = arith.constant 2 : index
    %c2_92 = arith.constant 2 : index
    %c0_93 = arith.constant 0 : index
    %76 = vector.load %arg11[%c2_91, %c2_92, %c0_93] : memref<18x18x64xf32, #tpu.memory_space<vmem>>, vector<16x16x64xf32>
    %77 = vector.shape_cast %76 : vector<16x16x64xf32> to vector<256x64xf32>
    %c8 = arith.constant 8 : index
    %c0_94 = arith.constant 0 : index
    %c0_95 = arith.constant 0 : index
    %78 = vector.load %arg4[%c8, %c0_94, %c0_95] : memref<9x64x128xf32, #tpu.memory_space<vmem>>, vector<1x64x128xf32>
    %79 = vector.shape_cast %78 : vector<1x64x128xf32> to vector<64x128xf32>
    %cst_96 = arith.constant dense<0.000000e+00> : vector<256x128xf32>
    %80 = tpu.matmul %77, %79, %cst_96 {dimension_numbers = #tpu.dot_dimension_numbers<[1], [0], [0], [1], [0, 0, 1, 1], [], []>} : vector<256x64xf32>, vector<64x128xf32>, vector<256x128xf32> -> vector<256x128xf32>
    %81 = arith.addf %75, %80 : vector<256x128xf32>
    %c0_97 = arith.constant 0 : index
    %c0_98 = arith.constant 0 : index
    %82 = vector.load %arg5[%c0_97, %c0_98] : memref<1x128xf32, #tpu.memory_space<vmem>>, vector<1x128xf32>
    %83 = vector.broadcast %82 : vector<1x128xf32> to vector<256x128xf32>
    %84 = arith.addf %81, %83 : vector<256x128xf32>
    %cst_99 = arith.constant 0.000000e+00 : f32
    %85 = vector.broadcast %cst_99 : f32 to vector<256x128xf32>
    %86 = arith.maximumf %84, %85 : vector<256x128xf32>
    %87 = vector.shape_cast %86 : vector<256x128xf32> to vector<16x16x128xf32>
    %c1_100 = arith.constant 1 : index
    %c1_101 = arith.constant 1 : index
    %c0_102 = arith.constant 0 : index
    %88 = vector.load %arg12[%c1_100, %c1_101, %c0_102] : memref<18x18x128xf32, #tpu.memory_space<vmem>>, vector<16x16x128xf32>
    tpu.vector_store %arg12[%c1_100, %c1_101, %c0_102], %87 {strides = array<i32>} : memref<18x18x128xf32, #tpu.memory_space<vmem>>, vector<16x16x128xf32>,
    %cst_103 = arith.constant 0.000000e+00 : f32
    %89 = vector.broadcast %cst_103 : f32 to vector<256x64xf32>
    %c0_104 = arith.constant 0 : index
    %c0_105 = arith.constant 0 : index
    %c0_106 = arith.constant 0 : index
    %90 = vector.load %arg12[%c0_104, %c0_105, %c0_106] : memref<18x18x128xf32, #tpu.memory_space<vmem>>, vector<16x16x128xf32>
    %91 = vector.shape_cast %90 : vector<16x16x128xf32> to vector<256x128xf32>
    %c0_107 = arith.constant 0 : index
    %c0_108 = arith.constant 0 : index
    %c0_109 = arith.constant 0 : index
    %92 = vector.load %arg6[%c0_107, %c0_108, %c0_109] : memref<9x128x64xf32, #tpu.memory_space<vmem>>, vector<1x128x64xf32>
    %93 = vector.shape_cast %92 : vector<1x128x64xf32> to vector<128x64xf32>
    %cst_110 = arith.constant dense<0.000000e+00> : vector<256x64xf32>
    %94 = tpu.matmul %91, %93, %cst_110 {dimension_numbers = #tpu.dot_dimension_numbers<[1], [0], [0], [1], [0, 0, 1, 1], [], []>} : vector<256x128xf32>, vector<128x64xf32>, vector<256x64xf32> -> vector<256x64xf32>
    %95 = arith.addf %89, %94 : vector<256x64xf32>
    %c0_111 = arith.constant 0 : index
    %c1_112 = arith.constant 1 : index
    %c0_113 = arith.constant 0 : index
    %96 = vector.load %arg12[%c0_111, %c1_112, %c0_113] : memref<18x18x128xf32, #tpu.memory_space<vmem>>, vector<16x16x128xf32>
    %97 = vector.shape_cast %96 : vector<16x16x128xf32> to vector<256x128xf32>
    %c1_114 = arith.constant 1 : index
    %c0_115 = arith.constant 0 : index
    %c0_116 = arith.constant 0 : index
    %98 = vector.load %arg6[%c1_114, %c0_115, %c0_116] : memref<9x128x64xf32, #tpu.memory_space<vmem>>, vector<1x128x64xf32>
    %99 = vector.shape_cast %98 : vector<1x128x64xf32> to vector<128x64xf32>
    %cst_117 = arith.constant dense<0.000000e+00> : vector<256x64xf32>
    %100 = tpu.matmul %97, %99, %cst_117 {dimension_numbers = #tpu.dot_dimension_numbers<[1], [0], [0], [1], [0, 0, 1, 1], [], []>} : vector<256x128xf32>, vector<128x64xf32>, vector<256x64xf32> -> vector<256x64xf32>
    %101 = arith.addf %95, %100 : vector<256x64xf32>
    %c0_118 = arith.constant 0 : index
    %c2_119 = arith.constant 2 : index
    %c0_120 = arith.constant 0 : index
    %102 = vector.load %arg12[%c0_118, %c2_119, %c0_120] : memref<18x18x128xf32, #tpu.memory_space<vmem>>, vector<16x16x128xf32>
    %103 = vector.shape_cast %102 : vector<16x16x128xf32> to vector<256x128xf32>
    %c2_121 = arith.constant 2 : index
    %c0_122 = arith.constant 0 : index
    %c0_123 = arith.constant 0 : index
    %104 = vector.load %arg6[%c2_121, %c0_122, %c0_123] : memref<9x128x64xf32, #tpu.memory_space<vmem>>, vector<1x128x64xf32>
    %105 = vector.shape_cast %104 : vector<1x128x64xf32> to vector<128x64xf32>
    %cst_124 = arith.constant dense<0.000000e+00> : vector<256x64xf32>
    %106 = tpu.matmul %103, %105, %cst_124 {dimension_numbers = #tpu.dot_dimension_numbers<[1], [0], [0], [1], [0, 0, 1, 1], [], []>} : vector<256x128xf32>, vector<128x64xf32>, vector<256x64xf32> -> vector<256x64xf32>
    %107 = arith.addf %101, %106 : vector<256x64xf32>
    %c1_125 = arith.constant 1 : index
    %c0_126 = arith.constant 0 : index
    %c0_127 = arith.constant 0 : index
    %108 = vector.load %arg12[%c1_125, %c0_126, %c0_127] : memref<18x18x128xf32, #tpu.memory_space<vmem>>, vector<16x16x128xf32>
    %109 = vector.shape_cast %108 : vector<16x16x128xf32> to vector<256x128xf32>
    %c3_128 = arith.constant 3 : index
    %c0_129 = arith.constant 0 : index
    %c0_130 = arith.constant 0 : index
    %110 = vector.load %arg6[%c3_128, %c0_129, %c0_130] : memref<9x128x64xf32, #tpu.memory_space<vmem>>, vector<1x128x64xf32>
    %111 = vector.shape_cast %110 : vector<1x128x64xf32> to vector<128x64xf32>
    %cst_131 = arith.constant dense<0.000000e+00> : vector<256x64xf32>
    %112 = tpu.matmul %109, %111, %cst_131 {dimension_numbers = #tpu.dot_dimension_numbers<[1], [0], [0], [1], [0, 0, 1, 1], [], []>} : vector<256x128xf32>, vector<128x64xf32>, vector<256x64xf32> -> vector<256x64xf32>
    %113 = arith.addf %107, %112 : vector<256x64xf32>
    %c1_132 = arith.constant 1 : index
    %c1_133 = arith.constant 1 : index
    %c0_134 = arith.constant 0 : index
    %114 = vector.load %arg12[%c1_132, %c1_133, %c0_134] : memref<18x18x128xf32, #tpu.memory_space<vmem>>, vector<16x16x128xf32>
    %115 = vector.shape_cast %114 : vector<16x16x128xf32> to vector<256x128xf32>
    %c4_135 = arith.constant 4 : index
    %c0_136 = arith.constant 0 : index
    %c0_137 = arith.constant 0 : index
    %116 = vector.load %arg6[%c4_135, %c0_136, %c0_137] : memref<9x128x64xf32, #tpu.memory_space<vmem>>, vector<1x128x64xf32>
    %117 = vector.shape_cast %116 : vector<1x128x64xf32> to vector<128x64xf32>
    %cst_138 = arith.constant dense<0.000000e+00> : vector<256x64xf32>
    %118 = tpu.matmul %115, %117, %cst_138 {dimension_numbers = #tpu.dot_dimension_numbers<[1], [0], [0], [1], [0, 0, 1, 1], [], []>} : vector<256x128xf32>, vector<128x64xf32>, vector<256x64xf32> -> vector<256x64xf32>
    %119 = arith.addf %113, %118 : vector<256x64xf32>
    %c1_139 = arith.constant 1 : index
    %c2_140 = arith.constant 2 : index
    %c0_141 = arith.constant 0 : index
    %120 = vector.load %arg12[%c1_139, %c2_140, %c0_141] : memref<18x18x128xf32, #tpu.memory_space<vmem>>, vector<16x16x128xf32>
    %121 = vector.shape_cast %120 : vector<16x16x128xf32> to vector<256x128xf32>
    %c5_142 = arith.constant 5 : index
    %c0_143 = arith.constant 0 : index
    %c0_144 = arith.constant 0 : index
    %122 = vector.load %arg6[%c5_142, %c0_143, %c0_144] : memref<9x128x64xf32, #tpu.memory_space<vmem>>, vector<1x128x64xf32>
    %123 = vector.shape_cast %122 : vector<1x128x64xf32> to vector<128x64xf32>
    %cst_145 = arith.constant dense<0.000000e+00> : vector<256x64xf32>
    %124 = tpu.matmul %121, %123, %cst_145 {dimension_numbers = #tpu.dot_dimension_numbers<[1], [0], [0], [1], [0, 0, 1, 1], [], []>} : vector<256x128xf32>, vector<128x64xf32>, vector<256x64xf32> -> vector<256x64xf32>
    %125 = arith.addf %119, %124 : vector<256x64xf32>
    %c2_146 = arith.constant 2 : index
    %c0_147 = arith.constant 0 : index
    %c0_148 = arith.constant 0 : index
    %126 = vector.load %arg12[%c2_146, %c0_147, %c0_148] : memref<18x18x128xf32, #tpu.memory_space<vmem>>, vector<16x16x128xf32>
    %127 = vector.shape_cast %126 : vector<16x16x128xf32> to vector<256x128xf32>
    %c6_149 = arith.constant 6 : index
    %c0_150 = arith.constant 0 : index
    %c0_151 = arith.constant 0 : index
    %128 = vector.load %arg6[%c6_149, %c0_150, %c0_151] : memref<9x128x64xf32, #tpu.memory_space<vmem>>, vector<1x128x64xf32>
    %129 = vector.shape_cast %128 : vector<1x128x64xf32> to vector<128x64xf32>
    %cst_152 = arith.constant dense<0.000000e+00> : vector<256x64xf32>
    %130 = tpu.matmul %127, %129, %cst_152 {dimension_numbers = #tpu.dot_dimension_numbers<[1], [0], [0], [1], [0, 0, 1, 1], [], []>} : vector<256x128xf32>, vector<128x64xf32>, vector<256x64xf32> -> vector<256x64xf32>
    %131 = arith.addf %125, %130 : vector<256x64xf32>
    %c2_153 = arith.constant 2 : index
    %c1_154 = arith.constant 1 : index
    %c0_155 = arith.constant 0 : index
    %132 = vector.load %arg12[%c2_153, %c1_154, %c0_155] : memref<18x18x128xf32, #tpu.memory_space<vmem>>, vector<16x16x128xf32>
    %133 = vector.shape_cast %132 : vector<16x16x128xf32> to vector<256x128xf32>
    %c7_156 = arith.constant 7 : index
    %c0_157 = arith.constant 0 : index
    %c0_158 = arith.constant 0 : index
    %134 = vector.load %arg6[%c7_156, %c0_157, %c0_158] : memref<9x128x64xf32, #tpu.memory_space<vmem>>, vector<1x128x64xf32>
    %135 = vector.shape_cast %134 : vector<1x128x64xf32> to vector<128x64xf32>
    %cst_159 = arith.constant dense<0.000000e+00> : vector<256x64xf32>
    %136 = tpu.matmul %133, %135, %cst_159 {dimension_numbers = #tpu.dot_dimension_numbers<[1], [0], [0], [1], [0, 0, 1, 1], [], []>} : vector<256x128xf32>, vector<128x64xf32>, vector<256x64xf32> -> vector<256x64xf32>
    %137 = arith.addf %131, %136 : vector<256x64xf32>
    %c2_160 = arith.constant 2 : index
    %c2_161 = arith.constant 2 : index
    %c0_162 = arith.constant 0 : index
    %138 = vector.load %arg12[%c2_160, %c2_161, %c0_162] : memref<18x18x128xf32, #tpu.memory_space<vmem>>, vector<16x16x128xf32>
    %139 = vector.shape_cast %138 : vector<16x16x128xf32> to vector<256x128xf32>
    %c8_163 = arith.constant 8 : index
    %c0_164 = arith.constant 0 : index
    %c0_165 = arith.constant 0 : index
    %140 = vector.load %arg6[%c8_163, %c0_164, %c0_165] : memref<9x128x64xf32, #tpu.memory_space<vmem>>, vector<1x128x64xf32>
    %141 = vector.shape_cast %140 : vector<1x128x64xf32> to vector<128x64xf32>
    %cst_166 = arith.constant dense<0.000000e+00> : vector<256x64xf32>
    %142 = tpu.matmul %139, %141, %cst_166 {dimension_numbers = #tpu.dot_dimension_numbers<[1], [0], [0], [1], [0, 0, 1, 1], [], []>} : vector<256x128xf32>, vector<128x64xf32>, vector<256x64xf32> -> vector<256x64xf32>
    %143 = arith.addf %137, %142 : vector<256x64xf32>
    %c0_167 = arith.constant 0 : index
    %c0_168 = arith.constant 0 : index
    %144 = vector.load %arg7[%c0_167, %c0_168] : memref<1x64xf32, #tpu.memory_space<vmem>>, vector<1x64xf32>
    %145 = vector.broadcast %144 : vector<1x64xf32> to vector<256x64xf32>
    %146 = arith.addf %143, %145 : vector<256x64xf32>
    %cst_169 = arith.constant 0.000000e+00 : f32
    %147 = vector.broadcast %cst_169 : f32 to vector<256x64xf32>
    %148 = arith.maximumf %146, %147 : vector<256x64xf32>
    %149 = vector.shape_cast %148 : vector<256x64xf32> to vector<16x16x64xf32>
    %c1_170 = arith.constant 1 : index
    %c1_171 = arith.constant 1 : index
    %c0_172 = arith.constant 0 : index
    %150 = vector.load %arg11[%c1_170, %c1_171, %c0_172] : memref<18x18x64xf32, #tpu.memory_space<vmem>>, vector<16x16x64xf32>
    tpu.vector_store %arg11[%c1_170, %c1_171, %c0_172], %149 {strides = array<i32>} : memref<18x18x64xf32, #tpu.memory_space<vmem>>, vector<16x16x64xf32>,
    %cst_173 = arith.constant 0.000000e+00 : f32
    %151 = vector.broadcast %cst_173 : f32 to vector<256x1xf32>
    %c0_174 = arith.constant 0 : index
    %c0_175 = arith.constant 0 : index
    %c0_176 = arith.constant 0 : index
    %152 = vector.load %arg11[%c0_174, %c0_175, %c0_176] : memref<18x18x64xf32, #tpu.memory_space<vmem>>, vector<16x16x64xf32>
    %153 = vector.shape_cast %152 : vector<16x16x64xf32> to vector<256x64xf32>
    %c0_177 = arith.constant 0 : index
    %c0_178 = arith.constant 0 : index
    %c0_179 = arith.constant 0 : index
    %154 = vector.load %arg8[%c0_177, %c0_178, %c0_179] : memref<9x64x1xf32, #tpu.memory_space<vmem>>, vector<1x64x1xf32>
    %155 = vector.shape_cast %154 : vector<1x64x1xf32> to vector<64x1xf32>
    %cst_180 = arith.constant dense<0.000000e+00> : vector<256x1xf32>
    %156 = tpu.matmul %153, %155, %cst_180 {dimension_numbers = #tpu.dot_dimension_numbers<[1], [0], [0], [1], [0, 0, 1, 1], [], []>} : vector<256x64xf32>, vector<64x1xf32>, vector<256x1xf32> -> vector<256x1xf32>
    %157 = arith.addf %151, %156 : vector<256x1xf32>
    %c0_181 = arith.constant 0 : index
    %c1_182 = arith.constant 1 : index
    %c0_183 = arith.constant 0 : index
    %158 = vector.load %arg11[%c0_181, %c1_182, %c0_183] : memref<18x18x64xf32, #tpu.memory_space<vmem>>, vector<16x16x64xf32>
    %159 = vector.shape_cast %158 : vector<16x16x64xf32> to vector<256x64xf32>
    %c1_184 = arith.constant 1 : index
    %c0_185 = arith.constant 0 : index
    %c0_186 = arith.constant 0 : index
    %160 = vector.load %arg8[%c1_184, %c0_185, %c0_186] : memref<9x64x1xf32, #tpu.memory_space<vmem>>, vector<1x64x1xf32>
    %161 = vector.shape_cast %160 : vector<1x64x1xf32> to vector<64x1xf32>
    %cst_187 = arith.constant dense<0.000000e+00> : vector<256x1xf32>
    %162 = tpu.matmul %159, %161, %cst_187 {dimension_numbers = #tpu.dot_dimension_numbers<[1], [0], [0], [1], [0, 0, 1, 1], [], []>} : vector<256x64xf32>, vector<64x1xf32>, vector<256x1xf32> -> vector<256x1xf32>
    %163 = arith.addf %157, %162 : vector<256x1xf32>
    %c0_188 = arith.constant 0 : index
    %c2_189 = arith.constant 2 : index
    %c0_190 = arith.constant 0 : index
    %164 = vector.load %arg11[%c0_188, %c2_189, %c0_190] : memref<18x18x64xf32, #tpu.memory_space<vmem>>, vector<16x16x64xf32>
    %165 = vector.shape_cast %164 : vector<16x16x64xf32> to vector<256x64xf32>
    %c2_191 = arith.constant 2 : index
    %c0_192 = arith.constant 0 : index
    %c0_193 = arith.constant 0 : index
    %166 = vector.load %arg8[%c2_191, %c0_192, %c0_193] : memref<9x64x1xf32, #tpu.memory_space<vmem>>, vector<1x64x1xf32>
    %167 = vector.shape_cast %166 : vector<1x64x1xf32> to vector<64x1xf32>
    %cst_194 = arith.constant dense<0.000000e+00> : vector<256x1xf32>
    %168 = tpu.matmul %165, %167, %cst_194 {dimension_numbers = #tpu.dot_dimension_numbers<[1], [0], [0], [1], [0, 0, 1, 1], [], []>} : vector<256x64xf32>, vector<64x1xf32>, vector<256x1xf32> -> vector<256x1xf32>
    %169 = arith.addf %163, %168 : vector<256x1xf32>
    %c1_195 = arith.constant 1 : index
    %c0_196 = arith.constant 0 : index
    %c0_197 = arith.constant 0 : index
    %170 = vector.load %arg11[%c1_195, %c0_196, %c0_197] : memref<18x18x64xf32, #tpu.memory_space<vmem>>, vector<16x16x64xf32>
    %171 = vector.shape_cast %170 : vector<16x16x64xf32> to vector<256x64xf32>
    %c3_198 = arith.constant 3 : index
    %c0_199 = arith.constant 0 : index
    %c0_200 = arith.constant 0 : index
    %172 = vector.load %arg8[%c3_198, %c0_199, %c0_200] : memref<9x64x1xf32, #tpu.memory_space<vmem>>, vector<1x64x1xf32>
    %173 = vector.shape_cast %172 : vector<1x64x1xf32> to vector<64x1xf32>
    %cst_201 = arith.constant dense<0.000000e+00> : vector<256x1xf32>
    %174 = tpu.matmul %171, %173, %cst_201 {dimension_numbers = #tpu.dot_dimension_numbers<[1], [0], [0], [1], [0, 0, 1, 1], [], []>} : vector<256x64xf32>, vector<64x1xf32>, vector<256x1xf32> -> vector<256x1xf32>
    %175 = arith.addf %169, %174 : vector<256x1xf32>
    %c1_202 = arith.constant 1 : index
    %c1_203 = arith.constant 1 : index
    %c0_204 = arith.constant 0 : index
    %176 = vector.load %arg11[%c1_202, %c1_203, %c0_204] : memref<18x18x64xf32, #tpu.memory_space<vmem>>, vector<16x16x64xf32>
    %177 = vector.shape_cast %176 : vector<16x16x64xf32> to vector<256x64xf32>
    %c4_205 = arith.constant 4 : index
    %c0_206 = arith.constant 0 : index
    %c0_207 = arith.constant 0 : index
    %178 = vector.load %arg8[%c4_205, %c0_206, %c0_207] : memref<9x64x1xf32, #tpu.memory_space<vmem>>, vector<1x64x1xf32>
    %179 = vector.shape_cast %178 : vector<1x64x1xf32> to vector<64x1xf32>
    %cst_208 = arith.constant dense<0.000000e+00> : vector<256x1xf32>
    %180 = tpu.matmul %177, %179, %cst_208 {dimension_numbers = #tpu.dot_dimension_numbers<[1], [0], [0], [1], [0, 0, 1, 1], [], []>} : vector<256x64xf32>, vector<64x1xf32>, vector<256x1xf32> -> vector<256x1xf32>
    %181 = arith.addf %175, %180 : vector<256x1xf32>
    %c1_209 = arith.constant 1 : index
    %c2_210 = arith.constant 2 : index
    %c0_211 = arith.constant 0 : index
    %182 = vector.load %arg11[%c1_209, %c2_210, %c0_211] : memref<18x18x64xf32, #tpu.memory_space<vmem>>, vector<16x16x64xf32>
    %183 = vector.shape_cast %182 : vector<16x16x64xf32> to vector<256x64xf32>
    %c5_212 = arith.constant 5 : index
    %c0_213 = arith.constant 0 : index
    %c0_214 = arith.constant 0 : index
    %184 = vector.load %arg8[%c5_212, %c0_213, %c0_214] : memref<9x64x1xf32, #tpu.memory_space<vmem>>, vector<1x64x1xf32>
    %185 = vector.shape_cast %184 : vector<1x64x1xf32> to vector<64x1xf32>
    %cst_215 = arith.constant dense<0.000000e+00> : vector<256x1xf32>
    %186 = tpu.matmul %183, %185, %cst_215 {dimension_numbers = #tpu.dot_dimension_numbers<[1], [0], [0], [1], [0, 0, 1, 1], [], []>} : vector<256x64xf32>, vector<64x1xf32>, vector<256x1xf32> -> vector<256x1xf32>
    %187 = arith.addf %181, %186 : vector<256x1xf32>
    %c2_216 = arith.constant 2 : index
    %c0_217 = arith.constant 0 : index
    %c0_218 = arith.constant 0 : index
    %188 = vector.load %arg11[%c2_216, %c0_217, %c0_218] : memref<18x18x64xf32, #tpu.memory_space<vmem>>, vector<16x16x64xf32>
    %189 = vector.shape_cast %188 : vector<16x16x64xf32> to vector<256x64xf32>
    %c6_219 = arith.constant 6 : index
    %c0_220 = arith.constant 0 : index
    %c0_221 = arith.constant 0 : index
    %190 = vector.load %arg8[%c6_219, %c0_220, %c0_221] : memref<9x64x1xf32, #tpu.memory_space<vmem>>, vector<1x64x1xf32>
    %191 = vector.shape_cast %190 : vector<1x64x1xf32> to vector<64x1xf32>
    %cst_222 = arith.constant dense<0.000000e+00> : vector<256x1xf32>
    %192 = tpu.matmul %189, %191, %cst_222 {dimension_numbers = #tpu.dot_dimension_numbers<[1], [0], [0], [1], [0, 0, 1, 1], [], []>} : vector<256x64xf32>, vector<64x1xf32>, vector<256x1xf32> -> vector<256x1xf32>
    %193 = arith.addf %187, %192 : vector<256x1xf32>
    %c2_223 = arith.constant 2 : index
    %c1_224 = arith.constant 1 : index
    %c0_225 = arith.constant 0 : index
    %194 = vector.load %arg11[%c2_223, %c1_224, %c0_225] : memref<18x18x64xf32, #tpu.memory_space<vmem>>, vector<16x16x64xf32>
    %195 = vector.shape_cast %194 : vector<16x16x64xf32> to vector<256x64xf32>
    %c7_226 = arith.constant 7 : index
    %c0_227 = arith.constant 0 : index
    %c0_228 = arith.constant 0 : index
    %196 = vector.load %arg8[%c7_226, %c0_227, %c0_228] : memref<9x64x1xf32, #tpu.memory_space<vmem>>, vector<1x64x1xf32>
    %197 = vector.shape_cast %196 : vector<1x64x1xf32> to vector<64x1xf32>
    %cst_229 = arith.constant dense<0.000000e+00> : vector<256x1xf32>
    %198 = tpu.matmul %195, %197, %cst_229 {dimension_numbers = #tpu.dot_dimension_numbers<[1], [0], [0], [1], [0, 0, 1, 1], [], []>} : vector<256x64xf32>, vector<64x1xf32>, vector<256x1xf32> -> vector<256x1xf32>
    %199 = arith.addf %193, %198 : vector<256x1xf32>
    %c2_230 = arith.constant 2 : index
    %c2_231 = arith.constant 2 : index
    %c0_232 = arith.constant 0 : index
    %200 = vector.load %arg11[%c2_230, %c2_231, %c0_232] : memref<18x18x64xf32, #tpu.memory_space<vmem>>, vector<16x16x64xf32>
    %201 = vector.shape_cast %200 : vector<16x16x64xf32> to vector<256x64xf32>
    %c8_233 = arith.constant 8 : index
    %c0_234 = arith.constant 0 : index
    %c0_235 = arith.constant 0 : index
    %202 = vector.load %arg8[%c8_233, %c0_234, %c0_235] : memref<9x64x1xf32, #tpu.memory_space<vmem>>, vector<1x64x1xf32>
    %203 = vector.shape_cast %202 : vector<1x64x1xf32> to vector<64x1xf32>
    %cst_236 = arith.constant dense<0.000000e+00> : vector<256x1xf32>
    %204 = tpu.matmul %201, %203, %cst_236 {dimension_numbers = #tpu.dot_dimension_numbers<[1], [0], [0], [1], [0, 0, 1, 1], [], []>} : vector<256x64xf32>, vector<64x1xf32>, vector<256x1xf32> -> vector<256x1xf32>
    %205 = arith.addf %199, %204 : vector<256x1xf32>
    %c0_237 = arith.constant 0 : index
    %c0_238 = arith.constant 0 : index
    %206 = vector.load %arg9[%c0_237, %c0_238] : memref<1x1xf32, #tpu.memory_space<vmem>>, vector<1x1xf32>
    %207 = vector.broadcast %206 : vector<1x1xf32> to vector<256x1xf32>
    %208 = arith.addf %205, %207 : vector<256x1xf32>
    %cst_239 = arith.constant 0.000000e+00 : f32
    %209 = vector.broadcast %cst_239 : f32 to vector<256x1xf32>
    %210 = arith.subf %209, %208 : vector<256x1xf32>
    %211 = math.exp %210 : vector<256x1xf32>
    %cst_240 = arith.constant 1.000000e+00 : f32
    %212 = vector.broadcast %cst_240 : f32 to vector<256x1xf32>
    %213 = arith.addf %212, %211 : vector<256x1xf32>
    %214 = tpu.reciprocal %213 {approx = true} : vector<256x1xf32> -> vector<256x1xf32>
    %215 = vector.shape_cast %214 : vector<256x1xf32> to vector<1x1x256xf32>
    %c0_241 = arith.constant 0 : index
    %c0_242 = arith.constant 0 : index
    %c0_243 = arith.constant 0 : index
    %216 = vector.load %arg10[%c0_241, %c0_242, %c0_243] : memref<1x1x256xf32, #tpu.memory_space<vmem>>, vector<1x1x256xf32>
    tpu.vector_store %arg10[%c0_241, %c0_242, %c0_243], %215 {strides = array<i32>} : memref<1x1x256xf32, #tpu.memory_space<vmem>>, vector<1x1x256xf32>,
    return
  }
  func.func @transform_0(%arg0: i32) -> (i32, i32, i32) {
    %c0_i32 = arith.constant 0 : i32
    %c0_i32_0 = arith.constant 0 : i32
    %c0_i32_1 = arith.constant 0 : i32
    return %arg0, %c0_i32, %c0_i32_0 : i32, i32, i32
  }
  func.func @transform_1(%arg0: i32) -> (i32, i32) {
    %c0_i32 = arith.constant 0 : i32
    %c0_i32_0 = arith.constant 0 : i32
    %c0_i32_1 = arith.constant 0 : i32
    return %c0_i32, %c0_i32_0 : i32, i32
  }
  func.func @transform_2(%arg0: i32) -> (i32, i32) {
    %c0_i32 = arith.constant 0 : i32
    %c0_i32_0 = arith.constant 0 : i32
    %c0_i32_1 = arith.constant 0 : i32
    return %c0_i32, %c0_i32_0 : i32, i32
  }
  func.func @transform_3(%arg0: i32) -> (i32, i32, i32) {
    %c0_i32 = arith.constant 0 : i32
    %c0_i32_0 = arith.constant 0 : i32
    %c0_i32_1 = arith.constant 0 : i32
    %c0_i32_2 = arith.constant 0 : i32
    return %c0_i32, %c0_i32_0, %c0_i32_1 : i32, i32, i32
  }
  func.func @transform_4(%arg0: i32) -> (i32, i32) {
    %c0_i32 = arith.constant 0 : i32
    %c0_i32_0 = arith.constant 0 : i32
    %c0_i32_1 = arith.constant 0 : i32
    return %c0_i32, %c0_i32_0 : i32, i32
  }
  func.func @transform_5(%arg0: i32) -> (i32, i32, i32) {
    %c0_i32 = arith.constant 0 : i32
    %c0_i32_0 = arith.constant 0 : i32
    %c0_i32_1 = arith.constant 0 : i32
    %c0_i32_2 = arith.constant 0 : i32
    return %c0_i32, %c0_i32_0, %c0_i32_1 : i32, i32, i32
  }
  func.func @transform_6(%arg0: i32) -> (i32, i32) {
    %c0_i32 = arith.constant 0 : i32
    %c0_i32_0 = arith.constant 0 : i32
    %c0_i32_1 = arith.constant 0 : i32
    return %c0_i32, %c0_i32_0 : i32, i32
  }
  func.func @transform_7(%arg0: i32) -> (i32, i32, i32) {
    %c0_i32 = arith.constant 0 : i32
    %c0_i32_0 = arith.constant 0 : i32
    %c0_i32_1 = arith.constant 0 : i32
    %c0_i32_2 = arith.constant 0 : i32
    return %c0_i32, %c0_i32_0, %c0_i32_1 : i32, i32, i32
  }
  func.func @transform_8(%arg0: i32) -> (i32, i32) {
    %c0_i32 = arith.constant 0 : i32
    %c0_i32_0 = arith.constant 0 : i32
    %c0_i32_1 = arith.constant 0 : i32
    return %c0_i32, %c0_i32_0 : i32, i32
  }
  func.func @transform_9(%arg0: i32) -> (i32, i32, i32) {
    %c0_i32 = arith.constant 0 : i32
    %c0_i32_0 = arith.constant 0 : i32
    %c0_i32_1 = arith.constant 0 : i32
    return %arg0, %c0_i32, %c0_i32_0 : i32, i32, i32
  }
}

</mosaic_0001>

<bundles_post_ra>
// kernel: unet_shadow_detection.1
= control target key start
LH: loop header
LB: loop body
LE: loop exit
PB: predicated region body
PF: predicated region fallthrough
CT: control target
= control target key end

     0   :  { %s20064_s11 = smov 0   ;;  %s23996_s0 = inlined_call_operand.vmem [shape: f32[2,256,32], index: 0, kind: input, shape index: {}]   ;;  %s23997_s1 = inlined_call_operand.vmem [shape: f32[32,64], index: 1, kind: input, shape index: {}]   ;;  %s23998_s2 = inlined_call_operand.vmem [shape: f32[1,64], index: 2, kind: input, shape index: {}]   ;;  %s23999_s3 = inlined_call_operand.vmem [shape: f32[9,64,128], index: 3, kind: input, shape index: {}]   ;;  %s24000_s4 = inlined_call_operand.vmem [shape: f32[1,128], index: 4, kind: input, shape index: {}]   ;;  %s24001_s5 = inlined_call_operand.vmem [shape: f32[9,128,64], index: 5, kind: input, shape index: {}]   ;;  %s24002_s6 = inlined_call_operand.vmem [shape: f32[1,64], index: 6, kind: input, shape index: {}]   ;;  %s24003_s7 = inlined_call_operand.vmem [shape: f32[9,64,1], index: 7, kind: input, shape index: {}]   ;;  %s24004_s8 = inlined_call_operand.<no memory space> [shape: f32[1,1], index: 8, kind: input, shape index: {}]   ;;  %s24005_s9 = inlined_call_operand.vmem [shape: f32[2,1,256], index: 9, kind: output, shape index: {}]  }
   0x1   :  { %v14_v0 = vstv %s24004_s8 }
   0x2   :  { %15 = vst [vmem:[#allocation4] sm:$0x1] %v14_v0 }
   0x3 LB: > { %s14439_s12 = sadd.s32 4294967295, %s20006_s11   ;;  %p14443_p0 = scmp.ge.s32.totalorder %s20006_s11, 1  ;;  %s20006_s11 = sphi %s20064_s11, %s21_s11  }
   0x4   : > { %p289_p1 = scmp.lt.s32.totalorder %s20006_s11, 3 }
   0x6   : > { %p290_p2 = pnand %p14443_p0, %p289_p1 }
   0x8   : > { %293 = sbr.rel (%p290_p2) target bundleno = 2565 (0xa05), region = 56 }
   0xf   : > { %v454_v1 = vld [vmem:[%s23997_s1] sm:$0xff]  ;;  %v455_v2 = vld [vmem:[%s23997_s1 + $0x8] sm:$0xff]  ;;  %v456_v3 = vld [vmem:[%s23997_s1 + $0x10] sm:$0xff]  ;;  %p324_p3 = scmp.lt.s32.totalorder %s14439_s12, 1  ;;  %vm465_vm0 = vcmask 261120   ;;  %vm333_vm1 = vcmask 523264  }
  0x10   : > { %v18498_v4 = vpack.c.bf16 %v455_v2, %v454_v1  ;;  %v457_v5 = vld [vmem:[%s23997_s1 + $0x18] sm:$0xff]  ;;  %v14480_v6 = vld [vmem:[%s23999_s3 + $0x40] sm:$0xff]  ;;  %v14481_v8 = vld [vmem:[%s23999_s3 + $0x48] sm:$0xff]  ;;  %v20008_v54 = vmov 0.0   ;;  %vm336_vm2 = vcmask 517120   ;;  %vm342_vm3 = vcmask 516096  }
  0x11   : > { %v18502_v7 = vpack.c.bf16 %v457_v5, %v456_v3  ;;  %s24289_s12 = smov (!%p324_p3, %s14439_s12), 1  ;;  %v14632_v9 = vld [vmem:[%s23999_s3 + $0x100] sm:$0xff]  ;;  %v14633_v10 = vld [vmem:[%s23999_s3 + $0x108] sm:$0xff]  ;;  %v18506_v12 = vpack.c.bf16 %v14481_v8, %v14480_v6  ;;  %v14482_v14 = vld [vmem:[%s23999_s3 + $0x50] sm:$0xff]  ;;  %334 = vst.msk [vmem:[#allocation2] sm:$0xff] %vm333_vm1, %v20008_v54  ;;  %vm14186_vm4 = vcmask 130112  }
  0x12   : > { %18499 = vmatprep.subr.bf16.mxu0 %v18498_v4  ;;  %v18570_v11 = vpack.c.bf16 %v14633_v10, %v14632_v9  ;;  %s15381_s28 = sshll.u32 %s24289_s12, 8  ;;  %v14483_v15 = vld [vmem:[%s23999_s3 + $0x58] sm:$0xff]  ;;  %v14634_v48 = vld [vmem:[%s23999_s3 + $0x110] sm:$0xff]  ;;  %v14484_v51 = vld [vmem:[%s23999_s3 + $0x60] sm:$0xff]  ;;  %335 = vst.msk [vmem:[#allocation2 + $0x8] sm:$0xff] %vm333_vm1, %v20008_v54  ;;  %vm14193_vm5 = vcmask 195712  }
  0x13   : > { %18501 = vmatpush3.bf16.msra.mxu0 %v18498_v4  ;;  %s20102_s10 = scalar_lea.vmem %s23996_s0, %s15381_s28  ;;  %v18510_v18 = vpack.c.bf16 %v14483_v15, %v14482_v14  ;;  %v14635_v49 = vld [vmem:[%s23999_s3 + $0x118] sm:$0xff]  ;;  %v14485_v52 = vld [vmem:[%s23999_s3 + $0x68] sm:$0xff]  ;;  %339 = vst.msk [vmem:[#allocation2 + $0x198] sm:$0xff] %vm333_vm1, %v20008_v54  ;;  %340 = vst.msk [vmem:[#allocation2 + $0x1a0] sm:$0xff] %vm333_vm1, %v20008_v54  ;;  %vm14200_vm6 = vcmask 261312   ;;  %vm14207_vm7 = vcmask 326912  }
  0x14   : > { %18503 = vmatprep.subr.bf16.mxu0 %v18502_v7  ;;  %18571 = vmatprep.subr.bf16.mxu1 %v18570_v11  ;;  %v422_v13 = vld [vmem:[%s20102_s10] sm:$0xff]  ;;  %v423_v16 = vld [vmem:[%s20102_s10 + $0x8] sm:$0xff]  ;;  %v424_v17 = vld [vmem:[%s20102_s10 + $0x10] sm:$0xff]  ;;  %v18574_v50 = vpack.c.bf16 %v14635_v49, %v14634_v48  ;;  %v18514_v53 = vpack.c.bf16 %v14485_v52, %v14484_v51  ;;  %379 = vst [vmem:[#allocation3] sm:$0xff] %v20008_v54  ;;  %vm14214_vm8 = vcmask 392512   ;;  %vm14221_vm9 = vcmask 458112  }
  0x15   : > { %18573 = vmatpush3.bf16.msra.mxu1 %v18570_v11  ;;  %16578 = vmatprep.mubr.msk.f32.mxu0 %vm465_vm0, %v422_v13  ;;  %v425_v19 = vld [vmem:[%s20102_s10 + $0x18] sm:$0xff]  ;;  %v426_v20 = vld [vmem:[%s20102_s10 + $0x20] sm:$0xff]  ;;  %v427_v21 = vld [vmem:[%s20102_s10 + $0x28] sm:$0xff]  ;;  %380 = vst [vmem:[#allocation3 + $0x8] sm:$0xff] %v20008_v54  ;;  %vm14228_vm10 = vcmask 523712   ;;  %vm14235_vm11 = vcmask 589312  }
  0x16   : > { %v428_v22 = vld [vmem:[%s20102_s10 + $0x30] sm:$0xff]  ;;  %v429_v23 = vld [vmem:[%s20102_s10 + $0x38] sm:$0xff]  ;;  %v430_v24 = vld [vmem:[%s20102_s10 + $0x40] sm:$0xff]  ;;  %381 = vst [vmem:[#allocation3 + $0x10] sm:$0x3] %v20008_v54  ;;  %18575 = vmatprep.subr.bf16.mxu1 %v18574_v50  ;;  %vm14242_vm12 = vcmask 654912  }
  0x17   : > { %18505 = vmatpush3.bf16.msra.mxu0 %v18502_v7  ;;  %v431_v25 = vld [vmem:[%s20102_s10 + $0x48] sm:$0xff]  ;;  %v432_v26 = vld [vmem:[%s20102_s10 + $0x50] sm:$0xff]  ;;  %v433_v27 = vld [vmem:[%s20102_s10 + $0x58] sm:$0xff]  ;;  %383 = vst [vmem:[#allocation3 + $0x198] sm:$0xff] %v20008_v54  ;;  %vm14249_vm13 = vcmask 720512   ;;  %vm14256_vm14 = vcmask 786112  }
  0x18   : > { %18507 = vmatprep.subr.bf16.mxu0 %v18506_v12  ;;  %v434_v28 = vld [vmem:[%s20102_s10 + $0x60] sm:$0xff]  ;;  %v435_v29 = vld [vmem:[%s20102_s10 + $0x68] sm:$0xff]  ;;  %v436_v30 = vld [vmem:[%s20102_s10 + $0x70] sm:$0xff]  ;;  %384 = vst [vmem:[#allocation3 + $0x1a0] sm:$0xff] %v20008_v54  ;;  %vm14263_vm15 = vcmask 851712   ;;  %s14446_s26 = sshll.u32 %s24289_s12, 1 }
  0x19   : > { %v437_v31 = vld [vmem:[%s20102_s10 + $0x78] sm:$0xff]  ;;  %v438_v32 = vld [vmem:[%s20102_s10 + $0x80] sm:$0xff]  ;;  %v439_v33 = vld [vmem:[%s20102_s10 + $0x88] sm:$0xff]  ;;  %385 = vst [vmem:[#allocation3 + $0x1a8] sm:$0x3] %v20008_v54  ;;  %18577 = vmatpush3.bf16.msra.mxu1 %v18574_v50  ;;  %s332_s29 = scalar_lea.vmem %s24005_s9, %s14446_s26 }
  0x1a   : > { %16579 = vmatmul.mubr.msk.f32.vlgmr.msra.gmra.mrb[0].mxu0 %vm465_vm0, %v423_v16  ;;  %v440_v34 = vld [vmem:[%s20102_s10 + $0x90] sm:$0xff]  ;;  %v441_v35 = vld [vmem:[%s20102_s10 + $0x98] sm:$0xff]  ;;  %v442_v36 = vld [vmem:[%s20102_s10 + $0xa0] sm:$0xff]  ;;  %387 = vst [vmem:[#allocation3 + $0x18] sm:$0x1] %v20008_v54 }
  0x1b   : > { %16581 = vmatprep.mubr.msk.f32.mxu0 %vm465_vm0, %v424_v17  ;;  %18509 = vmatpush3.bf16.msra.mxu0 %v18506_v12  ;;  %v443_v37 = vld [vmem:[%s20102_s10 + $0xa8] sm:$0xff]  ;;  %v444_v38 = vld [vmem:[%s20102_s10 + $0xb0] sm:$0xff]  ;;  %v445_v39 = vld [vmem:[%s20102_s10 + $0xb8] sm:$0xff]  ;;  %388 = vst [vmem:[#allocation3 + $0x30] sm:$0x1] %v20008_v54 }
  0x1c   : > { %18511 = vmatprep.subr.bf16.mxu0 %v18510_v18  ;;  %v446_v40 = vld [vmem:[%s20102_s10 + $0xc0] sm:$0xff]  ;;  %v447_v41 = vld [vmem:[%s20102_s10 + $0xc8] sm:$0xff]  ;;  %v448_v42 = vld [vmem:[%s20102_s10 + $0xd0] sm:$0xff]  ;;  %389 = vst [vmem:[#allocation3 + $0x48] sm:$0x1] %v20008_v54 }
  0x1d   : > { %v449_v43 = vld [vmem:[%s20102_s10 + $0xd8] sm:$0xff]  ;;  %v450_v44 = vld [vmem:[%s20102_s10 + $0xe0] sm:$0xff]  ;;  %v451_v45 = vld [vmem:[%s20102_s10 + $0xe8] sm:$0xff]  ;;  %390 = vst [vmem:[#allocation3 + $0x60] sm:$0x1] %v20008_v54 }
  0x1e   : > { %16582 = vmatmul.mubr.msk.f32.gmra.mrb[2].mxu0 %vm465_vm0, %v425_v19  ;;  %v452_v46 = vld [vmem:[%s20102_s10 + $0xf0] sm:$0xff]  ;;  %v453_v47 = vld [vmem:[%s20102_s10 + $0xf8] sm:$0xff]  ;;  %391 = vst [vmem:[#allocation3 + $0x78] sm:$0x1] %v20008_v54  ;;  %392 = vst [vmem:[#allocation3 + $0x90] sm:$0x1] %v20008_v54 }
  0x1f   : > { %16584 = vmatprep.mubr.msk.f32.mxu0 %vm465_vm0, %v426_v20  ;;  %18513 = vmatpush3.bf16.msra.mxu0 %v18510_v18  ;;  %393 = vst [vmem:[#allocation3 + $0xa8] sm:$0x1] %v20008_v54  ;;  %394 = vst [vmem:[#allocation3 + $0xc0] sm:$0x1] %v20008_v54  ;;  %v14636_v55 = vld [vmem:[%s23999_s3 + $0x120] sm:$0xff]  ;;  %v14637_v56 = vld [vmem:[%s23999_s3 + $0x128] sm:$0xff] }
  0x20   : > { %395 = vst [vmem:[#allocation3 + $0xd8] sm:$0x1] %v20008_v54  ;;  %396 = vst [vmem:[#allocation3 + $0xf0] sm:$0x1] %v20008_v54  ;;  %18515 = vmatprep.subr.bf16.mxu0 %v18514_v53  ;;  %v14486_v57 = vld [vmem:[%s23999_s3 + $0x70] sm:$0xff]  ;;  %v18578_v58 = vpack.c.bf16 %v14637_v56, %v14636_v55  ;;  %v14487_v59 = vld [vmem:[%s23999_s3 + $0x78] sm:$0xff] }
  0x21   : > { %397 = vst [vmem:[#allocation3 + $0x108] sm:$0x1] %v20008_v54  ;;  %398 = vst [vmem:[#allocation3 + $0x120] sm:$0x1] %v20008_v54  ;;  %v18518_v60 = vpack.c.bf16 %v14487_v59, %v14486_v57  ;;  %v14638_v61 = vld [vmem:[%s23999_s3 + $0x130] sm:$0xff]  ;;  %v14639_v62 = vld [vmem:[%s23999_s3 + $0x138] sm:$0xff] }
  0x22   : > { %16585 = vmatmul.mubr.msk.f32.gmra.mrb[4].mxu0 %vm465_vm0, %v427_v21  ;;  %399 = vst [vmem:[#allocation3 + $0x138] sm:$0x1] %v20008_v54  ;;  %400 = vst [vmem:[#allocation3 + $0x150] sm:$0x1] %v20008_v54  ;;  %18579 = vmatprep.subr.bf16.mxu1 %v18578_v58  ;;  %v892_v63 = vld [vmem:[#allocation2 + $0x1] sm:$0xff]  ;;  %v18582_v0 = vpack.c.bf16 %v14639_v62, %v14638_v61  ;;  %v886_v8 = vld [vmem:[%s23999_s3 + $0x10] sm:$0xff] }
  0x23   : > { %16587 = vmatprep.mubr.msk.f32.mxu0 %vm465_vm0, %v428_v22  ;;  %401 = vst [vmem:[#allocation3 + $0x168] sm:$0x1] %v20008_v54  ;;  %402 = vst [vmem:[#allocation3 + $0x180] sm:$0x1] %v20008_v54  ;;  %18517 = vmatpush3.bf16.msra.mxu0 %v18514_v53  ;;  %v14672_v2 = vld [vmem:[%s23999_s3 + $0x140] sm:$0xff]  ;;  %v14673_v3 = vld [vmem:[%s23999_s3 + $0x148] sm:$0xff] }
  0x24   : > { %405 = vst [vmem:[#allocation3 + $0x29] sm:$0x1] %v20008_v54  ;;  %406 = vst [vmem:[#allocation3 + $0x41] sm:$0x1] %v20008_v54  ;;  %18519 = vmatprep.subr.bf16.mxu0 %v18518_v60  ;;  %18581 = vmatpush3.bf16.msra.mxu1 %v18578_v58  ;;  %v20336_v4 = vpack.c.bf16 %v14673_v3, %v14672_v2  ;;  %v884_v5 = vld [vmem:[%s23999_s3] sm:$0xff]  ;;  %v885_v6 = vld [vmem:[%s23999_s3 + $0x8] sm:$0xff] }
  0x25   : > { %407 = vst [vmem:[#allocation3 + $0x59] sm:$0x1] %v20008_v54  ;;  %408 = vst [vmem:[#allocation3 + $0x71] sm:$0x1] %v20008_v54  ;;  %18583 = vmatprep.subr.bf16.mxu1 %v18582_v0  ;;  %v18522_v7 = vpack.c.bf16 %v885_v6, %v884_v5  ;;  %v887_v9 = vld [vmem:[%s23999_s3 + $0x18] sm:$0xff]  ;;  %v888_v11 = vld [vmem:[%s23999_s3 + $0x20] sm:$0xff] }
  0x26   : > { %16588 = vmatmul.mubr.msk.f32.gmra.mrb[6].mxu0 %vm465_vm0, %v429_v23  ;;  %409 = vst [vmem:[#allocation3 + $0x89] sm:$0x1] %v20008_v54  ;;  %410 = vst [vmem:[#allocation3 + $0xa1] sm:$0x1] %v20008_v54  ;;  %v18526_v10 = vpack.c.bf16 %v887_v9, %v886_v8  ;;  %v889_v12 = vld [vmem:[%s23999_s3 + $0x28] sm:$0xff]  ;;  %v890_v14 = vld [vmem:[%s23999_s3 + $0x30] sm:$0xff] }
  0x27   : > { %16590 = vmatprep.mubr.msk.f32.mxu0 %vm465_vm0, %v430_v24  ;;  %411 = vst [vmem:[#allocation3 + $0xb9] sm:$0x1] %v20008_v54  ;;  %412 = vst [vmem:[#allocation3 + $0xd1] sm:$0x1] %v20008_v54  ;;  %18521 = vmatpush3.bf16.msra.mxu0 %v18518_v60  ;;  %v18530_v13 = vpack.c.bf16 %v889_v12, %v888_v11  ;;  %v891_v15 = vld [vmem:[%s23999_s3 + $0x38] sm:$0xff]  ;;  %v14552_v17 = vld [vmem:[%s23999_s3 + $0x80] sm:$0xff] }
  0x28   : > { %413 = vst [vmem:[#allocation3 + $0xe9] sm:$0x1] %v20008_v54  ;;  %414 = vst [vmem:[#allocation3 + $0x101] sm:$0x1] %v20008_v54  ;;  %18585 = vmatpush3.bf16.msra.mxu1 %v18582_v0  ;;  %18523 = vmatprep.subr.bf16.mxu0 %v18522_v7  ;;  %v18534_v16 = vpack.c.bf16 %v891_v15, %v890_v14  ;;  %v14553_v18 = vld [vmem:[%s23999_s3 + $0x88] sm:$0xff]  ;;  %v14676_v48 = vld [vmem:[%s23999_s3 + $0x160] sm:$0xff] }
  0x29   : > { %415 = vst [vmem:[#allocation3 + $0x119] sm:$0x1] %v20008_v54  ;;  %416 = vst [vmem:[#allocation3 + $0x131] sm:$0x1] %v20008_v54  ;;  %18587 = vmatprep.subr.bf16.mxu1 %v20336_v4  ;;  %v20369_v19 = vpack.c.bf16 %v14553_v18, %v14552_v17  ;;  %v20375_v20 = vld [vmem:[%s23998_s2] ss:$0 sm:$0xff] }
  0x2a   : > { %16591 = vmatmul.mubr.msk.f32.gmra.mrb[8].mxu0 %vm465_vm0, %v431_v25  ;;  %417 = vst [vmem:[#allocation3 + $0x149] sm:$0x1] %v20008_v54  ;;  %418 = vst [vmem:[#allocation3 + $0x161] sm:$0x1] %v20008_v54  ;;  %v14677_v49 = vld [vmem:[%s23999_s3 + $0x168] sm:$0xff]  ;;  %v14678_v59 = vld [vmem:[%s23999_s3 + $0x170] sm:$0xff] }
  0x2b   : > { %16593 = vmatprep.mubr.msk.f32.mxu0 %vm465_vm0, %v432_v26  ;;  %419 = vst [vmem:[#allocation3 + $0x179] sm:$0x1] %v20008_v54  ;;  %420 = vst [vmem:[#allocation3 + $0x191] sm:$0x1] %v20008_v54  ;;  %v18594_v56 = vpack.c.bf16 %v14677_v49, %v14676_v48  ;;  %v14679_v60 = vld [vmem:[%s23999_s3 + $0x178] sm:$0xff]  ;;  %v14712_v6 = vld [vmem:[%s23999_s3 + $0x180] sm:$0xff] }
  0x2c   : > { %386 = vst [vmem:[#allocation3] sm:$0x1] %v20008_v54  ;;  %403 = vst [vmem:[#allocation3 + $0x198] sm:$0x1] %v20008_v54  ;;  %v18598_v3 = vpack.c.bf16 %v14679_v60, %v14678_v59 }
  0x2d   : > { %404 = vst [vmem:[#allocation3 + $0x11] sm:$0x1] %v20008_v54  ;;  %421 = vst [vmem:[#allocation3 + $0x1a9] sm:$0x1] %v20008_v54 }
  0x2e   : > { %16594 = vmatmul.mubr.msk.f32.gmra.mrb[10].mxu0 %vm465_vm0, %v433_v27  ;;  %337 = vst.msk [vmem:[#allocation2 + $0x10] sm:$0x3] %vm336_vm2, %v20008_v54  ;;  %341 = vst.msk [vmem:[#allocation2 + $0x1a8] sm:$0x3] %vm336_vm2, %v20008_v54  ;;  %vm14284_vm2 = vcmask 1048512  }
  0x2f   : > { %16596 = vmatprep.mubr.msk.f32.mxu0 %vm465_vm0, %v434_v28  ;;  %343 = vst.msk [vmem:[#allocation2] sm:$0x1] %vm342_vm3, %v20008_v54  ;;  %344 = vst.msk [vmem:[#allocation2 + $0x18] sm:$0x1] %vm342_vm3, %v20008_v54 }
  0x30   : > { %345 = vst.msk [vmem:[#allocation2 + $0x30] sm:$0x1] %vm342_vm3, %v20008_v54  ;;  %346 = vst.msk [vmem:[#allocation2 + $0x48] sm:$0x1] %vm342_vm3, %v20008_v54 }
  0x31   : > { %347 = vst.msk [vmem:[#allocation2 + $0x60] sm:$0x1] %vm342_vm3, %v20008_v54  ;;  %348 = vst.msk [vmem:[#allocation2 + $0x78] sm:$0x1] %vm342_vm3, %v20008_v54 }
  0x32   : > { %16597 = vmatmul.mubr.msk.f32.gmra.mrb[12].mxu0 %vm465_vm0, %v435_v29  ;;  %349 = vst.msk [vmem:[#allocation2 + $0x90] sm:$0x1] %vm342_vm3, %v20008_v54  ;;  %350 = vst.msk [vmem:[#allocation2 + $0xa8] sm:$0x1] %vm342_vm3, %v20008_v54 }
  0x33   : > { %16599 = vmatprep.mubr.msk.f32.mxu0 %vm465_vm0, %v436_v30  ;;  %351 = vst.msk [vmem:[#allocation2 + $0xc0] sm:$0x1] %vm342_vm3, %v20008_v54  ;;  %352 = vst.msk [vmem:[#allocation2 + $0xd8] sm:$0x1] %vm342_vm3, %v20008_v54 }
  0x34   : > { %353 = vst.msk [vmem:[#allocation2 + $0xf0] sm:$0x1] %vm342_vm3, %v20008_v54  ;;  %354 = vst.msk [vmem:[#allocation2 + $0x108] sm:$0x1] %vm342_vm3, %v20008_v54 }
  0x35   : > { %355 = vst.msk [vmem:[#allocation2 + $0x120] sm:$0x1] %vm342_vm3, %v20008_v54  ;;  %356 = vst.msk [vmem:[#allocation2 + $0x138] sm:$0x1] %vm342_vm3, %v20008_v54  ;;  %v893_v1 = vld [vmem:[#allocation2 + $0x9] sm:$0xff] }
  0x36   : > { %16600 = vmatmul.mubr.msk.f32.gmra.mrb[14].mxu0 %vm465_vm0, %v437_v31  ;;  %357 = vst.msk [vmem:[#allocation2 + $0x150] sm:$0x1] %vm342_vm3, %v20008_v54  ;;  %358 = vst.msk [vmem:[#allocation2 + $0x168] sm:$0x1] %vm342_vm3, %v20008_v54 }
  0x37   : > { %16602 = vmatprep.mubr.msk.f32.mxu0 %vm465_vm0, %v438_v32  ;;  %359 = vst.msk [vmem:[#allocation2 + $0x180] sm:$0x1] %vm342_vm3, %v20008_v54  ;;  %360 = vst.msk [vmem:[#allocation2 + $0x198] sm:$0x1] %vm342_vm3, %v20008_v54 }
  0x38   : > { %361 = vst.msk [vmem:[#allocation2 + $0x11] sm:$0x1] %vm342_vm3, %v20008_v54  ;;  %362 = vst.msk [vmem:[#allocation2 + $0x29] sm:$0x1] %vm342_vm3, %v20008_v54 }
  0x39   : > { %363 = vst.msk [vmem:[#allocation2 + $0x41] sm:$0x1] %vm342_vm3, %v20008_v54  ;;  %364 = vst.msk [vmem:[#allocation2 + $0x59] sm:$0x1] %vm342_vm3, %v20008_v54 }
  0x3a   : > { %16603 = vmatmul.mubr.msk.f32.gmra.mrb[16].mxu0 %vm465_vm0, %v439_v33  ;;  %365 = vst.msk [vmem:[#allocation2 + $0x71] sm:$0x1] %vm342_vm3, %v20008_v54  ;;  %366 = vst.msk [vmem:[#allocation2 + $0x89] sm:$0x1] %vm342_vm3, %v20008_v54 }
  0x3b   : > { %16605 = vmatprep.mubr.msk.f32.mxu0 %vm465_vm0, %v440_v34  ;;  %367 = vst.msk [vmem:[#allocation2 + $0xa1] sm:$0x1] %vm342_vm3, %v20008_v54  ;;  %368 = vst.msk [vmem:[#allocation2 + $0xb9] sm:$0x1] %vm342_vm3, %v20008_v54 }
  0x3c   : > { %369 = vst.msk [vmem:[#allocation2 + $0xd1] sm:$0x1] %vm342_vm3, %v20008_v54  ;;  %370 = vst.msk [vmem:[#allocation2 + $0xe9] sm:$0x1] %vm342_vm3, %v20008_v54 }
  0x3d   : > { %371 = vst.msk [vmem:[#allocation2 + $0x101] sm:$0x1] %vm342_vm3, %v20008_v54  ;;  %372 = vst.msk [vmem:[#allocation2 + $0x119] sm:$0x1] %vm342_vm3, %v20008_v54 }
  0x3e   : > { %16606 = vmatmul.mubr.msk.f32.gmra.mrb[18].mxu0 %vm465_vm0, %v441_v35  ;;  %373 = vst.msk [vmem:[#allocation2 + $0x131] sm:$0x1] %vm342_vm3, %v20008_v54  ;;  %374 = vst.msk [vmem:[#allocation2 + $0x149] sm:$0x1] %vm342_vm3, %v20008_v54 }
  0x3f   : > { %16608 = vmatprep.mubr.msk.f32.mxu0 %vm465_vm0, %v442_v36  ;;  %375 = vst.msk [vmem:[#allocation2 + $0x161] sm:$0x1] %vm342_vm3, %v20008_v54  ;;  %376 = vst.msk [vmem:[#allocation2 + $0x179] sm:$0x1] %vm342_vm3, %v20008_v54 }
  0x40   : > { %377 = vst.msk [vmem:[#allocation2 + $0x191] sm:$0x1] %vm342_vm3, %v20008_v54  ;;  %378 = vst.msk [vmem:[#allocation2 + $0x1a9] sm:$0x1] %vm342_vm3, %v20008_v54 }
  0x42   : > { %16609 = vmatmul.mubr.msk.f32.gmra.mrb[20].mxu0 %vm465_vm0, %v443_v37  ;;  %v14674_v37 = vld [vmem:[%s23999_s3 + $0x150] sm:$0xff] }
  0x43   : > { %16611 = vmatprep.mubr.msk.f32.mxu0 %vm465_vm0, %v444_v38  ;;  %v14675_v38 = vld [vmem:[%s23999_s3 + $0x158] sm:$0xff] }
  0x46   : > { %16612 = vmatmul.mubr.msk.f32.gmra.mrb[22].mxu0 %vm465_vm0, %v445_v39 }
  0x47   : > { %16614 = vmatprep.mubr.msk.f32.mxu0 %vm465_vm0, %v446_v40 }
  0x4a   : > { %16615 = vmatmul.mubr.msk.f32.gmra.mrb[24].mxu0 %vm465_vm0, %v447_v41 }
  0x4b   : > { %16617 = vmatprep.mubr.msk.f32.mxu0 %vm465_vm0, %v448_v42 }
  0x4e   : > { %16618 = vmatmul.mubr.msk.f32.gmra.mrb[26].mxu0 %vm465_vm0, %v449_v43 }
  0x4f   : > { %16620 = vmatprep.mubr.msk.f32.mxu0 %vm465_vm0, %v450_v44 }
  0x52   : > { %16621 = vmatmul.mubr.msk.f32.gmra.mrb[28].mxu0 %vm465_vm0, %v451_v45  ;;  %v18590_v45 = vpack.c.bf16 %v14675_v38, %v14674_v37 }
  0x53   : > { %16623 = vmatprep.mubr.msk.f32.mxu0 %vm465_vm0, %v452_v46 }
  0x56   : > { %16624 = vmatmul.mubr.msk.f32.gmra.mrb[30].mxu0 %vm465_vm0, %v453_v47  ;;  %vm14270_vm0 = vcmask 917312  }
  0x57   : > { %16642 = vmatprep.mubr.msk.f32.mxu0 %vm333_vm1, %v892_v63 }
  0x5a   : > { %16643 = vmatmul.mubr.msk.f32.vlgmr.msra.gmra.mrb[32].mxu0 %vm333_vm1, %v893_v1 }
  0x5b   : > { %18525 = vmatpush3.bf16.msra.mxu0 %v18522_v7  ;;  %v14713_v7 = vld [vmem:[%s23999_s3 + $0x188] sm:$0xff] }
  0x5c   : > { %18527 = vmatprep.subr.bf16.mxu0 %v18526_v10  ;;  %v20438_v14 = vpack.c.bf16 %v14713_v7, %v14712_v6 }
  0x5f   : > { %18529 = vmatpush3.bf16.msra.mxu0 %v18526_v10 }
  0x60   : > { %18531 = vmatprep.subr.bf16.mxu0 %v18530_v13 }
  0x63   : > { %18533 = vmatpush3.bf16.msra.mxu0 %v18530_v13 }
  0x64   : > { %18535 = vmatprep.subr.bf16.mxu0 %v18534_v16 }
  0x67   : > { %18537 = vmatpush3.bf16.msra.mxu0 %v18534_v16 }
  0x68   : > { %18539 = vmatprep.subr.bf16.mxu0 %v20369_v19 }
  0xed   : > { %v16580_v21 = vpop.f32.mrb[0].mxu0 }
  0xee   : > { %v634_v22 = vadd.f32 %v16580_v21, %v20375_v20  ;;  %v628_v23 = vpop.f32.mrb[1].mxu0 }
  0xef   : > { %v629_v24 = vadd.f32 %v20375_v20, %v628_v23 }
  0xf0   : > { %v788_v25 = vmax.f32 %v634_v22, 0.0 }
  0xf1   : > { %v787_v26 = vmax.f32 %v629_v24, 0.0  ;;  %v16583_v27 = vpop.f32.mrb[2].mxu0 }
  0xf2   : > { %821 = vst.msk [vmem:[#allocation2 + $0x21] sm:$0xff] %vm333_vm1, %v788_v25  ;;  %v644_v28 = vadd.f32 %v16583_v27, %v20375_v20  ;;  %v638_v29 = vpop.f32.mrb[3].mxu0 }
  0xf3   : > { %820 = vst.msk [vmem:[#allocation2 + $0x19] sm:$0xff] %vm333_vm1, %v787_v26  ;;  %v639_v30 = vadd.f32 %v20375_v20, %v638_v29 }
  0xf4   : > { %v790_v31 = vmax.f32 %v644_v28, 0.0 }
  0xf5   : > { %v789_v32 = vmax.f32 %v639_v30, 0.0  ;;  %v16586_v33 = vpop.f32.mrb[4].mxu0 }
  0xf6   : > { %823 = vst.msk [vmem:[#allocation2 + $0x39] sm:$0xff] %vm333_vm1, %v790_v31  ;;  %v654_v34 = vadd.f32 %v16586_v33, %v20375_v20  ;;  %v648_v35 = vpop.f32.mrb[5].mxu0 }
  0xf7   : > { %822 = vst.msk [vmem:[#allocation2 + $0x31] sm:$0xff] %vm333_vm1, %v789_v32  ;;  %v649_v36 = vadd.f32 %v20375_v20, %v648_v35 }
  0xf8   : > { %v792_v39 = vmax.f32 %v654_v34, 0.0 }
  0xf9   : > { %v791_v40 = vmax.f32 %v649_v36, 0.0  ;;  %v16589_v41 = vpop.f32.mrb[6].mxu0  ;;  %v895_v47 = vld [vmem:[#allocation2 + $0x21] sm:$0xff] }
  0xfa   : > { %825 = vst.msk [vmem:[#allocation2 + $0x51] sm:$0xff] %vm333_vm1, %v792_v39  ;;  %v664_v42 = vadd.f32 %v16589_v41, %v20375_v20  ;;  %v658_v43 = vpop.f32.mrb[7].mxu0  ;;  %v894_v44 = vld [vmem:[#allocation2 + $0x19] sm:$0xff] }
  0xfb   : > { %824 = vst.msk [vmem:[#allocation2 + $0x49] sm:$0xff] %vm333_vm1, %v791_v40  ;;  %v659_v46 = vadd.f32 %v20375_v20, %v658_v43  ;;  %16645 = vmatprep.mubr.msk.f32.mxu0 %vm333_vm1, %v894_v44  ;;  %16898 = vmatprep.mubr.msk.f32.mxu1 %vm333_vm1, %v894_v44 }
  0xfc   : > { %v794_v50 = vmax.f32 %v664_v42, 0.0  ;;  %16646 = vmatmul.mubr.msk.f32.gmra.mrb[34].mxu0 %vm333_vm1, %v895_v47  ;;  %16899 = vmatmul.mubr.msk.f32.vlgmr.msra.gmra.mrb[0].mxu1 %vm333_vm1, %v895_v47 }
  0xfd   : > { %v793_v51 = vmax.f32 %v659_v46, 0.0  ;;  %18589 = vmatpush3.bf16.msra.mxu1 %v20336_v4  ;;  %v16592_v52 = vpop.f32.mrb[8].mxu0  ;;  %v897_v58 = vld [vmem:[#allocation2 + $0x39] sm:$0xff] }
  0xfe   : > { %827 = vst.msk [vmem:[#allocation2 + $0x69] sm:$0xff] %vm333_vm1, %v794_v50  ;;  %v674_v53 = vadd.f32 %v16592_v52, %v20375_v20  ;;  %v668_v54 = vpop.f32.mrb[9].mxu0  ;;  %v896_v55 = vld [vmem:[#allocation2 + $0x31] sm:$0xff]  ;;  %18591 = vmatprep.subr.bf16.mxu1 %v18590_v45 }
  0xff   : > { %826 = vst.msk [vmem:[#allocation2 + $0x61] sm:$0xff] %vm333_vm1, %v793_v51  ;;  %v669_v57 = vadd.f32 %v20375_v20, %v668_v54  ;;  %16648 = vmatprep.mubr.msk.f32.mxu0 %vm333_vm1, %v896_v55  ;;  %16901 = vmatprep.mubr.msk.f32.mxu1 %vm333_vm1, %v896_v55 }
 0x100   : > { %v796_v61 = vmax.f32 %v674_v53, 0.0  ;;  %16649 = vmatmul.mubr.msk.f32.gmra.mrb[36].mxu0 %vm333_vm1, %v897_v58  ;;  %16902 = vmatmul.mubr.msk.f32.gmra.mrb[2].mxu1 %vm333_vm1, %v897_v58 }
 0x101   : > { %v795_v62 = vmax.f32 %v669_v57, 0.0  ;;  %v16595_v63 = vpop.f32.mrb[10].mxu0  ;;  %18593 = vmatpush3.bf16.msra.mxu1 %v18590_v45  ;;  %v899_v5 = vld [vmem:[#allocation2 + $0x51] sm:$0xff] }
 0x102   : > { %829 = vst.msk [vmem:[#allocation2 + $0x81] sm:$0xff] %vm333_vm1, %v796_v61  ;;  %v684_v0 = vadd.f32 %v16595_v63, %v20375_v20  ;;  %v678_v1 = vpop.f32.mrb[11].mxu0  ;;  %v898_v2 = vld [vmem:[#allocation2 + $0x49] sm:$0xff]  ;;  %18595 = vmatprep.subr.bf16.mxu1 %v18594_v56 }
 0x103   : > { %828 = vst.msk [vmem:[#allocation2 + $0x79] sm:$0xff] %vm333_vm1, %v795_v62  ;;  %v679_v4 = vadd.f32 %v20375_v20, %v678_v1  ;;  %16651 = vmatprep.mubr.msk.f32.mxu0 %vm333_vm1, %v898_v2  ;;  %16904 = vmatprep.mubr.msk.f32.mxu1 %vm333_vm1, %v898_v2 }
 0x104   : > { %v798_v8 = vmax.f32 %v684_v0, 0.0  ;;  %16652 = vmatmul.mubr.msk.f32.gmra.mrb[38].mxu0 %vm333_vm1, %v899_v5  ;;  %16905 = vmatmul.mubr.msk.f32.gmra.mrb[4].mxu1 %vm333_vm1, %v899_v5 }
 0x105   : > { %v797_v9 = vmax.f32 %v679_v4, 0.0  ;;  %v16598_v10 = vpop.f32.mrb[12].mxu0  ;;  %18597 = vmatpush3.bf16.msra.mxu1 %v18594_v56  ;;  %v901_v16 = vld [vmem:[#allocation2 + $0x69] sm:$0xff] }
 0x106   : > { %831 = vst.msk [vmem:[#allocation2 + $0x99] sm:$0xff] %vm333_vm1, %v798_v8  ;;  %v694_v11 = vadd.f32 %v16598_v10, %v20375_v20  ;;  %v688_v12 = vpop.f32.mrb[13].mxu0  ;;  %v900_v13 = vld [vmem:[#allocation2 + $0x61] sm:$0xff]  ;;  %18599 = vmatprep.subr.bf16.mxu1 %v18598_v3 }
 0x107   : > { %830 = vst.msk [vmem:[#allocation2 + $0x91] sm:$0xff] %vm333_vm1, %v797_v9  ;;  %v689_v15 = vadd.f32 %v20375_v20, %v688_v12  ;;  %16654 = vmatprep.mubr.msk.f32.mxu0 %vm333_vm1, %v900_v13  ;;  %16907 = vmatprep.mubr.msk.f32.mxu1 %vm333_vm1, %v900_v13 }
 0x108   : > { %v800_v17 = vmax.f32 %v694_v11, 0.0  ;;  %16655 = vmatmul.mubr.msk.f32.gmra.mrb[40].mxu0 %vm333_vm1, %v901_v16  ;;  %16908 = vmatmul.mubr.msk.f32.gmra.mrb[6].mxu1 %vm333_vm1, %v901_v16 }
 0x109   : > { %v799_v18 = vmax.f32 %v689_v15, 0.0  ;;  %v16601_v21 = vpop.f32.mrb[14].mxu0  ;;  %18601 = vmatpush3.bf16.msra.mxu1 %v18598_v3  ;;  %v903_v26 = vld [vmem:[#allocation2 + $0x81] sm:$0xff] }
 0x10a   : > { %833 = vst.msk [vmem:[#allocation2 + $0xb1] sm:$0xff] %vm333_vm1, %v800_v17  ;;  %v704_v22 = vadd.f32 %v16601_v21, %v20375_v20  ;;  %v698_v23 = vpop.f32.mrb[15].mxu0  ;;  %v902_v24 = vld [vmem:[#allocation2 + $0x79] sm:$0xff]  ;;  %18603 = vmatprep.subr.bf16.mxu1 %v20438_v14 }
 0x10b   : > { %832 = vst.msk [vmem:[#allocation2 + $0xa9] sm:$0xff] %vm333_vm1, %v799_v18  ;;  %v699_v25 = vadd.f32 %v20375_v20, %v698_v23  ;;  %16657 = vmatprep.mubr.msk.f32.mxu0 %vm333_vm1, %v902_v24  ;;  %16910 = vmatprep.mubr.msk.f32.mxu1 %vm333_vm1, %v902_v24 }
 0x10c   : > { %v802_v27 = vmax.f32 %v704_v22, 0.0  ;;  %16658 = vmatmul.mubr.msk.f32.gmra.mrb[42].mxu0 %vm333_vm1, %v903_v26  ;;  %16911 = vmatmul.mubr.msk.f32.gmra.mrb[8].mxu1 %vm333_vm1, %v903_v26 }
 0x10d   : > { %v801_v28 = vmax.f32 %v699_v25, 0.0  ;;  %v16604_v29 = vpop.f32.mrb[16].mxu0  ;;  %v905_v34 = vld [vmem:[#allocation2 + $0x99] sm:$0xff] }
 0x10e   : > { %835 = vst.msk [vmem:[#allocation2 + $0xc9] sm:$0xff] %vm333_vm1, %v802_v27  ;;  %v714_v30 = vadd.f32 %v16604_v29, %v20375_v20  ;;  %v708_v31 = vpop.f32.mrb[17].mxu0  ;;  %v904_v32 = vld [vmem:[#allocation2 + $0x91] sm:$0xff] }
 0x10f   : > { %834 = vst.msk [vmem:[#allocation2 + $0xc1] sm:$0xff] %vm333_vm1, %v801_v28  ;;  %v709_v33 = vadd.f32 %v20375_v20, %v708_v31  ;;  %16660 = vmatprep.mubr.msk.f32.mxu0 %vm333_vm1, %v904_v32  ;;  %16913 = vmatprep.mubr.msk.f32.mxu1 %vm333_vm1, %v904_v32 }
 0x110   : > { %v804_v35 = vmax.f32 %v714_v30, 0.0  ;;  %16661 = vmatmul.mubr.msk.f32.gmra.mrb[44].mxu0 %vm333_vm1, %v905_v34  ;;  %16914 = vmatmul.mubr.msk.f32.gmra.mrb[10].mxu1 %vm333_vm1, %v905_v34  ;;  %v852_v34 = vld [vmem:[#allocation2] sm:$0xff] }
 0x111   : > { %v803_v36 = vmax.f32 %v709_v33, 0.0  ;;  %v16607_v37 = vpop.f32.mrb[18].mxu0  ;;  %v907_v42 = vld [vmem:[#allocation2 + $0xb1] sm:$0xff] }
 0x112   : > { %837 = vst.msk [vmem:[#allocation2 + $0xe1] sm:$0xff] %vm333_vm1, %v804_v35  ;;  %v724_v38 = vadd.f32 %v16607_v37, %v20375_v20  ;;  %v718_v39 = vpop.f32.mrb[19].mxu0  ;;  %v906_v40 = vld [vmem:[#allocation2 + $0xa9] sm:$0xff]  ;;  %v14555_v37 = vld [vmem:[%s23999_s3 + $0x98] sm:$0xff] }
 0x113   : > { %836 = vst.msk [vmem:[#allocation2 + $0xd9] sm:$0xff] %vm333_vm1, %v803_v36  ;;  %v719_v41 = vadd.f32 %v20375_v20, %v718_v39  ;;  %16663 = vmatprep.mubr.msk.f32.mxu0 %vm333_vm1, %v906_v40  ;;  %16916 = vmatprep.mubr.msk.f32.mxu1 %vm333_vm1, %v906_v40  ;;  %v14554_v36 = vld [vmem:[%s23999_s3 + $0x90] sm:$0xff] }
 0x114   : > { %v806_v43 = vmax.f32 %v724_v38, 0.0  ;;  %16664 = vmatmul.mubr.msk.f32.gmra.mrb[46].mxu0 %vm333_vm1, %v907_v42  ;;  %16917 = vmatmul.mubr.msk.f32.gmra.mrb[12].mxu1 %vm333_vm1, %v907_v42  ;;  %v853_v38 = vld [vmem:[#allocation2 + $0x8] sm:$0xff]  ;;  %v14715_v42 = vld [vmem:[%s23999_s3 + $0x198] sm:$0xff] }
 0x115   : > { %v805_v44 = vmax.f32 %v719_v41, 0.0  ;;  %v16610_v45 = vpop.f32.mrb[20].mxu0  ;;  %v909_v50 = vld [vmem:[#allocation2 + $0xc9] sm:$0xff] }
 0x116   : > { %839 = vst.msk [vmem:[#allocation2 + $0xf9] sm:$0xff] %vm333_vm1, %v806_v43  ;;  %v734_v46 = vadd.f32 %v16610_v45, %v20375_v20  ;;  %v728_v47 = vpop.f32.mrb[21].mxu0  ;;  %v908_v48 = vld [vmem:[#allocation2 + $0xc1] sm:$0xff]  ;;  %v14714_v41 = vld [vmem:[%s23999_s3 + $0x190] sm:$0xff]  ;;  %v18542_v43 = vpack.c.bf16 %v14555_v37, %v14554_v36 }
 0x117   : > { %838 = vst.msk [vmem:[#allocation2 + $0xf1] sm:$0xff] %vm333_vm1, %v805_v44  ;;  %v729_v49 = vadd.f32 %v20375_v20, %v728_v47  ;;  %16666 = vmatprep.mubr.msk.f32.mxu0 %vm333_vm1, %v908_v48  ;;  %16919 = vmatprep.mubr.msk.f32.mxu1 %vm333_vm1, %v908_v48  ;;  %v20551_v44 = vld [vmem:[#allocation2 + $0x18] sm:$0xff]  ;;  %v14556_v47 = vld [vmem:[%s23999_s3 + $0xa0] sm:$0xff] }
 0x118   : > { %v808_v51 = vmax.f32 %v734_v46, 0.0  ;;  %16667 = vmatmul.mubr.msk.f32.gmra.mrb[48].mxu0 %vm333_vm1, %v909_v50  ;;  %16920 = vmatmul.mubr.msk.f32.gmra.mrb[14].mxu1 %vm333_vm1, %v909_v50  ;;  %24119 = vst [vmem:[#allocation7_spill] sm:$0xff] %v20551_v44  ;;  %v20553_v45 = vld [vmem:[#allocation2 + $0x1a] sm:$0xff]  ;;  %v18606_v46 = vpack.c.bf16 %v14715_v42, %v14714_v41  ;;  %v14557_v50 = vld [vmem:[%s23999_s3 + $0xa8] sm:$0xff] }
 0x119   : > { %v807_v52 = vmax.f32 %v729_v49, 0.0  ;;  %v16613_v53 = vpop.f32.mrb[22].mxu0  ;;  %v911_v58 = vld [vmem:[#allocation2 + $0xe1] sm:$0xff] }
 0x11a   : > { %841 = vst.msk [vmem:[#allocation2 + $0x111] sm:$0xff] %vm333_vm1, %v808_v51  ;;  %v744_v54 = vadd.f32 %v16613_v53, %v20375_v20  ;;  %v738_v55 = vpop.f32.mrb[23].mxu0  ;;  %v910_v56 = vld [vmem:[#allocation2 + $0xd9] sm:$0xff]  ;;  %v20565_v49 = vld [vmem:[#allocation2 + $0x22] sm:$0xff] }
 0x11b   : > { %840 = vst.msk [vmem:[#allocation2 + $0x109] sm:$0xff] %vm333_vm1, %v807_v52  ;;  %v739_v57 = vadd.f32 %v20375_v20, %v738_v55  ;;  %16669 = vmatprep.mubr.msk.f32.mxu0 %vm333_vm1, %v910_v56  ;;  %16922 = vmatprep.mubr.msk.f32.mxu1 %vm333_vm1, %v910_v56  ;;  %v20563_v48 = vld [vmem:[#allocation2 + $0x20] sm:$0xff]  ;;  %v14717_v52 = vld [vmem:[%s23999_s3 + $0x1a8] sm:$0xff]  ;;  %v20585_v53 = vld [vmem:[#allocation2 + $0x32] sm:$0xff]  ;;  %v18546_v55 = vpack.c.bf16 %v14557_v50, %v14556_v47 }
 0x11c   : > { %v810_v59 = vmax.f32 %v744_v54, 0.0  ;;  %16670 = vmatmul.mubr.msk.f32.gmra.mrb[50].mxu0 %vm333_vm1, %v911_v58  ;;  %16923 = vmatmul.mubr.msk.f32.gmra.mrb[16].mxu1 %vm333_vm1, %v911_v58  ;;  %24120 = vst [vmem:[#allocation8_spill] sm:$0xff] %v20563_v48  ;;  %v14716_v51 = vld [vmem:[%s23999_s3 + $0x1a0] sm:$0xff]  ;;  %v14718_v54 = vld [vmem:[%s23999_s3 + $0x1b0] sm:$0xff] }
 0x11d   : > { %v809_v60 = vmax.f32 %v739_v57, 0.0  ;;  %v16616_v61 = vpop.f32.mrb[24].mxu0  ;;  %v913_v2 = vld [vmem:[#allocation2 + $0xf9] sm:$0xff]  ;;  %v14558_v56 = vld [vmem:[%s23999_s3 + $0xb0] sm:$0xff]  ;;  %v18610_v58 = vpack.c.bf16 %v14717_v52, %v14716_v51 }
 0x11e   : > { %843 = vst.msk [vmem:[#allocation2 + $0x129] sm:$0xff] %vm333_vm1, %v810_v59  ;;  %v754_v62 = vadd.f32 %v16616_v61, %v20375_v20  ;;  %v748_v63 = vpop.f32.mrb[25].mxu0  ;;  %v912_v0 = vld [vmem:[#allocation2 + $0xf1] sm:$0xff] }
 0x11f   : > { %842 = vst.msk [vmem:[#allocation2 + $0x121] sm:$0xff] %vm333_vm1, %v809_v60  ;;  %v749_v1 = vadd.f32 %v20375_v20, %v748_v63  ;;  %16672 = vmatprep.mubr.msk.f32.mxu0 %vm333_vm1, %v912_v0  ;;  %16925 = vmatprep.mubr.msk.f32.mxu1 %vm333_vm1, %v912_v0  ;;  %v20595_v57 = vld [vmem:[#allocation2 + $0x38] sm:$0xff]  ;;  %v20606_v60 = vld [vmem:[#allocation2 + $0x48] sm:$0xff] }
 0x120   : > { %v812_v3 = vmax.f32 %v754_v62, 0.0  ;;  %16673 = vmatmul.mubr.msk.f32.gmra.mrb[52].mxu0 %vm333_vm1, %v913_v2  ;;  %16926 = vmatmul.mubr.msk.f32.gmra.mrb[18].mxu1 %vm333_vm1, %v913_v2  ;;  %v14559_v59 = vld [vmem:[%s23999_s3 + $0xb8] sm:$0xff]  ;;  %v20608_v61 = vld [vmem:[#allocation2 + $0x4a] sm:$0xff] }
 0x121   : > { %v811_v4 = vmax.f32 %v749_v1, 0.0  ;;  %v16619_v5 = vpop.f32.mrb[26].mxu0  ;;  %v915_v10 = vld [vmem:[#allocation2 + $0x111] sm:$0xff]  ;;  %v18550_v0 = vpack.c.bf16 %v14559_v59, %v14558_v56  ;;  %v14752_v1 = vld [vmem:[%s23999_s3 + $0x1c0] sm:$0xff] }
 0x122   : > { %845 = vst.msk [vmem:[#allocation2 + $0x141] sm:$0xff] %vm333_vm1, %v812_v3  ;;  %v764_v6 = vadd.f32 %v16619_v5, %v20375_v20  ;;  %v758_v7 = vpop.f32.mrb[27].mxu0  ;;  %v914_v8 = vld [vmem:[#allocation2 + $0x109] sm:$0xff]  ;;  %v14719_v62 = vld [vmem:[%s23999_s3 + $0x1b8] sm:$0xff] }
 0x123   : > { %844 = vst.msk [vmem:[#allocation2 + $0x139] sm:$0xff] %vm333_vm1, %v811_v4  ;;  %v759_v9 = vadd.f32 %v20375_v20, %v758_v7  ;;  %16675 = vmatprep.mubr.msk.f32.mxu0 %vm333_vm1, %v914_v8  ;;  %16928 = vmatprep.mubr.msk.f32.mxu1 %vm333_vm1, %v914_v8  ;;  %v20617_v63 = vld [vmem:[#allocation2 + $0x52] sm:$0xff]  ;;  %v18614_v3 = vpack.c.bf16 %v14719_v62, %v14718_v54  ;;  %v14592_v4 = vld [vmem:[%s23999_s3 + $0xc0] sm:$0xff]  ;;  %v14593_v5 = vld [vmem:[%s23999_s3 + $0xc8] sm:$0xff] }
 0x124   : > { %v814_v11 = vmax.f32 %v764_v6, 0.0  ;;  %16676 = vmatmul.mubr.msk.f32.gmra.mrb[54].mxu0 %vm333_vm1, %v915_v10  ;;  %16929 = vmatmul.mubr.msk.f32.gmra.mrb[20].mxu1 %vm333_vm1, %v915_v10  ;;  %v20622_v2 = vld [vmem:[#allocation2 + $0x50] sm:$0xff]  ;;  %v20634_v6 = vld [vmem:[#allocation2 + $0x60] sm:$0xff]  ;;  %v14753_v8 = vld [vmem:[%s23999_s3 + $0x1c8] sm:$0xff] }
 0x125   : > { %v813_v12 = vmax.f32 %v759_v9, 0.0  ;;  %v16622_v13 = vpop.f32.mrb[28].mxu0  ;;  %v917_v21 = vld [vmem:[#allocation2 + $0x129] sm:$0xff]  ;;  %v20645_v9 = vpack.c.bf16 %v14593_v5, %v14592_v4  ;;  %v20741_v36 = vld [vmem:[#allocation2 + $0xf2] sm:$0xff] }
 0x126   : > { %847 = vst.msk [vmem:[#allocation2 + $0x159] sm:$0xff] %vm333_vm1, %v814_v11  ;;  %v774_v15 = vadd.f32 %v16622_v13, %v20375_v20  ;;  %v768_v16 = vpop.f32.mrb[29].mxu0  ;;  %v916_v17 = vld [vmem:[#allocation2 + $0x121] sm:$0xff]  ;;  %v20649_v11 = vld [vmem:[#allocation2 + $0x6a] sm:$0xff]  ;;  %v20657_v13 = vld [vmem:[#allocation2 + $0x78] sm:$0xff] }
 0x127   : > { %846 = vst.msk [vmem:[#allocation2 + $0x151] sm:$0xff] %vm333_vm1, %v813_v12  ;;  %v769_v18 = vadd.f32 %v20375_v20, %v768_v16  ;;  %16678 = vmatprep.mubr.msk.f32.mxu0 %vm333_vm1, %v916_v17  ;;  %16931 = vmatprep.mubr.msk.f32.mxu1 %vm333_vm1, %v916_v17  ;;  %v20636_v7 = vld [vmem:[#allocation2 + $0x62] sm:$0xff]  ;;  %v20651_v12 = vpack.c.bf16 %v14753_v8, %v14752_v1  ;;  %v20747_v37 = vld [vmem:[#allocation2 + $0xf8] sm:$0xff]  ;;  %v20757_v42 = vld [vmem:[#allocation2 + $0x10a] sm:$0xff] }
 0x128   : > { %v816_v22 = vmax.f32 %v774_v15, 0.0  ;;  %16679 = vmatmul.mubr.msk.f32.gmra.mrb[56].mxu0 %vm333_vm1, %v917_v21  ;;  %16932 = vmatmul.mubr.msk.f32.gmra.mrb[22].mxu1 %vm333_vm1, %v917_v21  ;;  %v20647_v10 = vld [vmem:[#allocation2 + $0x68] sm:$0xff]  ;;  %v20659_v15 = vld [vmem:[#allocation2 + $0x7a] sm:$0xff]  ;;  %v20677_v21 = vld [vmem:[#allocation2 + $0x92] sm:$0xff] }
 0x129   : > { %v815_v23 = vmax.f32 %v769_v18, 0.0  ;;  %v16625_v24 = vpop.f32.mrb[30].mxu0  ;;  %v919_v29 = vld [vmem:[#allocation2 + $0x141] sm:$0xff]  ;;  %v20675_v18 = vld [vmem:[#allocation2 + $0x90] sm:$0xff] }
 0x12a   : > { %849 = vst.msk [vmem:[#allocation2 + $0x171] sm:$0xff] %vm333_vm1, %v816_v22  ;;  %v784_v25 = vadd.f32 %v16625_v24, %v20375_v20  ;;  %v778_v26 = vpop.f32.mrb[31].mxu0  ;;  %v918_v27 = vld [vmem:[#allocation2 + $0x139] sm:$0xff]  ;;  %v20668_v17 = vld [vmem:[#allocation2 + $0x82] sm:$0xff]  ;;  %v20781_v52 = vld [vmem:[#allocation2 + $0x12a] sm:$0xff] }
 0x12b   : > { %848 = vst.msk [vmem:[#allocation2 + $0x169] sm:$0xff] %vm333_vm1, %v815_v23  ;;  %v779_v28 = vadd.f32 %v20375_v20, %v778_v26  ;;  %16681 = vmatprep.mubr.msk.f32.mxu0 %vm333_vm1, %v918_v27  ;;  %16934 = vmatprep.mubr.msk.f32.mxu1 %vm333_vm1, %v918_v27  ;;  %v20666_v16 = vld [vmem:[#allocation2 + $0x80] sm:$0xff]  ;;  %v20683_v22 = vld [vmem:[#allocation2 + $0x98] sm:$0xff]  ;;  %v20691_v24 = vld [vmem:[#allocation2 + $0xa8] sm:$0xff] }
 0x12c   : > { %v818_v30 = vmax.f32 %v784_v25, 0.0  ;;  %16682 = vmatmul.mubr.msk.f32.gmra.mrb[58].mxu0 %vm333_vm1, %v919_v29  ;;  %16935 = vmatmul.mubr.msk.f32.gmra.mrb[24].mxu1 %vm333_vm1, %v919_v29  ;;  %v20685_v23 = vld [vmem:[#allocation2 + $0x9a] sm:$0xff]  ;;  %v20693_v25 = vld [vmem:[#allocation2 + $0xaa] sm:$0xff]  ;;  %v20701_v27 = vld [vmem:[#allocation2 + $0xb2] sm:$0xff] }
 0x12d   : > { %v817_v31 = vmax.f32 %v779_v28, 0.0  ;;  %v921_v20 = vld [vmem:[#allocation2 + $0x159] sm:$0xff]  ;;  %v20699_v26 = vld [vmem:[#allocation2 + $0xb0] sm:$0xff]  ;;  %v20709_v29 = vld [vmem:[#allocation2 + $0xc2] sm:$0xff] }
 0x12e   : > { %851 = vst.msk [vmem:[#allocation2 + $0x189] sm:$0xff] %vm333_vm1, %v818_v30  ;;  %v920_v32 = vld [vmem:[#allocation2 + $0x151] sm:$0xff]  ;;  %v20707_v28 = vld [vmem:[#allocation2 + $0xc0] sm:$0xff]  ;;  %v20715_v30 = vld [vmem:[#allocation2 + $0xc8] sm:$0xff] }
 0x12f   : > { %850 = vst.msk [vmem:[#allocation2 + $0x181] sm:$0xff] %vm333_vm1, %v817_v31  ;;  %16684 = vmatprep.mubr.msk.f32.mxu0 %vm333_vm1, %v920_v32  ;;  %16937 = vmatprep.mubr.msk.f32.mxu1 %vm333_vm1, %v920_v32  ;;  %v20717_v31 = vld [vmem:[#allocation2 + $0xca] sm:$0xff]  ;;  %v20723_v32 = vld [vmem:[#allocation2 + $0xd8] sm:$0xff]  ;;  %v20771_v47 = vld [vmem:[#allocation2 + $0x120] sm:$0xff] }
 0x130   : > { %16685 = vmatmul.mubr.msk.f32.gmra.mrb[60].mxu0 %vm333_vm1, %v921_v20  ;;  %16938 = vmatmul.mubr.msk.f32.gmra.mrb[26].mxu1 %vm333_vm1, %v921_v20  ;;  %v20725_v20 = vld [vmem:[#allocation2 + $0xda] sm:$0xff]  ;;  %v20755_v41 = vld [vmem:[#allocation2 + $0x108] sm:$0xff]  ;;  %v20803_v59 = vld [vmem:[#allocation2 + $0x150] sm:$0xff] }
 0x131   : > { %v923_v35 = vld [vmem:[#allocation2 + $0x171] sm:$0xff]  ;;  %v20773_v50 = vld [vmem:[#allocation2 + $0x122] sm:$0xff]  ;;  %v20813_v1 = vld [vmem:[#allocation2 + $0x15a] sm:$0xff] }
 0x132   : > { %v922_v33 = vld [vmem:[#allocation2 + $0x169] sm:$0xff]  ;;  %v20787_v54 = vld [vmem:[#allocation2 + $0x138] sm:$0xff]  ;;  %v20795_v56 = vld [vmem:[#allocation2 + $0x140] sm:$0xff]  ;;  %24121 = vst [vmem:[#allocation9_spill] sm:$0xff] %v20813_v1 }
 0x133   : > { %16687 = vmatprep.mubr.msk.f32.mxu0 %vm333_vm1, %v922_v33  ;;  %16940 = vmatprep.mubr.msk.f32.mxu1 %vm333_vm1, %v922_v33  ;;  %v20731_v33 = vld [vmem:[#allocation2 + $0xe0] sm:$0xff]  ;;  %v20779_v51 = vld [vmem:[#allocation2 + $0x128] sm:$0xff]  ;;  %v20805_v62 = vld [vmem:[#allocation2 + $0x152] sm:$0xff] }
 0x134   : > { %16688 = vmatmul.mubr.msk.f32.gmra.mrb[62].mxu0 %vm333_vm1, %v923_v35  ;;  %16941 = vmatmul.mubr.msk.f32.gmra.mrb[28].mxu1 %vm333_vm1, %v923_v35  ;;  %v20739_v35 = vld [vmem:[#allocation2 + $0xf0] sm:$0xff]  ;;  %v1575_v5 = vld [vmem:[#allocation2 + $0x2] sm:$0xff] }
 0x135   : > { %16706 = vmatprep.mubr.msk.f32.mxu0 %vm333_vm1, %v852_v34  ;;  %v20540_v40 = vld [vmem:[#allocation2 + $0x189] sm:$0xff] }
 0x136   : > { %v20536_v39 = vld [vmem:[#allocation2 + $0x181] sm:$0xff]  ;;  %24118 = vst [vmem:[#allocation6_spill] sm:$0xff] %v20540_v40  ;;  %v20821_v4 = vld [vmem:[#allocation2 + $0x16a] sm:$0xff] }
 0x137   : > { %24117 = vst [vmem:[#allocation5_spill] sm:$0xff] %v20536_v39  ;;  %16943 = vmatprep.mubr.msk.f32.mxu1 %vm333_vm1, %v20536_v39  ;;  %v20733_v34 = vld [vmem:[#allocation2 + $0xe2] sm:$0xff]  ;;  %24123 = vst [vmem:[#allocation11_spill] sm:$0xff] %v20821_v4  ;;  %v20827_v8 = vld [vmem:[#allocation2 + $0x170] sm:$0xff] }
 0x138   : > { %16707 = vmatmul.mubr.msk.f32.vlgmr.msra.gmra.mrb[32].mxu0 %vm333_vm1, %v853_v38  ;;  %16944 = vmatmul.mubr.msk.f32.gmra.mrb[30].mxu1 %vm333_vm1, %v20540_v40  ;;  %v20749_v38 = vld [vmem:[#allocation2 + $0xfa] sm:$0xff]  ;;  %24124 = vst [vmem:[#allocation12_spill] sm:$0xff] %v20827_v8  ;;  %v20829_v40 = vld [vmem:[#allocation2 + $0x172] sm:$0xff]  ;;  %v20835_v39 = vld [vmem:[#allocation2 + $0x182] sm:$0xff] }
 0x139   : > { %16709 = vmatprep.mubr.msk.f32.mxu0 %vm333_vm1, %v20551_v44  ;;  %16962 = vmatprep.mubr.msk.f32.mxu1 %vm333_vm1, %v20553_v45  ;;  %24125 = vst [vmem:[#allocation13_spill] sm:$0xff] %v20829_v40  ;;  %24126 = vst [vmem:[#allocation14_spill] sm:$0xff] %v20835_v39  ;;  %v14595_v44 = vld [vmem:[%s23999_s3 + $0xd8] sm:$0xff] }
 0x13a   : > { %18541 = vmatpush3.bf16.msra.mxu0 %v20369_v19  ;;  %v20574_v19 = vld [vmem:[#allocation2 + $0x30] sm:$0xff] }
 0x13b   : > { %18543 = vmatprep.subr.bf16.mxu0 %v18542_v43 }
 0x13c   : > { %16710 = vmatmul.mubr.msk.f32.gmra.mrb[34].mxu0 %vm333_vm1, %v20563_v48  ;;  %16963 = vmatmul.mubr.msk.f32.vlgmr.msra.gmra.mrb[0].mxu1 %vm333_vm1, %v20565_v49  ;;  %v14594_v48 = vld [vmem:[%s23999_s3 + $0xd0] sm:$0xff] }
 0x13d   : > { %18605 = vmatpush3.bf16.msra.mxu1 %v20438_v14  ;;  %16712 = vmatprep.mubr.msk.f32.mxu0 %vm333_vm1, %v20574_v19  ;;  %v20597_v14 = vld [vmem:[#allocation2 + $0x3a] sm:$0xff] }
 0x13e   : > { %16965 = vmatprep.mubr.msk.f32.mxu1 %vm333_vm1, %v20585_v53  ;;  %18607 = vmatprep.subr.bf16.mxu1 %v18606_v46 }
 0x13f   : > { %18545 = vmatpush3.bf16.msra.mxu0 %v18542_v43  ;;  %v20763_v43 = vld [vmem:[#allocation2 + $0x110] sm:$0xff] }
 0x140   : > { %16713 = vmatmul.mubr.msk.f32.gmra.mrb[36].mxu0 %vm333_vm1, %v20595_v57  ;;  %16966 = vmatmul.mubr.msk.f32.gmra.mrb[2].mxu1 %vm333_vm1, %v20597_v14 }
 0x141   : > { %16715 = vmatprep.mubr.msk.f32.mxu0 %vm333_vm1, %v20606_v60  ;;  %16968 = vmatprep.mubr.msk.f32.mxu1 %vm333_vm1, %v20608_v61 }
 0x142   : > { %18609 = vmatpush3.bf16.msra.mxu1 %v18606_v46  ;;  %18547 = vmatprep.subr.bf16.mxu0 %v18546_v55  ;;  %v20765_v46 = vld [vmem:[#allocation2 + $0x112] sm:$0xff] }
 0x143   : > { %18611 = vmatprep.subr.bf16.mxu1 %v18610_v58  ;;  %18549 = vmatpush3.bf16.msra.mxu0 %v18546_v55  ;;  %v20789_v55 = vld [vmem:[#allocation2 + $0x13a] sm:$0xff] }
 0x144   : > { %16716 = vmatmul.mubr.msk.f32.gmra.mrb[38].mxu0 %vm333_vm1, %v20622_v2  ;;  %16969 = vmatmul.mubr.msk.f32.gmra.mrb[4].mxu1 %vm333_vm1, %v20617_v63 }
 0x145   : > { %16718 = vmatprep.mubr.msk.f32.mxu0 %vm333_vm1, %v20634_v6  ;;  %16971 = vmatprep.mubr.msk.f32.mxu1 %vm333_vm1, %v20636_v7 }
 0x146   : > { %18613 = vmatpush3.bf16.msra.mxu1 %v18610_v58  ;;  %18551 = vmatprep.subr.bf16.mxu0 %v18550_v0  ;;  %v20797_v58 = vld [vmem:[#allocation2 + $0x142] sm:$0xff] }
 0x147   : > { %18615 = vmatprep.subr.bf16.mxu1 %v18614_v3  ;;  %18553 = vmatpush3.bf16.msra.mxu0 %v18550_v0  ;;  %v20811_v0 = vld [vmem:[#allocation2 + $0x158] sm:$0xff] }
 0x148   : > { %16719 = vmatmul.mubr.msk.f32.gmra.mrb[40].mxu0 %vm333_vm1, %v20647_v10  ;;  %16972 = vmatmul.mubr.msk.f32.gmra.mrb[6].mxu1 %vm333_vm1, %v20649_v11 }
 0x149   : > { %16721 = vmatprep.mubr.msk.f32.mxu0 %vm333_vm1, %v20657_v13  ;;  %16974 = vmatprep.mubr.msk.f32.mxu1 %vm333_vm1, %v20659_v15 }
 0x14a   : > { %18617 = vmatpush3.bf16.msra.mxu1 %v18614_v3  ;;  %18555 = vmatprep.subr.bf16.mxu0 %v20645_v9  ;;  %v20819_v3 = vld [vmem:[#allocation2 + $0x168] sm:$0xff] }
 0x14b   : > { %18619 = vmatprep.subr.bf16.mxu1 %v20651_v12  ;;  %24122 = vst [vmem:[#allocation10_spill] sm:$0xff] %v20819_v3 }
 0x14c   : > { %16722 = vmatmul.mubr.msk.f32.gmra.mrb[42].mxu0 %vm333_vm1, %v20666_v16  ;;  %16975 = vmatmul.mubr.msk.f32.gmra.mrb[8].mxu1 %vm333_vm1, %v20668_v17 }
 0x14d   : > { %16724 = vmatprep.mubr.msk.f32.mxu0 %vm333_vm1, %v20675_v18  ;;  %16977 = vmatprep.mubr.msk.f32.mxu1 %vm333_vm1, %v20677_v21 }
 0x150   : > { %16725 = vmatmul.mubr.msk.f32.gmra.mrb[44].mxu0 %vm333_vm1, %v20683_v22  ;;  %16978 = vmatmul.mubr.msk.f32.gmra.mrb[10].mxu1 %vm333_vm1, %v20685_v23 }
 0x151   : > { %16727 = vmatprep.mubr.msk.f32.mxu0 %vm333_vm1, %v20691_v24  ;;  %16980 = vmatprep.mubr.msk.f32.mxu1 %vm333_vm1, %v20693_v25 }
 0x154   : > { %16728 = vmatmul.mubr.msk.f32.gmra.mrb[46].mxu0 %vm333_vm1, %v20699_v26  ;;  %16981 = vmatmul.mubr.msk.f32.gmra.mrb[12].mxu1 %vm333_vm1, %v20701_v27 }
 0x155   : > { %16730 = vmatprep.mubr.msk.f32.mxu0 %vm333_vm1, %v20707_v28  ;;  %16983 = vmatprep.mubr.msk.f32.mxu1 %vm333_vm1, %v20709_v29 }
 0x158   : > { %16731 = vmatmul.mubr.msk.f32.gmra.mrb[48].mxu0 %vm333_vm1, %v20715_v30  ;;  %16984 = vmatmul.mubr.msk.f32.gmra.mrb[14].mxu1 %vm333_vm1, %v20717_v31 }
 0x159   : > { %16733 = vmatprep.mubr.msk.f32.mxu0 %vm333_vm1, %v20723_v32  ;;  %16986 = vmatprep.mubr.msk.f32.mxu1 %vm333_vm1, %v20725_v20 }
 0x15c   : > { %16734 = vmatmul.mubr.msk.f32.gmra.mrb[50].mxu0 %vm333_vm1, %v20731_v33  ;;  %16987 = vmatmul.mubr.msk.f32.gmra.mrb[16].mxu1 %vm333_vm1, %v20733_v34 }
 0x15d   : > { %16736 = vmatprep.mubr.msk.f32.mxu0 %vm333_vm1, %v20739_v35  ;;  %16989 = vmatprep.mubr.msk.f32.mxu1 %vm333_vm1, %v20741_v36 }
 0x160   : > { %16737 = vmatmul.mubr.msk.f32.gmra.mrb[52].mxu0 %vm333_vm1, %v20747_v37  ;;  %16990 = vmatmul.mubr.msk.f32.gmra.mrb[18].mxu1 %vm333_vm1, %v20749_v38 }
 0x161   : > { %16739 = vmatprep.mubr.msk.f32.mxu0 %vm333_vm1, %v20755_v41  ;;  %16992 = vmatprep.mubr.msk.f32.mxu1 %vm333_vm1, %v20757_v42 }
 0x164   : > { %16740 = vmatmul.mubr.msk.f32.gmra.mrb[54].mxu0 %vm333_vm1, %v20763_v43  ;;  %16993 = vmatmul.mubr.msk.f32.gmra.mrb[20].mxu1 %vm333_vm1, %v20765_v46 }
 0x165   : > { %16742 = vmatprep.mubr.msk.f32.mxu0 %vm333_vm1, %v20771_v47  ;;  %16995 = vmatprep.mubr.msk.f32.mxu1 %vm333_vm1, %v20773_v50 }
 0x168   : > { %16743 = vmatmul.mubr.msk.f32.gmra.mrb[56].mxu0 %vm333_vm1, %v20779_v51  ;;  %16996 = vmatmul.mubr.msk.f32.gmra.mrb[22].mxu1 %vm333_vm1, %v20781_v52 }
 0x169   : > { %16745 = vmatprep.mubr.msk.f32.mxu0 %vm333_vm1, %v20787_v54  ;;  %16998 = vmatprep.mubr.msk.f32.mxu1 %vm333_vm1, %v20789_v55 }
 0x16c   : > { %16746 = vmatmul.mubr.msk.f32.gmra.mrb[58].mxu0 %vm333_vm1, %v20795_v56  ;;  %16999 = vmatmul.mubr.msk.f32.gmra.mrb[24].mxu1 %vm333_vm1, %v20797_v58 }
 0x16d   : > { %16748 = vmatprep.mubr.msk.f32.mxu0 %vm333_vm1, %v20803_v59  ;;  %17001 = vmatprep.mubr.msk.f32.mxu1 %vm333_vm1, %v20805_v62 }
 0x170   : > { %16749 = vmatmul.mubr.msk.f32.gmra.mrb[60].mxu0 %vm333_vm1, %v20811_v0  ;;  %17002 = vmatmul.mubr.msk.f32.gmra.mrb[26].mxu1 %vm333_vm1, %v20813_v1  ;;  %v14755_v1 = vld [vmem:[%s23999_s3 + $0x1d8] sm:$0xff] }
 0x171   : > { %16751 = vmatprep.mubr.msk.f32.mxu0 %vm333_vm1, %v20819_v3  ;;  %17004 = vmatprep.mubr.msk.f32.mxu1 %vm333_vm1, %v20821_v4  ;;  %v1576_v4 = vld [vmem:[#allocation2 + $0xa] sm:$0xff]  ;;  %v18558_v3 = vpack.c.bf16 %v14595_v44, %v14594_v48 }
 0x172   : > { %v14597_v44 = vld [vmem:[%s23999_s3 + $0xe8] sm:$0xff] }
 0x174   : > { %16752 = vmatmul.mubr.msk.f32.gmra.mrb[62].mxu0 %vm333_vm1, %v20827_v8  ;;  %17005 = vmatmul.mubr.msk.f32.gmra.mrb[28].mxu1 %vm333_vm1, %v20829_v40  ;;  %v20846_v8 = vld [vmem:[#allocation2 + $0x18a] sm:$0xff] }
 0x175   : > { %17007 = vmatprep.mubr.msk.f32.mxu1 %vm333_vm1, %v20835_v39  ;;  %16770 = vmatprep.mubr.msk.f32.mxu0 %vm333_vm1, %v1575_v5  ;;  %24127 = vst [vmem:[#allocation15_spill] sm:$0xff] %v20846_v8  ;;  %v14754_v40 = vld [vmem:[%s23999_s3 + $0x1d0] sm:$0xff]  ;;  %v14596_v39 = vld [vmem:[%s23999_s3 + $0xe0] sm:$0xff] }
 0x176   : > { %v18622_v5 = vpack.c.bf16 %v14755_v1, %v14754_v40  ;;  %v14756_v40 = vld [vmem:[%s23999_s3 + $0x1e0] sm:$0xff]  ;;  %v18562_v48 = vpack.c.bf16 %v14597_v44, %v14596_v39  ;;  %v14599_v1 = vld [vmem:[%s23999_s3 + $0xf8] sm:$0xff]  ;;  %v14758_v39 = vld [vmem:[%s23999_s3 + $0x1f0] sm:$0xff] }
 0x177   : > { %v14792_v44 = vld [vmem:[%s23999_s3 + $0x200] sm:$0xff] }
 0x178   : > { %16771 = vmatmul.mubr.msk.f32.vlgmr.msra.gmra.mrb[32].mxu0 %vm333_vm1, %v1576_v4  ;;  %17008 = vmatmul.mubr.msk.f32.gmra.mrb[30].mxu1 %vm333_vm1, %v20846_v8  ;;  %v14795_v8 = vld [vmem:[%s23999_s3 + $0x218] sm:$0xff] }
 0x179   : > { %16773 = vmatprep.mubr.msk.f32.mxu0 %vm333_vm1, %v20553_v45  ;;  %17026 = vmatprep.mubr.msk.f32.mxu1 %vm333_vm1, %v20574_v19  ;;  %v14757_v45 = vld [vmem:[%s23999_s3 + $0x1e8] sm:$0xff] }
 0x17a   : > { %18557 = vmatpush3.bf16.msra.mxu0 %v20645_v9  ;;  %v14598_v9 = vld [vmem:[%s23999_s3 + $0xf0] sm:$0xff] }
 0x17b   : > { %18559 = vmatprep.subr.bf16.mxu0 %v18558_v3 }
 0x17c   : > { %16774 = vmatmul.mubr.msk.f32.gmra.mrb[34].mxu0 %vm333_vm1, %v20565_v49  ;;  %17027 = vmatmul.mubr.msk.f32.vlgmr.msra.gmra.mrb[0].mxu1 %vm333_vm1, %v20595_v57  ;;  %v18626_v49 = vpack.c.bf16 %v14757_v45, %v14756_v40  ;;  %v14793_v40 = vld [vmem:[%s23999_s3 + $0x208] sm:$0xff] }
 0x17d   : > { %18621 = vmatpush3.bf16.msra.mxu1 %v20651_v12  ;;  %16776 = vmatprep.mubr.msk.f32.mxu0 %vm333_vm1, %v20585_v53  ;;  %v14759_v12 = vld [vmem:[%s23999_s3 + $0x1f8] sm:$0xff]  ;;  %v24128_v45 = vld [vmem:[#allocation10_spill] sm:$0xff] }
 0x17e   : > { %17029 = vmatprep.mubr.msk.f32.mxu1 %vm333_vm1, %v20606_v60  ;;  %18623 = vmatprep.subr.bf16.mxu1 %v18622_v5  ;;  %v18630_v4 = vpack.c.bf16 %v14759_v12, %v14758_v39  ;;  %v3182_v39 = vld [vmem:[#allocation2 + $0x198] sm:$0xff]  ;;  %v21010_v12 = vld [vmem:[#allocation2 + $0x188] sm:$0xff] }
 0x17f   : > { %18561 = vmatpush3.bf16.msra.mxu0 %v18558_v3  ;;  %v18566_v3 = vpack.c.bf16 %v14599_v1, %v14598_v9  ;;  %v21004_v9 = vld [vmem:[#allocation2 + $0x180] sm:$0xff]  ;;  %v24131_v1 = vld [vmem:[#allocation11_spill] sm:$0xff] }
 0x180   : > { %16777 = vmatmul.mubr.msk.f32.gmra.mrb[36].mxu0 %vm333_vm1, %v20597_v14  ;;  %17030 = vmatmul.mubr.msk.f32.gmra.mrb[2].mxu1 %vm333_vm1, %v20622_v2 }
 0x181   : > { %16779 = vmatprep.mubr.msk.f32.mxu0 %vm333_vm1, %v20608_v61  ;;  %17032 = vmatprep.mubr.msk.f32.mxu1 %vm333_vm1, %v20634_v6 }
 0x182   : > { %18625 = vmatpush3.bf16.msra.mxu1 %v18622_v5  ;;  %18563 = vmatprep.subr.bf16.mxu0 %v18562_v48  ;;  %v20917_v5 = vpack.c.bf16 %v14793_v40, %v14792_v44  ;;  %v3183_v44 = vld [vmem:[#allocation2 + $0x1a0] sm:$0xff]  ;;  %v14794_v40 = vld [vmem:[%s23999_s3 + $0x210] sm:$0xff] }
 0x183   : > { %18627 = vmatprep.subr.bf16.mxu1 %v18626_v49  ;;  %18565 = vmatpush3.bf16.msra.mxu0 %v18562_v48  ;;  %v24129_v48 = vld [vmem:[#allocation9_spill] sm:$0xff] }
 0x184   : > { %16780 = vmatmul.mubr.msk.f32.gmra.mrb[38].mxu0 %vm333_vm1, %v20617_v63  ;;  %17033 = vmatmul.mubr.msk.f32.gmra.mrb[4].mxu1 %vm333_vm1, %v20647_v10 }
 0x185   : > { %16782 = vmatprep.mubr.msk.f32.mxu0 %vm333_vm1, %v20636_v7  ;;  %17035 = vmatprep.mubr.msk.f32.mxu1 %vm333_vm1, %v20657_v13 }
 0x186   : > { %18629 = vmatpush3.bf16.msra.mxu1 %v18626_v49  ;;  %18567 = vmatprep.subr.bf16.mxu0 %v18566_v3  ;;  %v24130_v49 = vld [vmem:[#allocation12_spill] sm:$0xff] }
 0x187   : > { %18631 = vmatprep.subr.bf16.mxu1 %v18630_v4  ;;  %18569 = vmatpush3.bf16.msra.mxu0 %v18566_v3  ;;  %v24132_v3 = vld [vmem:[#allocation13_spill] sm:$0xff] }
 0x188   : > { %16783 = vmatmul.mubr.msk.f32.gmra.mrb[40].mxu0 %vm333_vm1, %v20649_v11  ;;  %17036 = vmatmul.mubr.msk.f32.gmra.mrb[6].mxu1 %vm333_vm1, %v20666_v16 }
 0x189   : > { %16785 = vmatprep.mubr.msk.f32.mxu0 %vm333_vm1, %v20659_v15  ;;  %17038 = vmatprep.mubr.msk.f32.mxu1 %vm333_vm1, %v20675_v18 }
 0x18a   : > { %18633 = vmatpush3.bf16.msra.mxu1 %v18630_v4  ;;  %v24133_v4 = vld [vmem:[#allocation7_spill] sm:$0xff] }
 0x18b   : > { %18635 = vmatprep.subr.bf16.mxu1 %v20917_v5 }
 0x18c   : > { %16786 = vmatmul.mubr.msk.f32.gmra.mrb[42].mxu0 %vm333_vm1, %v20668_v17  ;;  %17039 = vmatmul.mubr.msk.f32.gmra.mrb[8].mxu1 %vm333_vm1, %v20683_v22 }
 0x18d   : > { %16788 = vmatprep.mubr.msk.f32.mxu0 %vm333_vm1, %v20677_v21  ;;  %17041 = vmatprep.mubr.msk.f32.mxu1 %vm333_vm1, %v20691_v24 }
 0x190   : > { %16789 = vmatmul.mubr.msk.f32.gmra.mrb[44].mxu0 %vm333_vm1, %v20685_v23  ;;  %17042 = vmatmul.mubr.msk.f32.gmra.mrb[10].mxu1 %vm333_vm1, %v20699_v26 }
 0x191   : > { %16791 = vmatprep.mubr.msk.f32.mxu0 %vm333_vm1, %v20693_v25  ;;  %17044 = vmatprep.mubr.msk.f32.mxu1 %vm333_vm1, %v20707_v28 }
 0x194   : > { %16792 = vmatmul.mubr.msk.f32.gmra.mrb[46].mxu0 %vm333_vm1, %v20701_v27  ;;  %17045 = vmatmul.mubr.msk.f32.gmra.mrb[12].mxu1 %vm333_vm1, %v20715_v30 }
 0x195   : > { %16794 = vmatprep.mubr.msk.f32.mxu0 %vm333_vm1, %v20709_v29  ;;  %17047 = vmatprep.mubr.msk.f32.mxu1 %vm333_vm1, %v20723_v32 }
 0x198   : > { %16795 = vmatmul.mubr.msk.f32.gmra.mrb[48].mxu0 %vm333_vm1, %v20717_v31  ;;  %17048 = vmatmul.mubr.msk.f32.gmra.mrb[14].mxu1 %vm333_vm1, %v20731_v33 }
 0x199   : > { %16797 = vmatprep.mubr.msk.f32.mxu0 %vm333_vm1, %v20725_v20  ;;  %17050 = vmatprep.mubr.msk.f32.mxu1 %vm333_vm1, %v20739_v35 }
 0x19c   : > { %16798 = vmatmul.mubr.msk.f32.gmra.mrb[50].mxu0 %vm333_vm1, %v20733_v34  ;;  %17051 = vmatmul.mubr.msk.f32.gmra.mrb[16].mxu1 %vm333_vm1, %v20747_v37 }
 0x19d   : > { %16800 = vmatprep.mubr.msk.f32.mxu0 %vm333_vm1, %v20741_v36  ;;  %17053 = vmatprep.mubr.msk.f32.mxu1 %vm333_vm1, %v20755_v41 }
 0x1a0   : > { %16801 = vmatmul.mubr.msk.f32.gmra.mrb[52].mxu0 %vm333_vm1, %v20749_v38  ;;  %17054 = vmatmul.mubr.msk.f32.gmra.mrb[18].mxu1 %vm333_vm1, %v20763_v43 }
 0x1a1   : > { %16803 = vmatprep.mubr.msk.f32.mxu0 %vm333_vm1, %v20757_v42  ;;  %17056 = vmatprep.mubr.msk.f32.mxu1 %vm333_vm1, %v20771_v47 }
 0x1a4   : > { %16804 = vmatmul.mubr.msk.f32.gmra.mrb[54].mxu0 %vm333_vm1, %v20765_v46  ;;  %17057 = vmatmul.mubr.msk.f32.gmra.mrb[20].mxu1 %vm333_vm1, %v20779_v51 }
 0x1a5   : > { %16806 = vmatprep.mubr.msk.f32.mxu0 %vm333_vm1, %v20773_v50  ;;  %17059 = vmatprep.mubr.msk.f32.mxu1 %vm333_vm1, %v20787_v54 }
 0x1a8   : > { %16807 = vmatmul.mubr.msk.f32.gmra.mrb[56].mxu0 %vm333_vm1, %v20781_v52  ;;  %17060 = vmatmul.mubr.msk.f32.gmra.mrb[22].mxu1 %vm333_vm1, %v20795_v56 }
 0x1a9   : > { %16809 = vmatprep.mubr.msk.f32.mxu0 %vm333_vm1, %v20789_v55  ;;  %17062 = vmatprep.mubr.msk.f32.mxu1 %vm333_vm1, %v20803_v59 }
 0x1ac   : > { %16810 = vmatmul.mubr.msk.f32.gmra.mrb[58].mxu0 %vm333_vm1, %v20797_v58  ;;  %17063 = vmatmul.mubr.msk.f32.gmra.mrb[24].mxu1 %vm333_vm1, %v20811_v0 }
 0x1ad   : > { %16812 = vmatprep.mubr.msk.f32.mxu0 %vm333_vm1, %v20805_v62  ;;  %17065 = vmatprep.mubr.msk.f32.mxu1 %vm333_vm1, %v24128_v45 }
 0x1b0   : > { %16813 = vmatmul.mubr.msk.f32.gmra.mrb[60].mxu0 %vm333_vm1, %v24129_v48  ;;  %17066 = vmatmul.mubr.msk.f32.gmra.mrb[26].mxu1 %vm333_vm1, %v24130_v49  ;;  %v14796_v48 = vld [vmem:[%s23999_s3 + $0x220] sm:$0xff] }
 0x1b1   : > { %16815 = vmatprep.mubr.msk.f32.mxu0 %vm333_vm1, %v24131_v1  ;;  %17068 = vmatprep.mubr.msk.f32.mxu1 %vm333_vm1, %v21004_v9  ;;  %v24134_v1 = vld [vmem:[#allocation8_spill] sm:$0xff] }
 0x1b4   : > { %16816 = vmatmul.mubr.msk.f32.gmra.mrb[62].mxu0 %vm333_vm1, %v24132_v3  ;;  %17069 = vmatmul.mubr.msk.f32.gmra.mrb[28].mxu1 %vm333_vm1, %v21010_v12  ;;  %v3546_v3 = vld [vmem:[#allocation2 + $0x31] sm:$0xff] }
 0x1b5   : > { %16834 = vmatprep.mubr.msk.f32.mxu0 %vm333_vm1, %v24133_v4  ;;  %17071 = vmatprep.mubr.msk.f32.mxu1 %vm333_vm1, %v3182_v39  ;;  %v18638_v39 = vpack.c.bf16 %v14795_v8, %v14794_v40  ;;  %v3547_v4 = vld [vmem:[#allocation2 + $0x39] sm:$0xff]  ;;  %v3553_v40 = vld [vmem:[#allocation2 + $0x81] sm:$0xff] }
 0x1b8   : > { %16835 = vmatmul.mubr.msk.f32.vlgmr.msra.gmra.mrb[32].mxu0 %vm333_vm1, %v24134_v1  ;;  %17072 = vmatmul.mubr.msk.f32.gmra.mrb[30].mxu1 %vm333_vm1, %v3183_v44  ;;  %v14797_v1 = vld [vmem:[%s23999_s3 + $0x228] sm:$0xff]  ;;  %v14798_v44 = vld [vmem:[%s23999_s3 + $0x230] sm:$0xff] }
 0x1b9   : > { %16837 = vmatprep.mubr.msk.f32.mxu0 %vm333_vm1, %v20574_v19  ;;  %17090 = vmatprep.mubr.msk.f32.mxu1 %vm333_vm1, %v3546_v3  ;;  %v3548_v19 = vld [vmem:[#allocation2 + $0x49] sm:$0xff]  ;;  %v18642_v8 = vpack.c.bf16 %v14797_v1, %v14796_v48  ;;  %v3550_v3 = vld [vmem:[#allocation2 + $0x61] sm:$0xff]  ;;  %v3552_v48 = vld [vmem:[#allocation2 + $0x79] sm:$0xff] }
 0x1ba   : > { %v14848_v1 = vld [vmem:[%s24001_s5 + $0xf8] sm:$0xff] }
 0x1bc   : > { %16838 = vmatmul.mubr.msk.f32.gmra.mrb[34].mxu0 %vm333_vm1, %v20595_v57  ;;  %17091 = vmatmul.mubr.msk.f32.vlgmr.msra.gmra.mrb[0].mxu1 %vm333_vm1, %v3547_v4  ;;  %v3549_v57 = vld [vmem:[#allocation2 + $0x51] sm:$0xff] }
 0x1bd   : > { %18637 = vmatpush3.bf16.msra.mxu1 %v20917_v5  ;;  %16840 = vmatprep.mubr.msk.f32.mxu0 %vm333_vm1, %v20606_v60  ;;  %v14799_v60 = vld [vmem:[%s23999_s3 + $0x238] sm:$0xff]  ;;  %v3551_v5 = vld [vmem:[#allocation2 + $0x69] sm:$0xff] }
 0x1be   : > { %17093 = vmatprep.mubr.msk.f32.mxu1 %vm333_vm1, %v3548_v19  ;;  %18639 = vmatprep.subr.bf16.mxu1 %v18638_v39  ;;  %v14847_v4 = vld [vmem:[%s24001_s5 + $0xf0] sm:$0xff] }
 0x1bf   : > { %v18678_v19 = vpack.c.bf16 %v14848_v1, %v14847_v4  ;;  %v21353_v1 = vld [vmem:[%s24000_s4] ss:$0 sm:$0xff] }
 0x1c0   : > { %16841 = vmatmul.mubr.msk.f32.gmra.mrb[36].mxu0 %vm333_vm1, %v20622_v2  ;;  %17094 = vmatmul.mubr.msk.f32.gmra.mrb[2].mxu1 %vm333_vm1, %v3549_v57  ;;  %v18646_v2 = vpack.c.bf16 %v14799_v60, %v14798_v44  ;;  %v4486_v57 = vld [vmem:[#allocation3 + $0x1] sm:$0xff]  ;;  %v4471_v44 = vld [vmem:[%s24001_s5 + $0x8] sm:$0xff] }
 0x1c1   : > { %16843 = vmatprep.mubr.msk.f32.mxu0 %vm333_vm1, %v20634_v6  ;;  %17096 = vmatprep.mubr.msk.f32.mxu1 %vm333_vm1, %v3550_v3  ;;  %v3554_v6 = vld [vmem:[#allocation2 + $0x91] sm:$0xff]  ;;  %v4470_v3 = vld [vmem:[%s24001_s5] sm:$0xff] }
 0x1c2   : > { %18641 = vmatpush3.bf16.msra.mxu1 %v18638_v39  ;;  %v24136_v39 = vld [vmem:[#allocation6_spill] sm:$0xff]  ;;  %v18682_v60 = vpack.c.bf16 %v4471_v44, %v4470_v3 }
 0x1c3   : > { %18643 = vmatprep.subr.bf16.mxu1 %v18642_v8 }
 0x1c4   : > { %16844 = vmatmul.mubr.msk.f32.gmra.mrb[38].mxu0 %vm333_vm1, %v20647_v10  ;;  %17097 = vmatmul.mubr.msk.f32.gmra.mrb[4].mxu1 %vm333_vm1, %v3551_v5  ;;  %v3555_v10 = vld [vmem:[#allocation2 + $0x99] sm:$0xff]  ;;  %v4472_v5 = vld [vmem:[%s24001_s5 + $0x10] sm:$0xff] }
 0x1c5   : > { %16846 = vmatprep.mubr.msk.f32.mxu0 %vm333_vm1, %v20657_v13  ;;  %17099 = vmatprep.mubr.msk.f32.mxu1 %vm333_vm1, %v3552_v48  ;;  %v3556_v13 = vld [vmem:[#allocation2 + $0xa9] sm:$0xff] }
 0x1c6   : > { %18645 = vmatpush3.bf16.msra.mxu1 %v18642_v8  ;;  %v4487_v8 = vld [vmem:[#allocation3 + $0x9] sm:$0xff] }
 0x1c7   : > { %18647 = vmatprep.subr.bf16.mxu1 %v18646_v2 }
 0x1c8   : > { %16847 = vmatmul.mubr.msk.f32.gmra.mrb[40].mxu0 %vm333_vm1, %v20666_v16  ;;  %17100 = vmatmul.mubr.msk.f32.gmra.mrb[6].mxu1 %vm333_vm1, %v3553_v40  ;;  %v3557_v16 = vld [vmem:[#allocation2 + $0xb1] sm:$0xff]  ;;  %v4474_v40 = vld [vmem:[%s24001_s5 + $0x20] sm:$0xff] }
 0x1c9   : > { %16849 = vmatprep.mubr.msk.f32.mxu0 %vm333_vm1, %v20675_v18  ;;  %17102 = vmatprep.mubr.msk.f32.mxu1 %vm333_vm1, %v3554_v6  ;;  %v3558_v18 = vld [vmem:[#allocation2 + $0xc1] sm:$0xff] }
 0x1ca   : > { %18649 = vmatpush3.bf16.msra.mxu1 %v18646_v2  ;;  %v4473_v2 = vld [vmem:[%s24001_s5 + $0x18] sm:$0xff]  ;;  %v4475_v6 = vld [vmem:[%s24001_s5 + $0x28] sm:$0xff] }
 0x1cb   : > { %v18686_v48 = vpack.c.bf16 %v4473_v2, %v4472_v5 }
 0x1cc   : > { %16850 = vmatmul.mubr.msk.f32.gmra.mrb[42].mxu0 %vm333_vm1, %v20683_v22  ;;  %17103 = vmatmul.mubr.msk.f32.gmra.mrb[8].mxu1 %vm333_vm1, %v3555_v10  ;;  %v3559_v22 = vld [vmem:[#allocation2 + $0xc9] sm:$0xff]  ;;  %v18690_v10 = vpack.c.bf16 %v4475_v6, %v4474_v40 }
 0x1cd   : > { %16852 = vmatprep.mubr.msk.f32.mxu0 %vm333_vm1, %v20691_v24  ;;  %17105 = vmatprep.mubr.msk.f32.mxu1 %vm333_vm1, %v3556_v13  ;;  %v3560_v24 = vld [vmem:[#allocation2 + $0xd9] sm:$0xff]  ;;  %v4476_v13 = vld [vmem:[%s24001_s5 + $0x30] sm:$0xff] }
 0x1d0   : > { %16853 = vmatmul.mubr.msk.f32.gmra.mrb[44].mxu0 %vm333_vm1, %v20699_v26  ;;  %17106 = vmatmul.mubr.msk.f32.gmra.mrb[10].mxu1 %vm333_vm1, %v3557_v16  ;;  %v3561_v26 = vld [vmem:[#allocation2 + $0xe1] sm:$0xff]  ;;  %v4477_v16 = vld [vmem:[%s24001_s5 + $0x38] sm:$0xff] }
 0x1d1   : > { %16855 = vmatprep.mubr.msk.f32.mxu0 %vm333_vm1, %v20707_v28  ;;  %17108 = vmatprep.mubr.msk.f32.mxu1 %vm333_vm1, %v3558_v18  ;;  %v3562_v28 = vld [vmem:[#allocation2 + $0xf1] sm:$0xff]  ;;  %v18694_v18 = vpack.c.bf16 %v4477_v16, %v4476_v13 }
 0x1d4   : > { %16856 = vmatmul.mubr.msk.f32.gmra.mrb[46].mxu0 %vm333_vm1, %v20715_v30  ;;  %17109 = vmatmul.mubr.msk.f32.gmra.mrb[12].mxu1 %vm333_vm1, %v3559_v22  ;;  %v3563_v30 = vld [vmem:[#allocation2 + $0xf9] sm:$0xff] }
 0x1d5   : > { %16858 = vmatprep.mubr.msk.f32.mxu0 %vm333_vm1, %v20723_v32  ;;  %17111 = vmatprep.mubr.msk.f32.mxu1 %vm333_vm1, %v3560_v24  ;;  %v3564_v32 = vld [vmem:[#allocation2 + $0x109] sm:$0xff]  ;;  %v4478_v22 = vld [vmem:[%s24001_s5 + $0x40] sm:$0xff] }
 0x1d6   : > { %v4479_v24 = vld [vmem:[%s24001_s5 + $0x48] sm:$0xff] }
 0x1d8   : > { %16859 = vmatmul.mubr.msk.f32.gmra.mrb[48].mxu0 %vm333_vm1, %v20731_v33  ;;  %17112 = vmatmul.mubr.msk.f32.gmra.mrb[14].mxu1 %vm333_vm1, %v3561_v26  ;;  %v3565_v33 = vld [vmem:[#allocation2 + $0x111] sm:$0xff]  ;;  %v18698_v26 = vpack.c.bf16 %v4479_v24, %v4478_v22 }
 0x1d9   : > { %16861 = vmatprep.mubr.msk.f32.mxu0 %vm333_vm1, %v20739_v35  ;;  %17114 = vmatprep.mubr.msk.f32.mxu1 %vm333_vm1, %v3562_v28  ;;  %v3566_v35 = vld [vmem:[#allocation2 + $0x121] sm:$0xff]  ;;  %v4480_v28 = vld [vmem:[%s24001_s5 + $0x50] sm:$0xff] }
 0x1dc   : > { %16862 = vmatmul.mubr.msk.f32.gmra.mrb[50].mxu0 %vm333_vm1, %v20747_v37  ;;  %17115 = vmatmul.mubr.msk.f32.gmra.mrb[16].mxu1 %vm333_vm1, %v3563_v30  ;;  %v3567_v37 = vld [vmem:[#allocation2 + $0x129] sm:$0xff]  ;;  %v4481_v30 = vld [vmem:[%s24001_s5 + $0x58] sm:$0xff] }
 0x1dd   : > { %16864 = vmatprep.mubr.msk.f32.mxu0 %vm333_vm1, %v20755_v41  ;;  %17117 = vmatprep.mubr.msk.f32.mxu1 %vm333_vm1, %v3564_v32  ;;  %v3568_v41 = vld [vmem:[#allocation2 + $0x139] sm:$0xff]  ;;  %v18702_v32 = vpack.c.bf16 %v4481_v30, %v4480_v28 }
 0x1e0   : > { %16865 = vmatmul.mubr.msk.f32.gmra.mrb[52].mxu0 %vm333_vm1, %v20763_v43  ;;  %17118 = vmatmul.mubr.msk.f32.gmra.mrb[18].mxu1 %vm333_vm1, %v3565_v33  ;;  %v3569_v43 = vld [vmem:[#allocation2 + $0x141] sm:$0xff] }
 0x1e1   : > { %16867 = vmatprep.mubr.msk.f32.mxu0 %vm333_vm1, %v20771_v47  ;;  %17120 = vmatprep.mubr.msk.f32.mxu1 %vm333_vm1, %v3566_v35  ;;  %v3570_v47 = vld [vmem:[#allocation2 + $0x151] sm:$0xff] }
 0x1e4   : > { %16868 = vmatmul.mubr.msk.f32.gmra.mrb[54].mxu0 %vm333_vm1, %v20779_v51  ;;  %17121 = vmatmul.mubr.msk.f32.gmra.mrb[20].mxu1 %vm333_vm1, %v3567_v37  ;;  %v3571_v51 = vld [vmem:[#allocation2 + $0x159] sm:$0xff] }
 0x1e5   : > { %16870 = vmatprep.mubr.msk.f32.mxu0 %vm333_vm1, %v20787_v54  ;;  %17123 = vmatprep.mubr.msk.f32.mxu1 %vm333_vm1, %v3568_v41  ;;  %v3572_v54 = vld [vmem:[#allocation2 + $0x169] sm:$0xff]  ;;  %v4482_v37 = vld [vmem:[%s24001_s5 + $0x60] sm:$0xff] }
 0x1e6   : > { %v4483_v41 = vld [vmem:[%s24001_s5 + $0x68] sm:$0xff] }
 0x1e8   : > { %16871 = vmatmul.mubr.msk.f32.gmra.mrb[56].mxu0 %vm333_vm1, %v20795_v56  ;;  %17124 = vmatmul.mubr.msk.f32.gmra.mrb[22].mxu1 %vm333_vm1, %v3569_v43  ;;  %v3573_v56 = vld [vmem:[#allocation2 + $0x171] sm:$0xff]  ;;  %v18706_v43 = vpack.c.bf16 %v4483_v41, %v4482_v37 }
 0x1e9   : > { %16873 = vmatprep.mubr.msk.f32.mxu0 %vm333_vm1, %v20803_v59  ;;  %17126 = vmatprep.mubr.msk.f32.mxu1 %vm333_vm1, %v3570_v47  ;;  %v24135_v59 = vld [vmem:[#allocation5_spill] sm:$0xff] }
 0x1ec   : > { %16874 = vmatmul.mubr.msk.f32.gmra.mrb[58].mxu0 %vm333_vm1, %v20811_v0  ;;  %17127 = vmatmul.mubr.msk.f32.gmra.mrb[24].mxu1 %vm333_vm1, %v3571_v51  ;;  %v3576_v0 = vld [vmem:[#allocation2 + $0x199] sm:$0xff] }
 0x1ed   : > { %16876 = vmatprep.mubr.msk.f32.mxu0 %vm333_vm1, %v24128_v45  ;;  %17129 = vmatprep.mubr.msk.f32.mxu1 %vm333_vm1, %v3572_v54  ;;  %v3577_v45 = vld [vmem:[#allocation2 + $0x1a1] sm:$0xff]  ;;  %v4484_v54 = vld [vmem:[%s24001_s5 + $0x70] sm:$0xff] }
 0x1f0   : > { %16877 = vmatmul.mubr.msk.f32.gmra.mrb[60].mxu0 %vm333_vm1, %v24130_v49  ;;  %17130 = vmatmul.mubr.msk.f32.gmra.mrb[26].mxu1 %vm333_vm1, %v3573_v56  ;;  %v14845_v49 = vld [vmem:[%s24001_s5 + $0xe0] sm:$0xff]  ;;  %v4485_v56 = vld [vmem:[%s24001_s5 + $0x78] sm:$0xff] }
 0x1f1   : > { %16879 = vmatprep.mubr.msk.f32.mxu0 %vm333_vm1, %v21004_v9  ;;  %17132 = vmatprep.mubr.msk.f32.mxu1 %vm333_vm1, %v24135_v59  ;;  %v14846_v9 = vld [vmem:[%s24001_s5 + $0xe8] sm:$0xff]  ;;  %v18710_v59 = vpack.c.bf16 %v4485_v56, %v4484_v54 }
 0x1f4   : > { %16880 = vmatmul.mubr.msk.f32.gmra.mrb[62].mxu0 %vm333_vm1, %v21010_v12  ;;  %17133 = vmatmul.mubr.msk.f32.gmra.mrb[28].mxu1 %vm333_vm1, %v24136_v39  ;;  %v18674_v12 = vpack.c.bf16 %v14846_v9, %v14845_v49  ;;  %v14849_v39 = vld [vmem:[%s24001_s5 + $0x100] sm:$0xff] }
 0x1f5   : > { %17135 = vmatprep.mubr.msk.f32.mxu1 %vm333_vm1, %v3576_v0  ;;  %17234 = vmatprep.mubr.f32.mxu0 %v4486_v57 }
 0x1f8   : > { %17136 = vmatmul.mubr.msk.f32.gmra.mrb[30].mxu1 %vm333_vm1, %v3577_v45  ;;  %v14850_v45 = vld [vmem:[%s24001_s5 + $0x108] sm:$0xff] }
 0x1f9   : > { %17154 = vmatprep.mubr.msk.f32.mxu1 %vm333_vm1, %v20585_v53  ;;  %v14833_v53 = vld [vmem:[%s24001_s5 + $0x80] sm:$0xff] }
 0x1fc   : > { %17155 = vmatmul.mubr.msk.f32.vlgmr.msra.gmra.mrb[0].mxu1 %vm333_vm1, %v20597_v14  ;;  %v14834_v14 = vld [vmem:[%s24001_s5 + $0x88] sm:$0xff] }
 0x1fd   : > { %17157 = vmatprep.mubr.msk.f32.mxu1 %vm333_vm1, %v20608_v61  ;;  %v18650_v61 = vpack.c.bf16 %v14834_v14, %v14833_v53  ;;  %v21299_v14 = vpack.c.bf16 %v14850_v45, %v14849_v39 }
 0x1ff   : > { %18651 = vmatprep.subr.bf16.mxu0 %v18650_v61 }
 0x200   : > { %17158 = vmatmul.mubr.msk.f32.gmra.mrb[2].mxu1 %vm333_vm1, %v20617_v63  ;;  %18653 = vmatpush3.bf16.msra.mxu0 %v18650_v61  ;;  %v14835_v63 = vld [vmem:[%s24001_s5 + $0x90] sm:$0xff] }
 0x201   : > { %17160 = vmatprep.mubr.msk.f32.mxu1 %vm333_vm1, %v20636_v7  ;;  %v14836_v7 = vld [vmem:[%s24001_s5 + $0x98] sm:$0xff] }
 0x204   : > { %17161 = vmatmul.mubr.msk.f32.gmra.mrb[4].mxu1 %vm333_vm1, %v20649_v11  ;;  %v18654_v11 = vpack.c.bf16 %v14836_v7, %v14835_v63 }
 0x205   : > { %17163 = vmatprep.mubr.msk.f32.mxu1 %vm333_vm1, %v20659_v15  ;;  %v14837_v15 = vld [vmem:[%s24001_s5 + $0xa0] sm:$0xff] }
 0x206   : > { %18655 = vmatprep.subr.bf16.mxu0 %v18654_v11 }
 0x207   : > { %18657 = vmatpush3.bf16.msra.mxu0 %v18654_v11 }
 0x208   : > { %17164 = vmatmul.mubr.msk.f32.gmra.mrb[6].mxu1 %vm333_vm1, %v20668_v17  ;;  %v14838_v17 = vld [vmem:[%s24001_s5 + $0xa8] sm:$0xff] }
 0x209   : > { %17166 = vmatprep.mubr.msk.f32.mxu1 %vm333_vm1, %v20677_v21  ;;  %v24137_v21 = vld [vmem:[#allocation9_spill] sm:$0xff] }
 0x20c   : > { %17167 = vmatmul.mubr.msk.f32.gmra.mrb[8].mxu1 %vm333_vm1, %v20685_v23  ;;  %v18658_v23 = vpack.c.bf16 %v14838_v17, %v14837_v15 }
 0x20d   : > { %17169 = vmatprep.mubr.msk.f32.mxu1 %vm333_vm1, %v20693_v25  ;;  %v24138_v25 = vld [vmem:[#allocation11_spill] sm:$0xff] }
 0x20e   : > { %18659 = vmatprep.subr.bf16.mxu0 %v18658_v23 }
 0x20f   : > { %18661 = vmatpush3.bf16.msra.mxu0 %v18658_v23 }
 0x210   : > { %17170 = vmatmul.mubr.msk.f32.gmra.mrb[10].mxu1 %vm333_vm1, %v20701_v27  ;;  %v24139_v27 = vld [vmem:[#allocation13_spill] sm:$0xff] }
 0x211   : > { %17172 = vmatprep.mubr.msk.f32.mxu1 %vm333_vm1, %v20709_v29  ;;  %v24140_v29 = vld [vmem:[#allocation14_spill] sm:$0xff] }
 0x214   : > { %17173 = vmatmul.mubr.msk.f32.gmra.mrb[12].mxu1 %vm333_vm1, %v20717_v31  ;;  %v3970_v31 = vld [vmem:[#allocation2 + $0x19a] sm:$0xff] }
 0x215   : > { %17175 = vmatprep.mubr.msk.f32.mxu1 %vm333_vm1, %v20725_v20  ;;  %v14839_v20 = vld [vmem:[%s24001_s5 + $0xb0] sm:$0xff] }
 0x218   : > { %17176 = vmatmul.mubr.msk.f32.gmra.mrb[14].mxu1 %vm333_vm1, %v20733_v34  ;;  %v14840_v34 = vld [vmem:[%s24001_s5 + $0xb8] sm:$0xff] }
 0x219   : > { %17178 = vmatprep.mubr.msk.f32.mxu1 %vm333_vm1, %v20741_v36  ;;  %v24141_v36 = vld [vmem:[#allocation15_spill] sm:$0xff] }
 0x21c   : > { %17179 = vmatmul.mubr.msk.f32.gmra.mrb[16].mxu1 %vm333_vm1, %v20749_v38  ;;  %v18662_v38 = vpack.c.bf16 %v14840_v34, %v14839_v20 }
 0x21d   : > { %17181 = vmatprep.mubr.msk.f32.mxu1 %vm333_vm1, %v20757_v42  ;;  %v3971_v42 = vld [vmem:[#allocation2 + $0x1a2] sm:$0xff] }
 0x21e   : > { %18663 = vmatprep.subr.bf16.mxu0 %v18662_v38 }
 0x21f   : > { %18665 = vmatpush3.bf16.msra.mxu0 %v18662_v38 }
 0x220   : > { %17182 = vmatmul.mubr.msk.f32.gmra.mrb[18].mxu1 %vm333_vm1, %v20765_v46  ;;  %v14841_v46 = vld [vmem:[%s24001_s5 + $0xc0] sm:$0xff] }
 0x221   : > { %17184 = vmatprep.mubr.msk.f32.mxu1 %vm333_vm1, %v20773_v50  ;;  %v14842_v50 = vld [vmem:[%s24001_s5 + $0xc8] sm:$0xff] }
 0x224   : > { %17185 = vmatmul.mubr.msk.f32.gmra.mrb[20].mxu1 %vm333_vm1, %v20781_v52  ;;  %v18666_v52 = vpack.c.bf16 %v14842_v50, %v14841_v46 }
 0x225   : > { %17187 = vmatprep.mubr.msk.f32.mxu1 %vm333_vm1, %v20789_v55  ;;  %v14843_v55 = vld [vmem:[%s24001_s5 + $0xd0] sm:$0xff] }
 0x226   : > { %18667 = vmatprep.subr.bf16.mxu0 %v18666_v52 }
 0x227   : > { %18669 = vmatpush3.bf16.msra.mxu0 %v18666_v52 }
 0x228   : > { %17188 = vmatmul.mubr.msk.f32.gmra.mrb[22].mxu1 %vm333_vm1, %v20797_v58  ;;  %v14844_v58 = vld [vmem:[%s24001_s5 + $0xd8] sm:$0xff] }
 0x229   : > { %17190 = vmatprep.mubr.msk.f32.mxu1 %vm333_vm1, %v20805_v62  ;;  %v18670_v62 = vpack.c.bf16 %v14844_v58, %v14843_v55 }
 0x22b   : > { %18671 = vmatprep.subr.bf16.mxu0 %v18670_v62 }
 0x22c   : > { %17191 = vmatmul.mubr.msk.f32.gmra.mrb[24].mxu1 %vm333_vm1, %v24137_v21  ;;  %18673 = vmatpush3.bf16.msra.mxu0 %v18670_v62 }
 0x22d   : > { %17193 = vmatprep.mubr.msk.f32.mxu1 %vm333_vm1, %v24138_v25  ;;  %18675 = vmatprep.subr.bf16.mxu0 %v18674_v12 }
 0x230   : > { %17194 = vmatmul.mubr.msk.f32.gmra.mrb[26].mxu1 %vm333_vm1, %v24139_v27  ;;  %18677 = vmatpush3.bf16.msra.mxu0 %v18674_v12 }
 0x231   : > { %17196 = vmatprep.mubr.msk.f32.mxu1 %vm333_vm1, %v24140_v29  ;;  %18679 = vmatprep.subr.bf16.mxu0 %v18678_v19 }
 0x234   : > { %17197 = vmatmul.mubr.msk.f32.gmra.mrb[28].mxu1 %vm333_vm1, %v24141_v36  ;;  %18681 = vmatpush3.bf16.msra.mxu0 %v18678_v19 }
 0x235   : > { %17199 = vmatprep.mubr.msk.f32.mxu1 %vm333_vm1, %v3970_v31  ;;  %18683 = vmatprep.subr.bf16.mxu0 %v18682_v60 }
 0x237   : > { %17235 = vmatmul.mubr.f32.vlgmr.msra.gmra.mrb[64].mxu0 %v4487_v8 }
 0x238   : > { %17200 = vmatmul.mubr.msk.f32.gmra.mrb[30].mxu1 %vm333_vm1, %v3971_v42  ;;  %18685 = vmatpush3.bf16.msra.mxu0 %v18682_v60 }
 0x239   : > { %18687 = vmatprep.subr.bf16.mxu0 %v18686_v48 }
 0x23c   : > { %18689 = vmatpush3.bf16.msra.mxu0 %v18686_v48 }
 0x23d   : > { %18691 = vmatprep.subr.bf16.mxu0 %v18690_v10 }
 0x240   : > { %18693 = vmatpush3.bf16.msra.mxu0 %v18690_v10 }
 0x241   : > { %18695 = vmatprep.subr.bf16.mxu0 %v18694_v18 }
 0x244   : > { %18697 = vmatpush3.bf16.msra.mxu0 %v18694_v18 }
 0x245   : > { %18699 = vmatprep.subr.bf16.mxu0 %v18698_v26 }
 0x248   : > { %18701 = vmatpush3.bf16.msra.mxu0 %v18698_v26 }
 0x249   : > { %18703 = vmatprep.subr.bf16.mxu0 %v18702_v32 }
 0x24c   : > { %18705 = vmatpush3.bf16.msra.mxu0 %v18702_v32 }
 0x24d   : > { %18707 = vmatprep.subr.bf16.mxu0 %v18706_v43 }
 0x250   : > { %18709 = vmatpush3.bf16.msra.mxu0 %v18706_v43 }
 0x251   : > { %18711 = vmatprep.subr.bf16.mxu0 %v18710_v59 }
 0x254   : > { %18713 = vmatpush3.bf16.msra.mxu0 %v18710_v59 }
 0x255   : > { %18715 = vmatprep.subr.bf16.mxu0 %v21299_v14 }
 0x28b   : > { %v16836_v33 = vpop.f32.mrb[32].mxu0 }
 0x28c   : > { %v2172_v35 = vpop.f32.mrb[33].mxu0 }
 0x28f   : > { %v16839_v47 = vpop.f32.mrb[34].mxu0 }
 0x290   : > { %v2182_v51 = vpop.f32.mrb[35].mxu0 }
 0x293   : > { %v16842_v0 = vpop.f32.mrb[36].mxu0 }
 0x294   : > { %v2192_v53 = vpop.f32.mrb[37].mxu0 }
 0x297   : > { %v16845_v61 = vpop.f32.mrb[38].mxu0 }
 0x298   : > { %v2202_v63 = vpop.f32.mrb[39].mxu0 }
 0x29b   : > { %v21302_v7 = vpop.f32.mrb[40].mxu0 }
 0x29c   : > { %v21304_v11 = vpop.f32.mrb[41].mxu0 }
 0x29f   : > { %v21306_v15 = vpop.f32.mrb[42].mxu0 }
 0x2a0   : > { %v21308_v17 = vpop.f32.mrb[43].mxu0 }
 0x2a3   : > { %v21310_v21 = vpop.f32.mrb[44].mxu0 }
 0x2a4   : > { %v21312_v23 = vpop.f32.mrb[45].mxu0 }
 0x2a7   : > { %v21314_v25 = vpop.f32.mrb[46].mxu0 }
 0x2a8   : > { %v21316_v27 = vpop.f32.mrb[47].mxu0 }
 0x2ab   : > { %v21318_v29 = vpop.f32.mrb[48].mxu0 }
 0x2ac   : > { %v21320_v31 = vpop.f32.mrb[49].mxu0 }
 0x2af   : > { %v21322_v20 = vpop.f32.mrb[50].mxu0 }
 0x2b0   : > { %v21324_v34 = vpop.f32.mrb[51].mxu0 }
 0x2b3   : > { %v21326_v36 = vpop.f32.mrb[52].mxu0 }
 0x2b4   : > { %v21328_v38 = vpop.f32.mrb[53].mxu0 }
 0x2b7   : > { %v21330_v42 = vpop.f32.mrb[54].mxu0 }
 0x2b8   : > { %v21332_v46 = vpop.f32.mrb[55].mxu0 }
 0x2bb   : > { %v21334_v50 = vpop.f32.mrb[56].mxu0 }
 0x2bc   : > { %v21336_v52 = vpop.f32.mrb[57].mxu0 }
 0x2bf   : > { %v21338_v55 = vpop.f32.mrb[58].mxu0 }
 0x2c0   : > { %v21340_v58 = vpop.f32.mrb[59].mxu0 }
 0x2c3   : > { %v21342_v62 = vpop.f32.mrb[60].mxu0 }
 0x2c4   : > { %v21344_v49 = vpop.f32.mrb[61].mxu0 }
 0x2c7   : > { %v21346_v9 = vpop.f32.mrb[62].mxu0 }
 0x2c8   : > { %v21348_v12 = vpop.f32.mrb[63].mxu0 }
 0x2cf   : > { %v17156_v4 = vpop.f32.mrb[0].mxu1 }
 0x2d0   : > { %v19090_v19 = vadd.f32 %v17156_v4, %v16836_v33  ;;  %v4143_v57 = vpop.f32.mrb[1].mxu1 }
 0x2d1   : > { %v19091_v8 = vadd.f32 %v4143_v57, %v2172_v35 }
 0x2d2   : > { %v4342_v3 = vadd.f32 %v19090_v19, %v21353_v1 }
 0x2d3   : > { %v4341_v44 = vadd.f32 %v19091_v8, %v21353_v1  ;;  %v17159_v60 = vpop.f32.mrb[2].mxu1 }
 0x2d4   : > { %v4374_v5 = vmax.f32 %v4342_v3, 0.0  ;;  %v19092_v2 = vadd.f32 %v17159_v60, %v16839_v47  ;;  %v4153_v48 = vpop.f32.mrb[3].mxu1 }
 0x2d5   : > { %v4373_v40 = vmax.f32 %v4341_v44, 0.0  ;;  %v19093_v6 = vadd.f32 %v4153_v48, %v2182_v51 }
 0x2d6   : > { %4407 = vst [vmem:[#allocation3 + $0x21] sm:$0xff] %v4374_v5  ;;  %v4344_v10 = vadd.f32 %v19092_v2, %v21353_v1 }
 0x2d7   : > { %4406 = vst [vmem:[#allocation3 + $0x19] sm:$0xff] %v4373_v40  ;;  %v4343_v13 = vadd.f32 %v19093_v6, %v21353_v1  ;;  %v17162_v16 = vpop.f32.mrb[4].mxu1  ;;  %17237 = vmatprep.mubr.f32.mxu0 %v4373_v40 }
 0x2d8   : > { %v4376_v18 = vmax.f32 %v4344_v10, 0.0  ;;  %v19094_v22 = vadd.f32 %v17162_v16, %v16842_v0  ;;  %v4163_v24 = vpop.f32.mrb[5].mxu1  ;;  %17238 = vmatmul.mubr.f32.gmra.mrb[66].mxu0 %v4374_v5 }
 0x2d9   : > { %v4375_v26 = vmax.f32 %v4343_v13, 0.0  ;;  %v19095_v28 = vadd.f32 %v4163_v24, %v2192_v53 }
 0x2da   : > { %4409 = vst [vmem:[#allocation3 + $0x39] sm:$0xff] %v4376_v18  ;;  %v4346_v30 = vadd.f32 %v19094_v22, %v21353_v1 }
 0x2db   : > { %4408 = vst [vmem:[#allocation3 + $0x31] sm:$0xff] %v4375_v26  ;;  %v4345_v32 = vadd.f32 %v19095_v28, %v21353_v1  ;;  %v17165_v33 = vpop.f32.mrb[6].mxu1  ;;  %17240 = vmatprep.mubr.f32.mxu0 %v4375_v26 }
 0x2dc   : > { %v4378_v35 = vmax.f32 %v4346_v30, 0.0  ;;  %v19096_v37 = vadd.f32 %v17165_v33, %v16845_v61  ;;  %v4173_v41 = vpop.f32.mrb[7].mxu1  ;;  %17241 = vmatmul.mubr.f32.gmra.mrb[68].mxu0 %v4376_v18 }
 0x2dd   : > { %v4377_v43 = vmax.f32 %v4345_v32, 0.0  ;;  %v19097_v47 = vadd.f32 %v4173_v41, %v2202_v63 }
 0x2de   : > { %4411 = vst [vmem:[#allocation3 + $0x51] sm:$0xff] %v4378_v35  ;;  %v4348_v51 = vadd.f32 %v19096_v37, %v21353_v1 }
 0x2df   : > { %4410 = vst [vmem:[#allocation3 + $0x49] sm:$0xff] %v4377_v43  ;;  %v4347_v54 = vadd.f32 %v19097_v47, %v21353_v1  ;;  %v17168_v56 = vpop.f32.mrb[8].mxu1  ;;  %17243 = vmatprep.mubr.f32.mxu0 %v4377_v43 }
 0x2e0   : > { %v4380_v59 = vmax.f32 %v4348_v51, 0.0  ;;  %v19098_v0 = vadd.f32 %v17168_v56, %v21302_v7  ;;  %v4183_v39 = vpop.f32.mrb[9].mxu1  ;;  %17244 = vmatmul.mubr.f32.gmra.mrb[70].mxu0 %v4378_v35 }
 0x2e1   : > { %v4379_v45 = vmax.f32 %v4347_v54, 0.0  ;;  %v19099_v53 = vadd.f32 %v4183_v39, %v21304_v11 }
 0x2e2   : > { %4413 = vst [vmem:[#allocation3 + $0x69] sm:$0xff] %v4380_v59  ;;  %v4350_v61 = vadd.f32 %v19098_v0, %v21353_v1 }
 0x2e3   : > { %4412 = vst [vmem:[#allocation3 + $0x61] sm:$0xff] %v4379_v45  ;;  %v4349_v63 = vadd.f32 %v19099_v53, %v21353_v1  ;;  %v17171_v4 = vpop.f32.mrb[10].mxu1  ;;  %17246 = vmatprep.mubr.f32.mxu0 %v4379_v45 }
 0x2e4   : > { %v4382_v19 = vmax.f32 %v4350_v61, 0.0  ;;  %v19100_v57 = vadd.f32 %v17171_v4, %v21306_v15  ;;  %v4193_v8 = vpop.f32.mrb[11].mxu1  ;;  %17247 = vmatmul.mubr.f32.gmra.mrb[72].mxu0 %v4380_v59 }
 0x2e5   : > { %v4381_v3 = vmax.f32 %v4349_v63, 0.0  ;;  %v19101_v7 = vadd.f32 %v4193_v8, %v21308_v17 }
 0x2e6   : > { %4415 = vst [vmem:[#allocation3 + $0x81] sm:$0xff] %v4382_v19  ;;  %v4352_v44 = vadd.f32 %v19100_v57, %v21353_v1 }
 0x2e7   : > { %4414 = vst [vmem:[#allocation3 + $0x79] sm:$0xff] %v4381_v3  ;;  %v4351_v11 = vadd.f32 %v19101_v7, %v21353_v1  ;;  %v17174_v60 = vpop.f32.mrb[12].mxu1  ;;  %17249 = vmatprep.mubr.f32.mxu0 %v4381_v3 }
 0x2e8   : > { %v4384_v5 = vmax.f32 %v4352_v44, 0.0  ;;  %v19102_v2 = vadd.f32 %v17174_v60, %v21310_v21  ;;  %v4203_v48 = vpop.f32.mrb[13].mxu1  ;;  %17250 = vmatmul.mubr.f32.gmra.mrb[74].mxu0 %v4382_v19 }
 0x2e9   : > { %v4383_v40 = vmax.f32 %v4351_v11, 0.0  ;;  %v19103_v15 = vadd.f32 %v4203_v48, %v21312_v23 }
 0x2ea   : > { %4417 = vst [vmem:[#allocation3 + $0x99] sm:$0xff] %v4384_v5  ;;  %v4354_v6 = vadd.f32 %v19102_v2, %v21353_v1 }
 0x2eb   : > { %4416 = vst [vmem:[#allocation3 + $0x91] sm:$0xff] %v4383_v40  ;;  %v4353_v17 = vadd.f32 %v19103_v15, %v21353_v1  ;;  %v17177_v10 = vpop.f32.mrb[14].mxu1  ;;  %17252 = vmatprep.mubr.f32.mxu0 %v4383_v40 }
 0x2ec   : > { %v4386_v13 = vmax.f32 %v4354_v6, 0.0  ;;  %v19104_v16 = vadd.f32 %v17177_v10, %v21314_v25  ;;  %v4213_v18 = vpop.f32.mrb[15].mxu1  ;;  %17253 = vmatmul.mubr.f32.gmra.mrb[76].mxu0 %v4384_v5 }
 0x2ed   : > { %v4385_v22 = vmax.f32 %v4353_v17, 0.0  ;;  %v19105_v21 = vadd.f32 %v4213_v18, %v21316_v27 }
 0x2ee   : > { %4419 = vst [vmem:[#allocation3 + $0xb1] sm:$0xff] %v4386_v13  ;;  %v4356_v24 = vadd.f32 %v19104_v16, %v21353_v1 }
 0x2ef   : > { %4418 = vst [vmem:[#allocation3 + $0xa9] sm:$0xff] %v4385_v22  ;;  %v4355_v23 = vadd.f32 %v19105_v21, %v21353_v1  ;;  %v17180_v26 = vpop.f32.mrb[16].mxu1  ;;  %17255 = vmatprep.mubr.f32.mxu0 %v4385_v22 }
 0x2f0   : > { %v4388_v28 = vmax.f32 %v4356_v24, 0.0  ;;  %v19106_v30 = vadd.f32 %v17180_v26, %v21318_v29  ;;  %v4223_v32 = vpop.f32.mrb[17].mxu1  ;;  %17256 = vmatmul.mubr.f32.gmra.mrb[78].mxu0 %v4386_v13 }
 0x2f1   : > { %v4387_v33 = vmax.f32 %v4355_v23, 0.0  ;;  %v19107_v25 = vadd.f32 %v4223_v32, %v21320_v31  ;;  %v4438_v32 = vld [vmem:[#allocation3] sm:$0xff] }
 0x2f2   : > { %4421 = vst [vmem:[#allocation3 + $0xc9] sm:$0xff] %v4388_v28  ;;  %v4358_v35 = vadd.f32 %v19106_v30, %v21353_v1 }
 0x2f3   : > { %4420 = vst [vmem:[#allocation3 + $0xc1] sm:$0xff] %v4387_v33  ;;  %v4357_v27 = vadd.f32 %v19107_v25, %v21353_v1  ;;  %v17183_v37 = vpop.f32.mrb[18].mxu1  ;;  %17258 = vmatprep.mubr.f32.mxu0 %v4387_v33 }
 0x2f4   : > { %v4390_v41 = vmax.f32 %v4358_v35, 0.0  ;;  %v19108_v43 = vadd.f32 %v17183_v37, %v21322_v20  ;;  %v4233_v47 = vpop.f32.mrb[19].mxu1  ;;  %17259 = vmatmul.mubr.f32.gmra.mrb[80].mxu0 %v4388_v28  ;;  %v14854_v37 = vld [vmem:[%s24001_s5 + $0x128] sm:$0xff] }
 0x2f5   : > { %v21384_v51 = vmax.f32 %v4357_v27, 0.0  ;;  %v19109_v29 = vadd.f32 %v4233_v47, %v21324_v34  ;;  %v14853_v27 = vld [vmem:[%s24001_s5 + $0x120] sm:$0xff] }
 0x2f6   : > { %4423 = vst [vmem:[#allocation3 + $0xe1] sm:$0xff] %v4390_v41  ;;  %v4360_v31 = vadd.f32 %v19108_v43, %v21353_v1  ;;  %v21488_v43 = vld [vmem:[#allocation3 + $0x18] sm:$0xff]  ;;  %v18722_v47 = vpack.c.bf16 %v14854_v37, %v14853_v27 }
 0x2f7   : > { %4422 = vst [vmem:[#allocation3 + $0xd9] sm:$0xff] %v21384_v51  ;;  %v4359_v54 = vadd.f32 %v19109_v29, %v21353_v1  ;;  %v17186_v56 = vpop.f32.mrb[20].mxu1  ;;  %17261 = vmatprep.mubr.f32.mxu0 %v21384_v51  ;;  %v21492_v29 = vld [vmem:[#allocation3 + $0x20] sm:$0xff] }
 0x2f8   : > { %v21391_v59 = vmax.f32 %v4360_v31, 0.0  ;;  %v19110_v20 = vadd.f32 %v17186_v56, %v21326_v36  ;;  %v4243_v0 = vpop.f32.mrb[21].mxu1  ;;  %17262 = vmatmul.mubr.f32.gmra.mrb[82].mxu0 %v4390_v41  ;;  %v21485_v41 = vld [vmem:[#allocation3 + $0x8] sm:$0xff]  ;;  %v14855_v31 = vld [vmem:[%s24001_s5 + $0x130] sm:$0xff]  ;;  %v21501_v56 = vld [vmem:[#allocation3 + $0x30] sm:$0xff] }
 0x2f9   : > { %v21394_v39 = vmax.f32 %v4359_v54, 0.0  ;;  %v19111_v34 = vadd.f32 %v4243_v0, %v21328_v38  ;;  %24142 = vst [vmem:[#allocation10_spill] sm:$0xff] %v21485_v41  ;;  %v14856_v54 = vld [vmem:[%s24001_s5 + $0x138] sm:$0xff]  ;;  %v14857_v0 = vld [vmem:[%s24001_s5 + $0x140] sm:$0xff] }
 0x2fa   : > { %4425 = vst [vmem:[#allocation3 + $0xf9] sm:$0xff] %v21391_v59  ;;  %v4362_v45 = vadd.f32 %v19110_v20, %v21353_v1  ;;  %v21504_v20 = vld [vmem:[#allocation3 + $0x38] sm:$0xff] }
 0x2fb   : > { %4424 = vst [vmem:[#allocation3 + $0xf1] sm:$0xff] %v21394_v39  ;;  %v4361_v53 = vadd.f32 %v19111_v34, %v21353_v1  ;;  %v17189_v61 = vpop.f32.mrb[22].mxu1  ;;  %17264 = vmatprep.mubr.f32.mxu0 %v21394_v39  ;;  %v14858_v34 = vld [vmem:[%s24001_s5 + $0x148] sm:$0xff] }
 0x2fc   : > { %v21402_v63 = vmax.f32 %v4362_v45, 0.0  ;;  %v19112_v36 = vadd.f32 %v17189_v61, %v21330_v42  ;;  %v4253_v4 = vpop.f32.mrb[23].mxu1  ;;  %17265 = vmatmul.mubr.f32.gmra.mrb[84].mxu0 %v21391_v59  ;;  %v21513_v45 = vld [vmem:[#allocation3 + $0x48] sm:$0xff]  ;;  %v21516_v61 = vld [vmem:[#allocation3 + $0x50] sm:$0xff] }
 0x2fd   : > { %v21406_v19 = vmax.f32 %v4361_v53, 0.0  ;;  %v19113_v38 = vadd.f32 %v4253_v4, %v21332_v46  ;;  %v18730_v53 = vpack.c.bf16 %v14858_v34, %v14857_v0  ;;  %v14860_v4 = vld [vmem:[%s24001_s5 + $0x158] sm:$0xff]  ;;  %v14867_v0 = vld [vmem:[%s24001_s5 + $0x190] sm:$0xff] }
 0x2fe   : > { %4427 = vst [vmem:[#allocation3 + $0x111] sm:$0xff] %v21402_v63  ;;  %v4364_v57 = vadd.f32 %v19112_v36, %v21353_v1  ;;  %v14859_v36 = vld [vmem:[%s24001_s5 + $0x150] sm:$0xff]  ;;  %v14868_v34 = vld [vmem:[%s24001_s5 + $0x198] sm:$0xff] }
 0x2ff   : > { %4426 = vst [vmem:[#allocation3 + $0x109] sm:$0xff] %v21406_v19  ;;  %v4363_v8 = vadd.f32 %v19113_v38, %v21353_v1  ;;  %v17192_v3 = vpop.f32.mrb[24].mxu1  ;;  %17267 = vmatprep.mubr.f32.mxu0 %v21406_v19  ;;  %v21525_v38 = vld [vmem:[#allocation3 + $0x60] sm:$0xff] }
 0x300   : > { %v21414_v7 = vmax.f32 %v4364_v57, 0.0  ;;  %v19114_v42 = vadd.f32 %v17192_v3, %v21334_v50  ;;  %v4263_v44 = vpop.f32.mrb[25].mxu1  ;;  %17268 = vmatmul.mubr.f32.gmra.mrb[86].mxu0 %v21402_v63  ;;  %v18734_v57 = vpack.c.bf16 %v14860_v4, %v14859_v36  ;;  %v14861_v3 = vld [vmem:[%s24001_s5 + $0x160] sm:$0xff]  ;;  %v18750_v36 = vpack.c.bf16 %v14868_v34, %v14867_v0 }
 0x301   : > { %v21418_v11 = vmax.f32 %v4363_v8, 0.0  ;;  %v19115_v46 = vadd.f32 %v4263_v44, %v21336_v52  ;;  %v21528_v8 = vld [vmem:[#allocation3 + $0x68] sm:$0xff]  ;;  %v21537_v44 = vld [vmem:[#allocation3 + $0x78] sm:$0xff]  ;;  %v14869_v4 = vld [vmem:[%s24001_s5 + $0x1a0] sm:$0xff] }
 0x302   : > { %4429 = vst [vmem:[#allocation3 + $0x129] sm:$0xff] %v21414_v7  ;;  %v4366_v60 = vadd.f32 %v19114_v42, %v21353_v1  ;;  %v14862_v42 = vld [vmem:[%s24001_s5 + $0x168] sm:$0xff]  ;;  %v21651_v0 = vld [vmem:[#allocation3 + $0x4a] sm:$0xff] }
 0x303   : > { %4428 = vst [vmem:[#allocation3 + $0x121] sm:$0xff] %v21418_v11  ;;  %v4365_v5 = vadd.f32 %v19115_v46, %v21353_v1  ;;  %v17195_v2 = vpop.f32.mrb[26].mxu1  ;;  %17270 = vmatprep.mubr.f32.mxu0 %v21418_v11  ;;  %v18738_v46 = vpack.c.bf16 %v14862_v42, %v14861_v3  ;;  %v21627_v3 = vld [vmem:[#allocation3 + $0x1a] sm:$0xff] }
 0x304   : > { %v21426_v48 = vmax.f32 %v4366_v60, 0.0  ;;  %v19116_v50 = vadd.f32 %v17195_v2, %v21338_v55  ;;  %v4273_v40 = vpop.f32.mrb[27].mxu1  ;;  %17271 = vmatmul.mubr.f32.gmra.mrb[88].mxu0 %v21414_v7  ;;  %v21540_v60 = vld [vmem:[#allocation3 + $0x80] sm:$0xff]  ;;  %v14864_v2 = vld [vmem:[%s24001_s5 + $0x178] sm:$0xff] }
 0x305   : > { %v21430_v15 = vmax.f32 %v4365_v5, 0.0  ;;  %v19117_v52 = vadd.f32 %v4273_v40, %v21340_v58  ;;  %v14863_v5 = vld [vmem:[%s24001_s5 + $0x170] sm:$0xff] }
 0x306   : > { %4431 = vst [vmem:[#allocation3 + $0x141] sm:$0xff] %v21426_v48  ;;  %v4368_v6 = vadd.f32 %v19116_v50, %v21353_v1  ;;  %v21549_v50 = vld [vmem:[#allocation3 + $0x90] sm:$0xff]  ;;  %v18742_v40 = vpack.c.bf16 %v14864_v2, %v14863_v5  ;;  %v14871_v5 = vld [vmem:[%s24001_s5 + $0x1b0] sm:$0xff]  ;;  %v14872_v2 = vld [vmem:[%s24001_s5 + $0x1b8] sm:$0xff] }
 0x307   : > { %4430 = vst [vmem:[#allocation3 + $0x139] sm:$0xff] %v21430_v15  ;;  %v4367_v17 = vadd.f32 %v19117_v52, %v21353_v1  ;;  %v17198_v10 = vpop.f32.mrb[28].mxu1  ;;  %17273 = vmatprep.mubr.f32.mxu0 %v21430_v15  ;;  %v21552_v52 = vld [vmem:[#allocation3 + $0x98] sm:$0xff] }
 0x308   : > { %v21438_v13 = vmax.f32 %v4368_v6, 0.0  ;;  %v19118_v55 = vadd.f32 %v17198_v10, %v21342_v62  ;;  %v4283_v16 = vpop.f32.mrb[29].mxu1  ;;  %17274 = vmatmul.mubr.f32.gmra.mrb[90].mxu0 %v21426_v48  ;;  %v14865_v6 = vld [vmem:[%s24001_s5 + $0x180] sm:$0xff]  ;;  %v21561_v10 = vld [vmem:[#allocation3 + $0xa8] sm:$0xff] }
 0x309   : > { %v21442_v18 = vmax.f32 %v4367_v17, 0.0  ;;  %v19119_v58 = vadd.f32 %v4283_v16, %v21344_v49  ;;  %v14866_v17 = vld [vmem:[%s24001_s5 + $0x188] sm:$0xff]  ;;  %v21564_v16 = vld [vmem:[#allocation3 + $0xb0] sm:$0xff] }
 0x30a   : > { %4433 = vst [vmem:[#allocation3 + $0x159] sm:$0xff] %v21438_v13  ;;  %v4370_v22 = vadd.f32 %v19118_v55, %v21353_v1  ;;  %v18746_v55 = vpack.c.bf16 %v14866_v17, %v14865_v6  ;;  %v18758_v6 = vpack.c.bf16 %v14872_v2, %v14871_v5  ;;  %v21642_v17 = vld [vmem:[#allocation3 + $0x3a] sm:$0xff]  ;;  %v21666_v5 = vld [vmem:[#allocation3 + $0x6a] sm:$0xff] }
 0x30b   : > { %4432 = vst [vmem:[#allocation3 + $0x151] sm:$0xff] %v21442_v18  ;;  %v4369_v21 = vadd.f32 %v19119_v58, %v21353_v1  ;;  %v17201_v24 = vpop.f32.mrb[30].mxu1  ;;  %17276 = vmatprep.mubr.f32.mxu0 %v21442_v18  ;;  %v21567_v58 = vld [vmem:[#allocation3 + $0xc0] sm:$0xff]  ;;  %v14877_v2 = vld [vmem:[%s24001_s5 + $0x1e0] sm:$0xff] }
 0x30c   : > { %v21450_v23 = vmax.f32 %v4370_v22, 0.0  ;;  %v19120_v62 = vadd.f32 %v17201_v24, %v21346_v9  ;;  %v4293_v26 = vpop.f32.mrb[31].mxu1  ;;  %17277 = vmatmul.mubr.f32.gmra.mrb[92].mxu0 %v21438_v13  ;;  %v14851_v9 = vld [vmem:[%s24001_s5 + $0x110] sm:$0xff]  ;;  %v21570_v22 = vld [vmem:[#allocation3 + $0xc8] sm:$0xff] }
 0x30d   : > { %v21454_v28 = vmax.f32 %v4369_v21, 0.0  ;;  %v19121_v49 = vadd.f32 %v4293_v26, %v21348_v12  ;;  %v14852_v12 = vld [vmem:[%s24001_s5 + $0x118] sm:$0xff]  ;;  %v21573_v21 = vld [vmem:[#allocation3 + $0xd8] sm:$0xff]  ;;  %v21576_v24 = vld [vmem:[#allocation3 + $0xe0] sm:$0xff] }
 0x30e   : > { %4435 = vst [vmem:[#allocation3 + $0x171] sm:$0xff] %v21450_v23  ;;  %v21459_v30 = vadd.f32 %v19120_v62, %v21353_v1  ;;  %v21579_v62 = vld [vmem:[#allocation3 + $0xf0] sm:$0xff]  ;;  %v21582_v26 = vld [vmem:[#allocation3 + $0xf8] sm:$0xff]  ;;  %v21600_v27 = vld [vmem:[#allocation3 + $0x140] sm:$0xff] }
 0x30f   : > { %4434 = vst [vmem:[#allocation3 + $0x169] sm:$0xff] %v21454_v28  ;;  %v21463_v33 = vadd.f32 %v19121_v49, %v21353_v1  ;;  %17279 = vmatprep.mubr.f32.mxu0 %v21454_v28  ;;  %v18718_v1 = vpack.c.bf16 %v14852_v12, %v14851_v9  ;;  %v21585_v49 = vld [vmem:[#allocation3 + $0x108] sm:$0xff]  ;;  %v21591_v9 = vld [vmem:[#allocation3 + $0x120] sm:$0xff] }
 0x310   : > { %v24022_v25 = vmax.f32 %v21459_v30, 0.0  ;;  %17280 = vmatmul.mubr.f32.gmra.mrb[94].mxu0 %v21450_v23  ;;  %v21594_v12 = vld [vmem:[#allocation3 + $0x128] sm:$0xff] }
 0x311   : > { %v24023_v35 = vmax.f32 %v21463_v33, 0.0  ;;  %17314 = vmatprep.mubr.f32.mxu0 %v4438_v32  ;;  %v21588_v32 = vld [vmem:[#allocation3 + $0x110] sm:$0xff] }
 0x312   : > { %4437 = vst [vmem:[#allocation3 + $0x189] sm:$0xff] %v24022_v25  ;;  %v21603_v37 = vld [vmem:[#allocation3 + $0x150] sm:$0xff]  ;;  %v14880_v25 = vld [vmem:[%s24001_s5 + $0x1f8] sm:$0xff] }
 0x313   : > { %4436 = vst [vmem:[#allocation3 + $0x181] sm:$0xff] %v24023_v35  ;;  %v21687_v35 = vld [vmem:[#allocation3 + $0x92] sm:$0xff] }
 0x314   : > { %17315 = vmatmul.mubr.f32.vlgmr.msra.gmra.mrb[64].mxu0 %v21485_v41  ;;  %24146 = vst [vmem:[#allocation5_spill] sm:$0xff] %v21687_v35  ;;  %v14882_v41 = vld [vmem:[%s24001_s5 + $0x208] sm:$0xff] }
 0x315   : > { %18717 = vmatpush3.bf16.msra.mxu0 %v21299_v14  ;;  %17317 = vmatprep.mubr.f32.mxu0 %v21488_v43  ;;  %v18726_v14 = vpack.c.bf16 %v14856_v54, %v14855_v31  ;;  %v4985_v54 = vld [vmem:[#allocation3 + $0x2] sm:$0xff] }
 0x316   : > { %18719 = vmatprep.subr.bf16.mxu0 %v18718_v1  ;;  %v21609_v31 = vld [vmem:[#allocation3 + $0x168] sm:$0xff] }
 0x317   : > { %24143 = vst [vmem:[#allocation12_spill] sm:$0xff] %v21609_v31 }
 0x318   : > { %17318 = vmatmul.mubr.f32.gmra.mrb[66].mxu0 %v21492_v29 }
 0x319   : > { %17320 = vmatprep.mubr.f32.mxu0 %v21501_v56  ;;  %18721 = vmatpush3.bf16.msra.mxu0 %v18718_v1  ;;  %v21597_v1 = vld [vmem:[#allocation3 + $0x138] sm:$0xff] }
 0x31a   : > { %18723 = vmatprep.subr.bf16.mxu0 %v18722_v47 }
 0x31c   : > { %17321 = vmatmul.mubr.f32.gmra.mrb[68].mxu0 %v21504_v20 }
 0x31d   : > { %17323 = vmatprep.mubr.f32.mxu0 %v21513_v45  ;;  %18725 = vmatpush3.bf16.msra.mxu0 %v18722_v47  ;;  %v21606_v47 = vld [vmem:[#allocation3 + $0x158] sm:$0xff] }
 0x31e   : > { %18727 = vmatprep.subr.bf16.mxu0 %v18726_v14 }
 0x320   : > { %17324 = vmatmul.mubr.f32.gmra.mrb[70].mxu0 %v21516_v61 }
 0x321   : > { %17326 = vmatprep.mubr.f32.mxu0 %v21525_v38  ;;  %18729 = vmatpush3.bf16.msra.mxu0 %v18726_v14  ;;  %v21612_v14 = vld [vmem:[#allocation3 + $0x170] sm:$0xff] }
 0x322   : > { %18731 = vmatprep.subr.bf16.mxu0 %v18730_v53  ;;  %24144 = vst [vmem:[#allocation7_spill] sm:$0xff] %v21612_v14 }
 0x324   : > { %17327 = vmatmul.mubr.f32.gmra.mrb[72].mxu0 %v21528_v8 }
 0x325   : > { %17329 = vmatprep.mubr.f32.mxu0 %v21537_v44  ;;  %18733 = vmatpush3.bf16.msra.mxu0 %v18730_v53  ;;  %v4986_v53 = vld [vmem:[#allocation3 + $0xa] sm:$0xff] }
 0x326   : > { %18735 = vmatprep.subr.bf16.mxu0 %v18734_v57 }
 0x328   : > { %17330 = vmatmul.mubr.f32.gmra.mrb[74].mxu0 %v21540_v60 }
 0x329   : > { %17332 = vmatprep.mubr.f32.mxu0 %v21549_v50  ;;  %18737 = vmatpush3.bf16.msra.mxu0 %v18734_v57  ;;  %v14870_v57 = vld [vmem:[%s24001_s5 + $0x1a8] sm:$0xff] }
 0x32a   : > { %18739 = vmatprep.subr.bf16.mxu0 %v18738_v46  ;;  %v18754_v42 = vpack.c.bf16 %v14870_v57, %v14869_v4  ;;  %v14876_v4 = vld [vmem:[%s24001_s5 + $0x1d8] sm:$0xff] }
 0x32b   : > { %v21663_v57 = vld [vmem:[#allocation3 + $0x62] sm:$0xff] }
 0x32c   : > { %17333 = vmatmul.mubr.f32.gmra.mrb[76].mxu0 %v21552_v52 }
 0x32d   : > { %17335 = vmatprep.mubr.f32.mxu0 %v21561_v10  ;;  %18741 = vmatpush3.bf16.msra.mxu0 %v18738_v46  ;;  %v21630_v46 = vld [vmem:[#allocation3 + $0x22] sm:$0xff] }
 0x32e   : > { %18743 = vmatprep.subr.bf16.mxu0 %v18742_v40 }
 0x330   : > { %17336 = vmatmul.mubr.f32.gmra.mrb[78].mxu0 %v21564_v16 }
 0x331   : > { %17338 = vmatprep.mubr.f32.mxu0 %v21567_v58  ;;  %18745 = vmatpush3.bf16.msra.mxu0 %v18742_v40  ;;  %v21639_v40 = vld [vmem:[#allocation3 + $0x32] sm:$0xff] }
 0x332   : > { %18747 = vmatprep.subr.bf16.mxu0 %v18746_v55 }
 0x334   : > { %17339 = vmatmul.mubr.f32.gmra.mrb[80].mxu0 %v21570_v22 }
 0x335   : > { %17341 = vmatprep.mubr.f32.mxu0 %v21573_v21 }
 0x338   : > { %17342 = vmatmul.mubr.f32.gmra.mrb[82].mxu0 %v21576_v24 }
 0x339   : > { %17344 = vmatprep.mubr.f32.mxu0 %v21579_v62 }
 0x33c   : > { %17345 = vmatmul.mubr.f32.gmra.mrb[84].mxu0 %v21582_v26 }
 0x33d   : > { %17347 = vmatprep.mubr.f32.mxu0 %v21585_v49 }
 0x340   : > { %17348 = vmatmul.mubr.f32.gmra.mrb[86].mxu0 %v21588_v32 }
 0x341   : > { %17350 = vmatprep.mubr.f32.mxu0 %v21591_v9 }
 0x344   : > { %17351 = vmatmul.mubr.f32.gmra.mrb[88].mxu0 %v21594_v12 }
 0x345   : > { %17353 = vmatprep.mubr.f32.mxu0 %v21597_v1 }
 0x348   : > { %17354 = vmatmul.mubr.f32.gmra.mrb[90].mxu0 %v21600_v27 }
 0x349   : > { %17356 = vmatprep.mubr.f32.mxu0 %v21603_v37 }
 0x34c   : > { %17357 = vmatmul.mubr.f32.gmra.mrb[92].mxu0 %v21606_v47 }
 0x34d   : > { %17359 = vmatprep.mubr.f32.mxu0 %v21609_v31 }
 0x350   : > { %17360 = vmatmul.mubr.f32.gmra.mrb[94].mxu0 %v21612_v14 }
 0x351   : > { %17394 = vmatprep.mubr.f32.mxu0 %v4985_v54  ;;  %v14874_v54 = vld [vmem:[%s24001_s5 + $0x1c8] sm:$0xff] }
 0x354   : > { %17395 = vmatmul.mubr.f32.vlgmr.msra.gmra.mrb[64].mxu0 %v4986_v53  ;;  %v21654_v53 = vld [vmem:[#allocation3 + $0x52] sm:$0xff] }
 0x355   : > { %18749 = vmatpush3.bf16.msra.mxu0 %v18746_v55  ;;  %17397 = vmatprep.mubr.f32.mxu0 %v21627_v3  ;;  %v14873_v55 = vld [vmem:[%s24001_s5 + $0x1c0] sm:$0xff] }
 0x356   : > { %18751 = vmatprep.subr.bf16.mxu0 %v18750_v36  ;;  %v18762_v34 = vpack.c.bf16 %v14874_v54, %v14873_v55  ;;  %v14878_v55 = vld [vmem:[%s24001_s5 + $0x1e8] sm:$0xff] }
 0x357   : > { %v21675_v54 = vld [vmem:[#allocation3 + $0x7a] sm:$0xff] }
 0x358   : > { %17398 = vmatmul.mubr.f32.gmra.mrb[66].mxu0 %v21630_v46 }
 0x359   : > { %17400 = vmatprep.mubr.f32.mxu0 %v21639_v40  ;;  %18753 = vmatpush3.bf16.msra.mxu0 %v18750_v36  ;;  %v14875_v36 = vld [vmem:[%s24001_s5 + $0x1d0] sm:$0xff] }
 0x35a   : > { %18755 = vmatprep.subr.bf16.mxu0 %v18754_v42 }
 0x35c   : > { %17401 = vmatmul.mubr.f32.gmra.mrb[68].mxu0 %v21642_v17 }
 0x35d   : > { %17403 = vmatprep.mubr.f32.mxu0 %v21651_v0  ;;  %18757 = vmatpush3.bf16.msra.mxu0 %v18754_v42  ;;  %v18766_v42 = vpack.c.bf16 %v14876_v4, %v14875_v36  ;;  %v21678_v36 = vld [vmem:[#allocation3 + $0x82] sm:$0xff] }
 0x35e   : > { %18759 = vmatprep.subr.bf16.mxu0 %v18758_v6  ;;  %24145 = vst [vmem:[#allocation8_spill] sm:$0xff] %v21678_v36  ;;  %v14879_v4 = vld [vmem:[%s24001_s5 + $0x1f0] sm:$0xff] }
 0x360   : > { %17404 = vmatmul.mubr.f32.gmra.mrb[70].mxu0 %v21654_v53 }
 0x361   : > { %17406 = vmatprep.mubr.f32.mxu0 %v21663_v57  ;;  %18761 = vmatpush3.bf16.msra.mxu0 %v18758_v6  ;;  %v18770_v6 = vpack.c.bf16 %v14878_v55, %v14877_v2  ;;  %v21690_v2 = vld [vmem:[#allocation3 + $0x9a] sm:$0xff]  ;;  %v14881_v55 = vld [vmem:[%s24001_s5 + $0x200] sm:$0xff] }
 0x362   : > { %18763 = vmatprep.subr.bf16.mxu0 %v18762_v34  ;;  %24147 = vst [vmem:[#allocation6_spill] sm:$0xff] %v21690_v2 }
 0x364   : > { %17407 = vmatmul.mubr.f32.gmra.mrb[72].mxu0 %v21666_v5 }
 0x365   : > { %17409 = vmatprep.mubr.f32.mxu0 %v21675_v54  ;;  %18765 = vmatpush3.bf16.msra.mxu0 %v18762_v34  ;;  %v18774_v34 = vpack.c.bf16 %v14880_v25, %v14879_v4  ;;  %v21702_v25 = vld [vmem:[#allocation3 + $0xb2] sm:$0xff]  ;;  %v21705_v4 = vld [vmem:[#allocation3 + $0xc2] sm:$0xff] }
 0x366   : > { %18767 = vmatprep.subr.bf16.mxu0 %v18766_v42  ;;  %24148 = vst [vmem:[#allocation9_spill] sm:$0xff] %v21705_v4 }
 0x368   : > { %17410 = vmatmul.mubr.f32.gmra.mrb[74].mxu0 %v21678_v36  ;;  %v21699_v36 = vld [vmem:[#allocation3 + $0xaa] sm:$0xff] }
 0x369   : > { %17412 = vmatprep.mubr.f32.mxu0 %v21687_v35  ;;  %18769 = vmatpush3.bf16.msra.mxu0 %v18766_v42  ;;  %v18778_v42 = vpack.c.bf16 %v14882_v41, %v14881_v55  ;;  %v21708_v35 = vld [vmem:[#allocation3 + $0xca] sm:$0xff]  ;;  %v21717_v41 = vld [vmem:[#allocation3 + $0xf2] sm:$0xff]  ;;  %v21720_v55 = vld [vmem:[#allocation3 + $0xfa] sm:$0xff] }
 0x36a   : > { %18771 = vmatprep.subr.bf16.mxu0 %v18770_v6  ;;  %24149 = vst [vmem:[#allocation11_spill] sm:$0xff] %v21708_v35  ;;  %24152 = vst [vmem:[#allocation15_spill] sm:$0xff] %v21717_v41 }
 0x36b   : > { %24153 = vst [vmem:[#allocation16_spill] sm:$0xff] %v21720_v55 }
 0x36c   : > { %17413 = vmatmul.mubr.f32.gmra.mrb[76].mxu0 %v21690_v2  ;;  %v21711_v2 = vld [vmem:[#allocation3 + $0xda] sm:$0xff] }
 0x36d   : > { %17415 = vmatprep.mubr.f32.mxu0 %v21699_v36  ;;  %18773 = vmatpush3.bf16.msra.mxu0 %v18770_v6  ;;  %24150 = vst [vmem:[#allocation13_spill] sm:$0xff] %v21711_v2  ;;  %v21714_v6 = vld [vmem:[#allocation3 + $0xe2] sm:$0xff] }
 0x36e   : > { %18775 = vmatprep.subr.bf16.mxu0 %v18774_v34  ;;  %24151 = vst [vmem:[#allocation14_spill] sm:$0xff] %v21714_v6 }
 0x370   : > { %17416 = vmatmul.mubr.f32.gmra.mrb[78].mxu0 %v21702_v25 }
 0x371   : > { %17418 = vmatprep.mubr.f32.mxu0 %v21705_v4  ;;  %18777 = vmatpush3.bf16.msra.mxu0 %v18774_v34  ;;  %v21723_v34 = vld [vmem:[#allocation3 + $0x10a] sm:$0xff] }
 0x372   : > { %18779 = vmatprep.subr.bf16.mxu0 %v18778_v42  ;;  %24154 = vst [vmem:[#allocation17_spill] sm:$0xff] %v21723_v34 }
 0x374   : > { %17419 = vmatmul.mubr.f32.gmra.mrb[80].mxu0 %v21708_v35  ;;  %v21726_v35 = vld [vmem:[#allocation3 + $0x112] sm:$0xff] }
 0x375   : > { %17421 = vmatprep.mubr.f32.mxu0 %v21711_v2  ;;  %24155 = vst [vmem:[#allocation18_spill] sm:$0xff] %v21726_v35  ;;  %v21729_v2 = vld [vmem:[#allocation3 + $0x122] sm:$0xff] }
 0x376   : > { %24156 = vst [vmem:[#allocation19_spill] sm:$0xff] %v21729_v2 }
 0x378   : > { %17422 = vmatmul.mubr.f32.gmra.mrb[82].mxu0 %v21714_v6  ;;  %v21732_v6 = vld [vmem:[#allocation3 + $0x12a] sm:$0xff] }
 0x379   : > { %17424 = vmatprep.mubr.f32.mxu0 %v21717_v41  ;;  %24157 = vst [vmem:[#allocation20_spill] sm:$0xff] %v21732_v6  ;;  %v21735_v41 = vld [vmem:[#allocation3 + $0x13a] sm:$0xff] }
 0x37a   : > { %24158 = vst [vmem:[#allocation21_spill] sm:$0xff] %v21735_v41 }
 0x37c   : > { %17425 = vmatmul.mubr.f32.gmra.mrb[84].mxu0 %v21720_v55  ;;  %v21738_v55 = vld [vmem:[#allocation3 + $0x142] sm:$0xff] }
 0x37d   : > { %17427 = vmatprep.mubr.f32.mxu0 %v21723_v34  ;;  %24159 = vst [vmem:[#allocation22_spill] sm:$0xff] %v21738_v55  ;;  %v21741_v34 = vld [vmem:[#allocation3 + $0x152] sm:$0xff] }
 0x37e   : > { %24160 = vst [vmem:[#allocation23_spill] sm:$0xff] %v21741_v34 }
 0x380   : > { %17428 = vmatmul.mubr.f32.gmra.mrb[86].mxu0 %v21726_v35  ;;  %v21744_v35 = vld [vmem:[#allocation3 + $0x15a] sm:$0xff] }
 0x381   : > { %17430 = vmatprep.mubr.f32.mxu0 %v21729_v2  ;;  %24161 = vst [vmem:[#allocation24_spill] sm:$0xff] %v21744_v35  ;;  %v21747_v2 = vld [vmem:[#allocation3 + $0x16a] sm:$0xff] }
 0x382   : > { %24162 = vst [vmem:[#allocation25_spill] sm:$0xff] %v21747_v2 }
 0x384   : > { %17431 = vmatmul.mubr.f32.gmra.mrb[88].mxu0 %v21732_v6  ;;  %v21750_v6 = vld [vmem:[#allocation3 + $0x172] sm:$0xff] }
 0x385   : > { %17433 = vmatprep.mubr.f32.mxu0 %v21735_v41  ;;  %v14883_v41 = vld [vmem:[%s24001_s5 + $0x210] sm:$0xff] }
 0x388   : > { %17434 = vmatmul.mubr.f32.gmra.mrb[90].mxu0 %v21738_v55  ;;  %v14884_v55 = vld [vmem:[%s24001_s5 + $0x218] sm:$0xff] }
 0x389   : > { %17436 = vmatprep.mubr.f32.mxu0 %v21741_v34  ;;  %v18782_v34 = vpack.c.bf16 %v14884_v55, %v14883_v41  ;;  %v14888_v41 = vld [vmem:[%s24001_s5 + $0x238] sm:$0xff]  ;;  %v14891_v55 = vld [vmem:[%s24001_s5 + $0x250] sm:$0xff] }
 0x38c   : > { %17437 = vmatmul.mubr.f32.gmra.mrb[92].mxu0 %v21744_v35  ;;  %v14885_v35 = vld [vmem:[%s24001_s5 + $0x220] sm:$0xff] }
 0x38d   : > { %17439 = vmatprep.mubr.f32.mxu0 %v21747_v2  ;;  %v14886_v2 = vld [vmem:[%s24001_s5 + $0x228] sm:$0xff] }
 0x38e   : > { %v18786_v4 = vpack.c.bf16 %v14886_v2, %v14885_v35  ;;  %v14890_v35 = vld [vmem:[%s24001_s5 + $0x248] sm:$0xff] }
 0x390   : > { %17440 = vmatmul.mubr.f32.gmra.mrb[94].mxu0 %v21750_v6 }
 0x391   : > { %17474 = vmatprep.mubr.f32.mxu0 %v21488_v43  ;;  %v14887_v43 = vld [vmem:[%s24001_s5 + $0x230] sm:$0xff] }
 0x394   : > { %17475 = vmatmul.mubr.f32.vlgmr.msra.gmra.mrb[64].mxu0 %v21492_v29  ;;  %v18790_v29 = vpack.c.bf16 %v14888_v41, %v14887_v43  ;;  %v14894_v41 = vld [vmem:[%s24001_s5 + $0x268] sm:$0xff] }
 0x395   : > { %18781 = vmatpush3.bf16.msra.mxu0 %v18778_v42  ;;  %17477 = vmatprep.mubr.f32.mxu0 %v21501_v56  ;;  %v14889_v42 = vld [vmem:[%s24001_s5 + $0x240] sm:$0xff] }
 0x396   : > { %18783 = vmatprep.subr.bf16.mxu0 %v18782_v34  ;;  %v18794_v2 = vpack.c.bf16 %v14890_v35, %v14889_v42  ;;  %v14896_v35 = vld [vmem:[%s24001_s5 + $0x278] sm:$0xff] }
 0x398   : > { %17478 = vmatmul.mubr.f32.gmra.mrb[66].mxu0 %v21504_v20 }
 0x399   : > { %17480 = vmatprep.mubr.f32.mxu0 %v21513_v45  ;;  %18785 = vmatpush3.bf16.msra.mxu0 %v18782_v34  ;;  %v14892_v34 = vld [vmem:[%s24001_s5 + $0x258] sm:$0xff] }
 0x39a   : > { %18787 = vmatprep.subr.bf16.mxu0 %v18786_v4  ;;  %v18798_v43 = vpack.c.bf16 %v14892_v34, %v14891_v55  ;;  %v14898_v34 = vld [vmem:[%s24001_s5 + $0x288] sm:$0xff] }
 0x39c   : > { %17481 = vmatmul.mubr.f32.gmra.mrb[68].mxu0 %v21516_v61 }
 0x39d   : > { %17483 = vmatprep.mubr.f32.mxu0 %v21525_v38  ;;  %18789 = vmatpush3.bf16.msra.mxu0 %v18786_v4  ;;  %v14893_v4 = vld [vmem:[%s24001_s5 + $0x260] sm:$0xff] }
 0x39e   : > { %18791 = vmatprep.subr.bf16.mxu0 %v18790_v29  ;;  %v18802_v42 = vpack.c.bf16 %v14894_v41, %v14893_v4  ;;  %v21834_v41 = vld [vmem:[#allocation3 + $0x188] sm:$0xff] }
 0x39f   : > { %24164 = vst [vmem:[#allocation27_spill] sm:$0xff] %v21834_v41 }
 0x3a0   : > { %17484 = vmatmul.mubr.f32.gmra.mrb[70].mxu0 %v21528_v8 }
 0x3a1   : > { %17486 = vmatprep.mubr.f32.mxu0 %v21537_v44  ;;  %18793 = vmatpush3.bf16.msra.mxu0 %v18790_v29  ;;  %v14895_v29 = vld [vmem:[%s24001_s5 + $0x270] sm:$0xff] }
 0x3a2   : > { %18795 = vmatprep.subr.bf16.mxu0 %v18794_v2  ;;  %v18806_v55 = vpack.c.bf16 %v14896_v35, %v14895_v29  ;;  %v14900_v29 = vld [vmem:[%s24001_s5 + $0x298] sm:$0xff]  ;;  %v5597_v35 = vld [vmem:[#allocation3 + $0x19] sm:$0xff] }
 0x3a4   : > { %17487 = vmatmul.mubr.f32.gmra.mrb[72].mxu0 %v21540_v60 }
 0x3a5   : > { %17489 = vmatprep.mubr.f32.mxu0 %v21549_v50  ;;  %18797 = vmatpush3.bf16.msra.mxu0 %v18794_v2  ;;  %v14897_v2 = vld [vmem:[%s24001_s5 + $0x280] sm:$0xff] }
 0x3a6   : > { %18799 = vmatprep.subr.bf16.mxu0 %v18798_v43  ;;  %v18810_v4 = vpack.c.bf16 %v14898_v34, %v14897_v2  ;;  %v5598_v2 = vld [vmem:[#allocation3 + $0x21] sm:$0xff]  ;;  %v14901_v34 = vld [vmem:[%s24001_s5 + $0x2a0] sm:$0xff] }
 0x3a8   : > { %17490 = vmatmul.mubr.f32.gmra.mrb[74].mxu0 %v21552_v52 }
 0x3a9   : > { %17492 = vmatprep.mubr.f32.mxu0 %v21561_v10  ;;  %18801 = vmatpush3.bf16.msra.mxu0 %v18798_v43  ;;  %v21831_v43 = vld [vmem:[#allocation3 + $0x180] sm:$0xff] }
 0x3aa   : > { %18803 = vmatprep.subr.bf16.mxu0 %v18802_v42  ;;  %24163 = vst [vmem:[#allocation26_spill] sm:$0xff] %v21831_v43 }
 0x3ac   : > { %17493 = vmatmul.mubr.f32.gmra.mrb[76].mxu0 %v21564_v16 }
 0x3ad   : > { %17495 = vmatprep.mubr.f32.mxu0 %v21567_v58  ;;  %18805 = vmatpush3.bf16.msra.mxu0 %v18802_v42  ;;  %v14899_v42 = vld [vmem:[%s24001_s5 + $0x290] sm:$0xff] }
 0x3ae   : > { %18807 = vmatprep.subr.bf16.mxu0 %v18806_v55 }
 0x3b0   : > { %17496 = vmatmul.mubr.f32.gmra.mrb[78].mxu0 %v21570_v22 }
 0x3b1   : > { %17498 = vmatprep.mubr.f32.mxu0 %v21573_v21  ;;  %18809 = vmatpush3.bf16.msra.mxu0 %v18806_v55  ;;  %v18814_v55 = vpack.c.bf16 %v14900_v29, %v14899_v42  ;;  %v14903_v42 = vld [vmem:[%s24001_s5 + $0x2b0] sm:$0xff]  ;;  %v14904_v29 = vld [vmem:[%s24001_s5 + $0x2b8] sm:$0xff] }
 0x3b2   : > { %18811 = vmatprep.subr.bf16.mxu0 %v18810_v4 }
 0x3b4   : > { %17499 = vmatmul.mubr.f32.gmra.mrb[80].mxu0 %v21576_v24 }
 0x3b5   : > { %17501 = vmatprep.mubr.f32.mxu0 %v21579_v62 }
 0x3b8   : > { %17502 = vmatmul.mubr.f32.gmra.mrb[82].mxu0 %v21582_v26 }
 0x3b9   : > { %17504 = vmatprep.mubr.f32.mxu0 %v21585_v49 }
 0x3bc   : > { %17505 = vmatmul.mubr.f32.gmra.mrb[84].mxu0 %v21588_v32 }
 0x3bd   : > { %17507 = vmatprep.mubr.f32.mxu0 %v21591_v9 }
 0x3c0   : > { %17508 = vmatmul.mubr.f32.gmra.mrb[86].mxu0 %v21594_v12 }
 0x3c1   : > { %17510 = vmatprep.mubr.f32.mxu0 %v21597_v1 }
 0x3c4   : > { %17511 = vmatmul.mubr.f32.gmra.mrb[88].mxu0 %v21600_v27 }
 0x3c5   : > { %17513 = vmatprep.mubr.f32.mxu0 %v21603_v37 }
 0x3c8   : > { %17514 = vmatmul.mubr.f32.gmra.mrb[90].mxu0 %v21606_v47 }
 0x3c9   : > { %17516 = vmatprep.mubr.f32.mxu0 %v21609_v31  ;;  %v21852_v31 = vld [vmem:[#allocation3 + $0x39] sm:$0xff] }
 0x3ca   : > { %24165 = vst [vmem:[#allocation28_spill] sm:$0xff] %v21852_v31 }
 0x3cc   : > { %17517 = vmatmul.mubr.f32.gmra.mrb[92].mxu0 %v21612_v14  ;;  %v21849_v14 = vld [vmem:[#allocation3 + $0x31] sm:$0xff] }
 0x3cd   : > { %17519 = vmatprep.mubr.f32.mxu0 %v21831_v43  ;;  %v14902_v43 = vld [vmem:[%s24001_s5 + $0x2a8] sm:$0xff] }
 0x3d0   : > { %17520 = vmatmul.mubr.f32.gmra.mrb[94].mxu0 %v21834_v41  ;;  %v18818_v41 = vpack.c.bf16 %v14902_v43, %v14901_v34  ;;  %v21864_v43 = vld [vmem:[#allocation3 + $0x51] sm:$0xff] }
 0x3d1   : > { %17554 = vmatprep.mubr.f32.mxu0 %v5597_v35  ;;  %v21861_v35 = vld [vmem:[#allocation3 + $0x49] sm:$0xff]  ;;  %24167 = vst [vmem:[#allocation30_spill] sm:$0xff] %v21864_v43  ;;  %v14906_v34 = vld [vmem:[%s24001_s5 + $0x2c8] sm:$0xff] }
 0x3d2   : > { %24166 = vst [vmem:[#allocation29_spill] sm:$0xff] %v21861_v35 }
 0x3d4   : > { %17555 = vmatmul.mubr.f32.vlgmr.msra.gmra.mrb[64].mxu0 %v5598_v2  ;;  %v14905_v2 = vld [vmem:[%s24001_s5 + $0x2c0] sm:$0xff] }
 0x3d5   : > { %18813 = vmatpush3.bf16.msra.mxu0 %v18810_v4  ;;  %17557 = vmatprep.mubr.f32.mxu0 %v21849_v14  ;;  %v18822_v4 = vpack.c.bf16 %v14904_v29, %v14903_v42  ;;  %v21876_v42 = vld [vmem:[#allocation3 + $0x69] sm:$0xff]  ;;  %v14907_v29 = vld [vmem:[%s24001_s5 + $0x2d0] sm:$0xff] }
 0x3d6   : > { %18815 = vmatprep.subr.bf16.mxu0 %v18814_v55  ;;  %24169 = vst [vmem:[#allocation32_spill] sm:$0xff] %v21876_v42 }
 0x3d8   : > { %17558 = vmatmul.mubr.f32.gmra.mrb[66].mxu0 %v21852_v31  ;;  %v21873_v31 = vld [vmem:[#allocation3 + $0x61] sm:$0xff] }
 0x3d9   : > { %17560 = vmatprep.mubr.f32.mxu0 %v21861_v35  ;;  %18817 = vmatpush3.bf16.msra.mxu0 %v18814_v55  ;;  %24168 = vst [vmem:[#allocation31_spill] sm:$0xff] %v21873_v31  ;;  %v18826_v55 = vpack.c.bf16 %v14906_v34, %v14905_v2  ;;  %v14908_v35 = vld [vmem:[%s24001_s5 + $0x2d8] sm:$0xff]  ;;  %v14909_v34 = vld [vmem:[%s24001_s5 + $0x2e0] sm:$0xff] }
 0x3da   : > { %18819 = vmatprep.subr.bf16.mxu0 %v18818_v41  ;;  %v21888_v2 = vld [vmem:[#allocation3 + $0x81] sm:$0xff] }
 0x3db   : > { %24171 = vst [vmem:[#allocation34_spill] sm:$0xff] %v21888_v2 }
 0x3dc   : > { %17561 = vmatmul.mubr.f32.gmra.mrb[68].mxu0 %v21864_v43  ;;  %v21885_v43 = vld [vmem:[#allocation3 + $0x79] sm:$0xff] }
 0x3dd   : > { %17563 = vmatprep.mubr.f32.mxu0 %v21873_v31  ;;  %18821 = vmatpush3.bf16.msra.mxu0 %v18818_v41  ;;  %24170 = vst [vmem:[#allocation33_spill] sm:$0xff] %v21885_v43  ;;  %v18830_v41 = vpack.c.bf16 %v14908_v35, %v14907_v29  ;;  %v14910_v31 = vld [vmem:[%s24001_s5 + $0x2e8] sm:$0xff]  ;;  %v14911_v29 = vld [vmem:[%s24001_s5 + $0x2f0] sm:$0xff] }
 0x3de   : > { %18823 = vmatprep.subr.bf16.mxu0 %v18822_v4  ;;  %v21900_v35 = vld [vmem:[#allocation3 + $0x99] sm:$0xff] }
 0x3df   : > { %24173 = vst [vmem:[#allocation36_spill] sm:$0xff] %v21900_v35 }
 0x3e0   : > { %17564 = vmatmul.mubr.f32.gmra.mrb[70].mxu0 %v21876_v42  ;;  %v21897_v42 = vld [vmem:[#allocation3 + $0x91] sm:$0xff] }
 0x3e1   : > { %17566 = vmatprep.mubr.f32.mxu0 %v21885_v43  ;;  %18825 = vmatpush3.bf16.msra.mxu0 %v18822_v4  ;;  %24172 = vst [vmem:[#allocation35_spill] sm:$0xff] %v21897_v42  ;;  %v18834_v4 = vpack.c.bf16 %v14910_v31, %v14909_v34  ;;  %v14912_v43 = vld [vmem:[%s24001_s5 + $0x2f8] sm:$0xff]  ;;  %v21912_v31 = vld [vmem:[#allocation3 + $0xb1] sm:$0xff] }
 0x3e2   : > { %18827 = vmatprep.subr.bf16.mxu0 %v18826_v55  ;;  %v14913_v34 = vld [vmem:[%s24001_s5 + $0x300] sm:$0xff] }
 0x3e4   : > { %17567 = vmatmul.mubr.f32.gmra.mrb[72].mxu0 %v21888_v2  ;;  %v21909_v2 = vld [vmem:[#allocation3 + $0xa9] sm:$0xff] }
 0x3e5   : > { %17569 = vmatprep.mubr.f32.mxu0 %v21897_v42  ;;  %18829 = vmatpush3.bf16.msra.mxu0 %v18826_v55  ;;  %v18838_v55 = vpack.c.bf16 %v14912_v43, %v14911_v29  ;;  %v14914_v42 = vld [vmem:[%s24001_s5 + $0x308] sm:$0xff]  ;;  %v21924_v43 = vld [vmem:[#allocation3 + $0xc9] sm:$0xff]  ;;  %v21928_v29 = vld [vmem:[#allocation3 + $0xe1] sm:$0xff] }
 0x3e6   : > { %18831 = vmatprep.subr.bf16.mxu0 %v18830_v41 }
 0x3e8   : > { %17570 = vmatmul.mubr.f32.gmra.mrb[74].mxu0 %v21900_v35  ;;  %v21921_v35 = vld [vmem:[#allocation3 + $0xc1] sm:$0xff] }
 0x3e9   : > { %17572 = vmatprep.mubr.f32.mxu0 %v21909_v2  ;;  %18833 = vmatpush3.bf16.msra.mxu0 %v18830_v41  ;;  %v18842_v41 = vpack.c.bf16 %v14914_v42, %v14913_v34  ;;  %v24178_v42 = vld [vmem:[#allocation6_spill] sm:$0xff] }
 0x3ea   : > { %18835 = vmatprep.subr.bf16.mxu0 %v18834_v4  ;;  %v14930_v34 = vld [vmem:[%s24001_s5 + $0x388] sm:$0xff] }
 0x3ec   : > { %17573 = vmatmul.mubr.f32.gmra.mrb[76].mxu0 %v21912_v31 }
 0x3ed   : > { %17575 = vmatprep.mubr.f32.mxu0 %v21921_v35  ;;  %18837 = vmatpush3.bf16.msra.mxu0 %v18834_v4 }
 0x3ee   : > { %18839 = vmatprep.subr.bf16.mxu0 %v18838_v55 }
 0x3f0   : > { %17576 = vmatmul.mubr.f32.gmra.mrb[78].mxu0 %v21924_v43 }
 0x3f1   : > { %17578 = vmatprep.mubr.f32.mxu0 %v21384_v51  ;;  %18841 = vmatpush3.bf16.msra.mxu0 %v18838_v55  ;;  %v24174_v51 = vmax.f32 %v21463_v33, 0.0  ;;  %v14923_v33 = vld [vmem:[%s24001_s5 + $0x350] sm:$0xff]  ;;  %v14929_v55 = vld [vmem:[%s24001_s5 + $0x380] sm:$0xff] }
 0x3f2   : > { %18843 = vmatprep.subr.bf16.mxu0 %v18842_v41 }
 0x3f4   : > { %17579 = vmatmul.mubr.f32.gmra.mrb[80].mxu0 %v21928_v29 }
 0x3f5   : > { %17581 = vmatprep.mubr.f32.mxu0 %v21394_v39  ;;  %v14916_v39 = vld [vmem:[%s24001_s5 + $0x318] sm:$0xff] }
 0x3f8   : > { %17582 = vmatmul.mubr.f32.gmra.mrb[82].mxu0 %v21391_v59  ;;  %v14915_v59 = vld [vmem:[%s24001_s5 + $0x310] sm:$0xff] }
 0x3f9   : > { %17584 = vmatprep.mubr.f32.mxu0 %v21406_v19  ;;  %v18846_v19 = vpack.c.bf16 %v14916_v39, %v14915_v59  ;;  %v24180_v59 = vld [vmem:[#allocation11_spill] sm:$0xff]  ;;  %v24182_v39 = vld [vmem:[#allocation14_spill] sm:$0xff] }
 0x3fc   : > { %17585 = vmatmul.mubr.f32.gmra.mrb[84].mxu0 %v21402_v63  ;;  %v24175_v63 = vmax.f32 %v21459_v30, 0.0 }
 0x3fd   : > { %17587 = vmatprep.mubr.f32.mxu0 %v21418_v11  ;;  %v14918_v11 = vld [vmem:[%s24001_s5 + $0x328] sm:$0xff] }
 0x400   : > { %17588 = vmatmul.mubr.f32.gmra.mrb[86].mxu0 %v21414_v7  ;;  %v14917_v7 = vld [vmem:[%s24001_s5 + $0x320] sm:$0xff] }
 0x401   : > { %17590 = vmatprep.mubr.f32.mxu0 %v21430_v15  ;;  %v14919_v15 = vld [vmem:[%s24001_s5 + $0x330] sm:$0xff] }
 0x404   : > { %17591 = vmatmul.mubr.f32.gmra.mrb[88].mxu0 %v21426_v48  ;;  %v18850_v48 = vpack.c.bf16 %v14918_v11, %v14917_v7  ;;  %v24185_v7 = vld [vmem:[#allocation17_spill] sm:$0xff]  ;;  %v24187_v11 = vld [vmem:[#allocation19_spill] sm:$0xff] }
 0x405   : > { %17593 = vmatprep.mubr.f32.mxu0 %v21442_v18 }
 0x408   : > { %17594 = vmatmul.mubr.f32.gmra.mrb[90].mxu0 %v21438_v13  ;;  %v14920_v13 = vld [vmem:[%s24001_s5 + $0x338] sm:$0xff] }
 0x409   : > { %17596 = vmatprep.mubr.f32.mxu0 %v21454_v28  ;;  %v18854_v18 = vpack.c.bf16 %v14920_v13, %v14919_v15  ;;  %v14922_v28 = vld [vmem:[%s24001_s5 + $0x348] sm:$0xff] }
 0x40a   : > { %v24189_v15 = vld [vmem:[#allocation21_spill] sm:$0xff]  ;;  %v24190_v13 = vld [vmem:[#allocation22_spill] sm:$0xff] }
 0x40c   : > { %17597 = vmatmul.mubr.f32.gmra.mrb[92].mxu0 %v21450_v23  ;;  %v14921_v23 = vld [vmem:[%s24001_s5 + $0x340] sm:$0xff] }
 0x40d   : > { %17599 = vmatprep.mubr.f32.mxu0 %v24174_v51  ;;  %v18858_v30 = vpack.c.bf16 %v14922_v28, %v14921_v23  ;;  %v18874_v51 = vpack.c.bf16 %v14930_v34, %v14929_v55  ;;  %v24192_v23 = vld [vmem:[#allocation24_spill] sm:$0xff]  ;;  %v24193_v28 = vld [vmem:[#allocation25_spill] sm:$0xff] }
 0x40e   : > { %v14949_v55 = vld [vmem:[%s24001_s5 + $0x420] sm:$0xff] }
 0x410   : > { %17600 = vmatmul.mubr.f32.gmra.mrb[94].mxu0 %v24175_v63  ;;  %v24183_v63 = vld [vmem:[#allocation15_spill] sm:$0xff] }
 0x411   : > { %17634 = vmatprep.mubr.f32.mxu0 %v21627_v3  ;;  %v14924_v3 = vld [vmem:[%s24001_s5 + $0x358] sm:$0xff] }
 0x414   : > { %17635 = vmatmul.mubr.f32.vlgmr.msra.gmra.mrb[64].mxu0 %v21630_v46  ;;  %v18862_v46 = vpack.c.bf16 %v14924_v3, %v14923_v33  ;;  %v22028_v33 = vld [vmem:[#allocation3 + $0x18a] sm:$0xff]  ;;  %v14931_v3 = vld [vmem:[%s24001_s5 + $0x390] sm:$0xff] }
 0x415   : > { %18845 = vmatpush3.bf16.msra.mxu0 %v18842_v41  ;;  %17637 = vmatprep.mubr.f32.mxu0 %v21639_v40  ;;  %v14925_v40 = vld [vmem:[%s24001_s5 + $0x360] sm:$0xff] }
 0x416   : > { %18847 = vmatprep.subr.bf16.mxu0 %v18846_v19  ;;  %v24179_v41 = vld [vmem:[#allocation9_spill] sm:$0xff] }
 0x418   : > { %17638 = vmatmul.mubr.f32.gmra.mrb[66].mxu0 %v21642_v17  ;;  %v14926_v17 = vld [vmem:[%s24001_s5 + $0x368] sm:$0xff] }
 0x419   : > { %17640 = vmatprep.mubr.f32.mxu0 %v21651_v0  ;;  %18849 = vmatpush3.bf16.msra.mxu0 %v18846_v19  ;;  %v24176_v0 = vld [vmem:[#allocation8_spill] sm:$0xff] }
 0x41a   : > { %18851 = vmatprep.subr.bf16.mxu0 %v18850_v48  ;;  %v24184_v19 = vld [vmem:[#allocation16_spill] sm:$0xff] }
 0x41c   : > { %17641 = vmatmul.mubr.f32.gmra.mrb[68].mxu0 %v21654_v53  ;;  %v24177_v53 = vld [vmem:[#allocation5_spill] sm:$0xff] }
 0x41d   : > { %17643 = vmatprep.mubr.f32.mxu0 %v21663_v57  ;;  %18853 = vmatpush3.bf16.msra.mxu0 %v18850_v48  ;;  %v18866_v57 = vpack.c.bf16 %v14926_v17, %v14925_v40  ;;  %v24188_v48 = vld [vmem:[#allocation20_spill] sm:$0xff]  ;;  %v14934_v17 = vld [vmem:[%s24001_s5 + $0x3a8] sm:$0xff] }
 0x41e   : > { %18855 = vmatprep.subr.bf16.mxu0 %v18854_v18 }
 0x420   : > { %17644 = vmatmul.mubr.f32.gmra.mrb[70].mxu0 %v21666_v5  ;;  %v14927_v5 = vld [vmem:[%s24001_s5 + $0x370] sm:$0xff] }
 0x421   : > { %17646 = vmatprep.mubr.f32.mxu0 %v21675_v54  ;;  %18857 = vmatpush3.bf16.msra.mxu0 %v18854_v18  ;;  %v14928_v54 = vld [vmem:[%s24001_s5 + $0x378] sm:$0xff] }
 0x422   : > { %18859 = vmatprep.subr.bf16.mxu0 %v18858_v30  ;;  %v18870_v4 = vpack.c.bf16 %v14928_v54, %v14927_v5  ;;  %v24191_v18 = vld [vmem:[#allocation23_spill] sm:$0xff]  ;;  %v14942_v54 = vld [vmem:[%s24001_s5 + $0x3e8] sm:$0xff] }
 0x423   : > { %v14940_v5 = vld [vmem:[%s24001_s5 + $0x3d8] sm:$0xff] }
 0x424   : > { %17647 = vmatmul.mubr.f32.gmra.mrb[72].mxu0 %v24176_v0 }
 0x425   : > { %17649 = vmatprep.mubr.f32.mxu0 %v24177_v53  ;;  %18861 = vmatpush3.bf16.msra.mxu0 %v18858_v30  ;;  %v22025_v30 = vld [vmem:[#allocation3 + $0x182] sm:$0xff] }
 0x426   : > { %18863 = vmatprep.subr.bf16.mxu0 %v18862_v46  ;;  %v14936_v53 = vld [vmem:[%s24001_s5 + $0x3b8] sm:$0xff] }
 0x428   : > { %17650 = vmatmul.mubr.f32.gmra.mrb[74].mxu0 %v24178_v42  ;;  %v14944_v42 = vld [vmem:[%s24001_s5 + $0x3f8] sm:$0xff] }
 0x429   : > { %17652 = vmatprep.mubr.f32.mxu0 %v21699_v36  ;;  %18865 = vmatpush3.bf16.msra.mxu0 %v18862_v46  ;;  %v24181_v36 = vld [vmem:[#allocation13_spill] sm:$0xff]  ;;  %v14932_v46 = vld [vmem:[%s24001_s5 + $0x398] sm:$0xff] }
 0x42a   : > { %18867 = vmatprep.subr.bf16.mxu0 %v18866_v57  ;;  %v18878_v40 = vpack.c.bf16 %v14932_v46, %v14931_v3  ;;  %v24203_v3 = vld [vmem:[#allocation32_spill] sm:$0xff]  ;;  %v24204_v46 = vld [vmem:[#allocation33_spill] sm:$0xff] }
 0x42c   : > { %17653 = vmatmul.mubr.f32.gmra.mrb[76].mxu0 %v21702_v25  ;;  %v24186_v25 = vld [vmem:[#allocation18_spill] sm:$0xff] }
 0x42d   : > { %17655 = vmatprep.mubr.f32.mxu0 %v24179_v41  ;;  %18869 = vmatpush3.bf16.msra.mxu0 %v18866_v57  ;;  %v14938_v57 = vld [vmem:[%s24001_s5 + $0x3c8] sm:$0xff] }
 0x42e   : > { %18871 = vmatprep.subr.bf16.mxu0 %v18870_v4  ;;  %v14950_v41 = vld [vmem:[%s24001_s5 + $0x428] sm:$0xff] }
 0x430   : > { %17656 = vmatmul.mubr.f32.gmra.mrb[78].mxu0 %v24180_v59  ;;  %v24199_v59 = vld [vmem:[#allocation28_spill] sm:$0xff] }
 0x431   : > { %17658 = vmatprep.mubr.f32.mxu0 %v24181_v36  ;;  %18873 = vmatpush3.bf16.msra.mxu0 %v18870_v4  ;;  %v14946_v4 = vld [vmem:[%s24001_s5 + $0x408] sm:$0xff] }
 0x432   : > { %18875 = vmatprep.subr.bf16.mxu0 %v18874_v51  ;;  %v24200_v36 = vld [vmem:[#allocation29_spill] sm:$0xff] }
 0x434   : > { %17659 = vmatmul.mubr.f32.gmra.mrb[80].mxu0 %v24182_v39  ;;  %v18914_v39 = vpack.c.bf16 %v14950_v41, %v14949_v55  ;;  %v6833_v55 = vld [vmem:[#allocation3 + $0xb2] sm:$0xff]  ;;  %v6835_v41 = vld [vmem:[#allocation3 + $0xca] sm:$0xff] }
 0x435   : > { %17661 = vmatprep.mubr.f32.mxu0 %v24183_v63  ;;  %v14951_v63 = vld [vmem:[%s24001_s5 + $0x430] sm:$0xff] }
 0x438   : > { %17662 = vmatmul.mubr.f32.gmra.mrb[82].mxu0 %v24184_v19 }
 0x439   : > { %17664 = vmatprep.mubr.f32.mxu0 %v24185_v7  ;;  %v14952_v7 = vld [vmem:[%s24001_s5 + $0x438] sm:$0xff] }
 0x43c   : > { %17665 = vmatmul.mubr.f32.gmra.mrb[84].mxu0 %v24186_v25  ;;  %v14968_v25 = vld [vmem:[%s24003_s7 + $0x70] sm:$0xff] }
 0x43d   : > { %17667 = vmatprep.mubr.f32.mxu0 %v24187_v11  ;;  %v14969_v11 = vld [vmem:[%s24003_s7 + $0x78] sm:$0xff] }
 0x440   : > { %17668 = vmatmul.mubr.f32.gmra.mrb[86].mxu0 %v24188_v48  ;;  %v24201_v48 = vld [vmem:[#allocation30_spill] sm:$0xff] }
 0x441   : > { %17670 = vmatprep.mubr.f32.mxu0 %v24189_v15  ;;  %v24202_v15 = vld [vmem:[#allocation31_spill] sm:$0xff] }
 0x444   : > { %17671 = vmatmul.mubr.f32.gmra.mrb[88].mxu0 %v24190_v13  ;;  %v18918_v13 = vpack.c.bf16 %v14952_v7, %v14951_v63  ;;  %v6841_v63 = vld [vmem:[#allocation3 + $0x112] sm:$0xff]  ;;  %v6843_v7 = vld [vmem:[#allocation3 + $0x12a] sm:$0xff] }
 0x445   : > { %17673 = vmatprep.mubr.f32.mxu0 %v24191_v18  ;;  %v22168_v18 = vpack.c.bf16 %v14969_v11, %v14968_v25  ;;  %v6844_v25 = vld [vmem:[#allocation3 + $0x13a] sm:$0xff]  ;;  %v6845_v11 = vld [vmem:[#allocation3 + $0x142] sm:$0xff] }
 0x448   : > { %17674 = vmatmul.mubr.f32.gmra.mrb[90].mxu0 %v24192_v23  ;;  %v14953_v23 = vld [vmem:[%s24001_s5 + $0x440] sm:$0xff] }
 0x449   : > { %17676 = vmatprep.mubr.f32.mxu0 %v24193_v28  ;;  %v14954_v28 = vld [vmem:[%s24001_s5 + $0x448] sm:$0xff] }
 0x44c   : > { %17677 = vmatmul.mubr.f32.gmra.mrb[92].mxu0 %v21750_v6  ;;  %v14933_v6 = vld [vmem:[%s24001_s5 + $0x3a0] sm:$0xff] }
 0x44d   : > { %17679 = vmatprep.mubr.f32.mxu0 %v22025_v30  ;;  %v18882_v0 = vpack.c.bf16 %v14934_v17, %v14933_v6  ;;  %v14955_v6 = vld [vmem:[%s24001_s5 + $0x450] sm:$0xff]  ;;  %v14956_v17 = vld [vmem:[%s24001_s5 + $0x458] sm:$0xff] }
 0x450   : > { %17680 = vmatmul.mubr.f32.gmra.mrb[94].mxu0 %v22028_v33 }
 0x451   : > { %17714 = vmatprep.mubr.f32.mxu0 %v21501_v56  ;;  %v14935_v56 = vld [vmem:[%s24001_s5 + $0x3b0] sm:$0xff] }
 0x454   : > { %17715 = vmatmul.mubr.f32.vlgmr.msra.gmra.mrb[64].mxu0 %v21504_v20  ;;  %v18886_v20 = vpack.c.bf16 %v14936_v53, %v14935_v56  ;;  %v24206_v56 = vld [vmem:[#allocation35_spill] sm:$0xff]  ;;  %v18926_v53 = vpack.c.bf16 %v14956_v17, %v14955_v6 }
 0x455   : > { %18877 = vmatpush3.bf16.msra.mxu0 %v18874_v51  ;;  %17717 = vmatprep.mubr.f32.mxu0 %v21513_v45  ;;  %v14937_v45 = vld [vmem:[%s24001_s5 + $0x3c0] sm:$0xff]  ;;  %v14967_v51 = vld [vmem:[%s24003_s7 + $0x68] sm:$0xff] }
 0x456   : > { %18879 = vmatprep.subr.bf16.mxu0 %v18878_v40 }
 0x458   : > { %17718 = vmatmul.mubr.f32.gmra.mrb[66].mxu0 %v21516_v61  ;;  %v18890_v61 = vpack.c.bf16 %v14938_v57, %v14937_v45  ;;  %v14958_v45 = vld [vmem:[%s24001_s5 + $0x468] sm:$0xff]  ;;  %v24207_v57 = vld [vmem:[#allocation36_spill] sm:$0xff] }
 0x459   : > { %17720 = vmatprep.mubr.f32.mxu0 %v21525_v38  ;;  %18881 = vmatpush3.bf16.msra.mxu0 %v18878_v40  ;;  %v14939_v38 = vld [vmem:[%s24001_s5 + $0x3d0] sm:$0xff]  ;;  %v18922_v40 = vpack.c.bf16 %v14954_v28, %v14953_v23 }
 0x45a   : > { %18883 = vmatprep.subr.bf16.mxu0 %v18882_v0  ;;  %v6852_v23 = vld [vmem:[#allocation3 + $0x19a] sm:$0xff]  ;;  %v6853_v28 = vld [vmem:[#allocation3 + $0x1a2] sm:$0xff] }
 0x45c   : > { %17721 = vmatmul.mubr.f32.gmra.mrb[68].mxu0 %v21528_v8  ;;  %v18894_v8 = vpack.c.bf16 %v14940_v5, %v14939_v38  ;;  %v14959_v38 = vld [vmem:[%s24001_s5 + $0x470] sm:$0xff]  ;;  %v14960_v5 = vld [vmem:[%s24001_s5 + $0x478] sm:$0xff] }
 0x45d   : > { %17723 = vmatprep.mubr.f32.mxu0 %v21537_v44  ;;  %18885 = vmatpush3.bf16.msra.mxu0 %v18882_v0  ;;  %v14941_v44 = vld [vmem:[%s24001_s5 + $0x3e0] sm:$0xff]  ;;  %v24205_v0 = vld [vmem:[#allocation34_spill] sm:$0xff] }
 0x45e   : > { %18887 = vmatprep.subr.bf16.mxu0 %v18886_v20 }
 0x460   : > { %17724 = vmatmul.mubr.f32.gmra.mrb[70].mxu0 %v21540_v60  ;;  %v18898_v60 = vpack.c.bf16 %v14942_v54, %v14941_v44  ;;  %v6532_v44 = vld [vmem:[#allocation3 + $0xf1] sm:$0xff]  ;;  %v6533_v54 = vld [vmem:[#allocation3 + $0xf9] sm:$0xff] }
 0x461   : > { %17726 = vmatprep.mubr.f32.mxu0 %v21549_v50  ;;  %18889 = vmatpush3.bf16.msra.mxu0 %v18886_v20  ;;  %v14943_v50 = vld [vmem:[%s24001_s5 + $0x3f0] sm:$0xff]  ;;  %v14957_v20 = vld [vmem:[%s24001_s5 + $0x460] sm:$0xff] }
 0x462   : > { %18891 = vmatprep.subr.bf16.mxu0 %v18890_v61 }
 0x464   : > { %17727 = vmatmul.mubr.f32.gmra.mrb[72].mxu0 %v21552_v52  ;;  %v18902_v52 = vpack.c.bf16 %v14944_v42, %v14943_v50  ;;  %v6538_v50 = vld [vmem:[#allocation3 + $0x139] sm:$0xff]  ;;  %v6539_v42 = vld [vmem:[#allocation3 + $0x141] sm:$0xff] }
 0x465   : > { %17729 = vmatprep.mubr.f32.mxu0 %v21561_v10  ;;  %18893 = vmatpush3.bf16.msra.mxu0 %v18890_v61  ;;  %v14945_v10 = vld [vmem:[%s24001_s5 + $0x400] sm:$0xff]  ;;  %v18930_v61 = vpack.c.bf16 %v14958_v45, %v14957_v20 }
 0x466   : > { %18895 = vmatprep.subr.bf16.mxu0 %v18894_v8 }
 0x468   : > { %17730 = vmatmul.mubr.f32.gmra.mrb[74].mxu0 %v21564_v16  ;;  %v18906_v16 = vpack.c.bf16 %v14946_v4, %v14945_v10  ;;  %v6542_v10 = vld [vmem:[#allocation3 + $0x169] sm:$0xff]  ;;  %v6543_v4 = vld [vmem:[#allocation3 + $0x171] sm:$0xff] }
 0x469   : > { %17732 = vmatprep.mubr.f32.mxu0 %v21567_v58  ;;  %18897 = vmatpush3.bf16.msra.mxu0 %v18894_v8  ;;  %v24194_v58 = vld [vmem:[#allocation12_spill] sm:$0xff]  ;;  %v18934_v8 = vpack.c.bf16 %v14960_v5, %v14959_v38 }
 0x46a   : > { %18899 = vmatprep.subr.bf16.mxu0 %v18898_v60 }
 0x46c   : > { %17733 = vmatmul.mubr.f32.gmra.mrb[76].mxu0 %v21570_v22  ;;  %v24195_v22 = vld [vmem:[#allocation7_spill] sm:$0xff] }
 0x46d   : > { %17735 = vmatprep.mubr.f32.mxu0 %v21573_v21  ;;  %18901 = vmatpush3.bf16.msra.mxu0 %v18898_v60  ;;  %v24196_v21 = vld [vmem:[#allocation26_spill] sm:$0xff]  ;;  %v6536_v60 = vld [vmem:[#allocation3 + $0x121] sm:$0xff] }
 0x46e   : > { %18903 = vmatprep.subr.bf16.mxu0 %v18902_v52 }
 0x470   : > { %17736 = vmatmul.mubr.f32.gmra.mrb[78].mxu0 %v21576_v24  ;;  %v6240_v24 = vld [vmem:[#allocation3 + $0x198] sm:$0xff] }
 0x471   : > { %17738 = vmatprep.mubr.f32.mxu0 %v21579_v62  ;;  %18905 = vmatpush3.bf16.msra.mxu0 %v18902_v52  ;;  %v24197_v62 = vld [vmem:[#allocation27_spill] sm:$0xff]  ;;  %v6541_v52 = vld [vmem:[#allocation3 + $0x159] sm:$0xff] }
 0x472   : > { %18907 = vmatprep.subr.bf16.mxu0 %v18906_v16 }
 0x474   : > { %17739 = vmatmul.mubr.f32.gmra.mrb[80].mxu0 %v21582_v26  ;;  %v14947_v26 = vld [vmem:[%s24001_s5 + $0x410] sm:$0xff] }
 0x475   : > { %17741 = vmatprep.mubr.f32.mxu0 %v21585_v49  ;;  %v14948_v49 = vld [vmem:[%s24001_s5 + $0x418] sm:$0xff] }
 0x478   : > { %17742 = vmatmul.mubr.f32.gmra.mrb[82].mxu0 %v21588_v32  ;;  %v24198_v32 = vld [vmem:[#allocation10_spill] sm:$0xff] }
 0x479   : > { %17744 = vmatprep.mubr.f32.mxu0 %v21591_v9  ;;  %v14962_v9 = vld [vmem:[%s24003_s7 + $0x40] sm:$0xff] }
 0x47c   : > { %17745 = vmatmul.mubr.f32.gmra.mrb[84].mxu0 %v21594_v12  ;;  %v14963_v12 = vld [vmem:[%s24003_s7 + $0x48] sm:$0xff] }
 0x47d   : > { %17747 = vmatprep.mubr.f32.mxu0 %v21597_v1  ;;  %v14964_v1 = vld [vmem:[%s24003_s7 + $0x50] sm:$0xff] }
 0x480   : > { %17748 = vmatmul.mubr.f32.gmra.mrb[86].mxu0 %v21600_v27  ;;  %v22126_v27 = vpack.c.bf16 %v14963_v12, %v14962_v9  ;;  %v6827_v9 = vld [vmem:[#allocation3 + $0x6a] sm:$0xff]  ;;  %v6828_v12 = vld [vmem:[#allocation3 + $0x7a] sm:$0xff] }
 0x481   : > { %17750 = vmatprep.mubr.f32.mxu0 %v21603_v37  ;;  %v14965_v37 = vld [vmem:[%s24003_s7 + $0x58] sm:$0xff] }
 0x482   : > { %v22134_v34 = vpack.c.bf16 %v14965_v37, %v14964_v1  ;;  %19082 = vmatprep.subr.bf16.mxu1 %v22126_v27  ;;  %v6829_v1 = vld [vmem:[#allocation3 + $0x82] sm:$0xff]  ;;  %v6831_v37 = vld [vmem:[#allocation3 + $0x9a] sm:$0xff] }
 0x483   : > { %19086 = vmatpush3.bf16.msra.mxu1 %v22126_v27 }
 0x484   : > { %17751 = vmatmul.mubr.f32.gmra.mrb[88].mxu0 %v21606_v47  ;;  %v18910_v47 = vpack.c.bf16 %v14948_v49, %v14947_v26  ;;  %19083 = vmatprep.subr.bf16.mxu1 %v22134_v34  ;;  %v6824_v26 = vld [vmem:[#allocation3 + $0x4a] sm:$0xff]  ;;  %v6825_v49 = vld [vmem:[#allocation3 + $0x52] sm:$0xff] }
 0x485   : > { %17753 = vmatprep.mubr.f32.mxu0 %v24194_v58  ;;  %v6546_v58 = vld [vmem:[#allocation3 + $0x199] sm:$0xff] }
 0x487   : > { %19087 = vmatpush3.bf16.msra.mxu1 %v22134_v34 }
 0x488   : > { %17754 = vmatmul.mubr.f32.gmra.mrb[90].mxu0 %v24195_v22  ;;  %v6545_v22 = vld [vmem:[#allocation3 + $0x189] sm:$0xff] }
 0x489   : > { %17756 = vmatprep.mubr.f32.mxu0 %v24196_v21  ;;  %v6547_v21 = vld [vmem:[#allocation3 + $0x1a1] sm:$0xff] }
 0x48c   : > { %17757 = vmatmul.mubr.f32.gmra.mrb[92].mxu0 %v24197_v62  ;;  %v6823_v62 = vld [vmem:[#allocation3 + $0x3a] sm:$0xff] }
 0x48d   : > { %17759 = vmatprep.mubr.f32.mxu0 %v6240_v24  ;;  %v6822_v24 = vld [vmem:[#allocation3 + $0x32] sm:$0xff] }
 0x490   : > { %17760 = vmatmul.mubr.f32.gmra.mrb[94].mxu0 %v24198_v32  ;;  %v6826_v32 = vld [vmem:[#allocation3 + $0x62] sm:$0xff] }
 0x491   : > { %17794 = vmatprep.mubr.f32.mxu0 %v21849_v14  ;;  %v14966_v14 = vld [vmem:[%s24003_s7 + $0x60] sm:$0xff] }
 0x492   : > { %v22153_v19 = vpack.c.bf16 %v14967_v51, %v14966_v14  ;;  %v6836_v14 = vld [vmem:[#allocation3 + $0xda] sm:$0xff]  ;;  %v6837_v51 = vld [vmem:[#allocation3 + $0xe2] sm:$0xff] }
 0x494   : > { %17795 = vmatmul.mubr.f32.vlgmr.msra.gmra.mrb[64].mxu0 %v24199_v59  ;;  %19084 = vmatprep.subr.bf16.mxu1 %v22153_v19  ;;  %v6838_v59 = vld [vmem:[#allocation3 + $0xf2] sm:$0xff] }
 0x495   : > { %18909 = vmatpush3.bf16.msra.mxu0 %v18906_v16  ;;  %17797 = vmatprep.mubr.f32.mxu0 %v24200_v36  ;;  %v6544_v16 = vld [vmem:[#allocation3 + $0x181] sm:$0xff] }
 0x496   : > { %18911 = vmatprep.subr.bf16.mxu0 %v18910_v47  ;;  %19088 = vmatpush3.bf16.msra.mxu1 %v22153_v19  ;;  %v6839_v36 = vld [vmem:[#allocation3 + $0xfa] sm:$0xff] }
 0x497   : > { %19085 = vmatprep.subr.bf16.mxu1 %v22168_v18 }
 0x498   : > { %17798 = vmatmul.mubr.f32.gmra.mrb[66].mxu0 %v24201_v48  ;;  %v6846_v48 = vld [vmem:[#allocation3 + $0x152] sm:$0xff] }
 0x499   : > { %17800 = vmatprep.mubr.f32.mxu0 %v24202_v15  ;;  %18913 = vmatpush3.bf16.msra.mxu0 %v18910_v47  ;;  %v6832_v47 = vld [vmem:[#allocation3 + $0xaa] sm:$0xff]  ;;  %v6847_v15 = vld [vmem:[#allocation3 + $0x15a] sm:$0xff] }
 0x49a   : > { %18915 = vmatprep.subr.bf16.mxu0 %v18914_v39  ;;  %19089 = vmatpush3.bf16.msra.mxu1 %v22168_v18 }
 0x49c   : > { %17801 = vmatmul.mubr.f32.gmra.mrb[68].mxu0 %v24203_v3  ;;  %v7263_v3 = vld [vmem:[%s24003_s7] sm:$0xff] }
 0x49d   : > { %17803 = vmatprep.mubr.f32.mxu0 %v24204_v46  ;;  %18917 = vmatpush3.bf16.msra.mxu0 %v18914_v39  ;;  %v6840_v39 = vld [vmem:[#allocation3 + $0x10a] sm:$0xff]  ;;  %v7264_v46 = vld [vmem:[%s24003_s7 + $0x8] sm:$0xff] }
 0x49e   : > { %18919 = vmatprep.subr.bf16.mxu0 %v18918_v13 }
 0x4a0   : > { %17804 = vmatmul.mubr.f32.gmra.mrb[70].mxu0 %v24205_v0 }
 0x4a1   : > { %17806 = vmatprep.mubr.f32.mxu0 %v24206_v56  ;;  %18921 = vmatpush3.bf16.msra.mxu0 %v18918_v13  ;;  %v6848_v13 = vld [vmem:[#allocation3 + $0x16a] sm:$0xff] }
 0x4a2   : > { %18923 = vmatprep.subr.bf16.mxu0 %v18922_v40 }
 0x4a4   : > { %17807 = vmatmul.mubr.f32.gmra.mrb[72].mxu0 %v24207_v57 }
 0x4a5   : > { %17809 = vmatprep.mubr.f32.mxu0 %v21909_v2  ;;  %18925 = vmatpush3.bf16.msra.mxu0 %v18922_v40  ;;  %v6530_v2 = vld [vmem:[#allocation3 + $0xd9] sm:$0xff]  ;;  %v18954_v40 = vpack.c.bf16 %v7264_v46, %v7263_v3 }
 0x4a6   : > { %18927 = vmatprep.subr.bf16.mxu0 %v18926_v53 }
 0x4a7   : > { %18955 = vmatprep.subr.bf16.mxu1 %v18954_v40 }
 0x4a8   : > { %17810 = vmatmul.mubr.f32.gmra.mrb[74].mxu0 %v21912_v31  ;;  %v6534_v31 = vld [vmem:[#allocation3 + $0x109] sm:$0xff] }
 0x4a9   : > { %17812 = vmatprep.mubr.f32.mxu0 %v21921_v35  ;;  %18929 = vmatpush3.bf16.msra.mxu0 %v18926_v53  ;;  %v6535_v35 = vld [vmem:[#allocation3 + $0x111] sm:$0xff] }
 0x4aa   : > { %18931 = vmatprep.subr.bf16.mxu0 %v18930_v61 }
 0x4ac   : > { %17813 = vmatmul.mubr.f32.gmra.mrb[76].mxu0 %v21924_v43  ;;  %v6537_v43 = vld [vmem:[#allocation3 + $0x129] sm:$0xff] }
 0x4ad   : > { %17815 = vmatprep.mubr.f32.mxu0 %v6530_v2  ;;  %18933 = vmatpush3.bf16.msra.mxu0 %v18930_v61 }
 0x4ae   : > { %18935 = vmatprep.subr.bf16.mxu0 %v18934_v8 }
 0x4b0   : > { %17816 = vmatmul.mubr.f32.gmra.mrb[78].mxu0 %v21928_v29  ;;  %v6540_v29 = vld [vmem:[#allocation3 + $0x151] sm:$0xff] }
 0x4b1   : > { %17818 = vmatprep.mubr.f32.mxu0 %v6532_v44  ;;  %18937 = vmatpush3.bf16.msra.mxu0 %v18934_v8 }
 0x4b2   : > { %18939 = vmatprep.subr.bf16.mxu0 %v22126_v27 }
 0x4b4   : > { %17819 = vmatmul.mubr.f32.gmra.mrb[80].mxu0 %v6533_v54 }
 0x4b5   : > { %17821 = vmatprep.mubr.f32.mxu0 %v6534_v31  ;;  %v7265_v31 = vld [vmem:[%s24003_s7 + $0x10] sm:$0xff] }
 0x4b8   : > { %17822 = vmatmul.mubr.f32.gmra.mrb[82].mxu0 %v6535_v35  ;;  %v7266_v35 = vld [vmem:[%s24003_s7 + $0x18] sm:$0xff] }
 0x4b9   : > { %17824 = vmatprep.mubr.f32.mxu0 %v6536_v60 }
 0x4bc   : > { %17825 = vmatmul.mubr.f32.gmra.mrb[84].mxu0 %v6537_v43 }
 0x4bd   : > { %17827 = vmatprep.mubr.f32.mxu0 %v6538_v50 }
 0x4c0   : > { %17828 = vmatmul.mubr.f32.gmra.mrb[86].mxu0 %v6539_v42 }
 0x4c1   : > { %17830 = vmatprep.mubr.f32.mxu0 %v6540_v29 }
 0x4c4   : > { %17831 = vmatmul.mubr.f32.gmra.mrb[88].mxu0 %v6541_v52 }
 0x4c5   : > { %17833 = vmatprep.mubr.f32.mxu0 %v6542_v10  ;;  %v18958_v10 = vpack.c.bf16 %v7266_v35, %v7265_v31 }
 0x4c8   : > { %17834 = vmatmul.mubr.f32.gmra.mrb[90].mxu0 %v6543_v4 }
 0x4c9   : > { %17836 = vmatprep.mubr.f32.mxu0 %v6544_v16 }
 0x4cc   : > { %17837 = vmatmul.mubr.f32.gmra.mrb[92].mxu0 %v6545_v22  ;;  %v7268_v22 = vld [vmem:[%s24003_s7 + $0x28] sm:$0xff] }
 0x4cd   : > { %17839 = vmatprep.mubr.f32.mxu0 %v6546_v58  ;;  %v7267_v58 = vld [vmem:[%s24003_s7 + $0x20] sm:$0xff] }
 0x4d0   : > { %17840 = vmatmul.mubr.f32.gmra.mrb[94].mxu0 %v6547_v21 }
 0x4d1   : > { %17874 = vmatprep.mubr.f32.mxu0 %v6822_v24 }
 0x4d4   : > { %17875 = vmatmul.mubr.f32.vlgmr.msra.gmra.mrb[64].mxu0 %v6823_v62 }
 0x4d5   : > { %17877 = vmatprep.mubr.f32.mxu0 %v6824_v26  ;;  %18941 = vmatpush3.bf16.msra.mxu0 %v22126_v27  ;;  %v6830_v27 = vld [vmem:[#allocation3 + $0x92] sm:$0xff] }
 0x4d6   : > { %18943 = vmatprep.subr.bf16.mxu0 %v22134_v34 }
 0x4d8   : > { %17878 = vmatmul.mubr.f32.gmra.mrb[66].mxu0 %v6825_v49 }
 0x4d9   : > { %17880 = vmatprep.mubr.f32.mxu0 %v6826_v32  ;;  %18945 = vmatpush3.bf16.msra.mxu0 %v22134_v34  ;;  %v6834_v34 = vld [vmem:[#allocation3 + $0xc2] sm:$0xff] }
 0x4da   : > { %18947 = vmatprep.subr.bf16.mxu0 %v22153_v19 }
 0x4dc   : > { %17881 = vmatmul.mubr.f32.gmra.mrb[68].mxu0 %v6827_v9  ;;  %v18962_v9 = vpack.c.bf16 %v7268_v22, %v7267_v58 }
 0x4dd   : > { %17883 = vmatprep.mubr.f32.mxu0 %v6828_v12  ;;  %18949 = vmatpush3.bf16.msra.mxu0 %v22153_v19  ;;  %v6842_v19 = vld [vmem:[#allocation3 + $0x122] sm:$0xff] }
 0x4de   : > { %18951 = vmatprep.subr.bf16.mxu0 %v22168_v18 }
 0x4e0   : > { %17884 = vmatmul.mubr.f32.gmra.mrb[70].mxu0 %v6829_v1 }
 0x4e1   : > { %17886 = vmatprep.mubr.f32.mxu0 %v6830_v27  ;;  %18953 = vmatpush3.bf16.msra.mxu0 %v22168_v18  ;;  %v6849_v18 = vld [vmem:[#allocation3 + $0x172] sm:$0xff]  ;;  %v7269_v27 = vld [vmem:[%s24003_s7 + $0x30] sm:$0xff] }
 0x4e4   : > { %17887 = vmatmul.mubr.f32.gmra.mrb[72].mxu0 %v6831_v37  ;;  %v7270_v37 = vld [vmem:[%s24003_s7 + $0x38] sm:$0xff] }
 0x4e5   : > { %17889 = vmatprep.mubr.f32.mxu0 %v6832_v47 }
 0x4e8   : > { %17890 = vmatmul.mubr.f32.gmra.mrb[74].mxu0 %v6833_v55 }
 0x4e9   : > { %17892 = vmatprep.mubr.f32.mxu0 %v6834_v34 }
 0x4ec   : > { %17893 = vmatmul.mubr.f32.gmra.mrb[76].mxu0 %v6835_v41 }
 0x4ed   : > { %17895 = vmatprep.mubr.f32.mxu0 %v6836_v14 }
 0x4f0   : > { %17896 = vmatmul.mubr.f32.gmra.mrb[78].mxu0 %v6837_v51 }
 0x4f1   : > { %17898 = vmatprep.mubr.f32.mxu0 %v6838_v59  ;;  %v18966_v59 = vpack.c.bf16 %v7270_v37, %v7269_v27 }
 0x4f4   : > { %17899 = vmatmul.mubr.f32.gmra.mrb[80].mxu0 %v6839_v36 }
 0x4f5   : > { %17901 = vmatprep.mubr.f32.mxu0 %v6840_v39 }
 0x4f8   : > { %17902 = vmatmul.mubr.f32.gmra.mrb[82].mxu0 %v6841_v63  ;;  %v15034_v63 = vld [vmem:[%s24003_s7 + $0x80] sm:$0xff] }
 0x4f9   : > { %17904 = vmatprep.mubr.f32.mxu0 %v6842_v19  ;;  %v15035_v19 = vld [vmem:[%s24003_s7 + $0x88] sm:$0xff] }
 0x4fc   : > { %17905 = vmatmul.mubr.f32.gmra.mrb[84].mxu0 %v6843_v7 }
 0x4fd   : > { %17907 = vmatprep.mubr.f32.mxu0 %v6844_v25 }
 0x500   : > { %17908 = vmatmul.mubr.f32.gmra.mrb[86].mxu0 %v6845_v11 }
 0x501   : > { %17910 = vmatprep.mubr.f32.mxu0 %v6846_v48 }
 0x504   : > { %17911 = vmatmul.mubr.f32.gmra.mrb[88].mxu0 %v6847_v15 }
 0x505   : > { %17913 = vmatprep.mubr.f32.mxu0 %v6848_v13 }
 0x508   : > { %17914 = vmatmul.mubr.f32.gmra.mrb[90].mxu0 %v6849_v18  ;;  %v22302_v18 = vpack.c.bf16 %v15035_v19, %v15034_v63 }
 0x509   : > { %17916 = vmatprep.mubr.f32.mxu0 %v22025_v30  ;;  %v22226_v30 = vld [vmem:[%s24002_s6] ss:$0 sm:$0xff] }
 0x50c   : > { %17917 = vmatmul.mubr.f32.gmra.mrb[92].mxu0 %v22028_v33 }
 0x50d   : > { %17919 = vmatprep.mubr.f32.mxu0 %v6852_v23 }
 0x510   : > { %17920 = vmatmul.mubr.f32.gmra.mrb[94].mxu0 %v6853_v28 }
 0x5a7   : > { %v17876_v6 = vpop.f32.mrb[64].mxu0 }
 0x5a8   : > { %v7136_v33 = vadd.f32 %v17876_v6, %v22226_v30  ;;  %v6937_v17 = vpop.f32.mrb[65].mxu0 }
 0x5a9   : > { %v7135_v0 = vadd.f32 %v22226_v30, %v6937_v17 }
 0x5aa   : > { %v7168_v56 = vmax.f32 %v7136_v33, 0.0 }
 0x5ab   : > { %v7167_v53 = vmax.f32 %v7135_v0, 0.0  ;;  %v17879_v20 = vpop.f32.mrb[66].mxu0 }
 0x5ac   : > { %7200 = vst.msk [vmem:[#allocation2 + $0x21] sm:$0xff] %vm333_vm1, %v7168_v56  ;;  %v7138_v45 = vadd.f32 %v17879_v20, %v22226_v30  ;;  %v6947_v57 = vpop.f32.mrb[67].mxu0 }
 0x5ad   : > { %7199 = vst.msk [vmem:[#allocation2 + $0x19] sm:$0xff] %vm333_vm1, %v7167_v53  ;;  %v7137_v61 = vadd.f32 %v22226_v30, %v6947_v57 }
 0x5ae   : > { %v7170_v38 = vmax.f32 %v7138_v45, 0.0 }
 0x5af   : > { %v7169_v5 = vmax.f32 %v7137_v61, 0.0  ;;  %v17882_v8 = vpop.f32.mrb[68].mxu0 }
 0x5b0   : > { %7202 = vst.msk [vmem:[#allocation2 + $0x39] sm:$0xff] %vm333_vm1, %v7170_v38  ;;  %v7140_v2 = vadd.f32 %v17882_v8, %v22226_v30  ;;  %v6957_v44 = vpop.f32.mrb[69].mxu0 }
 0x5b1   : > { %7201 = vst.msk [vmem:[#allocation2 + $0x31] sm:$0xff] %vm333_vm1, %v7169_v5  ;;  %v7139_v54 = vadd.f32 %v22226_v30, %v6957_v44 }
 0x5b2   : > { %v7172_v60 = vmax.f32 %v7140_v2, 0.0 }
 0x5b3   : > { %v7171_v43 = vmax.f32 %v7139_v54, 0.0  ;;  %v17885_v50 = vpop.f32.mrb[70].mxu0  ;;  %v22252_v16 = vld [vmem:[#allocation2 + $0x21] sm:$0xff] }
 0x5b4   : > { %7204 = vst.msk [vmem:[#allocation2 + $0x51] sm:$0xff] %vm333_vm1, %v7172_v60  ;;  %v7142_v42 = vadd.f32 %v17885_v50, %v22226_v30  ;;  %v6967_v29 = vpop.f32.mrb[71].mxu0  ;;  %v22246_v52 = vld [vmem:[#allocation2 + $0x19] sm:$0xff] }
 0x5b5   : > { %7203 = vst.msk [vmem:[#allocation2 + $0x49] sm:$0xff] %vm333_vm1, %v7171_v43  ;;  %v7141_v4 = vadd.f32 %v22226_v30, %v6967_v29  ;;  %17941 = vmatprep.mubr.msk.f32.mxu1 %vm333_vm1, %v22246_v52 }
 0x5b6   : > { %v7174_v21 = vmax.f32 %v7142_v42, 0.0  ;;  %17942 = vmatmul.mubr.msk.f32.vlgmr.msra.gmra.mrb[32].mxu1 %vm333_vm1, %v22252_v16 }
 0x5b7   : > { %v7173_v24 = vmax.f32 %v7141_v4, 0.0  ;;  %18957 = vmatpush3.bf16.msra.mxu1 %v18954_v40  ;;  %v17888_v62 = vpop.f32.mrb[72].mxu0  ;;  %v22270_v1 = vld [vmem:[#allocation2 + $0x39] sm:$0xff] }
 0x5b8   : > { %7206 = vst.msk [vmem:[#allocation2 + $0x69] sm:$0xff] %vm333_vm1, %v7174_v21  ;;  %v7144_v26 = vadd.f32 %v17888_v62, %v22226_v30  ;;  %v6977_v49 = vpop.f32.mrb[73].mxu0  ;;  %v22264_v32 = vld [vmem:[#allocation2 + $0x31] sm:$0xff]  ;;  %18959 = vmatprep.subr.bf16.mxu1 %v18958_v10 }
 0x5b9   : > { %7205 = vst.msk [vmem:[#allocation2 + $0x61] sm:$0xff] %vm333_vm1, %v7173_v24  ;;  %v7143_v12 = vadd.f32 %v22226_v30, %v6977_v49  ;;  %17944 = vmatprep.mubr.msk.f32.mxu1 %vm333_vm1, %v22264_v32 }
 0x5ba   : > { %v7176_v47 = vmax.f32 %v7144_v26, 0.0  ;;  %17945 = vmatmul.mubr.msk.f32.gmra.mrb[34].mxu1 %vm333_vm1, %v22270_v1 }
 0x5bb   : > { %v7175_v55 = vmax.f32 %v7143_v12, 0.0  ;;  %v17891_v34 = vpop.f32.mrb[74].mxu0  ;;  %18961 = vmatpush3.bf16.msra.mxu1 %v18958_v10  ;;  %v22288_v39 = vld [vmem:[#allocation2 + $0x51] sm:$0xff] }
 0x5bc   : > { %7208 = vst.msk [vmem:[#allocation2 + $0x81] sm:$0xff] %vm333_vm1, %v7176_v47  ;;  %v7146_v41 = vadd.f32 %v17891_v34, %v22226_v30  ;;  %v6987_v14 = vpop.f32.mrb[75].mxu0  ;;  %v22282_v51 = vld [vmem:[#allocation2 + $0x49] sm:$0xff]  ;;  %18963 = vmatprep.subr.bf16.mxu1 %v18962_v9 }
 0x5bd   : > { %7207 = vst.msk [vmem:[#allocation2 + $0x79] sm:$0xff] %vm333_vm1, %v7175_v55  ;;  %v7145_v36 = vadd.f32 %v22226_v30, %v6987_v14  ;;  %17947 = vmatprep.mubr.msk.f32.mxu1 %vm333_vm1, %v22282_v51 }
 0x5be   : > { %v7178_v7 = vmax.f32 %v7146_v41, 0.0  ;;  %17948 = vmatmul.mubr.msk.f32.gmra.mrb[36].mxu1 %vm333_vm1, %v22288_v39 }
 0x5bf   : > { %v7177_v25 = vmax.f32 %v7145_v36, 0.0  ;;  %v17894_v11 = vpop.f32.mrb[76].mxu0  ;;  %18965 = vmatpush3.bf16.msra.mxu1 %v18962_v9  ;;  %v22308_v28 = vld [vmem:[#allocation2 + $0x69] sm:$0xff] }
 0x5c0   : > { %7210 = vst.msk [vmem:[#allocation2 + $0x99] sm:$0xff] %vm333_vm1, %v7178_v7  ;;  %v7148_v48 = vadd.f32 %v17894_v11, %v22226_v30  ;;  %v6997_v15 = vpop.f32.mrb[77].mxu0  ;;  %v22300_v13 = vld [vmem:[#allocation2 + $0x61] sm:$0xff]  ;;  %18967 = vmatprep.subr.bf16.mxu1 %v18966_v59 }
 0x5c1   : > { %7209 = vst.msk [vmem:[#allocation2 + $0x91] sm:$0xff] %vm333_vm1, %v7177_v25  ;;  %v7147_v23 = vadd.f32 %v22226_v30, %v6997_v15  ;;  %17950 = vmatprep.mubr.msk.f32.mxu1 %vm333_vm1, %v22300_v13 }
 0x5c2   : > { %v7180_v3 = vmax.f32 %v7148_v48, 0.0  ;;  %17951 = vmatmul.mubr.msk.f32.gmra.mrb[38].mxu1 %vm333_vm1, %v22308_v28 }
 0x5c3   : > { %v7179_v46 = vmax.f32 %v7147_v23, 0.0  ;;  %v17897_v40 = vpop.f32.mrb[78].mxu0  ;;  %18969 = vmatpush3.bf16.msra.mxu1 %v18966_v59  ;;  %v22321_v56 = vld [vmem:[#allocation2 + $0x81] sm:$0xff] }
 0x5c4   : > { %7212 = vst.msk [vmem:[#allocation2 + $0xb1] sm:$0xff] %vm333_vm1, %v7180_v3  ;;  %v7150_v6 = vadd.f32 %v17897_v40, %v22226_v30  ;;  %v7007_v33 = vpop.f32.mrb[79].mxu0  ;;  %v22314_v17 = vld [vmem:[#allocation2 + $0x79] sm:$0xff]  ;;  %18971 = vmatprep.subr.bf16.mxu1 %v22302_v18 }
 0x5c5   : > { %7211 = vst.msk [vmem:[#allocation2 + $0xa9] sm:$0xff] %vm333_vm1, %v7179_v46  ;;  %v7149_v0 = vadd.f32 %v22226_v30, %v7007_v33  ;;  %17953 = vmatprep.mubr.msk.f32.mxu1 %vm333_vm1, %v22314_v17 }
 0x5c6   : > { %v7182_v53 = vmax.f32 %v7150_v6, 0.0  ;;  %17954 = vmatmul.mubr.msk.f32.gmra.mrb[40].mxu1 %vm333_vm1, %v22321_v56 }
 0x5c7   : > { %v7181_v20 = vmax.f32 %v7149_v0, 0.0  ;;  %v17900_v45 = vpop.f32.mrb[80].mxu0  ;;  %v22333_v8 = vld [vmem:[#allocation2 + $0x99] sm:$0xff] }
 0x5c8   : > { %7214 = vst.msk [vmem:[#allocation2 + $0xc9] sm:$0xff] %vm333_vm1, %v7182_v53  ;;  %v7152_v57 = vadd.f32 %v17900_v45, %v22226_v30  ;;  %v7017_v61 = vpop.f32.mrb[81].mxu0  ;;  %v22327_v38 = vld [vmem:[#allocation2 + $0x91] sm:$0xff] }
 0x5c9   : > { %7213 = vst.msk [vmem:[#allocation2 + $0xc1] sm:$0xff] %vm333_vm1, %v7181_v20  ;;  %v7151_v5 = vadd.f32 %v22226_v30, %v7017_v61  ;;  %17956 = vmatprep.mubr.msk.f32.mxu1 %vm333_vm1, %v22327_v38 }
 0x5ca   : > { %v7184_v2 = vmax.f32 %v7152_v57, 0.0  ;;  %17957 = vmatmul.mubr.msk.f32.gmra.mrb[42].mxu1 %vm333_vm1, %v22333_v8 }
 0x5cb   : > { %v7183_v44 = vmax.f32 %v7151_v5, 0.0  ;;  %v17903_v54 = vpop.f32.mrb[82].mxu0  ;;  %v22345_v50 = vld [vmem:[#allocation2 + $0xb1] sm:$0xff] }
 0x5cc   : > { %7216 = vst.msk [vmem:[#allocation2 + $0xe1] sm:$0xff] %vm333_vm1, %v7184_v2  ;;  %v7154_v31 = vadd.f32 %v17903_v54, %v22226_v30  ;;  %v7027_v35 = vpop.f32.mrb[83].mxu0  ;;  %v22339_v60 = vld [vmem:[#allocation2 + $0xa9] sm:$0xff] }
 0x5cd   : > { %7215 = vst.msk [vmem:[#allocation2 + $0xd9] sm:$0xff] %vm333_vm1, %v7183_v44  ;;  %v7153_v43 = vadd.f32 %v22226_v30, %v7027_v35  ;;  %17959 = vmatprep.mubr.msk.f32.mxu1 %vm333_vm1, %v22339_v60 }
 0x5ce   : > { %v7186_v42 = vmax.f32 %v7154_v31, 0.0  ;;  %17960 = vmatmul.mubr.msk.f32.gmra.mrb[44].mxu1 %vm333_vm1, %v22345_v50 }
 0x5cf   : > { %v7185_v29 = vmax.f32 %v7153_v43, 0.0  ;;  %v17906_v10 = vpop.f32.mrb[84].mxu0  ;;  %v22357_v24 = vld [vmem:[#allocation2 + $0xc9] sm:$0xff] }
 0x5d0   : > { %7218 = vst.msk [vmem:[#allocation2 + $0xf9] sm:$0xff] %vm333_vm1, %v7186_v42  ;;  %v7156_v4 = vadd.f32 %v17906_v10, %v22226_v30  ;;  %v7037_v58 = vpop.f32.mrb[85].mxu0  ;;  %v22351_v22 = vld [vmem:[#allocation2 + $0xc1] sm:$0xff] }
 0x5d1   : > { %7217 = vst.msk [vmem:[#allocation2 + $0xf1] sm:$0xff] %vm333_vm1, %v7185_v29  ;;  %v7155_v21 = vadd.f32 %v22226_v30, %v7037_v58  ;;  %17962 = vmatprep.mubr.msk.f32.mxu1 %vm333_vm1, %v22351_v22  ;;  %v7231_v58 = vld [vmem:[#allocation2] sm:$0xff] }
 0x5d2   : > { %v7188_v62 = vmax.f32 %v7156_v4, 0.0  ;;  %17963 = vmatmul.mubr.msk.f32.gmra.mrb[46].mxu1 %vm333_vm1, %v22357_v24 }
 0x5d3   : > { %v7187_v26 = vmax.f32 %v7155_v21, 0.0  ;;  %v17909_v49 = vpop.f32.mrb[86].mxu0  ;;  %v22369_v47 = vld [vmem:[#allocation2 + $0xe1] sm:$0xff] }
 0x5d4   : > { %7220 = vst.msk [vmem:[#allocation2 + $0x111] sm:$0xff] %vm333_vm1, %v7188_v62  ;;  %v7158_v9 = vadd.f32 %v17909_v49, %v22226_v30  ;;  %v7047_v12 = vpop.f32.mrb[87].mxu0  ;;  %v22363_v27 = vld [vmem:[#allocation2 + $0xd9] sm:$0xff]  ;;  %v15036_v62 = vld [vmem:[%s24003_s7 + $0x90] sm:$0xff]  ;;  %v7232_v49 = vld [vmem:[#allocation2 + $0x8] sm:$0xff] }
 0x5d5   : > { %7219 = vst.msk [vmem:[#allocation2 + $0x109] sm:$0xff] %vm333_vm1, %v7187_v26  ;;  %v7157_v37 = vadd.f32 %v22226_v30, %v7047_v12  ;;  %17965 = vmatprep.mubr.msk.f32.mxu1 %vm333_vm1, %v22363_v27  ;;  %v15037_v26 = vld [vmem:[%s24003_s7 + $0x98] sm:$0xff]  ;;  %v15038_v12 = vld [vmem:[%s24003_s7 + $0xa0] sm:$0xff] }
 0x5d6   : > { %v7190_v55 = vmax.f32 %v7158_v9, 0.0  ;;  %17966 = vmatmul.mubr.msk.f32.gmra.mrb[48].mxu1 %vm333_vm1, %v22369_v47  ;;  %v18974_v9 = vpack.c.bf16 %v15037_v26, %v15036_v62 }
 0x5d7   : > { %v7189_v34 = vmax.f32 %v7157_v37, 0.0  ;;  %v17912_v41 = vpop.f32.mrb[88].mxu0  ;;  %v22381_v19 = vld [vmem:[#allocation2 + $0xf9] sm:$0xff]  ;;  %v15039_v37 = vld [vmem:[%s24003_s7 + $0xa8] sm:$0xff] }
 0x5d8   : > { %7222 = vst.msk [vmem:[#allocation2 + $0x129] sm:$0xff] %vm333_vm1, %v7190_v55  ;;  %v7160_v14 = vadd.f32 %v17912_v41, %v22226_v30  ;;  %v7057_v59 = vpop.f32.mrb[89].mxu0  ;;  %v22375_v36 = vld [vmem:[#allocation2 + $0xf1] sm:$0xff]  ;;  %v22458_v41 = vld [vmem:[#allocation2 + $0x20] sm:$0xff] }
 0x5d9   : > { %7221 = vst.msk [vmem:[#allocation2 + $0x121] sm:$0xff] %vm333_vm1, %v7189_v34  ;;  %v7159_v63 = vadd.f32 %v22226_v30, %v7057_v59  ;;  %17968 = vmatprep.mubr.msk.f32.mxu1 %vm333_vm1, %v22375_v36  ;;  %v22453_v55 = vld [vmem:[#allocation2 + $0x18] sm:$0xff]  ;;  %v18978_v34 = vpack.c.bf16 %v15039_v37, %v15038_v12 }
 0x5da   : > { %v7192_v7 = vmax.f32 %v7160_v14, 0.0  ;;  %17969 = vmatmul.mubr.msk.f32.gmra.mrb[50].mxu1 %vm333_vm1, %v22381_v19  ;;  %v15040_v14 = vld [vmem:[%s24003_s7 + $0xb0] sm:$0xff]  ;;  %v15041_v59 = vld [vmem:[%s24003_s7 + $0xb8] sm:$0xff] }
 0x5db   : > { %v7191_v25 = vmax.f32 %v7159_v63, 0.0  ;;  %v17915_v11 = vpop.f32.mrb[90].mxu0  ;;  %v22393_v46 = vld [vmem:[#allocation2 + $0x111] sm:$0xff] }
 0x5dc   : > { %7224 = vst.msk [vmem:[#allocation2 + $0x141] sm:$0xff] %vm333_vm1, %v7192_v7  ;;  %v7162_v48 = vadd.f32 %v17915_v11, %v22226_v30  ;;  %v7067_v15 = vpop.f32.mrb[91].mxu0  ;;  %v22387_v23 = vld [vmem:[#allocation2 + $0x109] sm:$0xff]  ;;  %v22472_v7 = vld [vmem:[#allocation2 + $0x38] sm:$0xff] }
 0x5dd   : > { %7223 = vst.msk [vmem:[#allocation2 + $0x139] sm:$0xff] %vm333_vm1, %v7191_v25  ;;  %v7161_v3 = vadd.f32 %v22226_v30, %v7067_v15  ;;  %17971 = vmatprep.mubr.msk.f32.mxu1 %vm333_vm1, %v22387_v23  ;;  %v22468_v63 = vld [vmem:[#allocation2 + $0x30] sm:$0xff]  ;;  %v15074_v25 = vld [vmem:[%s24003_s7 + $0xc0] sm:$0xff]  ;;  %v15075_v11 = vld [vmem:[%s24003_s7 + $0xc8] sm:$0xff] }
 0x5de   : > { %v7194_v40 = vmax.f32 %v7162_v48, 0.0  ;;  %17972 = vmatmul.mubr.msk.f32.gmra.mrb[52].mxu1 %vm333_vm1, %v22393_v46  ;;  %v22482_v48 = vld [vmem:[#allocation2 + $0x48] sm:$0xff]  ;;  %v18986_v15 = vpack.c.bf16 %v15075_v11, %v15074_v25  ;;  %v22550_v62 = vld [vmem:[#allocation2 + $0x110] sm:$0xff]  ;;  %v15077_v11 = vld [vmem:[%s24003_s7 + $0xd8] sm:$0xff] }
 0x5df   : > { %v7193_v6 = vmax.f32 %v7161_v3, 0.0  ;;  %v17918_v33 = vpop.f32.mrb[92].mxu0  ;;  %v22405_v57 = vld [vmem:[#allocation2 + $0x129] sm:$0xff] }
 0x5e0   : > { %7226 = vst.msk [vmem:[#allocation2 + $0x159] sm:$0xff] %vm333_vm1, %v7194_v40  ;;  %v7164_v0 = vadd.f32 %v17918_v33, %v22226_v30  ;;  %v7077_v53 = vpop.f32.mrb[93].mxu0  ;;  %v22399_v20 = vld [vmem:[#allocation2 + $0x121] sm:$0xff]  ;;  %v22486_v3 = vld [vmem:[#allocation2 + $0x50] sm:$0xff]  ;;  %v22498_v33 = vld [vmem:[#allocation2 + $0x78] sm:$0xff] }
 0x5e1   : > { %7225 = vst.msk [vmem:[#allocation2 + $0x151] sm:$0xff] %vm333_vm1, %v7193_v6  ;;  %v7163_v45 = vadd.f32 %v22226_v30, %v7077_v53  ;;  %17974 = vmatprep.mubr.msk.f32.mxu1 %vm333_vm1, %v22399_v20  ;;  %v22490_v40 = vld [vmem:[#allocation2 + $0x60] sm:$0xff]  ;;  %v22494_v6 = vld [vmem:[#allocation2 + $0x68] sm:$0xff]  ;;  %v22506_v53 = vld [vmem:[#allocation2 + $0x90] sm:$0xff] }
 0x5e2   : > { %v7196_v61 = vmax.f32 %v7164_v0, 0.0  ;;  %17975 = vmatmul.mubr.msk.f32.gmra.mrb[54].mxu1 %vm333_vm1, %v22405_v57  ;;  %v22502_v0 = vld [vmem:[#allocation2 + $0x80] sm:$0xff]  ;;  %v15076_v25 = vld [vmem:[%s24003_s7 + $0xd0] sm:$0xff] }
 0x5e3   : > { %v7195_v5 = vmax.f32 %v7163_v45, 0.0  ;;  %v17921_v2 = vpop.f32.mrb[94].mxu0  ;;  %v22417_v43 = vld [vmem:[#allocation2 + $0x141] sm:$0xff]  ;;  %v22510_v45 = vld [vmem:[#allocation2 + $0x98] sm:$0xff] }
 0x5e4   : > { %7228 = vst.msk [vmem:[#allocation2 + $0x171] sm:$0xff] %vm333_vm1, %v7196_v61  ;;  %v7166_v44 = vadd.f32 %v17921_v2, %v22226_v30  ;;  %v7087_v54 = vpop.f32.mrb[95].mxu0  ;;  %v22411_v31 = vld [vmem:[#allocation2 + $0x139] sm:$0xff]  ;;  %24209 = vst [vmem:[#allocation5_spill] sm:$0xff] %v22417_v43  ;;  %v22514_v61 = vld [vmem:[#allocation2 + $0xa8] sm:$0xff] }
 0x5e5   : > { %24208 = vst [vmem:[#allocation8_spill] sm:$0xff] %v22411_v31  ;;  %7227 = vst.msk [vmem:[#allocation2 + $0x169] sm:$0xff] %vm333_vm1, %v7195_v5  ;;  %v7165_v35 = vadd.f32 %v22226_v30, %v7087_v54  ;;  %17977 = vmatprep.mubr.msk.f32.mxu1 %vm333_vm1, %v22411_v31  ;;  %v22518_v5 = vld [vmem:[#allocation2 + $0xb0] sm:$0xff]  ;;  %v22522_v2 = vld [vmem:[#allocation2 + $0xc0] sm:$0xff] }
 0x5e6   : > { %v7198_v42 = vmax.f32 %v7166_v44, 0.0  ;;  %17978 = vmatmul.mubr.msk.f32.gmra.mrb[56].mxu1 %vm333_vm1, %v22417_v43  ;;  %v22526_v44 = vld [vmem:[#allocation2 + $0xc8] sm:$0xff]  ;;  %v22530_v54 = vld [vmem:[#allocation2 + $0xd8] sm:$0xff]  ;;  %v22554_v26 = vld [vmem:[#allocation2 + $0x120] sm:$0xff] }
 0x5e7   : > { %v7197_v29 = vmax.f32 %v7165_v35, 0.0  ;;  %v22427_v30 = vld [vmem:[#allocation2 + $0x159] sm:$0xff]  ;;  %v22604_v31 = vld [vmem:[#allocation2 + $0x22] sm:$0xff] }
 0x5e8   : > { %7230 = vst.msk [vmem:[#allocation2 + $0x189] sm:$0xff] %vm333_vm1, %v7198_v42  ;;  %v22422_v10 = vld [vmem:[#allocation2 + $0x151] sm:$0xff]  ;;  %24211 = vst [vmem:[#allocation9_spill] sm:$0xff] %v22427_v30  ;;  %v22534_v35 = vld [vmem:[#allocation2 + $0xe0] sm:$0xff] }
 0x5e9   : > { %24210 = vst [vmem:[#allocation6_spill] sm:$0xff] %v22422_v10  ;;  %7229 = vst.msk [vmem:[#allocation2 + $0x181] sm:$0xff] %vm333_vm1, %v7197_v29  ;;  %17980 = vmatprep.mubr.msk.f32.mxu1 %vm333_vm1, %v22422_v10  ;;  %v22538_v42 = vld [vmem:[#allocation2 + $0xf0] sm:$0xff]  ;;  %v22542_v29 = vld [vmem:[#allocation2 + $0xf8] sm:$0xff] }
 0x5ea   : > { %17981 = vmatmul.mubr.msk.f32.gmra.mrb[58].mxu1 %vm333_vm1, %v22427_v30  ;;  %v22566_v12 = vld [vmem:[#allocation2 + $0x140] sm:$0xff]  ;;  %v22570_v37 = vld [vmem:[#allocation2 + $0x150] sm:$0xff]  ;;  %v15079_v10 = vld [vmem:[%s24003_s7 + $0xe8] sm:$0xff]  ;;  %24215 = vst [vmem:[#allocation15_spill] sm:$0xff] %v22604_v31 }
 0x5eb   : > { %v22435_v21 = vld [vmem:[#allocation2 + $0x171] sm:$0xff]  ;;  %v15078_v30 = vld [vmem:[%s24003_s7 + $0xe0] sm:$0xff] }
 0x5ec   : > { %v22431_v4 = vld [vmem:[#allocation2 + $0x169] sm:$0xff]  ;;  %24213 = vst [vmem:[#allocation13_spill] sm:$0xff] %v22435_v21  ;;  %v22600_v43 = vld [vmem:[#allocation2 + $0x1a] sm:$0xff] }
 0x5ed   : > { %24212 = vst [vmem:[#allocation11_spill] sm:$0xff] %v22431_v4  ;;  %17983 = vmatprep.mubr.msk.f32.mxu1 %vm333_vm1, %v22431_v4  ;;  %v18990_v4 = vpack.c.bf16 %v15077_v11, %v15076_v25  ;;  %24214 = vst [vmem:[#allocation14_spill] sm:$0xff] %v22600_v43  ;;  %v15080_v25 = vld [vmem:[%s24003_s7 + $0xf0] sm:$0xff]  ;;  %v15081_v11 = vld [vmem:[%s24003_s7 + $0xf8] sm:$0xff] }
 0x5ee   : > { %17984 = vmatmul.mubr.msk.f32.gmra.mrb[60].mxu1 %vm333_vm1, %v22435_v21  ;;  %v7955_v21 = vld [vmem:[#allocation2 + $0xa] sm:$0xff] }
 0x5ef   : > { %18002 = vmatprep.mubr.msk.f32.mxu1 %vm333_vm1, %v7231_v58  ;;  %v22546_v58 = vld [vmem:[#allocation2 + $0x108] sm:$0xff] }
 0x5f2   : > { %18003 = vmatmul.mubr.msk.f32.vlgmr.msra.gmra.mrb[62].mxu1 %vm333_vm1, %v7232_v49  ;;  %v22558_v49 = vld [vmem:[#allocation2 + $0x128] sm:$0xff] }
 0x5f3   : > { %18973 = vmatpush3.bf16.msra.mxu1 %v22302_v18  ;;  %18005 = vmatprep.mubr.msk.f32.mxu1 %vm333_vm1, %v22453_v55  ;;  %v18982_v18 = vpack.c.bf16 %v15041_v59, %v15040_v14  ;;  %v22578_v14 = vld [vmem:[#allocation2 + $0x168] sm:$0xff] }
 0x5f4   : > { %18975 = vmatprep.subr.bf16.mxu1 %v18974_v9  ;;  %v7954_v59 = vld [vmem:[#allocation2 + $0x2] sm:$0xff] }
 0x5f6   : > { %18006 = vmatmul.mubr.msk.f32.gmra.mrb[32].mxu1 %vm333_vm1, %v22458_v41 }
 0x5f7   : > { %18008 = vmatprep.mubr.msk.f32.mxu1 %vm333_vm1, %v22468_v63  ;;  %18977 = vmatpush3.bf16.msra.mxu1 %v18974_v9  ;;  %v22562_v9 = vld [vmem:[#allocation2 + $0x138] sm:$0xff] }
 0x5f8   : > { %18979 = vmatprep.subr.bf16.mxu1 %v18978_v34 }
 0x5fa   : > { %18009 = vmatmul.mubr.msk.f32.gmra.mrb[34].mxu1 %vm333_vm1, %v22472_v7 }
 0x5fb   : > { %18011 = vmatprep.mubr.msk.f32.mxu1 %vm333_vm1, %v22482_v48  ;;  %18981 = vmatpush3.bf16.msra.mxu1 %v18978_v34  ;;  %v22574_v34 = vld [vmem:[#allocation2 + $0x158] sm:$0xff] }
 0x5fc   : > { %18983 = vmatprep.subr.bf16.mxu1 %v18982_v18 }
 0x5fe   : > { %18012 = vmatmul.mubr.msk.f32.gmra.mrb[36].mxu1 %vm333_vm1, %v22486_v3 }
 0x5ff   : > { %18014 = vmatprep.mubr.msk.f32.mxu1 %vm333_vm1, %v22490_v40  ;;  %18985 = vmatpush3.bf16.msra.mxu1 %v18982_v18  ;;  %v22582_v18 = vld [vmem:[#allocation2 + $0x170] sm:$0xff] }
 0x600   : > { %18987 = vmatprep.subr.bf16.mxu1 %v18986_v15 }
 0x602   : > { %18015 = vmatmul.mubr.msk.f32.gmra.mrb[38].mxu1 %vm333_vm1, %v22494_v6 }
 0x603   : > { %18017 = vmatprep.mubr.msk.f32.mxu1 %vm333_vm1, %v22498_v33 }
 0x606   : > { %18018 = vmatmul.mubr.msk.f32.gmra.mrb[40].mxu1 %vm333_vm1, %v22502_v0 }
 0x607   : > { %18020 = vmatprep.mubr.msk.f32.mxu1 %vm333_vm1, %v22506_v53 }
 0x60a   : > { %18021 = vmatmul.mubr.msk.f32.gmra.mrb[42].mxu1 %vm333_vm1, %v22510_v45 }
 0x60b   : > { %18023 = vmatprep.mubr.msk.f32.mxu1 %vm333_vm1, %v22514_v61 }
 0x60e   : > { %18024 = vmatmul.mubr.msk.f32.gmra.mrb[44].mxu1 %vm333_vm1, %v22518_v5 }
 0x60f   : > { %18026 = vmatprep.mubr.msk.f32.mxu1 %vm333_vm1, %v22522_v2 }
 0x612   : > { %18027 = vmatmul.mubr.msk.f32.gmra.mrb[46].mxu1 %vm333_vm1, %v22526_v44 }
 0x613   : > { %18029 = vmatprep.mubr.msk.f32.mxu1 %vm333_vm1, %v22530_v54 }
 0x616   : > { %18030 = vmatmul.mubr.msk.f32.gmra.mrb[48].mxu1 %vm333_vm1, %v22534_v35 }
 0x617   : > { %18032 = vmatprep.mubr.msk.f32.mxu1 %vm333_vm1, %v22538_v42 }
 0x61a   : > { %18033 = vmatmul.mubr.msk.f32.gmra.mrb[50].mxu1 %vm333_vm1, %v22542_v29 }
 0x61b   : > { %18035 = vmatprep.mubr.msk.f32.mxu1 %vm333_vm1, %v22546_v58 }
 0x61e   : > { %18036 = vmatmul.mubr.msk.f32.gmra.mrb[52].mxu1 %vm333_vm1, %v22550_v62 }
 0x61f   : > { %18038 = vmatprep.mubr.msk.f32.mxu1 %vm333_vm1, %v22554_v26 }
 0x622   : > { %18039 = vmatmul.mubr.msk.f32.gmra.mrb[54].mxu1 %vm333_vm1, %v22558_v49 }
 0x623   : > { %18041 = vmatprep.mubr.msk.f32.mxu1 %vm333_vm1, %v22562_v9 }
 0x626   : > { %18042 = vmatmul.mubr.msk.f32.gmra.mrb[56].mxu1 %vm333_vm1, %v22566_v12 }
 0x627   : > { %18044 = vmatprep.mubr.msk.f32.mxu1 %vm333_vm1, %v22570_v37 }
 0x62a   : > { %18045 = vmatmul.mubr.msk.f32.gmra.mrb[58].mxu1 %vm333_vm1, %v22574_v34 }
 0x62b   : > { %18047 = vmatprep.mubr.msk.f32.mxu1 %vm333_vm1, %v22578_v14 }
 0x62e   : > { %18048 = vmatmul.mubr.msk.f32.gmra.mrb[60].mxu1 %vm333_vm1, %v22582_v18 }
 0x62f   : > { %18066 = vmatprep.mubr.msk.f32.mxu1 %vm333_vm1, %v7954_v59  ;;  %v18994_v59 = vpack.c.bf16 %v15079_v10, %v15078_v30  ;;  %v18998_v10 = vpack.c.bf16 %v15081_v11, %v15080_v25  ;;  %v22618_v30 = vld [vmem:[#allocation2 + $0x3a] sm:$0xff]  ;;  %v22632_v25 = vld [vmem:[#allocation2 + $0x52] sm:$0xff]  ;;  %v22636_v11 = vld [vmem:[#allocation2 + $0x62] sm:$0xff] }
 0x630   : > { %24216 = vst [vmem:[#allocation16_spill] sm:$0xff] %v22618_v30  ;;  %24217 = vst [vmem:[#allocation17_spill] sm:$0xff] %v22636_v11 }
 0x632   : > { %18067 = vmatmul.mubr.msk.f32.vlgmr.msra.gmra.mrb[62].mxu1 %vm333_vm1, %v7955_v21  ;;  %v22614_v21 = vld [vmem:[#allocation2 + $0x32] sm:$0xff] }
 0x633   : > { %18989 = vmatpush3.bf16.msra.mxu1 %v18986_v15  ;;  %18069 = vmatprep.mubr.msk.f32.mxu1 %vm333_vm1, %v22600_v43  ;;  %v15114_v15 = vld [vmem:[%s24003_s7 + $0x100] sm:$0xff]  ;;  %v15115_v43 = vld [vmem:[%s24003_s7 + $0x108] sm:$0xff] }
 0x634   : > { %18991 = vmatprep.subr.bf16.mxu1 %v18990_v4 }
 0x636   : > { %18070 = vmatmul.mubr.msk.f32.gmra.mrb[32].mxu1 %vm333_vm1, %v22604_v31  ;;  %v22628_v31 = vld [vmem:[#allocation2 + $0x4a] sm:$0xff] }
 0x637   : > { %18072 = vmatprep.mubr.msk.f32.mxu1 %vm333_vm1, %v22614_v21  ;;  %18993 = vmatpush3.bf16.msra.mxu1 %v18990_v4  ;;  %v19002_v4 = vpack.c.bf16 %v15115_v43, %v15114_v15  ;;  %v22648_v43 = vld [vmem:[#allocation2 + $0x82] sm:$0xff]  ;;  %v22652_v15 = vld [vmem:[#allocation2 + $0x92] sm:$0xff] }
 0x638   : > { %18995 = vmatprep.subr.bf16.mxu1 %v18994_v59  ;;  %24220 = vst [vmem:[#allocation20_spill] sm:$0xff] %v22648_v43  ;;  %24221 = vst [vmem:[#allocation21_spill] sm:$0xff] %v22652_v15 }
 0x63a   : > { %18073 = vmatmul.mubr.msk.f32.gmra.mrb[34].mxu1 %vm333_vm1, %v22618_v30  ;;  %v22640_v30 = vld [vmem:[#allocation2 + $0x6a] sm:$0xff] }
 0x63b   : > { %18075 = vmatprep.mubr.msk.f32.mxu1 %vm333_vm1, %v22628_v31  ;;  %18997 = vmatpush3.bf16.msra.mxu1 %v18994_v59  ;;  %24218 = vst [vmem:[#allocation18_spill] sm:$0xff] %v22640_v30  ;;  %v22644_v59 = vld [vmem:[#allocation2 + $0x7a] sm:$0xff] }
 0x63c   : > { %18999 = vmatprep.subr.bf16.mxu1 %v18998_v10  ;;  %24219 = vst [vmem:[#allocation19_spill] sm:$0xff] %v22644_v59 }
 0x63e   : > { %18076 = vmatmul.mubr.msk.f32.gmra.mrb[36].mxu1 %vm333_vm1, %v22632_v25 }
 0x63f   : > { %18078 = vmatprep.mubr.msk.f32.mxu1 %vm333_vm1, %v22636_v11  ;;  %19001 = vmatpush3.bf16.msra.mxu1 %v18998_v10  ;;  %v22656_v10 = vld [vmem:[#allocation2 + $0x9a] sm:$0xff]  ;;  %v15119_v11 = vld [vmem:[%s24003_s7 + $0x128] sm:$0xff] }
 0x640   : > { %19003 = vmatprep.subr.bf16.mxu1 %v19002_v4  ;;  %24222 = vst [vmem:[#allocation22_spill] sm:$0xff] %v22656_v10 }
 0x642   : > { %18079 = vmatmul.mubr.msk.f32.gmra.mrb[38].mxu1 %vm333_vm1, %v22640_v30  ;;  %v22660_v30 = vld [vmem:[#allocation2 + $0xaa] sm:$0xff] }
 0x643   : > { %18081 = vmatprep.mubr.msk.f32.mxu1 %vm333_vm1, %v22644_v59  ;;  %24223 = vst [vmem:[#allocation23_spill] sm:$0xff] %v22660_v30  ;;  %v22664_v59 = vld [vmem:[#allocation2 + $0xb2] sm:$0xff] }
 0x644   : > { %24224 = vst [vmem:[#allocation24_spill] sm:$0xff] %v22664_v59 }
 0x646   : > { %18082 = vmatmul.mubr.msk.f32.gmra.mrb[40].mxu1 %vm333_vm1, %v22648_v43  ;;  %v22668_v43 = vld [vmem:[#allocation2 + $0xc2] sm:$0xff] }
 0x647   : > { %18084 = vmatprep.mubr.msk.f32.mxu1 %vm333_vm1, %v22652_v15  ;;  %24225 = vst [vmem:[#allocation25_spill] sm:$0xff] %v22668_v43  ;;  %v22672_v15 = vld [vmem:[#allocation2 + $0xca] sm:$0xff] }
 0x648   : > { %24226 = vst [vmem:[#allocation12_spill] sm:$0xff] %v22672_v15 }
 0x64a   : > { %18085 = vmatmul.mubr.msk.f32.gmra.mrb[42].mxu1 %vm333_vm1, %v22656_v10  ;;  %v22676_v10 = vld [vmem:[#allocation2 + $0xda] sm:$0xff] }
 0x64b   : > { %18087 = vmatprep.mubr.msk.f32.mxu1 %vm333_vm1, %v22660_v30  ;;  %24227 = vst [vmem:[#allocation7_spill] sm:$0xff] %v22676_v10  ;;  %v22680_v30 = vld [vmem:[#allocation2 + $0xe2] sm:$0xff] }
 0x64c   : > { %24228 = vst [vmem:[#allocation26_spill] sm:$0xff] %v22680_v30 }
 0x64e   : > { %18088 = vmatmul.mubr.msk.f32.gmra.mrb[44].mxu1 %vm333_vm1, %v22664_v59  ;;  %v22684_v59 = vld [vmem:[#allocation2 + $0xf2] sm:$0xff] }
 0x64f   : > { %18090 = vmatprep.mubr.msk.f32.mxu1 %vm333_vm1, %v22668_v43  ;;  %24229 = vst [vmem:[#allocation27_spill] sm:$0xff] %v22684_v59  ;;  %v22688_v43 = vld [vmem:[#allocation2 + $0xfa] sm:$0xff] }
 0x650   : > { %24230 = vst [vmem:[#allocation10_spill] sm:$0xff] %v22688_v43 }
 0x652   : > { %18091 = vmatmul.mubr.msk.f32.gmra.mrb[46].mxu1 %vm333_vm1, %v22672_v15  ;;  %v22692_v15 = vld [vmem:[#allocation2 + $0x10a] sm:$0xff] }
 0x653   : > { %18093 = vmatprep.mubr.msk.f32.mxu1 %vm333_vm1, %v22676_v10  ;;  %24231 = vst [vmem:[#allocation28_spill] sm:$0xff] %v22692_v15  ;;  %v22696_v10 = vld [vmem:[#allocation2 + $0x112] sm:$0xff] }
 0x654   : > { %24232 = vst [vmem:[#allocation29_spill] sm:$0xff] %v22696_v10 }
 0x656   : > { %18094 = vmatmul.mubr.msk.f32.gmra.mrb[48].mxu1 %vm333_vm1, %v22680_v30  ;;  %v22700_v30 = vld [vmem:[#allocation2 + $0x122] sm:$0xff] }
 0x657   : > { %18096 = vmatprep.mubr.msk.f32.mxu1 %vm333_vm1, %v22684_v59  ;;  %24233 = vst [vmem:[#allocation30_spill] sm:$0xff] %v22700_v30  ;;  %v22704_v59 = vld [vmem:[#allocation2 + $0x12a] sm:$0xff] }
 0x658   : > { %24234 = vst [vmem:[#allocation31_spill] sm:$0xff] %v22704_v59 }
 0x65a   : > { %18097 = vmatmul.mubr.msk.f32.gmra.mrb[50].mxu1 %vm333_vm1, %v22688_v43  ;;  %v22708_v43 = vld [vmem:[#allocation2 + $0x13a] sm:$0xff] }
 0x65b   : > { %18099 = vmatprep.mubr.msk.f32.mxu1 %vm333_vm1, %v22692_v15  ;;  %24235 = vst [vmem:[#allocation32_spill] sm:$0xff] %v22708_v43  ;;  %v22712_v15 = vld [vmem:[#allocation2 + $0x142] sm:$0xff] }
 0x65c   : > { %24236 = vst [vmem:[#allocation33_spill] sm:$0xff] %v22712_v15 }
 0x65e   : > { %18100 = vmatmul.mubr.msk.f32.gmra.mrb[52].mxu1 %vm333_vm1, %v22696_v10  ;;  %v22716_v10 = vld [vmem:[#allocation2 + $0x152] sm:$0xff] }
 0x65f   : > { %18102 = vmatprep.mubr.msk.f32.mxu1 %vm333_vm1, %v22700_v30  ;;  %24237 = vst [vmem:[#allocation34_spill] sm:$0xff] %v22716_v10  ;;  %v22720_v30 = vld [vmem:[#allocation2 + $0x15a] sm:$0xff] }
 0x660   : > { %24238 = vst [vmem:[#allocation35_spill] sm:$0xff] %v22720_v30 }
 0x662   : > { %18103 = vmatmul.mubr.msk.f32.gmra.mrb[54].mxu1 %vm333_vm1, %v22704_v59  ;;  %v22724_v59 = vld [vmem:[#allocation2 + $0x16a] sm:$0xff] }
 0x663   : > { %18105 = vmatprep.mubr.msk.f32.mxu1 %vm333_vm1, %v22708_v43  ;;  %24239 = vst [vmem:[#allocation36_spill] sm:$0xff] %v22724_v59  ;;  %v22728_v43 = vld [vmem:[#allocation2 + $0x172] sm:$0xff] }
 0x664   : > { %24240 = vst [vmem:[#allocation37_spill] sm:$0xff] %v22728_v43 }
 0x666   : > { %18106 = vmatmul.mubr.msk.f32.gmra.mrb[56].mxu1 %vm333_vm1, %v22712_v15  ;;  %v15116_v15 = vld [vmem:[%s24003_s7 + $0x110] sm:$0xff] }
 0x667   : > { %18108 = vmatprep.mubr.msk.f32.mxu1 %vm333_vm1, %v22716_v10  ;;  %v15117_v10 = vld [vmem:[%s24003_s7 + $0x118] sm:$0xff] }
 0x66a   : > { %18109 = vmatmul.mubr.msk.f32.gmra.mrb[58].mxu1 %vm333_vm1, %v22720_v30  ;;  %v19006_v30 = vpack.c.bf16 %v15117_v10, %v15116_v15  ;;  %v15121_v15 = vld [vmem:[%s24003_s7 + $0x138] sm:$0xff]  ;;  %v15156_v10 = vld [vmem:[%s24003_s7 + $0x150] sm:$0xff] }
 0x66b   : > { %18111 = vmatprep.mubr.msk.f32.mxu1 %vm333_vm1, %v22724_v59  ;;  %v15118_v59 = vld [vmem:[%s24003_s7 + $0x120] sm:$0xff] }
 0x66e   : > { %18112 = vmatmul.mubr.msk.f32.gmra.mrb[60].mxu1 %vm333_vm1, %v22728_v43  ;;  %v19010_v43 = vpack.c.bf16 %v15119_v11, %v15118_v59  ;;  %v15155_v11 = vld [vmem:[%s24003_s7 + $0x148] sm:$0xff] }
 0x66f   : > { %18130 = vmatprep.mubr.msk.f32.mxu1 %vm333_vm1, %v22453_v55  ;;  %v15120_v55 = vld [vmem:[%s24003_s7 + $0x130] sm:$0xff] }
 0x672   : > { %18131 = vmatmul.mubr.msk.f32.vlgmr.msra.gmra.mrb[62].mxu1 %vm333_vm1, %v22458_v41  ;;  %v19014_v41 = vpack.c.bf16 %v15121_v15, %v15120_v55  ;;  %v15157_v55 = vld [vmem:[%s24003_s7 + $0x158] sm:$0xff] }
 0x673   : > { %19005 = vmatpush3.bf16.msra.mxu1 %v19002_v4  ;;  %18133 = vmatprep.mubr.msk.f32.mxu1 %vm333_vm1, %v22468_v63  ;;  %v15154_v4 = vld [vmem:[%s24003_s7 + $0x140] sm:$0xff]  ;;  %v19022_v15 = vpack.c.bf16 %v15157_v55, %v15156_v10  ;;  %v15161_v10 = vld [vmem:[%s24003_s7 + $0x178] sm:$0xff] }
 0x674   : > { %19007 = vmatprep.subr.bf16.mxu1 %v19006_v30  ;;  %v19018_v59 = vpack.c.bf16 %v15155_v11, %v15154_v4  ;;  %v15159_v4 = vld [vmem:[%s24003_s7 + $0x168] sm:$0xff]  ;;  %v15234_v55 = vld [vmem:[%s24003_s7 + $0x1c0] sm:$0xff] }
 0x676   : > { %18134 = vmatmul.mubr.msk.f32.gmra.mrb[32].mxu1 %vm333_vm1, %v22472_v7 }
 0x677   : > { %18136 = vmatprep.mubr.msk.f32.mxu1 %vm333_vm1, %v22482_v48  ;;  %19009 = vmatpush3.bf16.msra.mxu1 %v19006_v30  ;;  %v22816_v30 = vld [vmem:[#allocation2 + $0x180] sm:$0xff] }
 0x678   : > { %19011 = vmatprep.subr.bf16.mxu1 %v19010_v43 }
 0x67a   : > { %18137 = vmatmul.mubr.msk.f32.gmra.mrb[34].mxu1 %vm333_vm1, %v22486_v3 }
 0x67b   : > { %18139 = vmatprep.mubr.msk.f32.mxu1 %vm333_vm1, %v22490_v40  ;;  %19013 = vmatpush3.bf16.msra.mxu1 %v19010_v43  ;;  %v22820_v43 = vld [vmem:[#allocation2 + $0x188] sm:$0xff] }
 0x67c   : > { %19015 = vmatprep.subr.bf16.mxu1 %v19014_v41 }
 0x67e   : > { %18140 = vmatmul.mubr.msk.f32.gmra.mrb[36].mxu1 %vm333_vm1, %v22494_v6 }
 0x67f   : > { %18142 = vmatprep.mubr.msk.f32.mxu1 %vm333_vm1, %v22498_v33  ;;  %19017 = vmatpush3.bf16.msra.mxu1 %v19014_v41  ;;  %v15158_v41 = vld [vmem:[%s24003_s7 + $0x160] sm:$0xff] }
 0x680   : > { %19019 = vmatprep.subr.bf16.mxu1 %v19018_v59  ;;  %v19026_v11 = vpack.c.bf16 %v15159_v4, %v15158_v41  ;;  %v24250_v41 = vld [vmem:[#allocation17_spill] sm:$0xff] }
 0x682   : > { %18143 = vmatmul.mubr.msk.f32.gmra.mrb[38].mxu1 %vm333_vm1, %v22502_v0 }
 0x683   : > { %18145 = vmatprep.mubr.msk.f32.mxu1 %vm333_vm1, %v22506_v53 }
 0x686   : > { %18146 = vmatmul.mubr.msk.f32.gmra.mrb[40].mxu1 %vm333_vm1, %v22510_v45 }
 0x687   : > { %18148 = vmatprep.mubr.msk.f32.mxu1 %vm333_vm1, %v22514_v61 }
 0x68a   : > { %18149 = vmatmul.mubr.msk.f32.gmra.mrb[42].mxu1 %vm333_vm1, %v22518_v5 }
 0x68b   : > { %18151 = vmatprep.mubr.msk.f32.mxu1 %vm333_vm1, %v22522_v2 }
 0x68e   : > { %18152 = vmatmul.mubr.msk.f32.gmra.mrb[44].mxu1 %vm333_vm1, %v22526_v44 }
 0x68f   : > { %18154 = vmatprep.mubr.msk.f32.mxu1 %vm333_vm1, %v22530_v54 }
 0x692   : > { %18155 = vmatmul.mubr.msk.f32.gmra.mrb[46].mxu1 %vm333_vm1, %v22534_v35 }
 0x693   : > { %18157 = vmatprep.mubr.msk.f32.mxu1 %vm333_vm1, %v22538_v42 }
 0x696   : > { %18158 = vmatmul.mubr.msk.f32.gmra.mrb[48].mxu1 %vm333_vm1, %v22542_v29 }
 0x697   : > { %18160 = vmatprep.mubr.msk.f32.mxu1 %vm333_vm1, %v22546_v58 }
 0x69a   : > { %18161 = vmatmul.mubr.msk.f32.gmra.mrb[50].mxu1 %vm333_vm1, %v22550_v62 }
 0x69b   : > { %18163 = vmatprep.mubr.msk.f32.mxu1 %vm333_vm1, %v22554_v26 }
 0x69e   : > { %18164 = vmatmul.mubr.msk.f32.gmra.mrb[52].mxu1 %vm333_vm1, %v22558_v49 }
 0x69f   : > { %18166 = vmatprep.mubr.msk.f32.mxu1 %vm333_vm1, %v22562_v9 }
 0x6a2   : > { %18167 = vmatmul.mubr.msk.f32.gmra.mrb[54].mxu1 %vm333_vm1, %v22566_v12 }
 0x6a3   : > { %18169 = vmatprep.mubr.msk.f32.mxu1 %vm333_vm1, %v22570_v37 }
 0x6a6   : > { %18170 = vmatmul.mubr.msk.f32.gmra.mrb[56].mxu1 %vm333_vm1, %v22574_v34 }
 0x6a7   : > { %18172 = vmatprep.mubr.msk.f32.mxu1 %vm333_vm1, %v22578_v14 }
 0x6aa   : > { %18173 = vmatmul.mubr.msk.f32.gmra.mrb[58].mxu1 %vm333_vm1, %v22582_v18 }
 0x6ab   : > { %18175 = vmatprep.mubr.msk.f32.mxu1 %vm333_vm1, %v22816_v30 }
 0x6ae   : > { %18176 = vmatmul.mubr.msk.f32.gmra.mrb[60].mxu1 %vm333_vm1, %v22820_v43 }
 0x6af   : > { %18194 = vmatprep.mubr.msk.f32.mxu1 %vm333_vm1, %v22246_v52  ;;  %v15160_v52 = vld [vmem:[%s24003_s7 + $0x170] sm:$0xff] }
 0x6b2   : > { %18195 = vmatmul.mubr.msk.f32.vlgmr.msra.gmra.mrb[62].mxu1 %vm333_vm1, %v22252_v16  ;;  %v19030_v16 = vpack.c.bf16 %v15161_v10, %v15160_v52  ;;  %v24252_v52 = vld [vmem:[#allocation19_spill] sm:$0xff]  ;;  %v24253_v10 = vld [vmem:[#allocation20_spill] sm:$0xff] }
 0x6b3   : > { %19021 = vmatpush3.bf16.msra.mxu1 %v19018_v59  ;;  %18197 = vmatprep.mubr.msk.f32.mxu1 %vm333_vm1, %v22264_v32  ;;  %v15194_v32 = vld [vmem:[%s24003_s7 + $0x180] sm:$0xff]  ;;  %v15195_v59 = vld [vmem:[%s24003_s7 + $0x188] sm:$0xff] }
 0x6b4   : > { %19023 = vmatprep.subr.bf16.mxu1 %v19022_v15 }
 0x6b6   : > { %18198 = vmatmul.mubr.msk.f32.gmra.mrb[32].mxu1 %vm333_vm1, %v22270_v1  ;;  %v19034_v1 = vpack.c.bf16 %v15195_v59, %v15194_v32  ;;  %v24255_v32 = vld [vmem:[#allocation22_spill] sm:$0xff]  ;;  %v24256_v59 = vld [vmem:[#allocation23_spill] sm:$0xff] }
 0x6b7   : > { %18200 = vmatprep.mubr.msk.f32.mxu1 %vm333_vm1, %v22282_v51  ;;  %19025 = vmatpush3.bf16.msra.mxu1 %v19022_v15  ;;  %v24241_v51 = vld [vmem:[#allocation8_spill] sm:$0xff]  ;;  %v15235_v15 = vld [vmem:[%s24003_s7 + $0x1c8] sm:$0xff] }
 0x6b8   : > { %19027 = vmatprep.subr.bf16.mxu1 %v19026_v11  ;;  %v19050_v4 = vpack.c.bf16 %v15235_v15, %v15234_v55  ;;  %v23004_v55 = vld [vmem:[#allocation2 + $0x18a] sm:$0xff] }
 0x6b9   : > { %v15236_v15 = vld [vmem:[%s24003_s7 + $0x1d0] sm:$0xff] }
 0x6ba   : > { %18201 = vmatmul.mubr.msk.f32.gmra.mrb[34].mxu1 %vm333_vm1, %v22288_v39  ;;  %v24242_v39 = vld [vmem:[#allocation5_spill] sm:$0xff] }
 0x6bb   : > { %18203 = vmatprep.mubr.msk.f32.mxu1 %vm333_vm1, %v22300_v13  ;;  %19029 = vmatpush3.bf16.msra.mxu1 %v19026_v11  ;;  %v24243_v13 = vld [vmem:[#allocation6_spill] sm:$0xff] }
 0x6bc   : > { %19031 = vmatprep.subr.bf16.mxu1 %v19030_v16  ;;  %v24251_v11 = vld [vmem:[#allocation18_spill] sm:$0xff] }
 0x6be   : > { %18204 = vmatmul.mubr.msk.f32.gmra.mrb[36].mxu1 %vm333_vm1, %v22308_v28  ;;  %v24244_v28 = vld [vmem:[#allocation9_spill] sm:$0xff] }
 0x6bf   : > { %18206 = vmatprep.mubr.msk.f32.mxu1 %vm333_vm1, %v22314_v17  ;;  %19033 = vmatpush3.bf16.msra.mxu1 %v19030_v16  ;;  %v24245_v17 = vld [vmem:[#allocation11_spill] sm:$0xff]  ;;  %v24254_v16 = vld [vmem:[#allocation21_spill] sm:$0xff] }
 0x6c0   : > { %19035 = vmatprep.subr.bf16.mxu1 %v19034_v1 }
 0x6c2   : > { %18207 = vmatmul.mubr.msk.f32.gmra.mrb[38].mxu1 %vm333_vm1, %v22321_v56  ;;  %v24246_v56 = vld [vmem:[#allocation13_spill] sm:$0xff] }
 0x6c3   : > { %18209 = vmatprep.mubr.msk.f32.mxu1 %vm333_vm1, %v22327_v38  ;;  %v22908_v38 = vld [vmem:[#allocation2 + $0x181] sm:$0xff] }
 0x6c6   : > { %18210 = vmatmul.mubr.msk.f32.gmra.mrb[40].mxu1 %vm333_vm1, %v22333_v8  ;;  %v22912_v8 = vld [vmem:[#allocation2 + $0x189] sm:$0xff] }
 0x6c7   : > { %18212 = vmatprep.mubr.msk.f32.mxu1 %vm333_vm1, %v22339_v60  ;;  %v15196_v60 = vld [vmem:[%s24003_s7 + $0x190] sm:$0xff] }
 0x6ca   : > { %18213 = vmatmul.mubr.msk.f32.gmra.mrb[42].mxu1 %vm333_vm1, %v22345_v50  ;;  %v15197_v50 = vld [vmem:[%s24003_s7 + $0x198] sm:$0xff] }
 0x6cb   : > { %18215 = vmatprep.mubr.msk.f32.mxu1 %vm333_vm1, %v22351_v22  ;;  %v24247_v22 = vld [vmem:[#allocation14_spill] sm:$0xff] }
 0x6ce   : > { %18216 = vmatmul.mubr.msk.f32.gmra.mrb[44].mxu1 %vm333_vm1, %v22357_v24  ;;  %v19038_v24 = vpack.c.bf16 %v15197_v50, %v15196_v60  ;;  %v24264_v60 = vld [vmem:[#allocation28_spill] sm:$0xff]  ;;  %v24265_v50 = vld [vmem:[#allocation29_spill] sm:$0xff] }
 0x6cf   : > { %18218 = vmatprep.mubr.msk.f32.mxu1 %vm333_vm1, %v22363_v27  ;;  %v15198_v27 = vld [vmem:[%s24003_s7 + $0x1a0] sm:$0xff] }
 0x6d2   : > { %18219 = vmatmul.mubr.msk.f32.gmra.mrb[46].mxu1 %vm333_vm1, %v22369_v47  ;;  %v15199_v47 = vld [vmem:[%s24003_s7 + $0x1a8] sm:$0xff] }
 0x6d3   : > { %18221 = vmatprep.mubr.msk.f32.mxu1 %vm333_vm1, %v22375_v36  ;;  %v24248_v36 = vld [vmem:[#allocation15_spill] sm:$0xff] }
 0x6d6   : > { %18222 = vmatmul.mubr.msk.f32.gmra.mrb[48].mxu1 %vm333_vm1, %v22381_v19  ;;  %v19042_v19 = vpack.c.bf16 %v15199_v47, %v15198_v27  ;;  %v24268_v27 = vld [vmem:[#allocation32_spill] sm:$0xff]  ;;  %v24269_v47 = vld [vmem:[#allocation33_spill] sm:$0xff] }
 0x6d7   : > { %18224 = vmatprep.mubr.msk.f32.mxu1 %vm333_vm1, %v22387_v23  ;;  %v15200_v23 = vld [vmem:[%s24003_s7 + $0x1b0] sm:$0xff] }
 0x6da   : > { %18225 = vmatmul.mubr.msk.f32.gmra.mrb[50].mxu1 %vm333_vm1, %v22393_v46  ;;  %v15201_v46 = vld [vmem:[%s24003_s7 + $0x1b8] sm:$0xff] }
 0x6db   : > { %18227 = vmatprep.mubr.msk.f32.mxu1 %vm333_vm1, %v22399_v20  ;;  %v24249_v20 = vld [vmem:[#allocation16_spill] sm:$0xff] }
 0x6de   : > { %18228 = vmatmul.mubr.msk.f32.gmra.mrb[52].mxu1 %vm333_vm1, %v22405_v57  ;;  %v19046_v57 = vpack.c.bf16 %v15201_v46, %v15200_v23  ;;  %v24272_v23 = vld [vmem:[#allocation36_spill] sm:$0xff]  ;;  %v24273_v46 = vld [vmem:[#allocation37_spill] sm:$0xff] }
 0x6df   : > { %18230 = vmatprep.mubr.msk.f32.mxu1 %vm333_vm1, %v24241_v51  ;;  %v24258_v51 = vld [vmem:[#allocation25_spill] sm:$0xff] }
 0x6e2   : > { %18231 = vmatmul.mubr.msk.f32.gmra.mrb[54].mxu1 %vm333_vm1, %v24242_v39  ;;  %v24259_v39 = vld [vmem:[#allocation12_spill] sm:$0xff] }
 0x6e3   : > { %18233 = vmatprep.mubr.msk.f32.mxu1 %vm333_vm1, %v24243_v13  ;;  %v24260_v13 = vld [vmem:[#allocation7_spill] sm:$0xff] }
 0x6e6   : > { %18234 = vmatmul.mubr.msk.f32.gmra.mrb[56].mxu1 %vm333_vm1, %v24244_v28  ;;  %v24261_v28 = vld [vmem:[#allocation26_spill] sm:$0xff] }
 0x6e7   : > { %18236 = vmatprep.mubr.msk.f32.mxu1 %vm333_vm1, %v24245_v17  ;;  %v24262_v17 = vld [vmem:[#allocation27_spill] sm:$0xff] }
 0x6ea   : > { %18237 = vmatmul.mubr.msk.f32.gmra.mrb[58].mxu1 %vm333_vm1, %v24246_v56  ;;  %v24263_v56 = vld [vmem:[#allocation10_spill] sm:$0xff] }
 0x6eb   : > { %18239 = vmatprep.mubr.msk.f32.mxu1 %vm333_vm1, %v22908_v38 }
 0x6ee   : > { %18240 = vmatmul.mubr.msk.f32.gmra.mrb[60].mxu1 %vm333_vm1, %v22912_v8 }
 0x6ef   : > { %18258 = vmatprep.mubr.msk.f32.mxu1 %vm333_vm1, %v24247_v22  ;;  %v24266_v22 = vld [vmem:[#allocation30_spill] sm:$0xff] }
 0x6f2   : > { %18259 = vmatmul.mubr.msk.f32.vlgmr.msra.gmra.mrb[62].mxu1 %vm333_vm1, %v24248_v36  ;;  %v24270_v36 = vld [vmem:[#allocation34_spill] sm:$0xff] }
 0x6f3   : > { %19037 = vmatpush3.bf16.msra.mxu1 %v19034_v1  ;;  %18261 = vmatprep.mubr.msk.f32.mxu1 %vm333_vm1, %v22614_v21  ;;  %v24257_v1 = vld [vmem:[#allocation24_spill] sm:$0xff] }
 0x6f4   : > { %19039 = vmatprep.subr.bf16.mxu1 %v19038_v24 }
 0x6f6   : > { %18262 = vmatmul.mubr.msk.f32.gmra.mrb[32].mxu1 %vm333_vm1, %v24249_v20 }
 0x6f7   : > { %18264 = vmatprep.mubr.msk.f32.mxu1 %vm333_vm1, %v22628_v31  ;;  %19041 = vmatpush3.bf16.msra.mxu1 %v19038_v24  ;;  %v24267_v24 = vld [vmem:[#allocation31_spill] sm:$0xff] }
 0x6f8   : > { %19043 = vmatprep.subr.bf16.mxu1 %v19042_v19 }
 0x6fa   : > { %18265 = vmatmul.mubr.msk.f32.gmra.mrb[34].mxu1 %vm333_vm1, %v22632_v25 }
 0x6fb   : > { %18267 = vmatprep.mubr.msk.f32.mxu1 %vm333_vm1, %v24250_v41  ;;  %19045 = vmatpush3.bf16.msra.mxu1 %v19042_v19  ;;  %v24271_v19 = vld [vmem:[#allocation35_spill] sm:$0xff] }
 0x6fc   : > { %19047 = vmatprep.subr.bf16.mxu1 %v19046_v57 }
 0x6fe   : > { %18268 = vmatmul.mubr.msk.f32.gmra.mrb[36].mxu1 %vm333_vm1, %v24251_v11 }
 0x6ff   : > { %18270 = vmatprep.mubr.msk.f32.mxu1 %vm333_vm1, %v24252_v52  ;;  %19049 = vmatpush3.bf16.msra.mxu1 %v19046_v57  ;;  %v23000_v57 = vld [vmem:[#allocation2 + $0x182] sm:$0xff] }
 0x700   : > { %19051 = vmatprep.subr.bf16.mxu1 %v19050_v4  ;;  %24274 = vst [vmem:[#allocation8_spill] sm:$0xff] %v23000_v57 }
 0x702   : > { %18271 = vmatmul.mubr.msk.f32.gmra.mrb[38].mxu1 %vm333_vm1, %v24253_v10 }
 0x703   : > { %18273 = vmatprep.mubr.msk.f32.mxu1 %vm333_vm1, %v24254_v16 }
 0x706   : > { %18274 = vmatmul.mubr.msk.f32.gmra.mrb[40].mxu1 %vm333_vm1, %v24255_v32 }
 0x707   : > { %18276 = vmatprep.mubr.msk.f32.mxu1 %vm333_vm1, %v24256_v59 }
 0x70a   : > { %18277 = vmatmul.mubr.msk.f32.gmra.mrb[42].mxu1 %vm333_vm1, %v24257_v1 }
 0x70b   : > { %18279 = vmatprep.mubr.msk.f32.mxu1 %vm333_vm1, %v24258_v51 }
 0x70e   : > { %18280 = vmatmul.mubr.msk.f32.gmra.mrb[44].mxu1 %vm333_vm1, %v24259_v39 }
 0x70f   : > { %18282 = vmatprep.mubr.msk.f32.mxu1 %vm333_vm1, %v24260_v13 }
 0x712   : > { %18283 = vmatmul.mubr.msk.f32.gmra.mrb[46].mxu1 %vm333_vm1, %v24261_v28 }
 0x713   : > { %18285 = vmatprep.mubr.msk.f32.mxu1 %vm333_vm1, %v24262_v17 }
 0x716   : > { %18286 = vmatmul.mubr.msk.f32.gmra.mrb[48].mxu1 %vm333_vm1, %v24263_v56 }
 0x717   : > { %18288 = vmatprep.mubr.msk.f32.mxu1 %vm333_vm1, %v24264_v60 }
 0x71a   : > { %18289 = vmatmul.mubr.msk.f32.gmra.mrb[50].mxu1 %vm333_vm1, %v24265_v50 }
 0x71b   : > { %18291 = vmatprep.mubr.msk.f32.mxu1 %vm333_vm1, %v24266_v22 }
 0x71e   : > { %18292 = vmatmul.mubr.msk.f32.gmra.mrb[52].mxu1 %vm333_vm1, %v24267_v24 }
 0x71f   : > { %18294 = vmatprep.mubr.msk.f32.mxu1 %vm333_vm1, %v24268_v27 }
 0x722   : > { %18295 = vmatmul.mubr.msk.f32.gmra.mrb[54].mxu1 %vm333_vm1, %v24269_v47  ;;  %v15239_v47 = vld [vmem:[%s24003_s7 + $0x1e8] sm:$0xff] }
 0x723   : > { %18297 = vmatprep.mubr.msk.f32.mxu1 %vm333_vm1, %v24270_v36 }
 0x726   : > { %18298 = vmatmul.mubr.msk.f32.gmra.mrb[56].mxu1 %vm333_vm1, %v24271_v19  ;;  %v15237_v19 = vld [vmem:[%s24003_s7 + $0x1d8] sm:$0xff] }
 0x727   : > { %18300 = vmatprep.mubr.msk.f32.mxu1 %vm333_vm1, %v24272_v23  ;;  %v7272_v23 = vld [vmem:[#allocation2 + $0x9] sm:$0xff]  ;;  %v19054_v36 = vpack.c.bf16 %v15237_v19, %v15236_v15  ;;  %v9943_v15 = vld [vmem:[#allocation2 + $0x111] sm:$0xff] }
 0x728   : > { %v15240_v19 = vld [vmem:[%s24003_s7 + $0x1f0] sm:$0xff] }
 0x72a   : > { %18301 = vmatmul.mubr.msk.f32.gmra.mrb[58].mxu1 %vm333_vm1, %v24273_v46  ;;  %v7271_v46 = vld [vmem:[#allocation2 + $0x1] sm:$0xff] }
 0x72b   : > { %18303 = vmatprep.mubr.msk.f32.mxu1 %vm333_vm1, %v23000_v57  ;;  %17938 = vmatprep.mubr.msk.f32.mxu0 %vm333_vm1, %v7271_v46  ;;  %v15238_v57 = vld [vmem:[%s24003_s7 + $0x1e0] sm:$0xff]  ;;  %v15241_v46 = vld [vmem:[%s24003_s7 + $0x1f8] sm:$0xff] }
 0x72c   : > { %17939 = vmatmul.mubr.msk.f32.vlgmr.msra.gmra.mrb[96].mxu0 %vm333_vm1, %v7272_v23  ;;  %v9941_v23 = vld [vmem:[#allocation2 + $0xf9] sm:$0xff] }
 0x72e   : > { %18304 = vmatmul.mubr.msk.f32.gmra.mrb[60].mxu1 %vm333_vm1, %v23004_v55 }
 0x72f   : > { %18322 = vmatprep.mubr.msk.f32.mxu1 %vm333_vm1, %v22468_v63  ;;  %v19058_v63 = vpack.c.bf16 %v15239_v47, %v15238_v57  ;;  %v9939_v47 = vld [vmem:[#allocation2 + $0xe1] sm:$0xff]  ;;  %v9942_v57 = vld [vmem:[#allocation2 + $0x109] sm:$0xff] }
 0x732   : > { %18323 = vmatmul.mubr.msk.f32.vlgmr.msra.gmra.mrb[62].mxu1 %vm333_vm1, %v22472_v7  ;;  %v19062_v7 = vpack.c.bf16 %v15241_v46, %v15240_v19  ;;  %v9945_v19 = vld [vmem:[#allocation2 + $0x129] sm:$0xff]  ;;  %v9946_v46 = vld [vmem:[#allocation2 + $0x139] sm:$0xff] }
 0x733   : > { %19053 = vmatpush3.bf16.msra.mxu1 %v19050_v4  ;;  %18325 = vmatprep.mubr.msk.f32.mxu1 %vm333_vm1, %v22482_v48  ;;  %v15274_v48 = vld [vmem:[%s24003_s7 + $0x200] sm:$0xff]  ;;  %v15275_v4 = vld [vmem:[%s24003_s7 + $0x208] sm:$0xff] }
 0x734   : > { %19055 = vmatprep.subr.bf16.mxu1 %v19054_v36 }
 0x736   : > { %18326 = vmatmul.mubr.msk.f32.gmra.mrb[32].mxu1 %vm333_vm1, %v22486_v3  ;;  %v19066_v3 = vpack.c.bf16 %v15275_v4, %v15274_v48  ;;  %v9948_v48 = vld [vmem:[#allocation2 + $0x151] sm:$0xff]  ;;  %v9949_v4 = vld [vmem:[#allocation2 + $0x159] sm:$0xff] }
 0x737   : > { %18328 = vmatprep.mubr.msk.f32.mxu1 %vm333_vm1, %v22490_v40  ;;  %19057 = vmatpush3.bf16.msra.mxu1 %v19054_v36  ;;  %v9560_v40 = vld [vmem:[#allocation2 + $0x198] sm:$0xff] }
 0x738   : > { %19059 = vmatprep.subr.bf16.mxu1 %v19058_v63  ;;  %v9940_v36 = vld [vmem:[#allocation2 + $0xf1] sm:$0xff] }
 0x73a   : > { %18329 = vmatmul.mubr.msk.f32.gmra.mrb[34].mxu1 %vm333_vm1, %v22494_v6  ;;  %v9561_v6 = vld [vmem:[#allocation2 + $0x1a0] sm:$0xff] }
 0x73b   : > { %18331 = vmatprep.mubr.msk.f32.mxu1 %vm333_vm1, %v22498_v33  ;;  %19061 = vmatpush3.bf16.msra.mxu1 %v19058_v63  ;;  %v15276_v33 = vld [vmem:[%s24003_s7 + $0x210] sm:$0xff]  ;;  %v9944_v63 = vld [vmem:[#allocation2 + $0x121] sm:$0xff] }
 0x73c   : > { %19063 = vmatprep.subr.bf16.mxu1 %v19062_v7 }
 0x73e   : > { %18332 = vmatmul.mubr.msk.f32.gmra.mrb[36].mxu1 %vm333_vm1, %v22502_v0  ;;  %v15277_v0 = vld [vmem:[%s24003_s7 + $0x218] sm:$0xff] }
 0x73f   : > { %18334 = vmatprep.mubr.msk.f32.mxu1 %vm333_vm1, %v22506_v53  ;;  %19065 = vmatpush3.bf16.msra.mxu1 %v19062_v7  ;;  %v9924_v53 = vld [vmem:[#allocation2 + $0x31] sm:$0xff]  ;;  %v9947_v7 = vld [vmem:[#allocation2 + $0x141] sm:$0xff] }
 0x740   : > { %19067 = vmatprep.subr.bf16.mxu1 %v19066_v3 }
 0x742   : > { %18335 = vmatmul.mubr.msk.f32.gmra.mrb[38].mxu1 %vm333_vm1, %v22510_v45  ;;  %v19070_v45 = vpack.c.bf16 %v15277_v0, %v15276_v33  ;;  %v9955_v33 = vld [vmem:[#allocation2 + $0x1a1] sm:$0xff] }
 0x743   : > { %18337 = vmatprep.mubr.msk.f32.mxu1 %vm333_vm1, %v22514_v61  ;;  %v9925_v61 = vld [vmem:[#allocation2 + $0x39] sm:$0xff] }
 0x746   : > { %18338 = vmatmul.mubr.msk.f32.gmra.mrb[40].mxu1 %vm333_vm1, %v22518_v5  ;;  %v15278_v5 = vld [vmem:[%s24003_s7 + $0x220] sm:$0xff] }
 0x747   : > { %18340 = vmatprep.mubr.msk.f32.mxu1 %vm333_vm1, %v22522_v2  ;;  %v15279_v2 = vld [vmem:[%s24003_s7 + $0x228] sm:$0xff] }
 0x74a   : > { %18341 = vmatmul.mubr.msk.f32.gmra.mrb[42].mxu1 %vm333_vm1, %v22526_v44  ;;  %v9926_v44 = vld [vmem:[#allocation2 + $0x49] sm:$0xff] }
 0x74b   : > { %18343 = vmatprep.mubr.msk.f32.mxu1 %vm333_vm1, %v22530_v54  ;;  %v19074_v54 = vpack.c.bf16 %v15279_v2, %v15278_v5 }
 0x74e   : > { %18344 = vmatmul.mubr.msk.f32.gmra.mrb[44].mxu1 %vm333_vm1, %v22534_v35  ;;  %v9927_v35 = vld [vmem:[#allocation2 + $0x51] sm:$0xff] }
 0x74f   : > { %18346 = vmatprep.mubr.msk.f32.mxu1 %vm333_vm1, %v22538_v42  ;;  %v15280_v42 = vld [vmem:[%s24003_s7 + $0x230] sm:$0xff] }
 0x752   : > { %18347 = vmatmul.mubr.msk.f32.gmra.mrb[46].mxu1 %vm333_vm1, %v22542_v29  ;;  %v15281_v29 = vld [vmem:[%s24003_s7 + $0x238] sm:$0xff] }
 0x753   : > { %18349 = vmatprep.mubr.msk.f32.mxu1 %vm333_vm1, %v22546_v58  ;;  %v9928_v58 = vld [vmem:[#allocation2 + $0x61] sm:$0xff] }
 0x756   : > { %18350 = vmatmul.mubr.msk.f32.gmra.mrb[48].mxu1 %vm333_vm1, %v22550_v62  ;;  %v19078_v62 = vpack.c.bf16 %v15281_v29, %v15280_v42 }
 0x757   : > { %18352 = vmatprep.mubr.msk.f32.mxu1 %vm333_vm1, %v22554_v26  ;;  %v9929_v26 = vld [vmem:[#allocation2 + $0x69] sm:$0xff] }
 0x75a   : > { %18353 = vmatmul.mubr.msk.f32.gmra.mrb[50].mxu1 %vm333_vm1, %v22558_v49  ;;  %v9930_v49 = vld [vmem:[#allocation2 + $0x79] sm:$0xff] }
 0x75b   : > { %18355 = vmatprep.mubr.msk.f32.mxu1 %vm333_vm1, %v22562_v9  ;;  %v9931_v9 = vld [vmem:[#allocation2 + $0x81] sm:$0xff] }
 0x75e   : > { %18356 = vmatmul.mubr.msk.f32.gmra.mrb[52].mxu1 %vm333_vm1, %v22566_v12  ;;  %v9932_v12 = vld [vmem:[#allocation2 + $0x91] sm:$0xff] }
 0x75f   : > { %18358 = vmatprep.mubr.msk.f32.mxu1 %vm333_vm1, %v22570_v37  ;;  %v9933_v37 = vld [vmem:[#allocation2 + $0x99] sm:$0xff] }
 0x762   : > { %18359 = vmatmul.mubr.msk.f32.gmra.mrb[54].mxu1 %vm333_vm1, %v22574_v34  ;;  %v9934_v34 = vld [vmem:[#allocation2 + $0xa9] sm:$0xff] }
 0x763   : > { %18361 = vmatprep.mubr.msk.f32.mxu1 %vm333_vm1, %v22578_v14  ;;  %v9935_v14 = vld [vmem:[#allocation2 + $0xb1] sm:$0xff] }
 0x766   : > { %18362 = vmatmul.mubr.msk.f32.gmra.mrb[56].mxu1 %vm333_vm1, %v22582_v18  ;;  %v9936_v18 = vld [vmem:[#allocation2 + $0xc1] sm:$0xff] }
 0x767   : > { %18364 = vmatprep.mubr.msk.f32.mxu1 %vm333_vm1, %v22816_v30  ;;  %v9937_v30 = vld [vmem:[#allocation2 + $0xc9] sm:$0xff] }
 0x76a   : > { %18365 = vmatmul.mubr.msk.f32.gmra.mrb[58].mxu1 %vm333_vm1, %v22820_v43  ;;  %v9938_v43 = vld [vmem:[#allocation2 + $0xd9] sm:$0xff] }
 0x76b   : > { %18367 = vmatprep.mubr.msk.f32.mxu1 %vm333_vm1, %v9560_v40  ;;  %v9951_v40 = vld [vmem:[#allocation2 + $0x171] sm:$0xff] }
 0x76e   : > { %18368 = vmatmul.mubr.msk.f32.gmra.mrb[60].mxu1 %vm333_vm1, %v9561_v6  ;;  %v9954_v6 = vld [vmem:[#allocation2 + $0x199] sm:$0xff] }
 0x76f   : > { %18386 = vmatprep.mubr.msk.f32.mxu1 %vm333_vm1, %v9924_v53 }
 0x772   : > { %18387 = vmatmul.mubr.msk.f32.vlgmr.msra.gmra.mrb[62].mxu1 %vm333_vm1, %v9925_v61 }
 0x773   : > { %19069 = vmatpush3.bf16.msra.mxu1 %v19066_v3  ;;  %18389 = vmatprep.mubr.msk.f32.mxu1 %vm333_vm1, %v9926_v44  ;;  %v9950_v3 = vld [vmem:[#allocation2 + $0x169] sm:$0xff] }
 0x774   : > { %19071 = vmatprep.subr.bf16.mxu1 %v19070_v45 }
 0x776   : > { %18390 = vmatmul.mubr.msk.f32.gmra.mrb[32].mxu1 %vm333_vm1, %v9927_v35 }
 0x777   : > { %18392 = vmatprep.mubr.msk.f32.mxu1 %vm333_vm1, %v9928_v58  ;;  %19073 = vmatpush3.bf16.msra.mxu1 %v19070_v45 }
 0x778   : > { %19075 = vmatprep.subr.bf16.mxu1 %v19074_v54 }
 0x77a   : > { %18393 = vmatmul.mubr.msk.f32.gmra.mrb[34].mxu1 %vm333_vm1, %v9929_v26 }
 0x77b   : > { %18395 = vmatprep.mubr.msk.f32.mxu1 %vm333_vm1, %v9930_v49  ;;  %19077 = vmatpush3.bf16.msra.mxu1 %v19074_v54 }
 0x77c   : > { %19079 = vmatprep.subr.bf16.mxu1 %v19078_v62 }
 0x77e   : > { %18396 = vmatmul.mubr.msk.f32.gmra.mrb[36].mxu1 %vm333_vm1, %v9931_v9 }
 0x77f   : > { %18398 = vmatprep.mubr.msk.f32.mxu1 %vm333_vm1, %v9932_v12  ;;  %19081 = vmatpush3.bf16.msra.mxu1 %v19078_v62 }
 0x782   : > { %18399 = vmatmul.mubr.msk.f32.gmra.mrb[38].mxu1 %vm333_vm1, %v9933_v37 }
 0x783   : > { %18401 = vmatprep.mubr.msk.f32.mxu1 %vm333_vm1, %v9934_v34 }
 0x786   : > { %18402 = vmatmul.mubr.msk.f32.gmra.mrb[40].mxu1 %vm333_vm1, %v9935_v14 }
 0x787   : > { %18404 = vmatprep.mubr.msk.f32.mxu1 %vm333_vm1, %v9936_v18 }
 0x78a   : > { %18405 = vmatmul.mubr.msk.f32.gmra.mrb[42].mxu1 %vm333_vm1, %v9937_v30 }
 0x78b   : > { %18407 = vmatprep.mubr.msk.f32.mxu1 %vm333_vm1, %v9938_v43 }
 0x78e   : > { %18408 = vmatmul.mubr.msk.f32.gmra.mrb[44].mxu1 %vm333_vm1, %v9939_v47 }
 0x78f   : > { %18410 = vmatprep.mubr.msk.f32.mxu1 %vm333_vm1, %v9940_v36 }
 0x792   : > { %18411 = vmatmul.mubr.msk.f32.gmra.mrb[46].mxu1 %vm333_vm1, %v9941_v23 }
 0x793   : > { %18413 = vmatprep.mubr.msk.f32.mxu1 %vm333_vm1, %v9942_v57 }
 0x796   : > { %18414 = vmatmul.mubr.msk.f32.gmra.mrb[48].mxu1 %vm333_vm1, %v9943_v15 }
 0x797   : > { %18416 = vmatprep.mubr.msk.f32.mxu1 %vm333_vm1, %v9944_v63 }
 0x79a   : > { %18417 = vmatmul.mubr.msk.f32.gmra.mrb[50].mxu1 %vm333_vm1, %v9945_v19 }
 0x79b   : > { %18419 = vmatprep.mubr.msk.f32.mxu1 %vm333_vm1, %v9946_v46 }
 0x79e   : > { %18420 = vmatmul.mubr.msk.f32.gmra.mrb[52].mxu1 %vm333_vm1, %v9947_v7 }
 0x79f   : > { %18422 = vmatprep.mubr.msk.f32.mxu1 %vm333_vm1, %v9948_v48 }
 0x7a2   : > { %18423 = vmatmul.mubr.msk.f32.gmra.mrb[54].mxu1 %vm333_vm1, %v9949_v4 }
 0x7a3   : > { %18425 = vmatprep.mubr.msk.f32.mxu1 %vm333_vm1, %v9950_v3  ;;  %v20010_v3 = vmov 1966171168  }
 0x7a6   : > { %18426 = vmatmul.mubr.msk.f32.gmra.mrb[56].mxu1 %vm333_vm1, %v9951_v40  ;;  %v10945_v40 = vunpack.c.l.s4 %v20010_v3 }
 0x7a7   : > { %18428 = vmatprep.mubr.msk.f32.mxu1 %vm333_vm1, %v22908_v38  ;;  %v24278_v38 = vld [vmem:[#allocation36_spill] sm:$0xff] }
 0x7aa   : > { %18429 = vmatmul.mubr.msk.f32.gmra.mrb[58].mxu1 %vm333_vm1, %v22912_v8  ;;  %v24279_v8 = vld [vmem:[#allocation37_spill] sm:$0xff] }
 0x7ab   : > { %18431 = vmatprep.mubr.msk.f32.mxu1 %vm333_vm1, %v9954_v6  ;;  %v24115_v6 = vlaneseq }
 0x7ae   : > { %18432 = vmatmul.mubr.msk.f32.gmra.mrb[60].mxu1 %vm333_vm1, %v9955_v33 }
 0x7af   : > { %18450 = vmatprep.mubr.msk.f32.mxu1 %vm333_vm1, %v22614_v21  ;;  %v24276_v21 = vld [vmem:[#allocation34_spill] sm:$0xff] }
 0x7b2   : > { %18451 = vmatmul.mubr.msk.f32.vlgmr.msra.gmra.mrb[62].mxu1 %vm333_vm1, %v24249_v20  ;;  %v24280_v20 = vld [vmem:[#allocation8_spill] sm:$0xff] }
 0x7b3   : > { %18453 = vmatprep.mubr.msk.f32.mxu1 %vm333_vm1, %v22628_v31  ;;  %v24275_v31 = vld [vmem:[#allocation33_spill] sm:$0xff] }
 0x7b6   : > { %18454 = vmatmul.mubr.msk.f32.gmra.mrb[32].mxu1 %vm333_vm1, %v22632_v25  ;;  %v24277_v25 = vld [vmem:[#allocation35_spill] sm:$0xff] }
 0x7b7   : > { %18456 = vmatprep.mubr.msk.f32.mxu1 %vm333_vm1, %v24250_v41  ;;  %v10348_v41 = vld [vmem:[#allocation2 + $0x19a] sm:$0xff] }
 0x7ba   : > { %18457 = vmatmul.mubr.msk.f32.gmra.mrb[34].mxu1 %vm333_vm1, %v24251_v11  ;;  %v10349_v11 = vld [vmem:[#allocation2 + $0x1a2] sm:$0xff] }
 0x7bb   : > { %18459 = vmatprep.mubr.msk.f32.mxu1 %vm333_vm1, %v24252_v52 }
 0x7be   : > { %18460 = vmatmul.mubr.msk.f32.gmra.mrb[36].mxu1 %vm333_vm1, %v24253_v10 }
 0x7bf   : > { %18462 = vmatprep.mubr.msk.f32.mxu1 %vm333_vm1, %v24254_v16  ;;  %v20009_v16 = vmov 0  }
 0x7c0   : > { %19869 = vset.pattern.permute.xlu0 %v20009_v16  ;;  %19870 = vset.pattern.permute.xlu1 %v20009_v16 }
 0x7c2   : > { %18463 = vmatmul.mubr.msk.f32.gmra.mrb[38].mxu1 %vm333_vm1, %v24255_v32 }
 0x7c3   : > { %18465 = vmatprep.mubr.msk.f32.mxu1 %vm333_vm1, %v24256_v59  ;;  %v23210_v59 = vld [vmem:[#allocation4] ss:$0 sm:$0xff] }
 0x7c6   : > { %18466 = vmatmul.mubr.msk.f32.gmra.mrb[40].mxu1 %vm333_vm1, %v24257_v1 }
 0x7c7   : > { %18468 = vmatprep.mubr.msk.f32.mxu1 %vm333_vm1, %v24258_v51 }
 0x7ca   : > { %18469 = vmatmul.mubr.msk.f32.gmra.mrb[42].mxu1 %vm333_vm1, %v24259_v39 }
 0x7cb   : > { %18471 = vmatprep.mubr.msk.f32.mxu1 %vm333_vm1, %v24260_v13 }
 0x7ce   : > { %18472 = vmatmul.mubr.msk.f32.gmra.mrb[44].mxu1 %vm333_vm1, %v24261_v28 }
 0x7cf   : > { %18474 = vmatprep.mubr.msk.f32.mxu1 %vm333_vm1, %v24262_v17 }
 0x7d2   : > { %18475 = vmatmul.mubr.msk.f32.gmra.mrb[46].mxu1 %vm333_vm1, %v24263_v56 }
 0x7d3   : > { %18477 = vmatprep.mubr.msk.f32.mxu1 %vm333_vm1, %v24264_v60 }
 0x7d6   : > { %18478 = vmatmul.mubr.msk.f32.gmra.mrb[48].mxu1 %vm333_vm1, %v24265_v50 }
 0x7d7   : > { %18480 = vmatprep.mubr.msk.f32.mxu1 %vm333_vm1, %v24266_v22 }
 0x7da   : > { %18481 = vmatmul.mubr.msk.f32.gmra.mrb[50].mxu1 %vm333_vm1, %v24267_v24 }
 0x7db   : > { %18483 = vmatprep.mubr.msk.f32.mxu1 %vm333_vm1, %v24268_v27 }
 0x7de   : > { %18484 = vmatmul.mubr.msk.f32.gmra.mrb[52].mxu1 %vm333_vm1, %v24275_v31 }
 0x7df   : > { %18486 = vmatprep.mubr.msk.f32.mxu1 %vm333_vm1, %v24276_v21 }
 0x7e2   : > { %18487 = vmatmul.mubr.msk.f32.gmra.mrb[54].mxu1 %vm333_vm1, %v24277_v25 }
 0x7e3   : > { %18489 = vmatprep.mubr.msk.f32.mxu1 %vm333_vm1, %v24278_v38 }
 0x7e6   : > { %18490 = vmatmul.mubr.msk.f32.gmra.mrb[56].mxu1 %vm333_vm1, %v24279_v8 }
 0x7e7   : > { %18492 = vmatprep.mubr.msk.f32.mxu1 %vm333_vm1, %v24280_v20 }
 0x7ea   : > { %18493 = vmatmul.mubr.msk.f32.gmra.mrb[58].mxu1 %vm333_vm1, %v23004_v55 }
 0x7eb   : > { %18495 = vmatprep.mubr.msk.f32.mxu1 %vm333_vm1, %v10348_v41 }
 0x7ee   : > { %18496 = vmatmul.mubr.msk.f32.gmra.mrb[60].mxu1 %vm333_vm1, %v10349_v11  ;;  %vm14277_vm1 = vcmask 982912  }
 0x7ff   : > { %v17940_v52 = vpop.f32.mrb[96].mxu0 }
 0x800   : > { %v7474_v10 = vpop.f32.mrb[97].mxu0 }
 0x885   : > { %v18452_v32 = vpop.f32.mrb[62].mxu1 }
 0x886   : > { %v19122_v1 = vadd.f32 %v18452_v32, %v17940_v52  ;;  %v10521_v51 = vpop.f32.mrb[63].mxu1  ;;  %v10946_v32 = vunpack.c.0.s8 %v10945_v40 }
 0x887   : > { %v19123_v39 = vadd.f32 %v10521_v51, %v7474_v10 }
 0x888   : > { %v10720_v13 = vadd.f32 %v19122_v1, %v23210_v59  ;;  %v23226_v1 = vshrl.u32 %v24115_v6, 7 }
 0x889   : > { %v10719_v28 = vadd.f32 %v19123_v39, %v23210_v59  ;;  %v18455_v17 = vpop.f32.mrb[32].mxu1 }
 0x88a   : > { %v10752_v56 = vsub.f32 0.0, %v10720_v13  ;;  %v10722_v60 = vadd.f32 %v18455_v17, %v23210_v59  ;;  %v10531_v50 = vpop.f32.mrb[33].mxu1 }
 0x88b   : > { %v10751_v22 = vsub.f32 0.0, %v10719_v28  ;;  %v10721_v24 = vadd.f32 %v23210_v59, %v10531_v50 }
 0x88c   : > { %v10785_v27 = vmul.f32 1.442695, %v10752_v56  ;;  %v10754_v55 = vsub.f32 0.0, %v10722_v60 }
 0x88d   : > { %v10783_v0 = vmul.f32 1.442695, %v10751_v22  ;;  %v10753_v53 = vsub.f32 0.0, %v10721_v24  ;;  %v18458_v45 = vpop.f32.mrb[34].mxu1 }
 0x88e   : > { %19871 = vpow2.f32 %v10785_v27  ;;  %v10789_v61 = vmul.f32 1.442695, %v10754_v55  ;;  %v10724_v5 = vadd.f32 %v18458_v45, %v23210_v59  ;;  %v10541_v2 = vpop.f32.mrb[35].mxu1 }
 0x88f   : > { %19873 = vpow2.f32 %v10783_v0  ;;  %v10787_v44 = vmul.f32 1.442695, %v10753_v53  ;;  %v10723_v54 = vadd.f32 %v23210_v59, %v10541_v2  ;;  %v23231_v0 = vsub.s32 %v10946_v32, %v23226_v1 }
 0x890   : > { %19875 = vpow2.f32 %v10789_v61  ;;  %v10756_v35 = vsub.f32 0.0, %v10724_v5 }
 0x891   : > { %19877 = vpow2.f32 %v10787_v44  ;;  %v10755_v42 = vsub.f32 0.0, %v10723_v54  ;;  %v18461_v29 = vpop.f32.mrb[36].mxu1 }
 0x892   : > { %v10793_v58 = vmul.f32 1.442695, %v10756_v35  ;;  %v10726_v62 = vadd.f32 %v18461_v29, %v23210_v59  ;;  %v10551_v26 = vpop.f32.mrb[37].mxu1 }
 0x893   : > { %v10791_v49 = vmul.f32 1.442695, %v10755_v42  ;;  %v10725_v9 = vadd.f32 %v23210_v59, %v10551_v26 }
 0x894   : > { %19879 = vpow2.f32 %v10793_v58  ;;  %v10758_v12 = vsub.f32 0.0, %v10726_v62 }
 0x895   : > { %19881 = vpow2.f32 %v10791_v49  ;;  %v10757_v37 = vsub.f32 0.0, %v10725_v9  ;;  %v18464_v34 = vpop.f32.mrb[38].mxu1 }
 0x896   : > { %v10797_v14 = vmul.f32 1.442695, %v10758_v12  ;;  %v10728_v18 = vadd.f32 %v18464_v34, %v23210_v59  ;;  %v10561_v30 = vpop.f32.mrb[39].mxu1 }
 0x897   : > { %v10795_v43 = vmul.f32 1.442695, %v10757_v37  ;;  %v10727_v47 = vadd.f32 %v23210_v59, %v10561_v30 }
 0x898   : > { %v19872_v36 = vpop.eup %19871  ;;  %19883 = vpow2.f32 %v10797_v14  ;;  %v10760_v23 = vsub.f32 0.0, %v10728_v18 }
 0x899   : > { %v19874_v57 = vpop.eup %19873  ;;  %v10848_v15 = vadd.f32 1.0, %v19872_v36  ;;  %19885 = vpow2.f32 %v10795_v43  ;;  %v10759_v63 = vsub.f32 0.0, %v10727_v47  ;;  %v18467_v19 = vpop.f32.mrb[40].mxu1 }
 0x89a   : > { %v19876_v46 = vpop.eup %19875  ;;  %v10847_v7 = vadd.f32 1.0, %v19874_v57  ;;  %v10730_v48 = vadd.f32 %v18467_v19, %v23210_v59  ;;  %v10571_v4 = vpop.f32.mrb[41].mxu1  ;;  %v10801_v21 = vmul.f32 1.442695, %v10760_v23 }
 0x89b   : > { %v19878_v33 = vpop.eup %19877  ;;  %19887 = vrcp.f32 %v10848_v15  ;;  %v10850_v31 = vadd.f32 1.0, %v19876_v46  ;;  %v10729_v25 = vadd.f32 %v23210_v59, %v10571_v4  ;;  %v10799_v8 = vmul.f32 1.442695, %v10759_v63 }
 0x89c   : > { %19889 = vrcp.f32 %v10847_v7  ;;  %v10849_v38 = vadd.f32 1.0, %v19878_v33  ;;  %v10762_v20 = vsub.f32 0.0, %v10730_v48 }
 0x89d   : > { %19891 = vrcp.f32 %v10850_v31  ;;  %v10761_v41 = vsub.f32 0.0, %v10729_v25  ;;  %v18470_v11 = vpop.f32.mrb[42].mxu1 }
 0x89e   : > { %v19880_v52 = vpop.eup %19879  ;;  %19893 = vrcp.f32 %v10849_v38  ;;  %v10732_v10 = vadd.f32 %v18470_v11, %v23210_v59  ;;  %v10581_v16 = vpop.f32.mrb[43].mxu1  ;;  %v10805_v13 = vmul.f32 1.442695, %v10762_v20 }
 0x89f   : > { %v19882_v51 = vpop.eup %19881  ;;  %v10852_v39 = vadd.f32 1.0, %v19880_v52  ;;  %19895 = vpow2.f32 %v10801_v21  ;;  %v10731_v28 = vadd.f32 %v23210_v59, %v10581_v16  ;;  %v10803_v56 = vmul.f32 1.442695, %v10761_v41 }
 0x8a0   : > { %v10851_v17 = vadd.f32 1.0, %v19882_v51  ;;  %19897 = vpow2.f32 %v10799_v8  ;;  %v10764_v60 = vsub.f32 0.0, %v10732_v10 }
 0x8a1   : > { %19899 = vrcp.f32 %v10852_v39  ;;  %v10763_v50 = vsub.f32 0.0, %v10731_v28  ;;  %v18473_v22 = vpop.f32.mrb[44].mxu1 }
 0x8a2   : > { %v19884_v24 = vpop.eup %19883  ;;  %19901 = vrcp.f32 %v10851_v17  ;;  %v10734_v27 = vadd.f32 %v18473_v22, %v23210_v59  ;;  %v10591_v55 = vpop.f32.mrb[45].mxu1  ;;  %v10809_v61 = vmul.f32 1.442695, %v10764_v60 }
 0x8a3   : > { %v19886_v53 = vpop.eup %19885  ;;  %v10854_v45 = vadd.f32 1.0, %v19884_v24  ;;  %19903 = vpow2.f32 %v10805_v13  ;;  %v10733_v5 = vadd.f32 %v23210_v59, %v10591_v55  ;;  %v10807_v44 = vmul.f32 1.442695, %v10763_v50 }
 0x8a4   : > { %v10853_v2 = vadd.f32 1.0, %v19886_v53  ;;  %19905 = vpow2.f32 %v10803_v56  ;;  %v10766_v54 = vsub.f32 0.0, %v10734_v27 }
 0x8a5   : > { %v19888_v35 = vpop.eup %19887  ;;  %19907 = vrcp.f32 %v10854_v45  ;;  %v10765_v42 = vsub.f32 0.0, %v10733_v5  ;;  %v18476_v29 = vpop.f32.mrb[46].mxu1 }
 0x8a6   : > { %v23234_v58 = vpop.eup %19889  ;;  %19909 = vrcp.f32 %v10853_v2  ;;  %v10813_v62 = vmul.f32 1.442695, %v10766_v54  ;;  %v10736_v26 = vadd.f32 %v18476_v29, %v23210_v59  ;;  %v10601_v49 = vpop.f32.mrb[47].mxu1  ;;  %v10992_v9 = vcombine.high %v19888_v35, %v19888_v35 }
 0x8a7   : > { %v23237_v12 = vpop.eup %19891  ;;  %19911 = vpow2.f32 %v10809_v61  ;;  %v10811_v37 = vmul.f32 1.442695, %v10765_v42  ;;  %v10735_v34 = vadd.f32 %v23210_v59, %v10601_v49  ;;  %v10999_v14 = vrot.slane %v19888_v35, %v23231_v0 }
 0x8a8   : > { %v23241_v18 = vpop.eup %19893  ;;  %19913 = vpow2.f32 %v10807_v44  ;;  %v10768_v30 = vsub.f32 0.0, %v10736_v26  ;;  %v11006_v43 = vrot.slane %v10992_v9, %v23231_v0  ;;  %v11090_v47 = vcombine.high %v23237_v12, %v23237_v12 }
 0x8a9   : > { %v19896_v36 = vpop.eup %19895  ;;  %v11041_v23 = vcombine.high %v23241_v18, %v23241_v18  ;;  %19915 = vpow2.f32 %v10813_v62  ;;  %v10767_v57 = vsub.f32 0.0, %v10735_v34  ;;  %v18479_v15 = vpop.f32.mrb[48].mxu1  ;;  %v11007_v63 = vcombine.high %v10999_v14, %v10999_v14 }
 0x8aa   : > { %v19898_v19 = vpop.eup %19897  ;;  %v10856_v46 = vadd.f32 1.0, %v19896_v36  ;;  %19917 = vpow2.f32 %v10811_v37  ;;  %v10817_v7 = vmul.f32 1.442695, %v10768_v30  ;;  %v10738_v48 = vadd.f32 %v18479_v15, %v23210_v59  ;;  %v10611_v4 = vpop.f32.mrb[49].mxu1 }
 0x8ab   : > { %v23249_v3 = vpop.eup %19899  ;;  %v10855_v40 = vadd.f32 1.0, %v19898_v19  ;;  %v10815_v33 = vmul.f32 1.442695, %v10767_v57  ;;  %v10737_v31 = vadd.f32 %v23210_v59, %v10611_v4  ;;  %v11008_v21 = vcombine.high %v11006_v43, %v11006_v43 }
 0x8ac   : > { %v23252_v25 = vpop.eup %19901  ;;  %v11188_v38 = vcombine.high %v23249_v3, %v23249_v3  ;;  %19919 = vrcp.f32 %v10856_v46  ;;  %v10770_v8 = vsub.f32 0.0, %v10738_v48  ;;  %v23257_v20 = vrot.slane %v10999_v14, %v23231_v0 }
 0x8ad   : > { %v19904_v41 = vpop.eup %19903  ;;  %v11139_v11 = vcombine.high %v23252_v25, %v23252_v25  ;;  %19921 = vrcp.f32 %v10855_v40  ;;  %v10769_v52 = vsub.f32 0.0, %v10737_v31  ;;  %v18482_v10 = vpop.f32.mrb[50].mxu1  ;;  %v23262_v16 = vrot.slane %v11006_v43, %v23231_v0 }
 0x8ae   : > { %v19906_v32 = vpop.eup %19905  ;;  %v10858_v51 = vadd.f32 1.0, %v19904_v41  ;;  %19923 = vpow2.f32 %v10817_v7  ;;  %v10821_v39 = vmul.f32 1.442695, %v10770_v8  ;;  %v10740_v13 = vadd.f32 %v18482_v10, %v23210_v59  ;;  %v10621_v28 = vpop.f32.mrb[51].mxu1 }
 0x8af   : > { %v23265_v17 = vpop.eup %19907  ;;  %v10857_v56 = vadd.f32 1.0, %v19906_v32  ;;  %19925 = vpow2.f32 %v10815_v33  ;;  %v10819_v60 = vmul.f32 1.442695, %v10769_v52  ;;  %v10739_v50 = vadd.f32 %v23210_v59, %v10621_v28 }
 0x8b0   : > { %v23268_v22 = vpop.eup %19909  ;;  %v11286_v24 = vcombine.high %v23265_v17, %v23265_v17  ;;  %19927 = vrcp.f32 %v10858_v51  ;;  %v10772_v27 = vsub.f32 0.0, %v10740_v13  ;;  %v11029_v55 = vrot.slane %v11007_v63, %v23231_v0 }
 0x8b1   : > { %v19912_v53 = vpop.eup %19911  ;;  %v11237_v45 = vcombine.high %v23268_v22, %v23268_v22  ;;  %19929 = vrcp.f32 %v10857_v56  ;;  %v10771_v61 = vsub.f32 0.0, %v10739_v50  ;;  %v18485_v5 = vpop.f32.mrb[52].mxu1  ;;  %v11036_v2 = vrot.slane %v11008_v21, %v23231_v0 }
 0x8b2   : > { %v19914_v44 = vpop.eup %19913  ;;  %v10860_v54 = vadd.f32 1.0, %v19912_v53  ;;  %19931 = vpow2.f32 %v10821_v39  ;;  %v10825_v35 = vmul.f32 1.442695, %v10772_v27  ;;  %v10742_v42 = vadd.f32 %v18485_v5, %v23210_v59  ;;  %v10631_v29 = vpop.f32.mrb[53].mxu1 }
 0x8b3   : > { %v19916_v62 = vpop.eup %19915  ;;  %v10859_v26 = vadd.f32 1.0, %v19914_v44  ;;  %19933 = vpow2.f32 %v10819_v60  ;;  %v10823_v49 = vmul.f32 1.442695, %v10771_v61  ;;  %v10741_v9 = vadd.f32 %v23210_v59, %v10631_v29 }
 0x8b4   : > { %v19918_v37 = vpop.eup %19917  ;;  %19935 = vrcp.f32 %v10860_v54  ;;  %v10862_v34 = vadd.f32 1.0, %v19916_v62  ;;  %v10774_v14 = vsub.f32 0.0, %v10742_v42  ;;  %v12560_v30 = vcombine.low %v23257_v20, %v11029_v55 }
 0x8b5   : > { %19937 = vrcp.f32 %v10859_v26  ;;  %v10861_v43 = vadd.f32 1.0, %v19918_v37  ;;  %v10773_v36 = vsub.f32 0.0, %v10741_v9  ;;  %v18488_v57 = vpop.f32.mrb[54].mxu1  ;;  %v15317_v15 = vcombine.high %v23257_v20, %v11029_v55 }
 0x8b6   : > { %v23280_v63 = vpop.eup %19919  ;;  %19939 = vrcp.f32 %v10862_v34  ;;  %v10829_v19 = vmul.f32 1.442695, %v10774_v14  ;;  %v10744_v46 = vadd.f32 %v18488_v57, %v23210_v59  ;;  %v10641_v7 = vpop.f32.mrb[55].mxu1  ;;  %v12562_v48 = vcombine.low %v23262_v16, %v11036_v2 }
 0x8b7   : > { %v23284_v4 = vpop.eup %19921  ;;  %v11384_v40 = vcombine.high %v23280_v63, %v23280_v63  ;;  %19941 = vrcp.f32 %v10861_v43  ;;  %v10827_v33 = vmul.f32 1.442695, %v10773_v36  ;;  %v10743_v31 = vadd.f32 %v23210_v59, %v10641_v7 }
 0x8b8   : > { %v19924_v21 = vpop.eup %19923  ;;  %v11335_v8 = vcombine.high %v23284_v4, %v23284_v4  ;;  %19943 = vpow2.f32 %v10825_v35  ;;  %v10776_v20 = vsub.f32 0.0, %v10744_v46  ;;  %v15318_v41 = vcombine.high %v23262_v16, %v11036_v2 }
 0x8b9   : > { %v19926_v52 = vpop.eup %19925  ;;  %v10864_v10 = vadd.f32 1.0, %v19924_v21  ;;  %19945 = vpow2.f32 %v10823_v49  ;;  %v10775_v32 = vsub.f32 0.0, %v10743_v31  ;;  %v12570_v51 = vrot.slane %v12560_v30, %v23231_v0  ;;  %v18491_v39 = vpop.f32.mrb[56].mxu1 }
 0x8ba   : > { %v23293_v13 = vpop.eup %19927  ;;  %v10863_v28 = vadd.f32 1.0, %v19926_v52  ;;  %19947 = vpow2.f32 %v10829_v19  ;;  %v10833_v56 = vmul.f32 1.442695, %v10776_v20  ;;  %v12577_v60 = vrot.slane %v15317_v15, %v23231_v0  ;;  %v10651_v50 = vpop.f32.mrb[57].mxu1 }
 0x8bb   : > { %v23296_v27 = vpop.eup %19929  ;;  %v11482_v16 = vcombine.high %v23293_v13, %v23293_v13  ;;  %19949 = vrcp.f32 %v10864_v10  ;;  %v10831_v55 = vmul.f32 1.442695, %v10775_v32  ;;  %v12584_v53 = vrot.slane %v12562_v48, %v23231_v0 }
 0x8bc   : > { %v19932_v61 = vpop.eup %19931  ;;  %v11433_v5 = vcombine.high %v23296_v27, %v23296_v27  ;;  %19951 = vrcp.f32 %v10863_v28  ;;  %v12591_v2 = vrot.slane %v15318_v41, %v23231_v0  ;;  %v12592_v44 = vcombine.low %v12570_v51, %v12577_v60 }
 0x8bd   : > { %v19934_v54 = vpop.eup %19933  ;;  %v10866_v35 = vadd.f32 1.0, %v19932_v61  ;;  %19953 = vpow2.f32 %v10827_v33  ;;  %v10746_v42 = vadd.f32 %v18491_v39, %v23210_v59  ;;  %v11097_v29 = vrot.slane %v23237_v12, %v23231_v0  ;;  %v23307_v62 = vpop.f32.mrb[58].mxu1 }
 0x8be   : > { %v23309_v26 = vpop.eup %19935  ;;  %v10865_v49 = vadd.f32 1.0, %v19934_v54  ;;  %19955 = vpow2.f32 %v10833_v56  ;;  %v12593_v9 = vcombine.low %v12584_v53, %v12591_v2  ;;  %v12600_v37 = vrot.slane %v12592_v44, %v23231_v0  ;;  %v23312_v34 = vpop.f32.mrb[59].mxu1 }
 0x8bf   : > { %v23314_v14 = vpop.eup %19937  ;;  %v11580_v30 = vcombine.high %v23309_v26, %v23309_v26  ;;  %19957 = vrcp.f32 %v10866_v35  ;;  %v10778_v43 = vsub.f32 0.0, %v10746_v42  ;;  %v11104_v36 = vrot.slane %v11090_v47, %v23231_v0 }
 0x8c0   : > { %v23322_v57 = vpop.eup %19939  ;;  %v11531_v15 = vcombine.high %v23314_v14, %v23314_v14  ;;  %19959 = vrcp.f32 %v10865_v49  ;;  %v12607_v19 = vrot.slane %v12593_v9, %v23231_v0  ;;  %v11105_v46 = vcombine.high %v11097_v29, %v11097_v29 }
 0x8c1   : > { %v23327_v7 = vpop.eup %19941  ;;  %19961 = vpow2.f32 %v10831_v55  ;;  %v10837_v33 = vmul.f32 1.442695, %v10778_v43  ;;  %v11106_v31 = vcombine.high %v11104_v36, %v11104_v36  ;;  %v23331_v21 = vpop.f32.mrb[60].mxu1  ;;  %v11113_v41 = vrot.slane %v11097_v29, %v23231_v0 }
 0x8c2   : > { %v19944_v12 = vpop.eup %19943  ;;  %v12608_v20 = vcombine.low %v12600_v37, %v12607_v19  ;;  %v11120_v52 = vrot.slane %v11104_v36, %v23231_v0  ;;  %v23337_v10 = vpop.f32.mrb[61].mxu1  ;;  %v11127_v39 = vrot.slane %v11105_v46, %v23231_v0  ;;  %v10745_v55 = vadd.f32 %v23210_v59, %v10651_v50 }
 0x8c3   : > { %v19946_v32 = vpop.eup %19945  ;;  %v10868_v51 = vadd.f32 1.0, %v19944_v12  ;;  %19963 = vpow2.f32 %v10837_v33  ;;  %v11134_v28 = vrot.slane %v11106_v31, %v23231_v0  ;;  %v10943_v53 = vcombine.high %v23234_v58, %v23234_v58 }
 0x8c4   : > { %v19948_v56 = vpop.eup %19947  ;;  %v10867_v60 = vadd.f32 1.0, %v19946_v32  ;;  %14083 = vperm.xlu0 %19869, %v12608_v20   ;;  %v10950_v61 = vrot.slane %v23234_v58, %v23231_v0  ;;  %v12658_v54 = vcombine.low %v11113_v41, %v11127_v39  ;;  %v15321_v35 = vcombine.high %v11113_v41, %v11127_v39 }
 0x8c5   : > { %v23346_v2 = vpop.eup %19949  ;;  %19965 = vrcp.f32 %v10868_v51  ;;  %v10870_v44 = vadd.f32 1.0, %v19948_v56  ;;  %v12660_v49 = vcombine.low %v11120_v52, %v11134_v28  ;;  %v15322_v50 = vcombine.high %v11120_v52, %v11134_v28 }
 0x8c6   : > { %v23348_v42 = vpop.eup %19951  ;;  %v11776_v29 = vcombine.high %v23346_v2, %v23346_v2  ;;  %19967 = vrcp.f32 %v10867_v60  ;;  %v12668_v58 = vrot.slane %v12658_v54, %v23231_v0  ;;  %v12675_v43 = vrot.slane %v15321_v35, %v23231_v0 }
 0x8c7   : > { %v19954_v9 = vpop.eup %19953  ;;  %v11727_v37 = vcombine.high %v23348_v42, %v23348_v42  ;;  %19969 = vrcp.f32 %v10870_v44  ;;  %v12682_v46 = vrot.slane %v12660_v49, %v23231_v0  ;;  %v12689_v33 = vrot.slane %v15322_v50, %v23231_v0 }
 0x8c8   : > { %v19956_v36 = vpop.eup %19955  ;;  %v10869_v19 = vadd.f32 1.0, %v19954_v9  ;;  %v10777_v31 = vsub.f32 0.0, %v10745_v55  ;;  %v12690_v41 = vcombine.low %v12668_v58, %v12675_v43  ;;  %v10957_v52 = vrot.slane %v10943_v53, %v23231_v0 }
 0x8c9   : > { %v23358_v12 = vpop.eup %19957  ;;  %v10872_v20 = vadd.f32 1.0, %v19956_v36  ;;  %v10958_v32 = vcombine.high %v10950_v61, %v10950_v61  ;;  %v12691_v28 = vcombine.low %v12682_v46, %v12689_v33  ;;  %v10966_v49 = vrot.slane %v10950_v61, %v23231_v0 }
 0x8ca   : > { %v23361_v51 = vpop.eup %19959  ;;  %v11874_v39 = vcombine.high %v23358_v12, %v23358_v12  ;;  %19971 = vrcp.f32 %v10869_v19  ;;  %v10835_v56 = vmul.f32 1.442695, %v10777_v31  ;;  %v12698_v55 = vrot.slane %v12690_v41, %v23231_v0 }
 0x8cb   : > { %v19962_v60 = vpop.eup %19961  ;;  %v11825_v44 = vcombine.high %v23361_v51, %v23361_v51  ;;  %19973 = vrcp.f32 %v10872_v20  ;;  %v10959_v54 = vcombine.high %v10957_v52, %v10957_v52  ;;  %v12705_v53 = vrot.slane %v12691_v28, %v23231_v0 }
 0x8cc   : > { %v10871_v35 = vadd.f32 1.0, %v19962_v60  ;;  %19975 = vpow2.f32 %v10835_v56  ;;  %v10973_v9 = vrot.slane %v10957_v52, %v23231_v0  ;;  %v10980_v58 = vrot.slane %v10958_v32, %v23231_v0 }
 0x8cd   : > { %v19964_v50 = vpop.eup %19963  ;;  %v10987_v43 = vrot.slane %v10959_v54, %v23231_v0  ;;  %v10748_v36 = vadd.f32 %v23307_v62, %v23210_v59  ;;  %v12706_v46 = vcombine.low %v12698_v55, %v12705_v53  ;;  %v11048_v33 = vrot.slane %v23241_v18, %v23231_v0 }
 0x8ce   : > { %19977 = vrcp.f32 %v10871_v35  ;;  %v10874_v19 = vadd.f32 1.0, %v19964_v50  ;;  %v12511_v20 = vcombine.low %v10966_v49, %v10980_v58  ;;  %v15315_v61 = vcombine.high %v10966_v49, %v10980_v58 }
 0x8cf   : > { %v23377_v31 = vpop.eup %19965  ;;  %v12513_v41 = vcombine.low %v10973_v9, %v10987_v43  ;;  %v15316_v28 = vcombine.high %v10973_v9, %v10987_v43  ;;  %14089 = vperm.xlu1 %19870, %v12706_v46   ;;  %v10780_v62 = vsub.f32 0.0, %v10748_v36  ;;  %v11055_v56 = vrot.slane %v11041_v23, %v23231_v0 }
 0x8d0   : > { %v23379_v52 = vpop.eup %19967  ;;  %v11972_v32 = vcombine.high %v23377_v31, %v23377_v31  ;;  %19979 = vrcp.f32 %v10874_v19  ;;  %v12521_v54 = vrot.slane %v12511_v20, %v23231_v0  ;;  %v12528_v35 = vrot.slane %v15315_v61, %v23231_v0 }
 0x8d1   : > { %v23387_v60 = vpop.eup %19969  ;;  %v11923_v55 = vcombine.high %v23379_v52, %v23379_v52  ;;  %v12535_v53 = vrot.slane %v12513_v41, %v23231_v0  ;;  %v12542_v50 = vrot.slane %v15316_v28, %v23231_v0  ;;  %v10841_v9 = vmul.f32 1.442695, %v10780_v62 }
 0x8d2   : > { %v12070_v49 = vcombine.high %v23387_v60, %v23387_v60  ;;  %v11056_v58 = vcombine.high %v11048_v33, %v11048_v33  ;;  %v12543_v18 = vcombine.low %v12521_v54, %v12528_v35  ;;  %v11057_v23 = vcombine.high %v11055_v56, %v11055_v56 }
 0x8d3   : > { %v11064_v43 = vrot.slane %v11048_v33, %v23231_v0  ;;  %v11071_v36 = vrot.slane %v11055_v56, %v23231_v0  ;;  %v12544_v46 = vcombine.low %v12535_v53, %v12542_v50  ;;  %19981 = vpow2.f32 %v10841_v9 }
 0x8d4   : > { %v23399_v19 = vpop.eup %19971  ;;  %v11078_v20 = vrot.slane %v11056_v58, %v23231_v0  ;;  %v10747_v61 = vadd.f32 %v23210_v59, %v23312_v34  ;;  %v12551_v62 = vrot.slane %v12543_v18, %v23231_v0  ;;  %v11085_v33 = vrot.slane %v11057_v23, %v23231_v0 }
 0x8d5   : > { %v23404_v41 = vpop.eup %19973  ;;  %v11146_v56 = vrot.slane %v23252_v25, %v23231_v0  ;;  %v12558_v53 = vrot.slane %v12544_v46, %v23231_v0  ;;  %v11153_v35 = vrot.slane %v11139_v11, %v23231_v0 }
 0x8d6   : > { %v19976_v54 = vpop.eup %19975  ;;  %v12609_v50 = vcombine.low %v11064_v43, %v11078_v20  ;;  %v15319_v34 = vcombine.high %v11064_v43, %v11078_v20  ;;  %v12611_v58 = vcombine.low %v11071_v36, %v11085_v33  ;;  %v15320_v6 = vcombine.high %v11071_v36, %v11085_v33 }
 0x8d7   : > { %v10873_v9 = vadd.f32 1.0, %v19976_v54  ;;  %v10779_v48 = vsub.f32 0.0, %v10747_v61  ;;  %v12559_v18 = vcombine.low %v12551_v62, %v12558_v53  ;;  %v11154_v33 = vcombine.high %v11146_v56, %v11146_v56 }
 0x8d8   : > { %v23415_v47 = vpop.eup %19977  ;;  %v12619_v23 = vrot.slane %v12609_v50, %v23231_v0  ;;  %v12626_v28 = vrot.slane %v15319_v34, %v23231_v0  ;;  %v12633_v43 = vrot.slane %v12611_v58, %v23231_v0  ;;  %v12640_v36 = vrot.slane %v15320_v6, %v23231_v0 }
 0x8d9   : > { %19983 = vrcp.f32 %v10873_v9  ;;  %14080 = vperm.xlu0 %19869, %v12559_v18   ;;  %v10839_v62 = vmul.f32 1.442695, %v10779_v48  ;;  %v11155_v54 = vcombine.high %v11153_v35, %v11153_v35  ;;  %v11162_v11 = vrot.slane %v11146_v56, %v23231_v0 }
 0x8da   : > { %v23427_v20 = vpop.eup %19979  ;;  %v12641_v61 = vcombine.low %v12619_v23, %v12626_v28  ;;  %v12642_v25 = vcombine.low %v12633_v43, %v12640_v36  ;;  %v11169_v50 = vrot.slane %v11153_v35, %v23231_v0  ;;  %v11176_v6 = vrot.slane %v11154_v33, %v23231_v0 }
 0x8db   : > { %19985 = vpow2.f32 %v10839_v62  ;;  %v11183_v9 = vrot.slane %v11155_v54, %v23231_v0  ;;  %v10750_v48 = vadd.f32 %v23331_v21, %v23210_v59  ;;  %v11195_v58 = vrot.slane %v23249_v3, %v23231_v0 }
 0x8dc   : > { %v12649_v34 = vrot.slane %v12641_v61, %v23231_v0  ;;  %v12656_v28 = vrot.slane %v12642_v25, %v23231_v0  ;;  %v11202_v56 = vrot.slane %v11188_v38, %v23231_v0  ;;  %v12707_v18 = vcombine.low %v11162_v11, %v11176_v6 }
 0x8dd   : > { %v19982_v35 = vpop.eup %19981  ;;  %v15323_v23 = vcombine.high %v11162_v11, %v11176_v6  ;;  %v12709_v43 = vcombine.low %v11169_v50, %v11183_v9  ;;  %v15324_v36 = vcombine.high %v11169_v50, %v11183_v9  ;;  %v10782_v33 = vsub.f32 0.0, %v10750_v48 }
 0x8de   : > { %v10876_v61 = vadd.f32 1.0, %v19982_v35  ;;  %v12657_v62 = vcombine.low %v12649_v34, %v12656_v28  ;;  %v11203_v54 = vcombine.high %v11195_v58, %v11195_v58  ;;  %v12717_v25 = vrot.slane %v12707_v18, %v23231_v0 }
 0x8df   : > { %v12724_v21 = vrot.slane %v15323_v23, %v23231_v0  ;;  %v12731_v46 = vrot.slane %v12709_v43, %v23231_v0  ;;  %v12738_v53 = vrot.slane %v15324_v36, %v23231_v0  ;;  %v10845_v3 = vmul.f32 1.442695, %v10782_v33 }
 0x8e0   : > { %19987 = vrcp.f32 %v10876_v61  ;;  %14086 = vperm.xlu1 %19870, %v12657_v62   ;;  %v11204_v38 = vcombine.high %v11202_v56, %v11202_v56  ;;  %v11211_v11 = vrot.slane %v11195_v58, %v23231_v0  ;;  %v11218_v34 = vrot.slane %v11202_v56, %v23231_v0 }
 0x8e1   : > { %v12739_v6 = vcombine.low %v12717_v25, %v12724_v21  ;;  %v12740_v50 = vcombine.low %v12731_v46, %v12738_v53  ;;  %v11225_v9 = vrot.slane %v11203_v54, %v23231_v0  ;;  %19989 = vpow2.f32 %v10845_v3 }
 0x8e2   : > { %v11232_v48 = vrot.slane %v11204_v38, %v23231_v0  ;;  %v10749_v35 = vadd.f32 %v23210_v59, %v23337_v10  ;;  %v11244_v18 = vrot.slane %v23268_v22, %v23231_v0  ;;  %v11251_v59 = vrot.slane %v11237_v45, %v23231_v0 }
 0x8e3   : > { %v23452_v28 = vpop.eup %19983  ;;  %v12747_v46 = vrot.slane %v12739_v6, %v23231_v0  ;;  %v12754_v53 = vrot.slane %v12740_v50, %v23231_v0  ;;  %v12756_v56 = vcombine.low %v11211_v11, %v11225_v9  ;;  %v15325_v23 = vcombine.high %v11211_v11, %v11225_v9 }
 0x8e4   : > { %v12217_v58 = vcombine.high %v23452_v28, %v23452_v28  ;;  %v12758_v43 = vcombine.low %v11218_v34, %v11232_v48  ;;  %v15326_v36 = vcombine.high %v11218_v34, %v11232_v48  ;;  %v10781_v61 = vsub.f32 0.0, %v10749_v35 }
 0x8e5   : > { %v19986_v62 = vpop.eup %19985  ;;  %v12755_v33 = vcombine.low %v12747_v46, %v12754_v53  ;;  %v12766_v54 = vrot.slane %v12756_v56, %v23231_v0  ;;  %v11252_v10 = vcombine.high %v11244_v18, %v11244_v18  ;;  %v12773_v21 = vrot.slane %v15325_v23, %v23231_v0 }
 0x8e6   : > { %v10875_v25 = vadd.f32 1.0, %v19986_v62  ;;  %v12780_v3 = vrot.slane %v12758_v43, %v23231_v0  ;;  %v12787_v38 = vrot.slane %v15326_v36, %v23231_v0  ;;  %v10843_v11 = vmul.f32 1.442695, %v10781_v61 }
 0x8e7   : > { %14092 = vperm.xlu0 %19869, %v12755_v33   ;;  %v11253_v6 = vcombine.high %v11251_v59, %v11251_v59  ;;  %v11260_v50 = vrot.slane %v11244_v18, %v23231_v0  ;;  %v11267_v34 = vrot.slane %v11251_v59, %v23231_v0  ;;  %v12788_v9 = vcombine.low %v12766_v54, %v12773_v21 }
 0x8e8   : > { %19991 = vrcp.f32 %v10875_v25  ;;  %v12789_v48 = vcombine.low %v12780_v3, %v12787_v38  ;;  %v11274_v22 = vrot.slane %v11252_v10, %v23231_v0  ;;  %v11293_v35 = vrot.slane %v23265_v17, %v23231_v0 }
 0x8e9   : > { %19993 = vpow2.f32 %v10843_v11  ;;  %v11281_v45 = vrot.slane %v11253_v6, %v23231_v0  ;;  %v11300_v46 = vrot.slane %v11286_v24, %v23231_v0  ;;  %v12796_v18 = vrot.slane %v12788_v9, %v23231_v0 }
 0x8ea   : > { %v23481_v53 = vpop.eup %19987  ;;  %v12803_v56 = vrot.slane %v12789_v48, %v23231_v0  ;;  %v12805_v23 = vcombine.low %v11260_v50, %v11274_v22  ;;  %v15327_v43 = vcombine.high %v11260_v50, %v11274_v22  ;;  %v11301_v33 = vcombine.high %v11293_v35, %v11293_v35 }
 0x8eb   : > { %v12364_v36 = vcombine.high %v23481_v53, %v23481_v53  ;;  %v12807_v61 = vcombine.low %v11267_v34, %v11281_v45  ;;  %v15328_v62 = vcombine.high %v11267_v34, %v11281_v45  ;;  %v19990_v54 = vpop.eup %19989  ;;  %v11302_v24 = vcombine.high %v11300_v46, %v11300_v46 }
 0x8ec   : > { %v12804_v59 = vcombine.low %v12796_v18, %v12803_v56  ;;  %v12815_v10 = vrot.slane %v12805_v23, %v23231_v0  ;;  %v12822_v17 = vrot.slane %v15327_v43, %v23231_v0  ;;  %v10878_v25 = vadd.f32 1.0, %v19990_v54 }
 0x8ed   : > { %v12829_v21 = vrot.slane %v12807_v61, %v23231_v0  ;;  %v12836_v3 = vrot.slane %v15328_v62, %v23231_v0  ;;  %v11309_v38 = vrot.slane %v11293_v35, %v23231_v0  ;;  %v11316_v6 = vrot.slane %v11300_v46, %v23231_v0 }
 0x8ee   : > { %14095 = vperm.xlu1 %19870, %v12804_v59   ;;  %v12837_v11 = vcombine.low %v12815_v10, %v12822_v17  ;;  %v11323_v50 = vrot.slane %v11301_v33, %v23231_v0  ;;  %v11330_v34 = vrot.slane %v11302_v24, %v23231_v0  ;;  %19995 = vrcp.f32 %v10878_v25 }
 0x8ef   : > { %v12838_v9 = vcombine.low %v12829_v21, %v12836_v3  ;;  %v11342_v48 = vrot.slane %v23284_v4, %v23231_v0  ;;  %v11349_v22 = vrot.slane %v11335_v8, %v23231_v0 }
 0x8f0   : > { %v12845_v45 = vrot.slane %v12837_v11, %v23231_v0  ;;  %v12854_v35 = vcombine.low %v11309_v38, %v11323_v50  ;;  %v15329_v18 = vcombine.high %v11309_v38, %v11323_v50  ;;  %v12856_v56 = vcombine.low %v11316_v6, %v11330_v34 }
 0x8f1   : > { %v12852_v46 = vrot.slane %v12838_v9, %v23231_v0  ;;  %v15330_v23 = vcombine.high %v11316_v6, %v11330_v34  ;;  %v11350_v43 = vcombine.high %v11342_v48, %v11342_v48  ;;  %v11351_v61 = vcombine.high %v11349_v22, %v11349_v22 }
 0x8f2   : > { %v23503_v62 = vpop.eup %19991  ;;  %v12864_v33 = vrot.slane %v12854_v35, %v23231_v0  ;;  %v12871_v54 = vrot.slane %v15329_v18, %v23231_v0  ;;  %v12878_v59 = vrot.slane %v12856_v56, %v23231_v0  ;;  %v11358_v4 = vrot.slane %v11342_v48, %v23231_v0 }
 0x8f3   : > { %v19994_v8 = vpop.eup %19993  ;;  %v12315_v10 = vcombine.high %v23503_v62, %v23503_v62  ;;  %v12853_v17 = vcombine.low %v12845_v45, %v12852_v46  ;;  %v12885_v24 = vrot.slane %v15330_v23, %v23231_v0  ;;  %v11365_v25 = vrot.slane %v11349_v22, %v23231_v0 }
 0x8f4   : > { %v10877_v21 = vadd.f32 1.0, %v19994_v8  ;;  %v12886_v3 = vcombine.low %v12864_v33, %v12871_v54  ;;  %v11372_v38 = vrot.slane %v11350_v43, %v23231_v0  ;;  %v11379_v11 = vrot.slane %v11351_v61, %v23231_v0 }
 0x8f5   : > { %14098 = vperm.xlu0 %19869, %v12853_v17   ;;  %v12887_v6 = vcombine.low %v12878_v59, %v12885_v24  ;;  %v11391_v50 = vrot.slane %v23280_v63, %v23231_v0  ;;  %v11398_v34 = vrot.slane %v11384_v40, %v23231_v0  ;;  %v11489_v9 = vrot.slane %v23293_v13, %v23231_v0 }
 0x8f6   : > { %19997 = vrcp.f32 %v10877_v21  ;;  %v12894_v48 = vrot.slane %v12886_v3, %v23231_v0  ;;  %v12903_v22 = vcombine.low %v11358_v4, %v11372_v38  ;;  %v15331_v45 = vcombine.high %v11358_v4, %v11372_v38 }
 0x8f7   : > { %v12901_v35 = vrot.slane %v12887_v6, %v23231_v0  ;;  %v12905_v18 = vcombine.low %v11365_v25, %v11379_v11  ;;  %v15332_v56 = vcombine.high %v11365_v25, %v11379_v11  ;;  %v11399_v46 = vcombine.high %v11391_v50, %v11391_v50 }
 0x8f8   : > { %v12913_v23 = vrot.slane %v12903_v22, %v23231_v0  ;;  %v12920_v43 = vrot.slane %v15331_v45, %v23231_v0  ;;  %v11400_v61 = vcombine.high %v11398_v34, %v11398_v34  ;;  %v11407_v63 = vrot.slane %v11391_v50, %v23231_v0  ;;  %v23528_v40 = vpop.eup %19995 }
 0x8f9   : > { %v12902_v33 = vcombine.low %v12894_v48, %v12901_v35  ;;  %v12927_v54 = vrot.slane %v12905_v18, %v23231_v0  ;;  %v12934_v59 = vrot.slane %v15332_v56, %v23231_v0  ;;  %v11414_v4 = vrot.slane %v11398_v34, %v23231_v0 }
 0x8fa   : > { %v12462_v8 = vcombine.high %v23528_v40, %v23528_v40  ;;  %v12935_v17 = vcombine.low %v12913_v23, %v12920_v43  ;;  %v11421_v24 = vrot.slane %v11399_v46, %v23231_v0  ;;  %v11428_v25 = vrot.slane %v11400_v61, %v23231_v0 }
 0x8fb   : > { %14101 = vperm.xlu1 %19870, %v12902_v33   ;;  %v12936_v21 = vcombine.low %v12927_v54, %v12934_v59  ;;  %v11496_v3 = vrot.slane %v11482_v16, %v23231_v0  ;;  %v11497_v38 = vcombine.high %v11489_v9, %v11489_v9  ;;  %v11505_v11 = vrot.slane %v11489_v9, %v23231_v0 }
 0x8fc   : > { %v12943_v6 = vrot.slane %v12935_v17, %v23231_v0  ;;  %v12952_v50 = vcombine.low %v11407_v63, %v11421_v24  ;;  %v15333_v34 = vcombine.high %v11407_v63, %v11421_v24  ;;  %v12954_v48 = vcombine.low %v11414_v4, %v11428_v25 }
 0x8fd   : > { %v12950_v22 = vrot.slane %v12936_v21, %v23231_v0  ;;  %v15334_v45 = vcombine.high %v11414_v4, %v11428_v25  ;;  %v11498_v35 = vcombine.high %v11496_v3, %v11496_v3  ;;  %v11512_v18 = vrot.slane %v11496_v3, %v23231_v0 }
 0x8fe   : > { %v12962_v56 = vrot.slane %v12952_v50, %v23231_v0  ;;  %v12969_v46 = vrot.slane %v15333_v34, %v23231_v0  ;;  %v12976_v13 = vrot.slane %v12954_v48, %v23231_v0  ;;  %v11519_v16 = vrot.slane %v11497_v38, %v23231_v0 }
 0x8ff   : > { %v12951_v9 = vcombine.low %v12943_v6, %v12950_v22  ;;  %v12983_v23 = vrot.slane %v15334_v45, %v23231_v0  ;;  %v11526_v43 = vrot.slane %v11498_v35, %v23231_v0  ;;  %v11440_v61 = vrot.slane %v23296_v27, %v23231_v0 }
 0x900   : > { %v23553_v63 = vpop.eup %19997  ;;  %v12984_v33 = vcombine.low %v12962_v56, %v12969_v46  ;;  %v13050_v54 = vcombine.low %v11505_v11, %v11519_v16  ;;  %v15337_v59 = vcombine.high %v11505_v11, %v11519_v16  ;;  %v11447_v4 = vrot.slane %v11433_v5, %v23231_v0 }
 0x901   : > { %v12413_v17 = vcombine.high %v23553_v63, %v23553_v63  ;;  %14104 = vperm.xlu0 %19869, %v12951_v9   ;;  %v12985_v24 = vcombine.low %v12976_v13, %v12983_v23  ;;  %v13052_v25 = vcombine.low %v11512_v18, %v11526_v43  ;;  %v15338_v21 = vcombine.high %v11512_v18, %v11526_v43 }
 0x902   : > { %v12992_v3 = vrot.slane %v12984_v33, %v23231_v0  ;;  %v13060_v38 = vrot.slane %v13050_v54, %v23231_v0  ;;  %v13067_v6 = vrot.slane %v15337_v59, %v23231_v0  ;;  %v11448_v50 = vcombine.high %v11440_v61, %v11440_v61 }
 0x903   : > { %v12999_v11 = vrot.slane %v12985_v24, %v23231_v0  ;;  %v13074_v34 = vrot.slane %v13052_v25, %v23231_v0  ;;  %v13081_v27 = vrot.slane %v15338_v21, %v23231_v0  ;;  %v11449_v5 = vcombine.high %v11447_v4, %v11447_v4 }
 0x904   : > { %v13082_v48 = vcombine.low %v13060_v38, %v13067_v6  ;;  %v11456_v22 = vrot.slane %v11440_v61, %v23231_v0  ;;  %v11463_v45 = vrot.slane %v11447_v4, %v23231_v0  ;;  %v11470_v35 = vrot.slane %v11448_v50, %v23231_v0 }
 0x905   : > { %v13000_v18 = vcombine.low %v12992_v3, %v12999_v11  ;;  %v13083_v56 = vcombine.low %v13074_v34, %v13081_v27  ;;  %v11477_v46 = vrot.slane %v11449_v5, %v23231_v0  ;;  %v11587_v13 = vrot.slane %v23309_v26, %v23231_v0 }
 0x906   : > { %v13090_v16 = vrot.slane %v13082_v48, %v23231_v0  ;;  %v13001_v9 = vcombine.low %v11456_v22, %v11470_v35  ;;  %v15335_v23 = vcombine.high %v11456_v22, %v11470_v35  ;;  %v11594_v43 = vrot.slane %v11580_v30, %v23231_v0 }
 0x907   : > { %14107 = vperm.xlu1 %19870, %v13000_v18   ;;  %v13097_v61 = vrot.slane %v13083_v56, %v23231_v0  ;;  %v13003_v33 = vcombine.low %v11463_v45, %v11477_v46  ;;  %v15336_v54 = vcombine.high %v11463_v45, %v11477_v46  ;;  %v11595_v59 = vcombine.high %v11587_v13, %v11587_v13 }
 0x908   : > { %v13011_v4 = vrot.slane %v13001_v9, %v23231_v0  ;;  %v13018_v24 = vrot.slane %v15335_v23, %v23231_v0  ;;  %v11596_v25 = vcombine.high %v11594_v43, %v11594_v43  ;;  %v11603_v21 = vrot.slane %v11587_v13, %v23231_v0 }
 0x909   : > { %v13098_v3 = vcombine.low %v13090_v16, %v13097_v61  ;;  %v13025_v38 = vrot.slane %v13003_v33, %v23231_v0  ;;  %v13032_v6 = vrot.slane %v15336_v54, %v23231_v0  ;;  %v11610_v26 = vrot.slane %v11594_v43, %v23231_v0 }
 0x90a   : > { %v13033_v30 = vcombine.low %v13011_v4, %v13018_v24  ;;  %v11617_v50 = vrot.slane %v11595_v59, %v23231_v0  ;;  %v11624_v11 = vrot.slane %v11596_v25, %v23231_v0  ;;  %v11783_v34 = vrot.slane %v23346_v2, %v23231_v0 }
 0x90b   : > { %14113 = vperm.xlu0 %19869, %v13098_v3   ;;  %v13034_v27 = vcombine.low %v13025_v38, %v13032_v6  ;;  %v11790_v5 = vrot.slane %v11776_v29, %v23231_v0  ;;  %v11538_v48 = vrot.slane %v23314_v14, %v23231_v0  ;;  %v11545_v22 = vrot.slane %v11531_v15, %v23231_v0 }
 0x90c   : > { %v13041_v45 = vrot.slane %v13033_v30, %v23231_v0  ;;  %v13148_v35 = vcombine.low %v11603_v21, %v11617_v50  ;;  %v15341_v18 = vcombine.high %v11603_v21, %v11617_v50  ;;  %v13150_v56 = vcombine.low %v11610_v26, %v11624_v11 }
 0x90d   : > { %v13048_v46 = vrot.slane %v13034_v27, %v23231_v0  ;;  %v15342_v13 = vcombine.high %v11610_v26, %v11624_v11  ;;  %v11791_v16 = vcombine.high %v11783_v34, %v11783_v34  ;;  %v11792_v9 = vcombine.high %v11790_v5, %v11790_v5 }
 0x90e   : > { %v13158_v2 = vrot.slane %v13148_v35, %v23231_v0  ;;  %v13165_v29 = vrot.slane %v15341_v18, %v23231_v0  ;;  %v13172_v23 = vrot.slane %v13150_v56, %v23231_v0  ;;  %v11799_v43 = vrot.slane %v11783_v34, %v23231_v0 }
 0x90f   : > { %v13049_v14 = vcombine.low %v13041_v45, %v13048_v46  ;;  %v13179_v15 = vrot.slane %v15342_v13, %v23231_v0  ;;  %v11806_v61 = vrot.slane %v11790_v5, %v23231_v0  ;;  %v11813_v33 = vrot.slane %v11791_v16, %v23231_v0 }
 0x910   : > { %v13180_v54 = vcombine.low %v13158_v2, %v13165_v29  ;;  %v11820_v59 = vrot.slane %v11792_v9, %v23231_v0  ;;  %v11546_v4 = vcombine.high %v11538_v48, %v11538_v48  ;;  %v11547_v24 = vcombine.high %v11545_v22, %v11545_v22 }
 0x911   : > { %14110 = vperm.xlu0 %19869, %v13049_v14   ;;  %v13181_v25 = vcombine.low %v13172_v23, %v13179_v15  ;;  %v13344_v21 = vcombine.low %v11799_v43, %v11813_v33  ;;  %v15349_v3 = vcombine.high %v11799_v43, %v11813_v33  ;;  %v11554_v38 = vrot.slane %v11538_v48, %v23231_v0 }
 0x912   : > { %v13188_v6 = vrot.slane %v13180_v54, %v23231_v0  ;;  %v13346_v26 = vcombine.low %v11806_v61, %v11820_v59  ;;  %v15350_v30 = vcombine.high %v11806_v61, %v11820_v59  ;;  %v11561_v50 = vrot.slane %v11545_v22, %v23231_v0 }
 0x913   : > { %v13195_v11 = vrot.slane %v13181_v25, %v23231_v0  ;;  %v13354_v34 = vrot.slane %v13344_v21, %v23231_v0  ;;  %v13361_v27 = vrot.slane %v15349_v3, %v23231_v0  ;;  %v11568_v5 = vrot.slane %v11546_v4, %v23231_v0 }
 0x914   : > { %v13368_v45 = vrot.slane %v13346_v26, %v23231_v0  ;;  %v13375_v35 = vrot.slane %v15350_v30, %v23231_v0  ;;  %v11575_v48 = vrot.slane %v11547_v24, %v23231_v0  ;;  %v11881_v18 = vrot.slane %v23358_v12, %v23231_v0 }
 0x915   : > { %v13196_v56 = vcombine.low %v13188_v6, %v13195_v11  ;;  %v13376_v46 = vcombine.low %v13354_v34, %v13361_v27  ;;  %v13099_v22 = vcombine.low %v11554_v38, %v11568_v5  ;;  %v15339_v13 = vcombine.high %v11554_v38, %v11568_v5 }
 0x916   : > { %v13377_v16 = vcombine.low %v13368_v45, %v13375_v35  ;;  %v13101_v9 = vcombine.low %v11561_v50, %v11575_v48  ;;  %v15340_v2 = vcombine.high %v11561_v50, %v11575_v48  ;;  %v11888_v29 = vrot.slane %v11874_v39, %v23231_v0 }
 0x917   : > { %14119 = vperm.xlu0 %19869, %v13196_v56   ;;  %v13384_v23 = vrot.slane %v13376_v46, %v23231_v0  ;;  %v13109_v43 = vrot.slane %v13099_v22, %v23231_v0  ;;  %v13116_v14 = vrot.slane %v15339_v13, %v23231_v0  ;;  %v11889_v15 = vcombine.high %v11881_v18, %v11881_v18 }
 0x918   : > { %v13391_v61 = vrot.slane %v13377_v16, %v23231_v0  ;;  %v13123_v33 = vrot.slane %v13101_v9, %v23231_v0  ;;  %v13130_v54 = vrot.slane %v15340_v2, %v23231_v0  ;;  %v11890_v59 = vcombine.high %v11888_v29, %v11888_v29 }
 0x919   : > { %v13131_v4 = vcombine.low %v13109_v43, %v13116_v14  ;;  %v11897_v24 = vrot.slane %v11881_v18, %v23231_v0  ;;  %v11904_v12 = vrot.slane %v11888_v29, %v23231_v0  ;;  %v11911_v39 = vrot.slane %v11889_v15, %v23231_v0 }
 0x91a   : > { %v13392_v25 = vcombine.low %v13384_v23, %v13391_v61  ;;  %v13132_v21 = vcombine.low %v13123_v33, %v13130_v54  ;;  %v11918_v3 = vrot.slane %v11890_v59, %v23231_v0  ;;  %v11734_v38 = vrot.slane %v23348_v42, %v23231_v0 }
 0x91b   : > { %v13139_v6 = vrot.slane %v13131_v4, %v23231_v0  ;;  %v13442_v26 = vcombine.low %v11897_v24, %v11911_v39  ;;  %v15353_v30 = vcombine.high %v11897_v24, %v11911_v39  ;;  %v11741_v50 = vrot.slane %v11727_v37, %v23231_v0 }
 0x91c   : > { %14131 = vperm.xlu1 %19870, %v13392_v25   ;;  %v13146_v11 = vrot.slane %v13132_v21, %v23231_v0  ;;  %v13444_v34 = vcombine.low %v11904_v12, %v11918_v3  ;;  %v15354_v27 = vcombine.high %v11904_v12, %v11918_v3  ;;  %v11742_v5 = vcombine.high %v11734_v38, %v11734_v38 }
 0x91d   : > { %v13452_v45 = vrot.slane %v13442_v26, %v23231_v0  ;;  %v13459_v35 = vrot.slane %v15353_v30, %v23231_v0  ;;  %v11743_v48 = vcombine.high %v11741_v50, %v11741_v50  ;;  %v11750_v18 = vrot.slane %v11734_v38, %v23231_v0 }
 0x91e   : > { %v13147_v56 = vcombine.low %v13139_v6, %v13146_v11  ;;  %v13466_v46 = vrot.slane %v13444_v34, %v23231_v0  ;;  %v13473_v22 = vrot.slane %v15354_v27, %v23231_v0  ;;  %v11757_v42 = vrot.slane %v11741_v50, %v23231_v0 }
 0x91f   : > { %v13474_v37 = vcombine.low %v13452_v45, %v13459_v35  ;;  %v11764_v13 = vrot.slane %v11742_v5, %v23231_v0  ;;  %v11771_v16 = vrot.slane %v11743_v48, %v23231_v0  ;;  %v11979_v9 = vrot.slane %v23377_v31, %v23231_v0 }
 0x920   : > { %14116 = vperm.xlu0 %19869, %v13147_v56   ;;  %v13475_v2 = vcombine.low %v13466_v46, %v13473_v22  ;;  %v11986_v29 = vrot.slane %v11972_v32, %v23231_v0  ;;  %v11832_v23 = vrot.slane %v23361_v51, %v23231_v0  ;;  %v11839_v43 = vrot.slane %v11825_v44, %v23231_v0 }
 0x921   : > { %v13482_v14 = vrot.slane %v13474_v37, %v23231_v0  ;;  %v13295_v15 = vcombine.low %v11750_v18, %v11764_v13  ;;  %v15347_v61 = vcombine.high %v11750_v18, %v11764_v13  ;;  %v13297_v33 = vcombine.low %v11757_v42, %v11771_v16 }
 0x922   : > { %v13489_v54 = vrot.slane %v13475_v2, %v23231_v0  ;;  %v15348_v59 = vcombine.high %v11757_v42, %v11771_v16  ;;  %v11987_v4 = vcombine.high %v11979_v9, %v11979_v9  ;;  %v11988_v24 = vcombine.high %v11986_v29, %v11986_v29 }
 0x923   : > { %v13305_v31 = vrot.slane %v13295_v15, %v23231_v0  ;;  %v13312_v32 = vrot.slane %v15347_v61, %v23231_v0  ;;  %v13319_v12 = vrot.slane %v13297_v33, %v23231_v0  ;;  %v11995_v39 = vrot.slane %v11979_v9, %v23231_v0 }
 0x924   : > { %v13490_v51 = vcombine.low %v13482_v14, %v13489_v54  ;;  %v13326_v44 = vrot.slane %v15348_v59, %v23231_v0  ;;  %v12002_v25 = vrot.slane %v11986_v29, %v23231_v0  ;;  %v12009_v21 = vrot.slane %v11987_v4, %v23231_v0 }
 0x925   : > { %v13327_v3 = vcombine.low %v13305_v31, %v13312_v32  ;;  %v12016_v38 = vrot.slane %v11988_v24, %v23231_v0  ;;  %v11840_v6 = vcombine.high %v11832_v23, %v11832_v23  ;;  %v11841_v26 = vcombine.high %v11839_v43, %v11839_v43 }
 0x926   : > { %14137 = vperm.xlu1 %19870, %v13490_v51   ;;  %v13328_v30 = vcombine.low %v13319_v12, %v13326_v44  ;;  %v13540_v50 = vcombine.low %v11995_v39, %v12009_v21  ;;  %v15357_v11 = vcombine.high %v11995_v39, %v12009_v21  ;;  %v11848_v34 = vrot.slane %v11832_v23, %v23231_v0 }
 0x927   : > { %v13335_v27 = vrot.slane %v13327_v3, %v23231_v0  ;;  %v13542_v5 = vcombine.low %v12002_v25, %v12016_v38  ;;  %v15358_v45 = vcombine.high %v12002_v25, %v12016_v38  ;;  %v11855_v35 = vrot.slane %v11839_v43, %v23231_v0 }
 0x928   : > { %v13342_v48 = vrot.slane %v13328_v30, %v23231_v0  ;;  %v13550_v18 = vrot.slane %v13540_v50, %v23231_v0  ;;  %v13557_v56 = vrot.slane %v15357_v11, %v23231_v0  ;;  %v11862_v46 = vrot.slane %v11840_v6, %v23231_v0 }
 0x929   : > { %v13564_v22 = vrot.slane %v13542_v5, %v23231_v0  ;;  %v13571_v42 = vrot.slane %v15358_v45, %v23231_v0  ;;  %v11869_v37 = vrot.slane %v11841_v26, %v23231_v0  ;;  %v12077_v13 = vrot.slane %v23387_v60, %v23231_v0 }
 0x92a   : > { %v13343_v16 = vcombine.low %v13335_v27, %v13342_v48  ;;  %v13572_v9 = vcombine.low %v13550_v18, %v13557_v56  ;;  %v13393_v2 = vcombine.low %v11848_v34, %v11862_v46  ;;  %v15351_v29 = vcombine.high %v11848_v34, %v11862_v46 }
 0x92b   : > { %v13573_v23 = vcombine.low %v13564_v22, %v13571_v42  ;;  %v13395_v43 = vcombine.low %v11855_v35, %v11869_v37  ;;  %v15352_v14 = vcombine.high %v11855_v35, %v11869_v37  ;;  %v12084_v15 = vrot.slane %v12070_v49, %v23231_v0 }
 0x92c   : > { %14128 = vperm.xlu0 %19869, %v13343_v16   ;;  %v13580_v61 = vrot.slane %v13572_v9, %v23231_v0  ;;  %v13403_v33 = vrot.slane %v13393_v2, %v23231_v0  ;;  %v13410_v54 = vrot.slane %v15351_v29, %v23231_v0  ;;  %v12085_v59 = vcombine.high %v12077_v13, %v12077_v13 }
 0x92d   : > { %v13587_v4 = vrot.slane %v13573_v23, %v23231_v0  ;;  %v13417_v24 = vrot.slane %v13395_v43, %v23231_v0  ;;  %v13424_v31 = vrot.slane %v15352_v14, %v23231_v0  ;;  %v12086_v32 = vcombine.high %v12084_v15, %v12084_v15 }
 0x92e   : > { %v13425_v12 = vcombine.low %v13403_v33, %v13410_v54  ;;  %v12093_v39 = vrot.slane %v12077_v13, %v23231_v0  ;;  %v12100_v60 = vrot.slane %v12084_v15, %v23231_v0  ;;  %v12107_v49 = vrot.slane %v12085_v59, %v23231_v0 }
 0x92f   : > { %v13588_v51 = vcombine.low %v13580_v61, %v13587_v4  ;;  %v13426_v44 = vcombine.low %v13417_v24, %v13424_v31  ;;  %v12114_v25 = vrot.slane %v12086_v32, %v23231_v0  ;;  %v11930_v21 = vrot.slane %v23379_v52, %v23231_v0 }
 0x930   : > { %v13433_v3 = vrot.slane %v13425_v12, %v23231_v0  ;;  %v13638_v38 = vcombine.low %v12093_v39, %v12107_v49  ;;  %v15361_v6 = vcombine.high %v12093_v39, %v12107_v49  ;;  %v11937_v26 = vrot.slane %v11923_v55, %v23231_v0 }
 0x931   : > { %14143 = vperm.xlu1 %19870, %v13588_v51   ;;  %v13440_v30 = vrot.slane %v13426_v44, %v23231_v0  ;;  %v13640_v50 = vcombine.low %v12100_v60, %v12114_v25  ;;  %v15362_v11 = vcombine.high %v12100_v60, %v12114_v25  ;;  %v11938_v34 = vcombine.high %v11930_v21, %v11930_v21 }
 0x932   : > { %v13648_v27 = vrot.slane %v13638_v38, %v23231_v0  ;;  %v13655_v5 = vrot.slane %v15361_v6, %v23231_v0  ;;  %v11939_v45 = vcombine.high %v11937_v26, %v11937_v26  ;;  %v11946_v35 = vrot.slane %v11930_v21, %v23231_v0 }
 0x933   : > { %v13441_v48 = vcombine.low %v13433_v3, %v13440_v30  ;;  %v13662_v18 = vrot.slane %v13640_v50, %v23231_v0  ;;  %v13669_v56 = vrot.slane %v15362_v11, %v23231_v0  ;;  %v11953_v52 = vrot.slane %v11937_v26, %v23231_v0 }
 0x934   : > { %v13670_v55 = vcombine.low %v13648_v27, %v13655_v5  ;;  %v11960_v46 = vrot.slane %v11938_v34, %v23231_v0  ;;  %v11967_v22 = vrot.slane %v11939_v45, %v23231_v0  ;;  %v12175_v42 = vrot.slane %v23404_v41, %v23231_v0 }
 0x935   : > { %14134 = vperm.xlu0 %19869, %v13441_v48   ;;  %v13671_v37 = vcombine.low %v13662_v18, %v13669_v56  ;;  %v24281_v13 = vcombine.high %v23404_v41, %v23404_v41  ;;  %v12028_v9 = vrot.slane %v23399_v19, %v23231_v0  ;;  %v24282_v2 = vcombine.high %v23399_v19, %v23399_v19 }
 0x936   : > { %v13678_v23 = vrot.slane %v13670_v55, %v23231_v0  ;;  %v13491_v43 = vcombine.low %v11946_v35, %v11960_v46  ;;  %v15355_v14 = vcombine.high %v11946_v35, %v11960_v46  ;;  %v13493_v15 = vcombine.low %v11953_v52, %v11967_v22 }
 0x937   : > { %v12182_v16 = vrot.slane %v24281_v13, %v23231_v0  ;;  %v12035_v29 = vrot.slane %v24282_v2, %v23231_v0  ;;  %v13685_v61 = vrot.slane %v13671_v37, %v23231_v0  ;;  %v15356_v33 = vcombine.high %v11953_v52, %v11967_v22 }
 0x938   : > { %v12183_v54 = vcombine.high %v12175_v42, %v12175_v42  ;;  %v13501_v41 = vrot.slane %v13491_v43, %v23231_v0  ;;  %v13508_v4 = vrot.slane %v15355_v14, %v23231_v0  ;;  %v13515_v24 = vrot.slane %v13493_v15, %v23231_v0 }
 0x939   : > { %v12184_v59 = vcombine.high %v12182_v16, %v12182_v16  ;;  %v12191_v31 = vrot.slane %v12175_v42, %v23231_v0  ;;  %v13686_v19 = vcombine.low %v13678_v23, %v13685_v61  ;;  %v13522_v32 = vrot.slane %v15356_v33, %v23231_v0 }
 0x93a   : > { %v12198_v12 = vrot.slane %v12182_v16, %v23231_v0  ;;  %v12205_v39 = vrot.slane %v12183_v54, %v23231_v0  ;;  %v13523_v60 = vcombine.low %v13501_v41, %v13508_v4  ;;  %v12036_v51 = vcombine.high %v12028_v9, %v12028_v9 }
 0x93b   : > { %v12212_v49 = vrot.slane %v12184_v59, %v23231_v0  ;;  %v12037_v44 = vcombine.high %v12035_v29, %v12035_v29  ;;  %14149 = vperm.xlu1 %19870, %v13686_v19   ;;  %v13524_v25 = vcombine.low %v13515_v24, %v13522_v32  ;;  %v12044_v38 = vrot.slane %v12028_v9, %v23231_v0 }
 0x93c   : > { %v13736_v21 = vcombine.low %v12191_v31, %v12205_v39  ;;  %v15365_v3 = vcombine.high %v12191_v31, %v12205_v39  ;;  %v13531_v6 = vrot.slane %v13523_v60, %v23231_v0  ;;  %v12051_v50 = vrot.slane %v12035_v29, %v23231_v0 }
 0x93d   : > { %v13738_v26 = vcombine.low %v12198_v12, %v12212_v49  ;;  %v15366_v30 = vcombine.high %v12198_v12, %v12212_v49  ;;  %v13538_v11 = vrot.slane %v13524_v25, %v23231_v0  ;;  %v12058_v5 = vrot.slane %v12036_v51, %v23231_v0 }
 0x93e   : > { %v13746_v34 = vrot.slane %v13736_v21, %v23231_v0  ;;  %v13753_v27 = vrot.slane %v15365_v3, %v23231_v0  ;;  %v12065_v48 = vrot.slane %v12037_v44, %v23231_v0  ;;  %v12273_v18 = vrot.slane %v23427_v20, %v23231_v0 }
 0x93f   : > { %v13760_v45 = vrot.slane %v13738_v26, %v23231_v0  ;;  %v13767_v35 = vrot.slane %v15366_v30, %v23231_v0  ;;  %v13539_v56 = vcombine.low %v13531_v6, %v13538_v11  ;;  %v13589_v55 = vcombine.low %v12044_v38, %v12058_v5 }
 0x940   : > { %v13768_v52 = vcombine.low %v13746_v34, %v13753_v27  ;;  %v15359_v46 = vcombine.high %v12044_v38, %v12058_v5  ;;  %v13591_v42 = vcombine.low %v12051_v50, %v12065_v48  ;;  %v15360_v37 = vcombine.high %v12051_v50, %v12065_v48 }
 0x941   : > { %v13769_v22 = vcombine.low %v13760_v45, %v13767_v35  ;;  %v24283_v13 = vcombine.high %v23427_v20, %v23427_v20  ;;  %14140 = vperm.xlu0 %19869, %v13539_v56   ;;  %v13599_v2 = vrot.slane %v13589_v55, %v23231_v0  ;;  %v12281_v23 = vcombine.high %v12273_v18, %v12273_v18 }
 0x942   : > { %v13776_v9 = vrot.slane %v13768_v52, %v23231_v0  ;;  %v13606_v29 = vrot.slane %v15359_v46, %v23231_v0  ;;  %v13613_v14 = vrot.slane %v13591_v42, %v23231_v0  ;;  %v13620_v15 = vrot.slane %v15360_v37, %v23231_v0 }
 0x943   : > { %v12280_v16 = vrot.slane %v24283_v13, %v23231_v0  ;;  %v13783_v43 = vrot.slane %v13769_v22, %v23231_v0  ;;  %v12289_v54 = vrot.slane %v12273_v18, %v23231_v0  ;;  %v12303_v59 = vrot.slane %v12281_v23, %v23231_v0 }
 0x944   : > { %v13621_v33 = vcombine.low %v13599_v2, %v13606_v29  ;;  %v13622_v4 = vcombine.low %v13613_v14, %v13620_v15  ;;  %v12126_v31 = vrot.slane %v23415_v47, %v23231_v0  ;;  %v24284_v39 = vcombine.high %v23415_v47, %v23415_v47 }
 0x945   : > { %v12282_v61 = vcombine.high %v12280_v16, %v12280_v16  ;;  %v12296_v20 = vrot.slane %v12280_v16, %v23231_v0  ;;  %v13784_v41 = vcombine.low %v13776_v9, %v13783_v43  ;;  %v13834_v32 = vcombine.low %v12289_v54, %v12303_v59 }
 0x946   : > { %v13629_v19 = vrot.slane %v13621_v33, %v23231_v0  ;;  %v15369_v12 = vcombine.high %v12289_v54, %v12303_v59  ;;  %v12133_v60 = vrot.slane %v24284_v39, %v23231_v0  ;;  %v13636_v49 = vrot.slane %v13622_v4, %v23231_v0 }
 0x947   : > { %v12310_v24 = vrot.slane %v12282_v61, %v23231_v0  ;;  %14155 = vperm.xlu1 %19870, %v13784_v41   ;;  %v12134_v25 = vcombine.high %v12126_v31, %v12126_v31  ;;  %v13844_v21 = vrot.slane %v13834_v32, %v23231_v0  ;;  %v12142_v6 = vrot.slane %v12126_v31, %v23231_v0 }
 0x948   : > { %v13851_v3 = vrot.slane %v15369_v12, %v23231_v0  ;;  %v12135_v38 = vcombine.high %v12133_v60, %v12133_v60  ;;  %v13637_v26 = vcombine.low %v13629_v19, %v13636_v49  ;;  %v12149_v47 = vrot.slane %v12133_v60, %v23231_v0 }
 0x949   : > { %v13836_v51 = vcombine.low %v12296_v20, %v12310_v24  ;;  %v15370_v44 = vcombine.high %v12296_v20, %v12310_v24  ;;  %v12156_v34 = vrot.slane %v12134_v25, %v23231_v0  ;;  %v12224_v5 = vrot.slane %v23452_v28, %v23231_v0 }
 0x94a   : > { %v13866_v11 = vcombine.low %v13844_v21, %v13851_v3  ;;  %v12163_v27 = vrot.slane %v12135_v38, %v23231_v0  ;;  %14146 = vperm.xlu0 %19869, %v13637_v26   ;;  %v12231_v35 = vrot.slane %v12217_v58, %v23231_v0  ;;  %v11636_v48 = vrot.slane %v23327_v7, %v23231_v0 }
 0x94b   : > { %v13858_v30 = vrot.slane %v13836_v51, %v23231_v0  ;;  %v13865_v50 = vrot.slane %v15370_v44, %v23231_v0  ;;  %v24285_v18 = vcombine.high %v23327_v7, %v23327_v7  ;;  %v13687_v55 = vcombine.low %v12142_v6, %v12156_v34 }
 0x94c   : > { %v13874_v52 = vrot.slane %v13866_v11, %v23231_v0  ;;  %v15363_v46 = vcombine.high %v12142_v6, %v12156_v34  ;;  %v13689_v22 = vcombine.low %v12149_v47, %v12163_v27  ;;  %v15364_v37 = vcombine.high %v12149_v47, %v12163_v27 }
 0x94d   : > { %v13867_v45 = vcombine.low %v13858_v30, %v13865_v50  ;;  %v11643_v56 = vrot.slane %v24285_v18, %v23231_v0  ;;  %v12232_v13 = vcombine.high %v12224_v5, %v12224_v5  ;;  %v12233_v16 = vcombine.high %v12231_v35, %v12231_v35 }
 0x94e   : > { %v13697_v28 = vrot.slane %v13687_v55, %v23231_v0  ;;  %v13704_v58 = vrot.slane %v15363_v46, %v23231_v0  ;;  %v13711_v9 = vrot.slane %v13689_v22, %v23231_v0  ;;  %v12240_v2 = vrot.slane %v12224_v5, %v23231_v0 }
 0x94f   : > { %v13881_v42 = vrot.slane %v13867_v45, %v23231_v0  ;;  %v13718_v29 = vrot.slane %v15364_v37, %v23231_v0  ;;  %v12247_v23 = vrot.slane %v12231_v35, %v23231_v0  ;;  %v12254_v43 = vrot.slane %v12232_v13, %v23231_v0 }
 0x950   : > { %v13719_v14 = vcombine.low %v13697_v28, %v13704_v58  ;;  %v12261_v15 = vrot.slane %v12233_v16, %v23231_v0  ;;  %v11644_v61 = vcombine.high %v11636_v48, %v11636_v48  ;;  %v11645_v33 = vcombine.high %v11643_v56, %v11643_v56 }
 0x951   : > { %v13882_v7 = vcombine.low %v13874_v52, %v13881_v42  ;;  %v13720_v54 = vcombine.low %v13711_v9, %v13718_v29  ;;  %v13785_v20 = vcombine.low %v12240_v2, %v12254_v43  ;;  %v15367_v59 = vcombine.high %v12240_v2, %v12254_v43 }
 0x952   : > { %v11652_v41 = vrot.slane %v11636_v48, %v23231_v0  ;;  %v13727_v4 = vrot.slane %v13719_v14, %v23231_v0  ;;  %v13787_v24 = vcombine.low %v12247_v23, %v12261_v15  ;;  %v15368_v31 = vcombine.high %v12247_v23, %v12261_v15 }
 0x953   : > { %14161 = vperm.xlu1 %19870, %v13882_v7   ;;  %v11659_v19 = vrot.slane %v11643_v56, %v23231_v0  ;;  %v13734_v32 = vrot.slane %v13720_v54, %v23231_v0  ;;  %v13795_v12 = vrot.slane %v13785_v20, %v23231_v0  ;;  %v13802_v39 = vrot.slane %v15367_v59, %v23231_v0 }
 0x954   : > { %v11666_v60 = vrot.slane %v11644_v61, %v23231_v0  ;;  %v13809_v49 = vrot.slane %v13787_v24, %v23231_v0  ;;  %v13816_v51 = vrot.slane %v15368_v31, %v23231_v0  ;;  %v11673_v44 = vrot.slane %v11645_v33, %v23231_v0 }
 0x955   : > { %v12371_v25 = vrot.slane %v23481_v53, %v23231_v0  ;;  %v13735_v21 = vcombine.low %v13727_v4, %v13734_v32  ;;  %v13817_v3 = vcombine.low %v13795_v12, %v13802_v39  ;;  %v12378_v47 = vrot.slane %v12364_v36, %v23231_v0 }
 0x956   : > { %v13197_v38 = vcombine.low %v11652_v41, %v11666_v60  ;;  %v15343_v6 = vcombine.high %v11652_v41, %v11666_v60  ;;  %v13818_v26 = vcombine.low %v13809_v49, %v13816_v51  ;;  %v13199_v30 = vcombine.low %v11659_v19, %v11673_v44 }
 0x957   : > { %v15344_v50 = vcombine.high %v11659_v19, %v11673_v44  ;;  %14152 = vperm.xlu0 %19869, %v13735_v21   ;;  %v13825_v11 = vrot.slane %v13817_v3, %v23231_v0  ;;  %v12379_v5 = vcombine.high %v12371_v25, %v12371_v25  ;;  %v12380_v18 = vcombine.high %v12378_v47, %v12378_v47 }
 0x958   : > { %v13207_v34 = vrot.slane %v13197_v38, %v23231_v0  ;;  %v13214_v27 = vrot.slane %v15343_v6, %v23231_v0  ;;  %v13832_v45 = vrot.slane %v13818_v26, %v23231_v0  ;;  %v13221_v35 = vrot.slane %v13199_v30, %v23231_v0 }
 0x959   : > { %v13228_v48 = vrot.slane %v15344_v50, %v23231_v0  ;;  %v12387_v52 = vrot.slane %v12371_v25, %v23231_v0  ;;  %v12394_v53 = vrot.slane %v12378_v47, %v23231_v0  ;;  %v12401_v36 = vrot.slane %v12379_v5, %v23231_v0 }
 0x95a   : > { %v13229_v56 = vcombine.low %v13207_v34, %v13214_v27  ;;  %v13833_v55 = vcombine.low %v13825_v11, %v13832_v45  ;;  %v12408_v22 = vrot.slane %v12380_v18, %v23231_v0  ;;  %v11685_v42 = vrot.slane %v23322_v57, %v23231_v0 }
 0x95b   : > { %v13230_v46 = vcombine.low %v13221_v35, %v13228_v48  ;;  %v13932_v13 = vcombine.low %v12387_v52, %v12401_v36  ;;  %v15373_v16 = vcombine.high %v12387_v52, %v12401_v36  ;;  %v24286_v28 = vcombine.high %v23322_v57, %v23322_v57 }
 0x95c   : > { %v13237_v37 = vrot.slane %v13229_v56, %v23231_v0  ;;  %14158 = vperm.xlu1 %19870, %v13833_v55   ;;  %v13934_v2 = vcombine.low %v12394_v53, %v12408_v22  ;;  %v15374_v7 = vcombine.high %v12394_v53, %v12408_v22  ;;  %v11693_v29 = vcombine.high %v11685_v42, %v11685_v42 }
 0x95d   : > { %v11692_v58 = vrot.slane %v24286_v28, %v23231_v0  ;;  %v13244_v9 = vrot.slane %v13230_v46, %v23231_v0  ;;  %v13942_v23 = vrot.slane %v13932_v13, %v23231_v0  ;;  %v13949_v43 = vrot.slane %v15373_v16, %v23231_v0 }
 0x95e   : > { %v11701_v15 = vrot.slane %v11685_v42, %v23231_v0  ;;  %v13956_v33 = vrot.slane %v13934_v2, %v23231_v0  ;;  %v13963_v54 = vrot.slane %v15374_v7, %v23231_v0  ;;  %v11715_v59 = vrot.slane %v11693_v29, %v23231_v0 }
 0x95f   : > { %v11694_v14 = vcombine.high %v11692_v58, %v11692_v58  ;;  %v13245_v61 = vcombine.low %v13237_v37, %v13244_v9  ;;  %v11708_v57 = vrot.slane %v11692_v58, %v23231_v0  ;;  %v13964_v20 = vcombine.low %v13942_v23, %v13949_v43 }
 0x960   : > { %v12322_v4 = vrot.slane %v23503_v62, %v23231_v0  ;;  %v13965_v24 = vcombine.low %v13956_v33, %v13963_v54  ;;  %v12329_v31 = vrot.slane %v12315_v10, %v23231_v0  ;;  %v12420_v19 = vrot.slane %v23553_v63, %v23231_v0 }
 0x961   : > { %v11722_v41 = vrot.slane %v11694_v14, %v23231_v0  ;;  %14122 = vperm.xlu0 %19869, %v13245_v61   ;;  %v12427_v32 = vrot.slane %v12413_v17, %v23231_v0  ;;  %v13972_v12 = vrot.slane %v13964_v20, %v23231_v0  ;;  %v13246_v39 = vcombine.low %v11701_v15, %v11715_v59 }
 0x962   : > { %v15345_v60 = vcombine.high %v11701_v15, %v11715_v59  ;;  %v13979_v51 = vrot.slane %v13965_v24, %v23231_v0  ;;  %v12330_v25 = vcombine.high %v12322_v4, %v12322_v4  ;;  %v12331_v21 = vcombine.high %v12329_v31, %v12329_v31 }
 0x963   : > { %v13248_v49 = vcombine.low %v11708_v57, %v11722_v41  ;;  %v15346_v44 = vcombine.high %v11708_v57, %v11722_v41  ;;  %v13256_v62 = vrot.slane %v13246_v39, %v23231_v0  ;;  %v12338_v38 = vrot.slane %v12322_v4, %v23231_v0 }
 0x964   : > { %v13263_v10 = vrot.slane %v15345_v60, %v23231_v0  ;;  %v13980_v63 = vcombine.low %v13972_v12, %v13979_v51  ;;  %v12345_v6 = vrot.slane %v12329_v31, %v23231_v0  ;;  %v12352_v26 = vrot.slane %v12330_v25, %v23231_v0 }
 0x965   : > { %v13270_v3 = vrot.slane %v13248_v49, %v23231_v0  ;;  %v13277_v17 = vrot.slane %v15346_v44, %v23231_v0  ;;  %v12359_v50 = vrot.slane %v12331_v21, %v23231_v0  ;;  %v12428_v47 = vcombine.high %v12420_v19, %v12420_v19 }
 0x966   : > { %v13278_v30 = vcombine.low %v13256_v62, %v13263_v10  ;;  %v12429_v11 = vcombine.high %v12427_v32, %v12427_v32  ;;  %14167 = vperm.xlu1 %19870, %v13980_v63   ;;  %v13883_v27 = vcombine.low %v12338_v38, %v12352_v26  ;;  %v15371_v5 = vcombine.high %v12338_v38, %v12352_v26  ;;  %v14090_v26 = vpop.permute.xlu1 %14089 }
 0x967   : > { %v13279_v34 = vcombine.low %v13270_v3, %v13277_v17  ;;  %v12436_v45 = vrot.slane %v12420_v19, %v23231_v0  ;;  %v13885_v48 = vcombine.low %v12345_v6, %v12359_v50  ;;  %v15372_v18 = vcombine.high %v12345_v6, %v12359_v50  ;;  %v14084_v17 = vpop.permute.xlu0 %14083 }
 0x968   : > { %v13286_v35 = vrot.slane %v13278_v30, %v23231_v0  ;;  %v12443_v56 = vrot.slane %v12427_v32, %v23231_v0  ;;  %v13893_v53 = vrot.slane %v13883_v27, %v23231_v0  ;;  %v13900_v36 = vrot.slane %v15371_v5, %v23231_v0 }
 0x969   : > { %v13293_v52 = vrot.slane %v13279_v34, %v23231_v0  ;;  %v12450_v55 = vrot.slane %v12428_v47, %v23231_v0  ;;  %v13907_v46 = vrot.slane %v13885_v48, %v23231_v0  ;;  %v13914_v22 = vrot.slane %v15372_v18, %v23231_v0 }
 0x96a   : > { %v12457_v42 = vrot.slane %v12429_v11, %v23231_v0  ;;  %v12469_v37 = vrot.slane %v23528_v40, %v23231_v0  ;;  %v13915_v16 = vcombine.low %v13893_v53, %v13900_v36  ;;  %v12476_v29 = vrot.slane %v12462_v8, %v23231_v0  ;;  %v14087_v50 = vpop.permute.xlu1 %14086 }
 0x96b   : > { %v13294_v13 = vcombine.low %v13286_v35, %v13293_v52  ;;  %v13981_v28 = vcombine.low %v12436_v45, %v12450_v55  ;;  %v15375_v58 = vcombine.high %v12436_v45, %v12450_v55  ;;  %v13916_v9 = vcombine.low %v13907_v46, %v13914_v22  ;;  %v14081_v6 = vpop.permute.xlu0 %14080 }
 0x96c   : > { %v13983_v2 = vcombine.low %v12443_v56, %v12457_v42  ;;  %v15376_v7 = vcombine.high %v12443_v56, %v12457_v42  ;;  %v13923_v23 = vrot.slane %v13915_v16, %v23231_v0  ;;  %v12477_v15 = vcombine.high %v12469_v37, %v12469_v37 }
 0x96d   : > { %14125 = vperm.xlu0 %19869, %v13294_v13   ;;  %v13991_v43 = vrot.slane %v13981_v28, %v23231_v0  ;;  %v13998_v14 = vrot.slane %v15375_v58, %v23231_v0  ;;  %v13930_v61 = vrot.slane %v13916_v9, %v23231_v0  ;;  %v12478_v57 = vcombine.high %v12476_v29, %v12476_v29 }
 0x96e   : > { %v14005_v33 = vrot.slane %v13983_v2, %v23231_v0  ;;  %v14012_v54 = vrot.slane %v15376_v7, %v23231_v0  ;;  %v12485_v59 = vrot.slane %v12469_v37, %v23231_v0  ;;  %v12499_v40 = vrot.slane %v12477_v15, %v23231_v0  ;;  %v23901_v11 = vpop.permute.xlu1 %14095 }
 0x96f   : > { %v14013_v20 = vcombine.low %v13991_v43, %v13998_v14  ;;  %v13931_v8 = vcombine.low %v13923_v23, %v13930_v61  ;;  %v12492_v4 = vrot.slane %v12476_v29, %v23231_v0  ;;  %v12506_v24 = vrot.slane %v12478_v57, %v23231_v0  ;;  %v14093_v30 = vpop.permute.xlu0 %14092 }
 0x970   : > { %v14014_v41 = vcombine.low %v14005_v33, %v14012_v54  ;;  %v14030_v31 = vcombine.low %v12485_v59, %v12499_v40  ;;  %v15377_v19 = vcombine.high %v12485_v59, %v12499_v40  ;;  %v24287_v36 = vlaneseq }
 0x971   : > { %14164 = vperm.xlu1 %19870, %v13931_v8   ;;  %v14021_v32 = vrot.slane %v14013_v20, %v23231_v0  ;;  %v14032_v39 = vcombine.low %v12492_v4, %v12506_v24  ;;  %v15378_v60 = vcombine.high %v12492_v4, %v12506_v24 }
 0x972   : > { %v14028_v12 = vrot.slane %v14014_v41, %v23231_v0  ;;  %v14040_v49 = vrot.slane %v14030_v31, %v23231_v0  ;;  %v14047_v51 = vrot.slane %v15377_v19, %v23231_v0  ;;  %v23918_v55 = vand.u32 127, %v24287_v36 }
 0x973   : > { %v14054_v25 = vrot.slane %v14032_v39, %v23231_v0  ;;  %v14061_v21 = vrot.slane %v15378_v60, %v23231_v0  ;;  %vm14383_vm3 = vcmp.lt.s32.totalorder %v24287_v36, 256 }
 0x974   : > { %v14029_v44 = vcombine.low %v14021_v32, %v14028_v12  ;;  %v14062_v62 = vcombine.low %v14040_v49, %v14047_v51  ;;  %v23899_v47 = vpop.permute.xlu0 %14098  ;;  %v14181_v22 = vadd.s32 4294967288, %v23918_v55  ;;  %v14188_v42 = vadd.s32 4294967280, %v23918_v55 }
 0x975   : > { %v14063_v10 = vcombine.low %v14054_v25, %v14061_v21  ;;  %v14179_v13 = vsub.s32 %v23918_v55, %v23226_v1  ;;  %v14195_v9 = vadd.s32 4294967272, %v23918_v55  ;;  %v14202_v7 = vadd.s32 4294967264, %v23918_v55 }
 0x976   : > { %14170 = vperm.xlu1 %19870, %v14029_v44   ;;  %v14070_v3 = vrot.slane %v14062_v62, %v23231_v0  ;;  %v14184_v16 = vsub.s32 %v14181_v22, %v23226_v1  ;;  %v14191_v58 = vsub.s32 %v14188_v42, %v23226_v1  ;;  %v14209_v61 = vadd.s32 4294967256, %v23918_v55 }
 0x977   : > { %v14077_v38 = vrot.slane %v14063_v10, %v23231_v0  ;;  %v14180_v2 = vrot.slane %v14081_v6, %v14179_v13  ;;  %v14198_v14 = vsub.s32 %v14195_v9, %v23226_v1  ;;  %v14205_v54 = vsub.s32 %v14202_v7, %v23226_v1 }
 0x978   : > { %v14185_v23 = vrot.slane %v14084_v17, %v14184_v16  ;;  %v14192_v43 = vrot.slane %v14087_v50, %v14191_v58  ;;  %v14216_v59 = vadd.s32 4294967248, %v23918_v55  ;;  %v14212_v4 = vsub.s32 %v14209_v61, %v23226_v1 }
 0x979   : > { %v14078_v63 = vcombine.low %v14070_v3, %v14077_v38  ;;  %v14199_v41 = vrot.slane %v14090_v26, %v14198_v14  ;;  %v14206_v31 = vrot.slane %v14093_v30, %v14205_v54  ;;  %v14223_v32 = vadd.s32 4294967240, %v23918_v55 }
 0x97a   : > { %v23905_v27 = vpop.permute.xlu1 %14101  ;;  %v14187_v15 = vsel %vm14186_vm4, %v14185_v23, %v14180_v2  ;;  %v14219_v60 = vsub.s32 %v14216_v59, %v23226_v1  ;;  %v14213_v44 = vrot.slane %v23901_v11, %v14212_v4  ;;  %v14230_v62 = vadd.s32 4294967232, %v23918_v55 }
 0x97b   : > { %14173 = vperm.xlu1 %19870, %v14078_v63   ;;  %v14194_v20 = vsel %vm14193_vm5, %v14192_v43, %v14187_v15  ;;  %v14226_v3 = vsub.s32 %v14223_v32, %v23226_v1  ;;  %v14237_v30 = vadd.s32 4294967224, %v23918_v55  ;;  %v14258_v2 = vadd.s32 4294967200, %v23918_v55 }
 0x97c   : > { %v14201_v19 = vsel %vm14200_vm6, %v14199_v41, %v14194_v20  ;;  %v14220_v63 = vrot.slane %v23899_v47, %v14219_v60 }
 0x97d   : > { %v14208_v21 = vsel %vm14207_vm7, %v14206_v31, %v14201_v19 }
 0x97e   : > { %v14215_v26 = vsel %vm14214_vm8, %v14213_v44, %v14208_v21 }
 0x97f   : > { %v14222_v42 = vsel %vm14221_vm9, %v14220_v63, %v14215_v26 }
 0x980   : > { %v23903_v34 = vpop.permute.xlu0 %14104 }
 0x986   : > { %v23909_v45 = vpop.permute.xlu1 %14107 }
 0x98a   : > { %v23907_v5 = vpop.permute.xlu0 %14113 }
 0x990   : > { %v23911_v35 = vpop.permute.xlu0 %14110 }
 0x996   : > { %v23913_v18 = vpop.permute.xlu0 %14119 }
 0x99b   : > { %v14132_v48 = vpop.permute.xlu1 %14131 }
 0x99c   : > { %v14293_v24 = vrot.slane %v14132_v48, %v14184_v16  ;;  %v14233_v48 = vsub.s32 %v14230_v62, %v23226_v1 }
 0x99f   : > { %v23915_v52 = vpop.permute.xlu0 %14116 }
 0x9a5   : > { %v14138_v56 = vpop.permute.xlu1 %14137 }
 0x9a6   : > { %v14303_v25 = vrot.slane %v14138_v56, %v14198_v14  ;;  %v14244_v56 = vadd.s32 4294967216, %v23918_v55 }
 0x9a8   : > { %v14247_v9 = vsub.s32 %v14244_v56, %v23226_v1 }
 0x9ab   : > { %v14129_v46 = vpop.permute.xlu0 %14128 }
 0x9ac   : > { %v14289_v57 = vrot.slane %v14129_v46, %v14179_v13  ;;  %v14227_v46 = vrot.slane %v23905_v27, %v14226_v3  ;;  %v14251_v27 = vadd.s32 4294967208, %v23918_v55 }
 0x9ae   : > { %v14294_v12 = vsel %vm14186_vm4, %v14293_v24, %v14289_v57  ;;  %v14229_v7 = vsel %vm14228_vm10, %v14227_v46, %v14222_v42  ;;  %v14254_v59 = vsub.s32 %v14251_v27, %v23226_v1 }
 0x9b0   : > { %v14144_v53 = vpop.permute.xlu1 %14143 }
 0x9b1   : > { %v14313_v50 = vrot.slane %v14144_v53, %v14212_v4  ;;  %v14234_v53 = vrot.slane %v23903_v34, %v14233_v48  ;;  %v14248_v34 = vrot.slane %v23911_v35, %v14247_v9 }
 0x9b3   : > { %v14236_v61 = vsel %vm14235_vm11, %v14234_v53, %v14229_v7 }
 0x9b4   : > { %v14135_v28 = vpop.permute.xlu0 %14134 }
 0x9b5   : > { %v14298_v40 = vrot.slane %v14135_v28, %v14191_v58  ;;  %v14240_v28 = vsub.s32 %v14237_v30, %v23226_v1 }
 0x9b7   : > { %v14299_v49 = vsel %vm14193_vm5, %v14298_v40, %v14294_v12  ;;  %v14241_v14 = vrot.slane %v23909_v45, %v14240_v28  ;;  %v14265_v40 = vadd.s32 4294967192, %v23918_v55  ;;  %v14279_v45 = vadd.s32 4294967176, %v23918_v55 }
 0x9b8   : > { %v14304_v38 = vsel %vm14200_vm6, %v14303_v25, %v14299_v49  ;;  %v14255_v12 = vrot.slane %v23907_v5, %v14254_v59 }
 0x9ba   : > { %v23922_v37 = vpop.permute.xlu1 %14149 }
 0x9bb   : > { %v14323_v58 = vrot.slane %v23922_v37, %v14226_v3  ;;  %v14272_v37 = vadd.s32 4294967184, %v23918_v55 }
 0x9bd   : > { %v14275_v4 = vsub.s32 %v14272_v37, %v23226_v1 }
 0x9c0   : > { %v14141_v33 = vpop.permute.xlu0 %14140 }
 0x9c1   : > { %v14308_v51 = vrot.slane %v14141_v33, %v14205_v54  ;;  %v14261_v33 = vsub.s32 %v14258_v2, %v23226_v1 }
 0x9c3   : > { %v14309_v17 = vsel %vm14207_vm7, %v14308_v51, %v14304_v38  ;;  %v14262_v24 = vrot.slane %v23915_v52, %v14261_v33 }
 0x9c4   : > { %v14314_v22 = vsel %vm14214_vm8, %v14313_v50, %v14309_v17 }
 0x9c6   : > { %v23930_v29 = vpop.permute.xlu1 %14155 }
 0x9c7   : > { %v14333_v15 = vrot.slane %v23930_v29, %v14240_v28  ;;  %v14243_v29 = vsel %vm14242_vm12, %v14241_v14, %v14236_v61 }
 0x9c8   : > { %v14250_v35 = vsel %vm14249_vm13, %v14248_v34, %v14243_v29 }
 0x9c9   : > { %v14147_v39 = vpop.permute.xlu0 %14146  ;;  %v14257_v51 = vsel %vm14256_vm14, %v14255_v12, %v14250_v35 }
 0x9ca   : > { %v14318_v6 = vrot.slane %v14147_v39, %v14219_v60  ;;  %v14268_v39 = vsub.s32 %v14265_v40, %v23226_v1  ;;  %v14282_v60 = vsub.s32 %v14279_v45, %v23226_v1  ;;  %v14264_v25 = vsel %vm14263_vm15, %v14262_v24, %v14257_v51 }
 0x9cc   : > { %v14319_v47 = vsel %vm14221_vm9, %v14318_v6, %v14314_v22 }
 0x9cd   : > { %v14324_v23 = vsel %vm14228_vm10, %v14323_v58, %v14319_v47 }
 0x9d2   : > { %v23938_v8 = vpop.permute.xlu1 %14161 }
 0x9d3   : > { %v14343_v55 = vrot.slane %v23938_v8, %v14254_v59 }
 0x9d6   : > { %v14153_v11 = vpop.permute.xlu0 %14152 }
 0x9d7   : > { %v14328_v13 = vrot.slane %v14153_v11, %v14233_v48 }
 0x9d9   : > { %v14329_v43 = vsel %vm14235_vm11, %v14328_v13, %v14324_v23 }
 0x9da   : > { %v14334_v41 = vsel %vm14242_vm12, %v14333_v15, %v14329_v43 }
 0x9db   : > { %v14159_v10 = vpop.permute.xlu1 %14158 }
 0x9dc   : > { %v14338_v54 = vrot.slane %v14159_v10, %v14247_v9  ;;  %v14269_v10 = vrot.slane %v23913_v18, %v14268_v39 }
 0x9de   : > { %v14339_v31 = vsel %vm14249_vm13, %v14338_v54, %v14334_v41  ;;  %v14271_v38 = vsel %vm14270_vm0, %v14269_v10, %v14264_v25 }
 0x9df   : > { %v14344_v44 = vsel %vm14256_vm14, %v14343_v55, %v14339_v31 }
 0x9e0   : > { %v14123_v57 = vpop.permute.xlu0 %14122 }
 0x9e1   : > { %v14276_v21 = vrot.slane %v14123_v57, %v14275_v4 }
 0x9e3   : > { %v14278_v17 = vsel %vm14277_vm1, %v14276_v21, %v14271_v38 }
 0x9e5   : > { %v14168_v16 = vpop.permute.xlu1 %14167 }
 0x9e6   : > { %v14353_v5 = vrot.slane %v14168_v16, %v14268_v39 }
 0x9ec   : > { %v14126_v49 = vpop.permute.xlu0 %14125 }
 0x9ed   : > { %v14283_v3 = vrot.slane %v14126_v49, %v14282_v60 }
 0x9ef   : > { %v14285_v26 = vsel %vm14284_vm2, %v14283_v3, %v14278_v17 }
 0x9f0   : > { %v14165_v20 = vpop.permute.xlu1 %14164 }
 0x9f1   : > { %v14348_v19 = vrot.slane %v14165_v20, %v14261_v33 }
 0x9f3   : > { %v14349_v52 = vsel %vm14263_vm15, %v14348_v19, %v14344_v44 }
 0x9f4   : > { %v14354_v1 = vsel %vm14270_vm0, %v14353_v5, %v14349_v52 }
 0x9f5   : > { %v14171_v32 = vpop.permute.xlu1 %14170 }
 0x9f6   : > { %v14358_v62 = vrot.slane %v14171_v32, %v14275_v4 }
 0x9f8   : > { %v14359_v6 = vsel %vm14277_vm1, %v14358_v62, %v14354_v1 }
 0x9fa   : > { %v14174_v8 = vpop.permute.xlu1 %14173 }
 0x9fb   : > { %v14363_v63 = vrot.slane %v14174_v8, %v14282_v60 }
 0x9fd   : > { %v14364_v30 = vsel %vm14284_vm2, %v14363_v63, %v14359_v6 }
 0x9fe   : > { %v14365_v50 = vcombine.low %v14285_v26, %v14364_v30 }
 0xa00   : > { %v14372_v11 = vrot.slane %v14365_v50, %v23231_v0 }
 0xa02   : > { %v14379_v18 = vrot.slane %v14372_v11, %v23231_v0 }
 0xa04   : > { %14385 = vst.msk [vmem:[%s332_s29] sm:$0x3] %vm14383_vm3, %v14379_v18 }
 0xa05 PF: > { %s21_s11 = sadd.s32 1, %s20006_s11  }
 0xa06   : > { %p18_p4 = scmp.ge.s32.totalorder %s21_s11, 4  }
 0xa08   :  { %20 = sbr.rel (!%p18_p4) target bundleno = 3 (0x3), region = 116 }

</bundles_post_ra>
